<compile_context>
chip_gen: v7x
topology: tpu7x:2x2x1
jax: 0.10.0
libtpu: 0.0.40
codegen_flags: <defaults>
</compile_context>

<pallas_src>
import functools

import jax
import jax.numpy as jnp
import numpy as np
from jax import lax
from jax.experimental import pallas as pl
from jax.experimental.pallas import tpu as pltpu

_COUT_PAD = 128   # final layer's 4 output channels padded to a lane-dense 128


def _fused_kernel(x1_ref, mask_ref,
                  w1_ref, t1_ref,
                  w2_ref, t2_ref,
                  w3_ref, t3_ref,
                  w4_ref, t4_ref,
                  out_ref,
                  act1_ref, act2_ref, act3_ref,
                  *, W2, R0, L_pad, P_pad):
    """All four conv3x3 + BN(+ReLU) blocks for one batch element, fused.

    Layout: rows = flattened zero-padded pixels, lanes = channels.  A 3x3 tap
    (dy, dx) is the constant row offset (dy-1)*W2+(dx-1); rows that straddle
    the zero-pad columns compute garbage and are masked back to zero so they
    keep acting as padding for the next layer (not needed on the final layer,
    whose non-interior rows are discarded by the wrapper).
    """
    tail = P_pad - R0 - L_pad
    mask = mask_ref[...]                         # (L_pad, 1) f32, 1.0 on interior

    # Zero ONLY the border rows (the conv zero-padding); the interior rows are
    # fully overwritten every layer.  Runs every grid step on purpose: scratch
    # is per-TensorCore under dimension_semantics=('parallel',) on v7x.
    for act in (act1_ref, act2_ref, act3_ref):
        act[pl.ds(0, R0), :] = jnp.zeros((R0, act.shape[1]), act.dtype)
        act[pl.ds(R0 + L_pad, tail), :] = jnp.zeros((tail, act.shape[1]), act.dtype)

    # Layer 1: host-side im2col input -> a single K=9*Cin MXU matmul.
    # BN scale is folded into the bf16 weights; only the shift is added here.
    y1 = jnp.dot(x1_ref[...], w1_ref[...], preferred_element_type=jnp.float32)
    y1 = jnp.maximum(y1 + t1_ref[...], 0.0) * mask
    act1_ref[pl.ds(R0, L_pad), :] = y1.astype(act1_ref.dtype)

    def conv3x3(src_ref, w_ref, shift_ref, relu):
        def tap(t):
            dy, dx = divmod(t, 3)
            off = (dy - 1) * W2 + (dx - 1)
            a = src_ref[pl.ds(R0 + off, L_pad), :]          # bf16, no per-tap cast
            return jnp.dot(a, w_ref[t], preferred_element_type=jnp.float32)
        acc = tap(0)                                        # init from first dot
        for t in range(1, 9):
            acc = acc + tap(t)
        y = acc + shift_ref[...]                            # folded bias + BN shift
        if relu:
            y = jnp.maximum(y, 0.0)
        return y

    act2_ref[pl.ds(R0, L_pad), :] = (conv3x3(act1_ref, w2_ref, t2_ref, True)
                                     * mask).astype(act2_ref.dtype)
    act3_ref[pl.ds(R0, L_pad), :] = (conv3x3(act2_ref, w3_ref, t3_ref, True)
                                     * mask).astype(act3_ref.dtype)
    # Final layer: no ReLU, no mask; lane-dense 128-wide bf16 store of exactly
    # the L_pad computed rows (wrapper discards non-interior rows / channels).
    out_ref[...] = conv3x3(act3_ref, w4_ref, t4_ref, False).astype(out_ref.dtype)


def _fold_conv_bn(w, b, gamma, beta, mean, var, eps):
    """Fold conv bias + eval-mode BN into bf16 taps (scale folded) + f32 shift."""
    cin, cout = w.shape[2], w.shape[3]
    scale = gamma / jnp.sqrt(var + eps)                       # (Cout,)
    shift = scale * (b - mean) + beta                         # (Cout,)
    w9 = (w.reshape(9, cin, cout) * scale[None, None, :]).astype(jnp.bfloat16)
    return w9, shift.reshape(1, -1).astype(jnp.float32)


@jax.jit
def yuyifenge_forward(x_nchw, params):
    """PyTorch-equivalent forward. x_nchw: (N, 4, H, W) -> (N, 4, H, W)."""
    eps = 1e-5
    N, Cin, H, W = x_nchw.shape
    H2, W2 = H + 2, W + 2
    P = H2 * W2                      # padded pixels in the real grid
    R0 = W2 + 1                      # flat index of padded pixel (1, 1)
    L = P - 2 * R0                   # rows that must be computed per layer
    L_pad = (L + 7) // 8 * 8         # sublane-aligned computed-row count
    P_pad = (2 * R0 + L_pad + 7) // 8 * 8   # buffer rows: every tap window in-bounds

    folded = [_fold_conv_bn(*p, eps) for p in params]
    (w1, t1), (w2, t2), (w3, t3), (w4, t4) = folded
    c1, c2, c3, c4 = w1.shape[-1], w2.shape[-1], w3.shape[-1], w4.shape[-1]

    # ---- layer-1 host-side im2col: (N, L_pad, 9*Cin) bf16 -------------------
    x = jnp.transpose(x_nchw, (0, 2, 3, 1)).astype(jnp.float32)   # NHWC
    x = jnp.pad(x, ((0, 0), (1, 1), (1, 1), (0, 0)))
    x = x.reshape(N, P, Cin)
    x = jnp.pad(x, ((0, 0), (0, P_pad - P), (0, 0)))
    cols = []
    for t in range(9):
        dy, dx = divmod(t, 3)
        off = (dy - 1) * W2 + (dx - 1)
        cols.append(x[:, R0 + off:R0 + off + L_pad, :])
    x1 = jnp.concatenate(cols, axis=-1).astype(jnp.bfloat16)      # (N, L_pad, 36)
    K1 = 9 * Cin
    w1 = w1.reshape(K1, c1)          # tap-major rows match the im2col lane order

    # Pad the 4-channel final layer to 128 lanes -> dense (unmasked) stores.
    w4 = jnp.pad(w4, ((0, 0), (0, 0), (0, _COUT_PAD - c4)))
    t4 = jnp.pad(t4, ((0, 0), (0, _COUT_PAD - c4)))

    # Interior-pixel mask over the L_pad computed rows of the padded layout.
    rows = jnp.arange(L_pad, dtype=jnp.int32) + R0
    hp, wp = rows // W2, rows % W2
    interior = (hp >= 1) & (hp <= H) & (wp >= 1) & (wp <= W) & (rows < P)
    mask = interior.astype(jnp.float32).reshape(L_pad, 1)

    kernel = functools.partial(_fused_kernel, W2=W2, R0=R0, L_pad=L_pad, P_pad=P_pad)
    out = pl.pallas_call(
        kernel,
        out_shape=jax.ShapeDtypeStruct((N, L_pad, _COUT_PAD), jnp.bfloat16),
        grid_spec=pltpu.PrefetchScalarGridSpec(
            num_scalar_prefetch=0,
            grid=(N,),
            in_specs=[
                pl.BlockSpec((None, L_pad, K1), lambda n: (n, 0, 0)),     # im2col x
                pl.BlockSpec((L_pad, 1), lambda n: (0, 0)),               # mask
                pl.BlockSpec((K1, c1), lambda n: (0, 0)),                 # w1 (2D)
                pl.BlockSpec((1, c1), lambda n: (0, 0)),                  # shift1
                pl.BlockSpec((9, c1, c2), lambda n: (0, 0, 0)),           # w2
                pl.BlockSpec((1, c2), lambda n: (0, 0)),                  # shift2
                pl.BlockSpec((9, c2, c3), lambda n: (0, 0, 0)),           # w3
                pl.BlockSpec((1, c3), lambda n: (0, 0)),                  # shift3
                pl.BlockSpec((9, c3, _COUT_PAD), lambda n: (0, 0, 0)),    # w4 (padded)
                pl.BlockSpec((1, _COUT_PAD), lambda n: (0, 0)),           # shift4
            ],
            out_specs=pl.BlockSpec((None, L_pad, _COUT_PAD), lambda n: (n, 0, 0)),
            scratch_shapes=[
                pltpu.VMEM((P_pad, c1), jnp.bfloat16),   # act1 (padded layout)
                pltpu.VMEM((P_pad, c2), jnp.bfloat16),   # act2
                pltpu.VMEM((P_pad, c3), jnp.bfloat16),   # act3
            ],
        ),
        compiler_params=pltpu.CompilerParams(
            dimension_semantics=("parallel",)),          # batch splits across TCs on v7x
    )(x1, mask, w1, t1, w2, t2, w3, t3, w4, t4)

    # (N, L_pad, 128) bf16 computed rows -> NCHW f32 (N, 4, H, W).
    out = out[:, :, :c4].astype(jnp.float32)                         # (N, L_pad, 4)
    out = jnp.pad(out, ((0, 0), (R0, P - R0 - L_pad), (0, 0)))       # back to P rows
    out = out.reshape(N, H2, W2, c4)[:, 1:H + 1, 1:W + 1, :]
    return jnp.transpose(out, (0, 3, 1, 2))


def init_params(key):
    """Deterministic synthetic parameters for the 4 conv+BN blocks."""
    specs = [(4, 64), (64, 128), (128, 64), (64, 4)]
    params = []
    for cin, cout in specs:
        key, k1, k2, k3, k4 = jax.random.split(key, 5)
        fan_in = cin * 9
        w = jax.random.normal(k1, (3, 3, cin, cout), jnp.float32) / np.sqrt(fan_in)
        b = 0.01 * jax.random.normal(k2, (cout,), jnp.float32)
        gamma = 1.0 + 0.1 * jax.random.normal(k3, (cout,), jnp.float32)
        beta = 0.1 * jax.random.normal(k4, (cout,), jnp.float32)
        mean = jnp.zeros((cout,), jnp.float32)    # running_mean init
        var = jnp.ones((cout,), jnp.float32)      # running_var init
        params.append((w, b, gamma, beta, mean, var))
    return params


def _ref_forward(x_nchw, params, eps=1e-5):
    """Pure-JAX/XLA f32 reference (NCHW), for numerical verification."""
    x = x_nchw
    relus = (True, True, True, False)
    for (w, b, g, bt, m, v), r in zip(params, relus):
        w_oihw = jnp.transpose(w, (3, 2, 0, 1))   # (3,3,Cin,Cout) -> OIHW
        y = lax.conv_general_dilated(
            x, w_oihw, window_strides=(1, 1), padding=((1, 1), (1, 1)),
            dimension_numbers=("NCHW", "OIHW", "NCHW"))
        y = y + b[None, :, None, None]
        y = (g[None, :, None, None] * (y - m[None, :, None, None])
             / jnp.sqrt(v[None, :, None, None] + eps) + bt[None, :, None, None])
        if r:
            y = jnp.maximum(y, 0.0)
        x = y
    return x


if __name__ == "__main__":
    key = jax.random.PRNGKey(0)
    key, kx = jax.random.split(key)
    x = jax.random.normal(kx, (2, 4, 16, 16), jnp.float32)   # NCHW, like PyTorch

    params = init_params(key)

    out = jax.block_until_ready(yuyifenge_forward(x, params))
    assert out.shape == (2, 4, 16, 16), out.shape

    ref = jax.block_until_ready(_ref_forward(x, params))
    # Tolerance covers bf16 MXU operands, bf16 inter-layer activations and the
    # bf16 output store cascaded across 4 layers (f32 accumulation throughout).
    np.testing.assert_allclose(np.asarray(out), np.asarray(ref),
                               rtol=5e-2, atol=5e-2)

    print("KERNEL_OK")
</pallas_src>

<mosaic_0001>
module attributes {stable_mosaic.version = 11 : i64} {
  func.func @_fused_kernel(%arg0: i32, %arg1: memref<1x288x36xbf16, #tpu.memory_space<vmem>>, %arg2: memref<288x1xf32, #tpu.memory_space<vmem>>, %arg3: memref<36x64xbf16, #tpu.memory_space<vmem>>, %arg4: memref<1x64xf32, #tpu.memory_space<vmem>>, %arg5: memref<9x64x128xbf16, #tpu.memory_space<vmem>>, %arg6: memref<1x128xf32, #tpu.memory_space<vmem>>, %arg7: memref<9x128x64xbf16, #tpu.memory_space<vmem>>, %arg8: memref<1x64xf32, #tpu.memory_space<vmem>>, %arg9: memref<9x64x128xbf16, #tpu.memory_space<vmem>>, %arg10: memref<1x128xf32, #tpu.memory_space<vmem>>, %arg11: memref<1x288x128xbf16, #tpu.memory_space<vmem>>, %arg12: memref<328x64xbf16, #tpu.memory_space<vmem>>, %arg13: memref<328x128xbf16, #tpu.memory_space<vmem>>, %arg14: memref<328x64xbf16, #tpu.memory_space<vmem>>) attributes {dimension_semantics = [#tpu.dimension_semantics<parallel>], iteration_bounds = array<i64: 2>, scalar_prefetch = 0 : i64, scratch_operands = 3 : i64, tpu.core_type = #tpu.core_type<tc>, window_params = [{transform_indices = @transform_0, window_bounds = array<i64: 1, 288, 36>}, {pipeline_mode = #tpu.pipeline_mode<synchronous>, transform_indices = @transform_1, window_bounds = array<i64: 288, 1>}, {pipeline_mode = #tpu.pipeline_mode<synchronous>, transform_indices = @transform_2, window_bounds = array<i64: 36, 64>}, {pipeline_mode = #tpu.pipeline_mode<synchronous>, transform_indices = @transform_3, window_bounds = array<i64: 1, 64>}, {pipeline_mode = #tpu.pipeline_mode<synchronous>, transform_indices = @transform_4, window_bounds = array<i64: 9, 64, 128>}, {pipeline_mode = #tpu.pipeline_mode<synchronous>, transform_indices = @transform_5, window_bounds = array<i64: 1, 128>}, {pipeline_mode = #tpu.pipeline_mode<synchronous>, transform_indices = @transform_6, window_bounds = array<i64: 9, 128, 64>}, {pipeline_mode = #tpu.pipeline_mode<synchronous>, transform_indices = @transform_7, window_bounds = array<i64: 1, 64>}, {pipeline_mode = #tpu.pipeline_mode<synchronous>, transform_indices = @transform_8, window_bounds = array<i64: 9, 64, 128>}, {pipeline_mode = #tpu.pipeline_mode<synchronous>, transform_indices = @transform_9, window_bounds = array<i64: 1, 128>}, {transform_indices = @transform_10, window_bounds = array<i64: 1, 288, 128>}]} {
    %c0 = arith.constant 0 : index
    %c0_0 = arith.constant 0 : index
    %0 = vector.load %arg2[%c0, %c0_0] : memref<288x1xf32, #tpu.memory_space<vmem>>, vector<288x1xf32>
    %cst = arith.constant 0.000000e+00 : bf16
    %1 = vector.broadcast %cst : bf16 to vector<19x64xbf16>
    %c0_1 = arith.constant 0 : index
    %c0_2 = arith.constant 0 : index
    %2 = vector.load %arg12[%c0_1, %c0_2] : memref<328x64xbf16, #tpu.memory_space<vmem>>, vector<19x64xbf16>
    tpu.vector_store %arg12[%c0_1, %c0_2], %1 {strides = array<i32>} : memref<328x64xbf16, #tpu.memory_space<vmem>>, vector<19x64xbf16>,
    %cst_3 = arith.constant 0.000000e+00 : bf16
    %3 = vector.broadcast %cst_3 : bf16 to vector<21x64xbf16>
    %c307 = arith.constant 307 : index
    %c0_4 = arith.constant 0 : index
    %4 = vector.load %arg12[%c307, %c0_4] : memref<328x64xbf16, #tpu.memory_space<vmem>>, vector<21x64xbf16>
    tpu.vector_store %arg12[%c307, %c0_4], %3 {strides = array<i32>} : memref<328x64xbf16, #tpu.memory_space<vmem>>, vector<21x64xbf16>,
    %cst_5 = arith.constant 0.000000e+00 : bf16
    %5 = vector.broadcast %cst_5 : bf16 to vector<19x128xbf16>
    %c0_6 = arith.constant 0 : index
    %c0_7 = arith.constant 0 : index
    %6 = vector.load %arg13[%c0_6, %c0_7] : memref<328x128xbf16, #tpu.memory_space<vmem>>, vector<19x128xbf16>
    tpu.vector_store %arg13[%c0_6, %c0_7], %5 {strides = array<i32>} : memref<328x128xbf16, #tpu.memory_space<vmem>>, vector<19x128xbf16>,
    %cst_8 = arith.constant 0.000000e+00 : bf16
    %7 = vector.broadcast %cst_8 : bf16 to vector<21x128xbf16>
    %c307_9 = arith.constant 307 : index
    %c0_10 = arith.constant 0 : index
    %8 = vector.load %arg13[%c307_9, %c0_10] : memref<328x128xbf16, #tpu.memory_space<vmem>>, vector<21x128xbf16>
    tpu.vector_store %arg13[%c307_9, %c0_10], %7 {strides = array<i32>} : memref<328x128xbf16, #tpu.memory_space<vmem>>, vector<21x128xbf16>,
    %cst_11 = arith.constant 0.000000e+00 : bf16
    %9 = vector.broadcast %cst_11 : bf16 to vector<19x64xbf16>
    %c0_12 = arith.constant 0 : index
    %c0_13 = arith.constant 0 : index
    %10 = vector.load %arg14[%c0_12, %c0_13] : memref<328x64xbf16, #tpu.memory_space<vmem>>, vector<19x64xbf16>
    tpu.vector_store %arg14[%c0_12, %c0_13], %9 {strides = array<i32>} : memref<328x64xbf16, #tpu.memory_space<vmem>>, vector<19x64xbf16>,
    %cst_14 = arith.constant 0.000000e+00 : bf16
    %11 = vector.broadcast %cst_14 : bf16 to vector<21x64xbf16>
    %c307_15 = arith.constant 307 : index
    %c0_16 = arith.constant 0 : index
    %12 = vector.load %arg14[%c307_15, %c0_16] : memref<328x64xbf16, #tpu.memory_space<vmem>>, vector<21x64xbf16>
    tpu.vector_store %arg14[%c307_15, %c0_16], %11 {strides = array<i32>} : memref<328x64xbf16, #tpu.memory_space<vmem>>, vector<21x64xbf16>,
    %c0_17 = arith.constant 0 : index
    %c0_18 = arith.constant 0 : index
    %c0_19 = arith.constant 0 : index
    %13 = vector.load %arg1[%c0_17, %c0_18, %c0_19] : memref<1x288x36xbf16, #tpu.memory_space<vmem>>, vector<1x288x36xbf16>
    %14 = vector.shape_cast %13 : vector<1x288x36xbf16> to vector<288x36xbf16>
    %c0_20 = arith.constant 0 : index
    %c0_21 = arith.constant 0 : index
    %15 = vector.load %arg3[%c0_20, %c0_21] : memref<36x64xbf16, #tpu.memory_space<vmem>>, vector<36x64xbf16>
    %cst_22 = arith.constant dense<0.000000e+00> : vector<288x64xf32>
    %16 = tpu.matmul %14, %15, %cst_22 {dimension_numbers = #tpu.dot_dimension_numbers<[1], [0], [0], [1], [0, 0, 1, 1], [], []>} : vector<288x36xbf16>, vector<36x64xbf16>, vector<288x64xf32> -> vector<288x64xf32>
    %c0_23 = arith.constant 0 : index
    %c0_24 = arith.constant 0 : index
    %17 = vector.load %arg4[%c0_23, %c0_24] : memref<1x64xf32, #tpu.memory_space<vmem>>, vector<1x64xf32>
    %18 = vector.broadcast %17 : vector<1x64xf32> to vector<288x64xf32>
    %19 = arith.addf %16, %18 : vector<288x64xf32>
    %cst_25 = arith.constant 0.000000e+00 : f32
    %20 = vector.broadcast %cst_25 : f32 to vector<288x64xf32>
    %21 = arith.maximumf %19, %20 : vector<288x64xf32>
    %22 = vector.broadcast %0 : vector<288x1xf32> to vector<288x64xf32>
    %23 = arith.mulf %21, %22 : vector<288x64xf32>
    %24 = arith.truncf %23 : vector<288x64xf32> to vector<288x64xbf16>
    %c19 = arith.constant 19 : index
    %c0_26 = arith.constant 0 : index
    %25 = vector.load %arg12[%c19, %c0_26] : memref<328x64xbf16, #tpu.memory_space<vmem>>, vector<288x64xbf16>
    tpu.vector_store %arg12[%c19, %c0_26], %24 {strides = array<i32>} : memref<328x64xbf16, #tpu.memory_space<vmem>>, vector<288x64xbf16>,
    %c0_27 = arith.constant 0 : index
    %c0_28 = arith.constant 0 : index
    %26 = vector.load %arg12[%c0_27, %c0_28] : memref<328x64xbf16, #tpu.memory_space<vmem>>, vector<288x64xbf16>
    %c0_29 = arith.constant 0 : index
    %c0_30 = arith.constant 0 : index
    %c0_31 = arith.constant 0 : index
    %27 = vector.load %arg5[%c0_29, %c0_30, %c0_31] : memref<9x64x128xbf16, #tpu.memory_space<vmem>>, vector<1x64x128xbf16>
    %28 = vector.shape_cast %27 : vector<1x64x128xbf16> to vector<64x128xbf16>
    %cst_32 = arith.constant dense<0.000000e+00> : vector<288x128xf32>
    %29 = tpu.matmul %26, %28, %cst_32 {dimension_numbers = #tpu.dot_dimension_numbers<[1], [0], [0], [1], [0, 0, 1, 1], [], []>} : vector<288x64xbf16>, vector<64x128xbf16>, vector<288x128xf32> -> vector<288x128xf32>
    %c1 = arith.constant 1 : index
    %c0_33 = arith.constant 0 : index
    %30 = vector.load %arg12[%c1, %c0_33] : memref<328x64xbf16, #tpu.memory_space<vmem>>, vector<288x64xbf16>
    %c1_34 = arith.constant 1 : index
    %c0_35 = arith.constant 0 : index
    %c0_36 = arith.constant 0 : index
    %31 = vector.load %arg5[%c1_34, %c0_35, %c0_36] : memref<9x64x128xbf16, #tpu.memory_space<vmem>>, vector<1x64x128xbf16>
    %32 = vector.shape_cast %31 : vector<1x64x128xbf16> to vector<64x128xbf16>
    %cst_37 = arith.constant dense<0.000000e+00> : vector<288x128xf32>
    %33 = tpu.matmul %30, %32, %cst_37 {dimension_numbers = #tpu.dot_dimension_numbers<[1], [0], [0], [1], [0, 0, 1, 1], [], []>} : vector<288x64xbf16>, vector<64x128xbf16>, vector<288x128xf32> -> vector<288x128xf32>
    %34 = arith.addf %29, %33 : vector<288x128xf32>
    %c2 = arith.constant 2 : index
    %c0_38 = arith.constant 0 : index
    %35 = vector.load %arg12[%c2, %c0_38] : memref<328x64xbf16, #tpu.memory_space<vmem>>, vector<288x64xbf16>
    %c2_39 = arith.constant 2 : index
    %c0_40 = arith.constant 0 : index
    %c0_41 = arith.constant 0 : index
    %36 = vector.load %arg5[%c2_39, %c0_40, %c0_41] : memref<9x64x128xbf16, #tpu.memory_space<vmem>>, vector<1x64x128xbf16>
    %37 = vector.shape_cast %36 : vector<1x64x128xbf16> to vector<64x128xbf16>
    %cst_42 = arith.constant dense<0.000000e+00> : vector<288x128xf32>
    %38 = tpu.matmul %35, %37, %cst_42 {dimension_numbers = #tpu.dot_dimension_numbers<[1], [0], [0], [1], [0, 0, 1, 1], [], []>} : vector<288x64xbf16>, vector<64x128xbf16>, vector<288x128xf32> -> vector<288x128xf32>
    %39 = arith.addf %34, %38 : vector<288x128xf32>
    %c18 = arith.constant 18 : index
    %c0_43 = arith.constant 0 : index
    %40 = vector.load %arg12[%c18, %c0_43] : memref<328x64xbf16, #tpu.memory_space<vmem>>, vector<288x64xbf16>
    %c3 = arith.constant 3 : index
    %c0_44 = arith.constant 0 : index
    %c0_45 = arith.constant 0 : index
    %41 = vector.load %arg5[%c3, %c0_44, %c0_45] : memref<9x64x128xbf16, #tpu.memory_space<vmem>>, vector<1x64x128xbf16>
    %42 = vector.shape_cast %41 : vector<1x64x128xbf16> to vector<64x128xbf16>
    %cst_46 = arith.constant dense<0.000000e+00> : vector<288x128xf32>
    %43 = tpu.matmul %40, %42, %cst_46 {dimension_numbers = #tpu.dot_dimension_numbers<[1], [0], [0], [1], [0, 0, 1, 1], [], []>} : vector<288x64xbf16>, vector<64x128xbf16>, vector<288x128xf32> -> vector<288x128xf32>
    %44 = arith.addf %39, %43 : vector<288x128xf32>
    %c19_47 = arith.constant 19 : index
    %c0_48 = arith.constant 0 : index
    %45 = vector.load %arg12[%c19_47, %c0_48] : memref<328x64xbf16, #tpu.memory_space<vmem>>, vector<288x64xbf16>
    %c4 = arith.constant 4 : index
    %c0_49 = arith.constant 0 : index
    %c0_50 = arith.constant 0 : index
    %46 = vector.load %arg5[%c4, %c0_49, %c0_50] : memref<9x64x128xbf16, #tpu.memory_space<vmem>>, vector<1x64x128xbf16>
    %47 = vector.shape_cast %46 : vector<1x64x128xbf16> to vector<64x128xbf16>
    %cst_51 = arith.constant dense<0.000000e+00> : vector<288x128xf32>
    %48 = tpu.matmul %45, %47, %cst_51 {dimension_numbers = #tpu.dot_dimension_numbers<[1], [0], [0], [1], [0, 0, 1, 1], [], []>} : vector<288x64xbf16>, vector<64x128xbf16>, vector<288x128xf32> -> vector<288x128xf32>
    %49 = arith.addf %44, %48 : vector<288x128xf32>
    %c20 = arith.constant 20 : index
    %c0_52 = arith.constant 0 : index
    %50 = vector.load %arg12[%c20, %c0_52] : memref<328x64xbf16, #tpu.memory_space<vmem>>, vector<288x64xbf16>
    %c5 = arith.constant 5 : index
    %c0_53 = arith.constant 0 : index
    %c0_54 = arith.constant 0 : index
    %51 = vector.load %arg5[%c5, %c0_53, %c0_54] : memref<9x64x128xbf16, #tpu.memory_space<vmem>>, vector<1x64x128xbf16>
    %52 = vector.shape_cast %51 : vector<1x64x128xbf16> to vector<64x128xbf16>
    %cst_55 = arith.constant dense<0.000000e+00> : vector<288x128xf32>
    %53 = tpu.matmul %50, %52, %cst_55 {dimension_numbers = #tpu.dot_dimension_numbers<[1], [0], [0], [1], [0, 0, 1, 1], [], []>} : vector<288x64xbf16>, vector<64x128xbf16>, vector<288x128xf32> -> vector<288x128xf32>
    %54 = arith.addf %49, %53 : vector<288x128xf32>
    %c36 = arith.constant 36 : index
    %c0_56 = arith.constant 0 : index
    %55 = vector.load %arg12[%c36, %c0_56] : memref<328x64xbf16, #tpu.memory_space<vmem>>, vector<288x64xbf16>
    %c6 = arith.constant 6 : index
    %c0_57 = arith.constant 0 : index
    %c0_58 = arith.constant 0 : index
    %56 = vector.load %arg5[%c6, %c0_57, %c0_58] : memref<9x64x128xbf16, #tpu.memory_space<vmem>>, vector<1x64x128xbf16>
    %57 = vector.shape_cast %56 : vector<1x64x128xbf16> to vector<64x128xbf16>
    %cst_59 = arith.constant dense<0.000000e+00> : vector<288x128xf32>
    %58 = tpu.matmul %55, %57, %cst_59 {dimension_numbers = #tpu.dot_dimension_numbers<[1], [0], [0], [1], [0, 0, 1, 1], [], []>} : vector<288x64xbf16>, vector<64x128xbf16>, vector<288x128xf32> -> vector<288x128xf32>
    %59 = arith.addf %54, %58 : vector<288x128xf32>
    %c37 = arith.constant 37 : index
    %c0_60 = arith.constant 0 : index
    %60 = vector.load %arg12[%c37, %c0_60] : memref<328x64xbf16, #tpu.memory_space<vmem>>, vector<288x64xbf16>
    %c7 = arith.constant 7 : index
    %c0_61 = arith.constant 0 : index
    %c0_62 = arith.constant 0 : index
    %61 = vector.load %arg5[%c7, %c0_61, %c0_62] : memref<9x64x128xbf16, #tpu.memory_space<vmem>>, vector<1x64x128xbf16>
    %62 = vector.shape_cast %61 : vector<1x64x128xbf16> to vector<64x128xbf16>
    %cst_63 = arith.constant dense<0.000000e+00> : vector<288x128xf32>
    %63 = tpu.matmul %60, %62, %cst_63 {dimension_numbers = #tpu.dot_dimension_numbers<[1], [0], [0], [1], [0, 0, 1, 1], [], []>} : vector<288x64xbf16>, vector<64x128xbf16>, vector<288x128xf32> -> vector<288x128xf32>
    %64 = arith.addf %59, %63 : vector<288x128xf32>
    %c38 = arith.constant 38 : index
    %c0_64 = arith.constant 0 : index
    %65 = vector.load %arg12[%c38, %c0_64] : memref<328x64xbf16, #tpu.memory_space<vmem>>, vector<288x64xbf16>
    %c8 = arith.constant 8 : index
    %c0_65 = arith.constant 0 : index
    %c0_66 = arith.constant 0 : index
    %66 = vector.load %arg5[%c8, %c0_65, %c0_66] : memref<9x64x128xbf16, #tpu.memory_space<vmem>>, vector<1x64x128xbf16>
    %67 = vector.shape_cast %66 : vector<1x64x128xbf16> to vector<64x128xbf16>
    %cst_67 = arith.constant dense<0.000000e+00> : vector<288x128xf32>
    %68 = tpu.matmul %65, %67, %cst_67 {dimension_numbers = #tpu.dot_dimension_numbers<[1], [0], [0], [1], [0, 0, 1, 1], [], []>} : vector<288x64xbf16>, vector<64x128xbf16>, vector<288x128xf32> -> vector<288x128xf32>
    %69 = arith.addf %64, %68 : vector<288x128xf32>
    %c0_68 = arith.constant 0 : index
    %c0_69 = arith.constant 0 : index
    %70 = vector.load %arg6[%c0_68, %c0_69] : memref<1x128xf32, #tpu.memory_space<vmem>>, vector<1x128xf32>
    %71 = vector.broadcast %70 : vector<1x128xf32> to vector<288x128xf32>
    %72 = arith.addf %69, %71 : vector<288x128xf32>
    %cst_70 = arith.constant 0.000000e+00 : f32
    %73 = vector.broadcast %cst_70 : f32 to vector<288x128xf32>
    %74 = arith.maximumf %72, %73 : vector<288x128xf32>
    %75 = vector.broadcast %0 : vector<288x1xf32> to vector<288x128xf32>
    %76 = arith.mulf %74, %75 : vector<288x128xf32>
    %77 = arith.truncf %76 : vector<288x128xf32> to vector<288x128xbf16>
    %c19_71 = arith.constant 19 : index
    %c0_72 = arith.constant 0 : index
    %78 = vector.load %arg13[%c19_71, %c0_72] : memref<328x128xbf16, #tpu.memory_space<vmem>>, vector<288x128xbf16>
    tpu.vector_store %arg13[%c19_71, %c0_72], %77 {strides = array<i32>} : memref<328x128xbf16, #tpu.memory_space<vmem>>, vector<288x128xbf16>,
    %c0_73 = arith.constant 0 : index
    %c0_74 = arith.constant 0 : index
    %79 = vector.load %arg13[%c0_73, %c0_74] : memref<328x128xbf16, #tpu.memory_space<vmem>>, vector<288x128xbf16>
    %c0_75 = arith.constant 0 : index
    %c0_76 = arith.constant 0 : index
    %c0_77 = arith.constant 0 : index
    %80 = vector.load %arg7[%c0_75, %c0_76, %c0_77] : memref<9x128x64xbf16, #tpu.memory_space<vmem>>, vector<1x128x64xbf16>
    %81 = vector.shape_cast %80 : vector<1x128x64xbf16> to vector<128x64xbf16>
    %cst_78 = arith.constant dense<0.000000e+00> : vector<288x64xf32>
    %82 = tpu.matmul %79, %81, %cst_78 {dimension_numbers = #tpu.dot_dimension_numbers<[1], [0], [0], [1], [0, 0, 1, 1], [], []>} : vector<288x128xbf16>, vector<128x64xbf16>, vector<288x64xf32> -> vector<288x64xf32>
    %c1_79 = arith.constant 1 : index
    %c0_80 = arith.constant 0 : index
    %83 = vector.load %arg13[%c1_79, %c0_80] : memref<328x128xbf16, #tpu.memory_space<vmem>>, vector<288x128xbf16>
    %c1_81 = arith.constant 1 : index
    %c0_82 = arith.constant 0 : index
    %c0_83 = arith.constant 0 : index
    %84 = vector.load %arg7[%c1_81, %c0_82, %c0_83] : memref<9x128x64xbf16, #tpu.memory_space<vmem>>, vector<1x128x64xbf16>
    %85 = vector.shape_cast %84 : vector<1x128x64xbf16> to vector<128x64xbf16>
    %cst_84 = arith.constant dense<0.000000e+00> : vector<288x64xf32>
    %86 = tpu.matmul %83, %85, %cst_84 {dimension_numbers = #tpu.dot_dimension_numbers<[1], [0], [0], [1], [0, 0, 1, 1], [], []>} : vector<288x128xbf16>, vector<128x64xbf16>, vector<288x64xf32> -> vector<288x64xf32>
    %87 = arith.addf %82, %86 : vector<288x64xf32>
    %c2_85 = arith.constant 2 : index
    %c0_86 = arith.constant 0 : index
    %88 = vector.load %arg13[%c2_85, %c0_86] : memref<328x128xbf16, #tpu.memory_space<vmem>>, vector<288x128xbf16>
    %c2_87 = arith.constant 2 : index
    %c0_88 = arith.constant 0 : index
    %c0_89 = arith.constant 0 : index
    %89 = vector.load %arg7[%c2_87, %c0_88, %c0_89] : memref<9x128x64xbf16, #tpu.memory_space<vmem>>, vector<1x128x64xbf16>
    %90 = vector.shape_cast %89 : vector<1x128x64xbf16> to vector<128x64xbf16>
    %cst_90 = arith.constant dense<0.000000e+00> : vector<288x64xf32>
    %91 = tpu.matmul %88, %90, %cst_90 {dimension_numbers = #tpu.dot_dimension_numbers<[1], [0], [0], [1], [0, 0, 1, 1], [], []>} : vector<288x128xbf16>, vector<128x64xbf16>, vector<288x64xf32> -> vector<288x64xf32>
    %92 = arith.addf %87, %91 : vector<288x64xf32>
    %c18_91 = arith.constant 18 : index
    %c0_92 = arith.constant 0 : index
    %93 = vector.load %arg13[%c18_91, %c0_92] : memref<328x128xbf16, #tpu.memory_space<vmem>>, vector<288x128xbf16>
    %c3_93 = arith.constant 3 : index
    %c0_94 = arith.constant 0 : index
    %c0_95 = arith.constant 0 : index
    %94 = vector.load %arg7[%c3_93, %c0_94, %c0_95] : memref<9x128x64xbf16, #tpu.memory_space<vmem>>, vector<1x128x64xbf16>
    %95 = vector.shape_cast %94 : vector<1x128x64xbf16> to vector<128x64xbf16>
    %cst_96 = arith.constant dense<0.000000e+00> : vector<288x64xf32>
    %96 = tpu.matmul %93, %95, %cst_96 {dimension_numbers = #tpu.dot_dimension_numbers<[1], [0], [0], [1], [0, 0, 1, 1], [], []>} : vector<288x128xbf16>, vector<128x64xbf16>, vector<288x64xf32> -> vector<288x64xf32>
    %97 = arith.addf %92, %96 : vector<288x64xf32>
    %c19_97 = arith.constant 19 : index
    %c0_98 = arith.constant 0 : index
    %98 = vector.load %arg13[%c19_97, %c0_98] : memref<328x128xbf16, #tpu.memory_space<vmem>>, vector<288x128xbf16>
    %c4_99 = arith.constant 4 : index
    %c0_100 = arith.constant 0 : index
    %c0_101 = arith.constant 0 : index
    %99 = vector.load %arg7[%c4_99, %c0_100, %c0_101] : memref<9x128x64xbf16, #tpu.memory_space<vmem>>, vector<1x128x64xbf16>
    %100 = vector.shape_cast %99 : vector<1x128x64xbf16> to vector<128x64xbf16>
    %cst_102 = arith.constant dense<0.000000e+00> : vector<288x64xf32>
    %101 = tpu.matmul %98, %100, %cst_102 {dimension_numbers = #tpu.dot_dimension_numbers<[1], [0], [0], [1], [0, 0, 1, 1], [], []>} : vector<288x128xbf16>, vector<128x64xbf16>, vector<288x64xf32> -> vector<288x64xf32>
    %102 = arith.addf %97, %101 : vector<288x64xf32>
    %c20_103 = arith.constant 20 : index
    %c0_104 = arith.constant 0 : index
    %103 = vector.load %arg13[%c20_103, %c0_104] : memref<328x128xbf16, #tpu.memory_space<vmem>>, vector<288x128xbf16>
    %c5_105 = arith.constant 5 : index
    %c0_106 = arith.constant 0 : index
    %c0_107 = arith.constant 0 : index
    %104 = vector.load %arg7[%c5_105, %c0_106, %c0_107] : memref<9x128x64xbf16, #tpu.memory_space<vmem>>, vector<1x128x64xbf16>
    %105 = vector.shape_cast %104 : vector<1x128x64xbf16> to vector<128x64xbf16>
    %cst_108 = arith.constant dense<0.000000e+00> : vector<288x64xf32>
    %106 = tpu.matmul %103, %105, %cst_108 {dimension_numbers = #tpu.dot_dimension_numbers<[1], [0], [0], [1], [0, 0, 1, 1], [], []>} : vector<288x128xbf16>, vector<128x64xbf16>, vector<288x64xf32> -> vector<288x64xf32>
    %107 = arith.addf %102, %106 : vector<288x64xf32>
    %c36_109 = arith.constant 36 : index
    %c0_110 = arith.constant 0 : index
    %108 = vector.load %arg13[%c36_109, %c0_110] : memref<328x128xbf16, #tpu.memory_space<vmem>>, vector<288x128xbf16>
    %c6_111 = arith.constant 6 : index
    %c0_112 = arith.constant 0 : index
    %c0_113 = arith.constant 0 : index
    %109 = vector.load %arg7[%c6_111, %c0_112, %c0_113] : memref<9x128x64xbf16, #tpu.memory_space<vmem>>, vector<1x128x64xbf16>
    %110 = vector.shape_cast %109 : vector<1x128x64xbf16> to vector<128x64xbf16>
    %cst_114 = arith.constant dense<0.000000e+00> : vector<288x64xf32>
    %111 = tpu.matmul %108, %110, %cst_114 {dimension_numbers = #tpu.dot_dimension_numbers<[1], [0], [0], [1], [0, 0, 1, 1], [], []>} : vector<288x128xbf16>, vector<128x64xbf16>, vector<288x64xf32> -> vector<288x64xf32>
    %112 = arith.addf %107, %111 : vector<288x64xf32>
    %c37_115 = arith.constant 37 : index
    %c0_116 = arith.constant 0 : index
    %113 = vector.load %arg13[%c37_115, %c0_116] : memref<328x128xbf16, #tpu.memory_space<vmem>>, vector<288x128xbf16>
    %c7_117 = arith.constant 7 : index
    %c0_118 = arith.constant 0 : index
    %c0_119 = arith.constant 0 : index
    %114 = vector.load %arg7[%c7_117, %c0_118, %c0_119] : memref<9x128x64xbf16, #tpu.memory_space<vmem>>, vector<1x128x64xbf16>
    %115 = vector.shape_cast %114 : vector<1x128x64xbf16> to vector<128x64xbf16>
    %cst_120 = arith.constant dense<0.000000e+00> : vector<288x64xf32>
    %116 = tpu.matmul %113, %115, %cst_120 {dimension_numbers = #tpu.dot_dimension_numbers<[1], [0], [0], [1], [0, 0, 1, 1], [], []>} : vector<288x128xbf16>, vector<128x64xbf16>, vector<288x64xf32> -> vector<288x64xf32>
    %117 = arith.addf %112, %116 : vector<288x64xf32>
    %c38_121 = arith.constant 38 : index
    %c0_122 = arith.constant 0 : index
    %118 = vector.load %arg13[%c38_121, %c0_122] : memref<328x128xbf16, #tpu.memory_space<vmem>>, vector<288x128xbf16>
    %c8_123 = arith.constant 8 : index
    %c0_124 = arith.constant 0 : index
    %c0_125 = arith.constant 0 : index
    %119 = vector.load %arg7[%c8_123, %c0_124, %c0_125] : memref<9x128x64xbf16, #tpu.memory_space<vmem>>, vector<1x128x64xbf16>
    %120 = vector.shape_cast %119 : vector<1x128x64xbf16> to vector<128x64xbf16>
    %cst_126 = arith.constant dense<0.000000e+00> : vector<288x64xf32>
    %121 = tpu.matmul %118, %120, %cst_126 {dimension_numbers = #tpu.dot_dimension_numbers<[1], [0], [0], [1], [0, 0, 1, 1], [], []>} : vector<288x128xbf16>, vector<128x64xbf16>, vector<288x64xf32> -> vector<288x64xf32>
    %122 = arith.addf %117, %121 : vector<288x64xf32>
    %c0_127 = arith.constant 0 : index
    %c0_128 = arith.constant 0 : index
    %123 = vector.load %arg8[%c0_127, %c0_128] : memref<1x64xf32, #tpu.memory_space<vmem>>, vector<1x64xf32>
    %124 = vector.broadcast %123 : vector<1x64xf32> to vector<288x64xf32>
    %125 = arith.addf %122, %124 : vector<288x64xf32>
    %cst_129 = arith.constant 0.000000e+00 : f32
    %126 = vector.broadcast %cst_129 : f32 to vector<288x64xf32>
    %127 = arith.maximumf %125, %126 : vector<288x64xf32>
    %128 = vector.broadcast %0 : vector<288x1xf32> to vector<288x64xf32>
    %129 = arith.mulf %127, %128 : vector<288x64xf32>
    %130 = arith.truncf %129 : vector<288x64xf32> to vector<288x64xbf16>
    %c19_130 = arith.constant 19 : index
    %c0_131 = arith.constant 0 : index
    %131 = vector.load %arg14[%c19_130, %c0_131] : memref<328x64xbf16, #tpu.memory_space<vmem>>, vector<288x64xbf16>
    tpu.vector_store %arg14[%c19_130, %c0_131], %130 {strides = array<i32>} : memref<328x64xbf16, #tpu.memory_space<vmem>>, vector<288x64xbf16>,
    %c0_132 = arith.constant 0 : index
    %c0_133 = arith.constant 0 : index
    %132 = vector.load %arg14[%c0_132, %c0_133] : memref<328x64xbf16, #tpu.memory_space<vmem>>, vector<288x64xbf16>
    %c0_134 = arith.constant 0 : index
    %c0_135 = arith.constant 0 : index
    %c0_136 = arith.constant 0 : index
    %133 = vector.load %arg9[%c0_134, %c0_135, %c0_136] : memref<9x64x128xbf16, #tpu.memory_space<vmem>>, vector<1x64x128xbf16>
    %134 = vector.shape_cast %133 : vector<1x64x128xbf16> to vector<64x128xbf16>
    %cst_137 = arith.constant dense<0.000000e+00> : vector<288x128xf32>
    %135 = tpu.matmul %132, %134, %cst_137 {dimension_numbers = #tpu.dot_dimension_numbers<[1], [0], [0], [1], [0, 0, 1, 1], [], []>} : vector<288x64xbf16>, vector<64x128xbf16>, vector<288x128xf32> -> vector<288x128xf32>
    %c1_138 = arith.constant 1 : index
    %c0_139 = arith.constant 0 : index
    %136 = vector.load %arg14[%c1_138, %c0_139] : memref<328x64xbf16, #tpu.memory_space<vmem>>, vector<288x64xbf16>
    %c1_140 = arith.constant 1 : index
    %c0_141 = arith.constant 0 : index
    %c0_142 = arith.constant 0 : index
    %137 = vector.load %arg9[%c1_140, %c0_141, %c0_142] : memref<9x64x128xbf16, #tpu.memory_space<vmem>>, vector<1x64x128xbf16>
    %138 = vector.shape_cast %137 : vector<1x64x128xbf16> to vector<64x128xbf16>
    %cst_143 = arith.constant dense<0.000000e+00> : vector<288x128xf32>
    %139 = tpu.matmul %136, %138, %cst_143 {dimension_numbers = #tpu.dot_dimension_numbers<[1], [0], [0], [1], [0, 0, 1, 1], [], []>} : vector<288x64xbf16>, vector<64x128xbf16>, vector<288x128xf32> -> vector<288x128xf32>
    %140 = arith.addf %135, %139 : vector<288x128xf32>
    %c2_144 = arith.constant 2 : index
    %c0_145 = arith.constant 0 : index
    %141 = vector.load %arg14[%c2_144, %c0_145] : memref<328x64xbf16, #tpu.memory_space<vmem>>, vector<288x64xbf16>
    %c2_146 = arith.constant 2 : index
    %c0_147 = arith.constant 0 : index
    %c0_148 = arith.constant 0 : index
    %142 = vector.load %arg9[%c2_146, %c0_147, %c0_148] : memref<9x64x128xbf16, #tpu.memory_space<vmem>>, vector<1x64x128xbf16>
    %143 = vector.shape_cast %142 : vector<1x64x128xbf16> to vector<64x128xbf16>
    %cst_149 = arith.constant dense<0.000000e+00> : vector<288x128xf32>
    %144 = tpu.matmul %141, %143, %cst_149 {dimension_numbers = #tpu.dot_dimension_numbers<[1], [0], [0], [1], [0, 0, 1, 1], [], []>} : vector<288x64xbf16>, vector<64x128xbf16>, vector<288x128xf32> -> vector<288x128xf32>
    %145 = arith.addf %140, %144 : vector<288x128xf32>
    %c18_150 = arith.constant 18 : index
    %c0_151 = arith.constant 0 : index
    %146 = vector.load %arg14[%c18_150, %c0_151] : memref<328x64xbf16, #tpu.memory_space<vmem>>, vector<288x64xbf16>
    %c3_152 = arith.constant 3 : index
    %c0_153 = arith.constant 0 : index
    %c0_154 = arith.constant 0 : index
    %147 = vector.load %arg9[%c3_152, %c0_153, %c0_154] : memref<9x64x128xbf16, #tpu.memory_space<vmem>>, vector<1x64x128xbf16>
    %148 = vector.shape_cast %147 : vector<1x64x128xbf16> to vector<64x128xbf16>
    %cst_155 = arith.constant dense<0.000000e+00> : vector<288x128xf32>
    %149 = tpu.matmul %146, %148, %cst_155 {dimension_numbers = #tpu.dot_dimension_numbers<[1], [0], [0], [1], [0, 0, 1, 1], [], []>} : vector<288x64xbf16>, vector<64x128xbf16>, vector<288x128xf32> -> vector<288x128xf32>
    %150 = arith.addf %145, %149 : vector<288x128xf32>
    %c19_156 = arith.constant 19 : index
    %c0_157 = arith.constant 0 : index
    %151 = vector.load %arg14[%c19_156, %c0_157] : memref<328x64xbf16, #tpu.memory_space<vmem>>, vector<288x64xbf16>
    %c4_158 = arith.constant 4 : index
    %c0_159 = arith.constant 0 : index
    %c0_160 = arith.constant 0 : index
    %152 = vector.load %arg9[%c4_158, %c0_159, %c0_160] : memref<9x64x128xbf16, #tpu.memory_space<vmem>>, vector<1x64x128xbf16>
    %153 = vector.shape_cast %152 : vector<1x64x128xbf16> to vector<64x128xbf16>
    %cst_161 = arith.constant dense<0.000000e+00> : vector<288x128xf32>
    %154 = tpu.matmul %151, %153, %cst_161 {dimension_numbers = #tpu.dot_dimension_numbers<[1], [0], [0], [1], [0, 0, 1, 1], [], []>} : vector<288x64xbf16>, vector<64x128xbf16>, vector<288x128xf32> -> vector<288x128xf32>
    %155 = arith.addf %150, %154 : vector<288x128xf32>
    %c20_162 = arith.constant 20 : index
    %c0_163 = arith.constant 0 : index
    %156 = vector.load %arg14[%c20_162, %c0_163] : memref<328x64xbf16, #tpu.memory_space<vmem>>, vector<288x64xbf16>
    %c5_164 = arith.constant 5 : index
    %c0_165 = arith.constant 0 : index
    %c0_166 = arith.constant 0 : index
    %157 = vector.load %arg9[%c5_164, %c0_165, %c0_166] : memref<9x64x128xbf16, #tpu.memory_space<vmem>>, vector<1x64x128xbf16>
    %158 = vector.shape_cast %157 : vector<1x64x128xbf16> to vector<64x128xbf16>
    %cst_167 = arith.constant dense<0.000000e+00> : vector<288x128xf32>
    %159 = tpu.matmul %156, %158, %cst_167 {dimension_numbers = #tpu.dot_dimension_numbers<[1], [0], [0], [1], [0, 0, 1, 1], [], []>} : vector<288x64xbf16>, vector<64x128xbf16>, vector<288x128xf32> -> vector<288x128xf32>
    %160 = arith.addf %155, %159 : vector<288x128xf32>
    %c36_168 = arith.constant 36 : index
    %c0_169 = arith.constant 0 : index
    %161 = vector.load %arg14[%c36_168, %c0_169] : memref<328x64xbf16, #tpu.memory_space<vmem>>, vector<288x64xbf16>
    %c6_170 = arith.constant 6 : index
    %c0_171 = arith.constant 0 : index
    %c0_172 = arith.constant 0 : index
    %162 = vector.load %arg9[%c6_170, %c0_171, %c0_172] : memref<9x64x128xbf16, #tpu.memory_space<vmem>>, vector<1x64x128xbf16>
    %163 = vector.shape_cast %162 : vector<1x64x128xbf16> to vector<64x128xbf16>
    %cst_173 = arith.constant dense<0.000000e+00> : vector<288x128xf32>
    %164 = tpu.matmul %161, %163, %cst_173 {dimension_numbers = #tpu.dot_dimension_numbers<[1], [0], [0], [1], [0, 0, 1, 1], [], []>} : vector<288x64xbf16>, vector<64x128xbf16>, vector<288x128xf32> -> vector<288x128xf32>
    %165 = arith.addf %160, %164 : vector<288x128xf32>
    %c37_174 = arith.constant 37 : index
    %c0_175 = arith.constant 0 : index
    %166 = vector.load %arg14[%c37_174, %c0_175] : memref<328x64xbf16, #tpu.memory_space<vmem>>, vector<288x64xbf16>
    %c7_176 = arith.constant 7 : index
    %c0_177 = arith.constant 0 : index
    %c0_178 = arith.constant 0 : index
    %167 = vector.load %arg9[%c7_176, %c0_177, %c0_178] : memref<9x64x128xbf16, #tpu.memory_space<vmem>>, vector<1x64x128xbf16>
    %168 = vector.shape_cast %167 : vector<1x64x128xbf16> to vector<64x128xbf16>
    %cst_179 = arith.constant dense<0.000000e+00> : vector<288x128xf32>
    %169 = tpu.matmul %166, %168, %cst_179 {dimension_numbers = #tpu.dot_dimension_numbers<[1], [0], [0], [1], [0, 0, 1, 1], [], []>} : vector<288x64xbf16>, vector<64x128xbf16>, vector<288x128xf32> -> vector<288x128xf32>
    %170 = arith.addf %165, %169 : vector<288x128xf32>
    %c38_180 = arith.constant 38 : index
    %c0_181 = arith.constant 0 : index
    %171 = vector.load %arg14[%c38_180, %c0_181] : memref<328x64xbf16, #tpu.memory_space<vmem>>, vector<288x64xbf16>
    %c8_182 = arith.constant 8 : index
    %c0_183 = arith.constant 0 : index
    %c0_184 = arith.constant 0 : index
    %172 = vector.load %arg9[%c8_182, %c0_183, %c0_184] : memref<9x64x128xbf16, #tpu.memory_space<vmem>>, vector<1x64x128xbf16>
    %173 = vector.shape_cast %172 : vector<1x64x128xbf16> to vector<64x128xbf16>
    %cst_185 = arith.constant dense<0.000000e+00> : vector<288x128xf32>
    %174 = tpu.matmul %171, %173, %cst_185 {dimension_numbers = #tpu.dot_dimension_numbers<[1], [0], [0], [1], [0, 0, 1, 1], [], []>} : vector<288x64xbf16>, vector<64x128xbf16>, vector<288x128xf32> -> vector<288x128xf32>
    %175 = arith.addf %170, %174 : vector<288x128xf32>
    %c0_186 = arith.constant 0 : index
    %c0_187 = arith.constant 0 : index
    %176 = vector.load %arg10[%c0_186, %c0_187] : memref<1x128xf32, #tpu.memory_space<vmem>>, vector<1x128xf32>
    %177 = vector.broadcast %176 : vector<1x128xf32> to vector<288x128xf32>
    %178 = arith.addf %175, %177 : vector<288x128xf32>
    %179 = arith.truncf %178 : vector<288x128xf32> to vector<288x128xbf16>
    %c0_188 = arith.constant 0 : index
    %c0_189 = arith.constant 0 : index
    %c0_190 = arith.constant 0 : index
    %180 = vector.load %arg11[%c0_188, %c0_189, %c0_190] : memref<1x288x128xbf16, #tpu.memory_space<vmem>>, vector<1x288x128xbf16>
    %181 = vector.shape_cast %180 : vector<1x288x128xbf16> to vector<288x128xbf16>
    %182 = vector.shape_cast %179 : vector<288x128xbf16> to vector<1x288x128xbf16>
    tpu.vector_store %arg11[%c0_188, %c0_189, %c0_190], %182 {strides = array<i32>} : memref<1x288x128xbf16, #tpu.memory_space<vmem>>, vector<1x288x128xbf16>,
    return
  }
  func.func @transform_0(%arg0: i32) -> (i32, i32, i32) {
    %c0_i32 = arith.constant 0 : i32
    %c0_i32_0 = arith.constant 0 : i32
    %c0_i32_1 = arith.constant 0 : i32
    return %arg0, %c0_i32, %c0_i32_0 : i32, i32, i32
  }
  func.func @transform_1(%arg0: i32) -> (i32, i32) {
    %c0_i32 = arith.constant 0 : i32
    %c0_i32_0 = arith.constant 0 : i32
    %c0_i32_1 = arith.constant 0 : i32
    return %c0_i32, %c0_i32_0 : i32, i32
  }
  func.func @transform_2(%arg0: i32) -> (i32, i32) {
    %c0_i32 = arith.constant 0 : i32
    %c0_i32_0 = arith.constant 0 : i32
    %c0_i32_1 = arith.constant 0 : i32
    return %c0_i32, %c0_i32_0 : i32, i32
  }
  func.func @transform_3(%arg0: i32) -> (i32, i32) {
    %c0_i32 = arith.constant 0 : i32
    %c0_i32_0 = arith.constant 0 : i32
    %c0_i32_1 = arith.constant 0 : i32
    return %c0_i32, %c0_i32_0 : i32, i32
  }
  func.func @transform_4(%arg0: i32) -> (i32, i32, i32) {
    %c0_i32 = arith.constant 0 : i32
    %c0_i32_0 = arith.constant 0 : i32
    %c0_i32_1 = arith.constant 0 : i32
    %c0_i32_2 = arith.constant 0 : i32
    return %c0_i32, %c0_i32_0, %c0_i32_1 : i32, i32, i32
  }
  func.func @transform_5(%arg0: i32) -> (i32, i32) {
    %c0_i32 = arith.constant 0 : i32
    %c0_i32_0 = arith.constant 0 : i32
    %c0_i32_1 = arith.constant 0 : i32
    return %c0_i32, %c0_i32_0 : i32, i32
  }
  func.func @transform_6(%arg0: i32) -> (i32, i32, i32) {
    %c0_i32 = arith.constant 0 : i32
    %c0_i32_0 = arith.constant 0 : i32
    %c0_i32_1 = arith.constant 0 : i32
    %c0_i32_2 = arith.constant 0 : i32
    return %c0_i32, %c0_i32_0, %c0_i32_1 : i32, i32, i32
  }
  func.func @transform_7(%arg0: i32) -> (i32, i32) {
    %c0_i32 = arith.constant 0 : i32
    %c0_i32_0 = arith.constant 0 : i32
    %c0_i32_1 = arith.constant 0 : i32
    return %c0_i32, %c0_i32_0 : i32, i32
  }
  func.func @transform_8(%arg0: i32) -> (i32, i32, i32) {
    %c0_i32 = arith.constant 0 : i32
    %c0_i32_0 = arith.constant 0 : i32
    %c0_i32_1 = arith.constant 0 : i32
    %c0_i32_2 = arith.constant 0 : i32
    return %c0_i32, %c0_i32_0, %c0_i32_1 : i32, i32, i32
  }
  func.func @transform_9(%arg0: i32) -> (i32, i32) {
    %c0_i32 = arith.constant 0 : i32
    %c0_i32_0 = arith.constant 0 : i32
    %c0_i32_1 = arith.constant 0 : i32
    return %c0_i32, %c0_i32_0 : i32, i32
  }
  func.func @transform_10(%arg0: i32) -> (i32, i32, i32) {
    %c0_i32 = arith.constant 0 : i32
    %c0_i32_0 = arith.constant 0 : i32
    %c0_i32_1 = arith.constant 0 : i32
    return %arg0, %c0_i32, %c0_i32_0 : i32, i32, i32
  }
}

</mosaic_0001>

<bundles_post_ra>
// kernel: yuyifenge_forward.1
= control target key start
LH: loop header
LB: loop body
LE: loop exit
PB: predicated region body
PF: predicated region fallthrough
CT: control target
= control target key end

     0   :  { %s18946_s13 = smov 0   ;;  %s23088_s0 = inlined_call_operand.vmem [shape: bf16[2,288,36], index: 0, kind: input, shape index: {}]   ;;  %s23089_s1 = inlined_call_operand.vmem [shape: f32[288,1], index: 1, kind: input, shape index: {}]   ;;  %s23090_s2 = inlined_call_operand.vmem [shape: bf16[36,64], index: 2, kind: input, shape index: {}]   ;;  %s23091_s3 = inlined_call_operand.vmem [shape: f32[1,64], index: 3, kind: input, shape index: {}]   ;;  %s23092_s4 = inlined_call_operand.vmem [shape: bf16[9,64,128], index: 4, kind: input, shape index: {}]   ;;  %s23093_s5 = inlined_call_operand.vmem [shape: f32[1,128], index: 5, kind: input, shape index: {}]   ;;  %s23094_s6 = inlined_call_operand.vmem [shape: bf16[9,128,64], index: 6, kind: input, shape index: {}]   ;;  %s23095_s7 = inlined_call_operand.vmem [shape: f32[1,64], index: 7, kind: input, shape index: {}]   ;;  %s23096_s8 = inlined_call_operand.vmem [shape: bf16[9,64,128], index: 8, kind: input, shape index: {}]   ;;  %s23097_s9 = inlined_call_operand.vmem [shape: f32[1,128], index: 9, kind: input, shape index: {}]   ;;  %s23098_s10 = inlined_call_operand.vmem [shape: bf16[2,288,128], index: 10, kind: output, shape index: {}]  }
   0x1 LB: > { %s14289_s14 = sadd.s32 4294967295, %s18888_s13   ;;  %p14293_p0 = scmp.ge.s32.totalorder %s18888_s13, 1  ;;  %s18888_s13 = sphi %s18946_s13, %s20_s13  }
   0x2   : > { %p312_p1 = scmp.lt.s32.totalorder %s18888_s13, 3 }
   0x4   : > { %p313_p2 = pnand %p14293_p0, %p312_p1 }
   0x6   : > { %316 = sbr.rel (%p313_p2) target bundleno = 2666 (0xa6a), region = 60 }
   0xd   : > { %v18476_v0 = vld [vmem:[%s23090_s2] sm:$0xff]   ;;  %vm400_vm0 = vcmask 517120   ;;  %v18477_v1 = vld [vmem:[%s23090_s2 + $0x8] sm:$0xff]   ;;  %vm401_vm1 = vsmask.f32 1280  ;;  %v23199_v4 = vmov 0 }
   0xe   : > { %16297 = vmatprep.subr.bf16.mxu0 %v18476_v0  ;;  %v403_v2 = vld [vmem:[#allocation2 + $0x8] sm:$0x3]  ;;  %v418_v3 = vld [vmem:[#allocation3 + $0x8] sm:$0x3]  ;;  %vm18961_vm2 = vmand %vm400_vm0, %vm401_vm1  ;;  %vm416_vm3 = vcmask 1041408   ;;  %v23202_v7 = vmov 0 }
   0xf   : > { %16298 = vmatpush3.bf16.msra.mxu0 %v18476_v0  ;;  %v23200_v4 = vsel %vm18961_vm2, 4294967295, %v23199_v4  ;;  %v430_v5 = vld [vmem:[#allocation4 + $0x8] sm:$0x3]  ;;  %v404_v6 = vsel %vm18961_vm2, 0, %v403_v2  ;;  %vm18969_vm4 = vmand %vm416_vm3, %vm401_vm1  ;;  %p350_p3 = scmp.lt.s32.totalorder %s14289_s14, 1  ;;  %v361_v11 = vld [vmem:[%s23089_s1] sm:$0xff] }
  0x10   : > { %23201 = vst [vmem:[#allocation5_spill] sm:$0xff] %v23200_v4  ;;  %16299 = vmatprep.subr.bf16.mxu0 %v18477_v1  ;;  %v23203_v7 = vsel %vm18969_vm4, 4294967295, %v23202_v7  ;;  %v431_v8 = vsel %vm18961_vm2, 0, %v430_v5  ;;  %v18478_v9 = vld [vmem:[%s23090_s2 + $0x10] ss:$0 sps:$4 sm:$0x33]  }
  0x11   : > { %23204 = vst [vmem:[#allocation6_spill] sm:$0xff] %v23203_v7  ;;  %405 = vst [vmem:[#allocation2 + $0x8] sm:$0x3] %v404_v6  ;;  %v419_v10 = vsel %vm18969_vm4, 0, %v418_v3  ;;  %v363_v12 = vld [vmem:[%s23089_s1 + $0x10] sm:$0xff]  ;;  %s23651_s14 = smov (!%p350_p3, %s14289_s14), 1 }
  0x12   : > { %432 = vst [vmem:[#allocation4 + $0x8] sm:$0x3] %v431_v8  ;;  %420 = vst [vmem:[#allocation3 + $0x8] sm:$0x3] %v419_v10  ;;  %v18890_v13 = vmov 0   ;;  %v648_v14 = vsel %vm416_vm3, %v18478_v9, 0 }
  0x13   : > { %18474 = vset.pattern.permute.xlu0 %v18890_v13  ;;  %414 = vst [vmem:[#allocation3] sm:$0xf] %v18890_v13  ;;  %415 = vst [vmem:[#allocation3 + $0x4] sm:$0xf] %v18890_v13  ;;  %18475 = vset.pattern.permute.xlu1 %v18890_v13  ;;  %s18464_s25 = smul.u32 144, %s23651_s14  ;;  %v362_v15 = vld [vmem:[%s23089_s1 + $0x8] sm:$0xff] }
  0x14   : > { %426 = vst [vmem:[#allocation3 + $0x9c] sm:$0xf] %v18890_v13  ;;  %427 = vst [vmem:[#allocation3 + $0xa0] sm:$0xf] %v18890_v13  ;;  %16300 = vmatpush3.bf16.msra.mxu0 %v18477_v1  ;;  %865 = vperm.xlu0 %18474, %v361_v11   ;;  %v364_v16 = vld [vmem:[%s23089_s1 + $0x18] sm:$0xff]  ;;  %vm591_vm5 = vcmask 293888  }
  0x15   : > { %18463 = vmatprep.subr.msk.bf16.mxu0 %vm416_vm3, %v18478_v9  ;;  %875 = vperm.xlu1 %18475, %v363_v12   ;;  %s19008_s12 = scalar_lea.vmem %s23088_s0, %s18464_s25  ;;  %v365_v17 = vld [vmem:[%s23089_s1 + $0x20] sm:$0xff]  ;;  %v366_v19 = vld [vmem:[%s23089_s1 + $0x28] sm:$0xff]  ;;  %v367_v22 = vld [vmem:[%s23089_s1 + $0x30] sm:$0xff]  ;;  %vm406_vm6 = vcmask 519169   ;;  %vm407_vm7 = vsmask.f32 7942  ;;  %s23032_s30 = scalar_lea.vmem %s23098_s10, %s18464_s25 }
  0x16   : > { %v18479_v18 = vld [vmem:[%s19008_s12] sm:$0xff]   ;;  %v18480_v20 = vld [vmem:[%s19008_s12 + $0x8] sm:$0xff]   ;;  %v18481_v21 = vld [vmem:[%s19008_s12 + $0x10] sm:$0xff]   ;;  %v23205_v3 = vmov 0  ;;  %vm397_vm9 = vcmask 519168   ;;  %vm1946_vm13 = vcmask 523264  }
  0x17   : > { %16303 = vmatprep.mubr.msk.bf16.mxu0 %vm591_vm5, %v18479_v18  ;;  %v368_v23 = vld [vmem:[%s23089_s1 + $0x38] sm:$0xff]  ;;  %v18483_v25 = vld [vmem:[%s19008_s12 + $0x20] sm:$0xff]   ;;  %v370_v27 = vld [vmem:[%s23089_s1 + $0x48] sm:$0xff]  ;;  %398 = vst.msk [vmem:[#allocation2] sm:$0xf] %vm397_vm9, %v18890_v13  ;;  %vm3712_vm15 = vcmask 1045504  }
  0x18   : > { %16302 = vmatpush3.bf16.msra.mxu0 %v648_v14  ;;  %870 = vperm.xlu0 %18474, %v362_v15   ;;  %v18482_v24 = vld [vmem:[%s19008_s12 + $0x18] sm:$0xff]   ;;  %v369_v26 = vld [vmem:[%s23089_s1 + $0x40] sm:$0xff]  ;;  %v371_v28 = vld [vmem:[%s23089_s1 + $0x50] sm:$0xff]  ;;  %399 = vst.msk [vmem:[#allocation2 + $0x4] sm:$0xf] %vm397_vm9, %v18890_v13  ;;  %vm4996_vm3 = vcmask 1044480  }
  0x19   : > { %880 = vperm.xlu1 %18475, %v364_v16   ;;  %v372_v29 = vld [vmem:[%s23089_s1 + $0x58] sm:$0xff]  ;;  %v18484_v30 = vld [vmem:[%s19008_s12 + $0x28] sm:$0xff]   ;;  %v18485_v31 = vld [vmem:[%s19008_s12 + $0x30] sm:$0xff]   ;;  %412 = vst.msk [vmem:[#allocation2 + $0x9c] sm:$0xf] %vm397_vm9, %v18890_v13 }
  0x1a   : > { %v373_v32 = vld [vmem:[%s23089_s1 + $0x60] sm:$0xff]  ;;  %v374_v33 = vld [vmem:[%s23089_s1 + $0x68] sm:$0xff]  ;;  %v375_v34 = vld [vmem:[%s23089_s1 + $0x70] sm:$0xff]  ;;  %413 = vst.msk [vmem:[#allocation2 + $0xa0] sm:$0xf] %vm397_vm9, %v18890_v13 }
  0x1b   : > { %16304 = vmatmul.mubr.msk.bf16.vlgmr.msra.gmra.mrb[0].mxu0 %vm591_vm5, %v18480_v20  ;;  %v376_v35 = vld [vmem:[%s23089_s1 + $0x78] sm:$0xff]  ;;  %v18487_v37 = vld [vmem:[%s19008_s12 + $0x40] sm:$0xff]   ;;  %v378_v39 = vld [vmem:[%s23089_s1 + $0x88] sm:$0xff]  ;;  %428 = vst.msk [vmem:[#allocation4] sm:$0xf] %vm397_vm9, %v18890_v13 }
  0x1c   : > { %16307 = vmatprep.mubr.msk.bf16.mxu0 %vm591_vm5, %v18481_v21  ;;  %885 = vperm.xlu0 %18474, %v365_v17   ;;  %v18486_v36 = vld [vmem:[%s19008_s12 + $0x38] sm:$0xff]   ;;  %v377_v38 = vld [vmem:[%s23089_s1 + $0x80] sm:$0xff]  ;;  %v379_v40 = vld [vmem:[%s23089_s1 + $0x90] sm:$0xff]  ;;  %429 = vst.msk [vmem:[#allocation4 + $0x4] sm:$0xf] %vm397_vm9, %v18890_v13 }
  0x1d   : > { %890 = vperm.xlu1 %18475, %v366_v19   ;;  %v380_v41 = vld [vmem:[%s23089_s1 + $0x98] sm:$0xff]  ;;  %v18488_v42 = vld [vmem:[%s19008_s12 + $0x48] sm:$0xff]   ;;  %v18489_v43 = vld [vmem:[%s19008_s12 + $0x50] sm:$0xff]   ;;  %436 = vst.msk [vmem:[#allocation4 + $0x9c] sm:$0xf] %vm397_vm9, %v18890_v13 }
  0x1e   : > { %v381_v44 = vld [vmem:[%s23089_s1 + $0xa0] sm:$0xff]  ;;  %v382_v45 = vld [vmem:[%s23089_s1 + $0xa8] sm:$0xff]  ;;  %v383_v46 = vld [vmem:[%s23089_s1 + $0xb0] sm:$0xff]  ;;  %437 = vst.msk [vmem:[#allocation4 + $0xa0] sm:$0xf] %vm397_vm9, %v18890_v13 }
  0x1f   : > { %v384_v47 = vld [vmem:[%s23089_s1 + $0xb8] sm:$0xff]  ;;  %v18491_v49 = vld [vmem:[%s19008_s12 + $0x60] sm:$0xff]   ;;  %v386_v51 = vld [vmem:[%s23089_s1 + $0xc8] sm:$0xff]  ;;  %vm1187_vm10 = vsmask.f32 5392 }
  0x20   : > { %895 = vperm.xlu0 %18474, %v367_v22   ;;  %v18490_v48 = vld [vmem:[%s19008_s12 + $0x58] sm:$0xff]   ;;  %v385_v50 = vld [vmem:[%s23089_s1 + $0xc0] sm:$0xff]  ;;  %v387_v52 = vld [vmem:[%s23089_s1 + $0xd0] sm:$0xff]  ;;  %vm1773_vm12 = vsmask.f32 7424 }
  0x21   : > { %900 = vperm.xlu1 %18475, %v368_v23   ;;  %v388_v53 = vld [vmem:[%s23089_s1 + $0xd8] sm:$0xff]  ;;  %v18492_v54 = vld [vmem:[%s19008_s12 + $0x68] sm:$0xff]   ;;  %v18493_v55 = vld [vmem:[%s19008_s12 + $0x70] sm:$0xff]   ;;  %vm3237_vm14 = vsmask.f32 6400 }
  0x22   : > { %v389_v56 = vld [vmem:[%s23089_s1 + $0xe0] sm:$0xff]  ;;  %v390_v57 = vld [vmem:[%s23089_s1 + $0xe8] sm:$0xff]  ;;  %v391_v58 = vld [vmem:[%s23089_s1 + $0xf0] sm:$0xff]  ;;  %vm4521_vm0 = vsmask.f32 5376 }
  0x23   : > { %16308 = vmatmul.mubr.msk.bf16.gmra.mrb[4].mxu0 %vm591_vm5, %v18482_v24  ;;  %v392_v59 = vld [vmem:[%s23089_s1 + $0xf8] sm:$0xff]  ;;  %v18495_v61 = vld [vmem:[%s19008_s12 + $0x80] sm:$0xff]   ;;  %v394_v63 = vld [vmem:[%s23089_s1 + $0x108] sm:$0xff] }
  0x24   : > { %16311 = vmatprep.mubr.msk.bf16.mxu0 %vm591_vm5, %v18483_v25  ;;  %905 = vperm.xlu0 %18474, %v369_v26   ;;  %v18494_v60 = vld [vmem:[%s19008_s12 + $0x78] sm:$0xff]   ;;  %v393_v62 = vld [vmem:[%s23089_s1 + $0x100] sm:$0xff]  ;;  %v395_v0 = vld [vmem:[%s23089_s1 + $0x110] sm:$0xff] }
  0x25   : > { %910 = vperm.xlu1 %18475, %v370_v27   ;;  %v396_v1 = vld [vmem:[%s23089_s1 + $0x118] sm:$0xff]  ;;  %v18496_v2 = vld [vmem:[%s19008_s12 + $0x88] sm:$0xff]   ;;  %vm19143_vm8 = vmand %vm406_vm6, %vm407_vm7 }
  0x26   : > { %v23206_v3 = vsel %vm19143_vm8, 4294967295, %v23205_v3  ;;  %v409_v5 = vld [vmem:[#allocation2 + $0x98] sm:$0xe]  ;;  %v433_v6 = vld [vmem:[#allocation4 + $0x98] sm:$0xe]  ;;  %v18498_v11 = vld [vmem:[%s23092_s4 + $0x28] sm:$0xff]  }
  0x27   : > { %23207 = vst [vmem:[#allocation7_spill] sm:$0xff] %v23206_v3  ;;  %v410_v8 = vsel %vm19143_vm8, 0, %v409_v5  ;;  %v434_v9 = vsel %vm19143_vm8, 0, %v433_v6  ;;  %v18497_v10 = vld [vmem:[%s23092_s4 + $0x20] sm:$0xff]   ;;  %v18500_v13 = vld [vmem:[%s23092_s4 + $0x30] sm:$0xff]   ;;  %v18501_v14 = vld [vmem:[%s23092_s4 + $0x88] sm:$0xff]  }
  0x28   : > { %915 = vperm.xlu0 %18474, %v371_v28   ;;  %411 = vst [vmem:[#allocation2 + $0x98] sm:$0xe] %v410_v8  ;;  %435 = vst [vmem:[#allocation4 + $0x98] sm:$0xe] %v434_v9  ;;  %16339 = vmatprep.subr.bf16.mxu0 %v18497_v10  ;;  %v18499_v12 = vld [vmem:[%s23092_s4 + $0x80] sm:$0xff]   ;;  %v18502_v15 = vld [vmem:[%s23092_s4 + $0x38] sm:$0xff]  }
  0x29   : > { %920 = vperm.xlu1 %18475, %v372_v29   ;;  %16340 = vmatpush3.bf16.msra.mxu0 %v18497_v10  ;;  %v18505_v16 = vld [vmem:[%s23092_s4 + $0x90] sm:$0xff]   ;;  %v18509_v17 = vld [vmem:[%s23092_s4 + $0x98] sm:$0xff]   ;;  %v19194_v18 = vld [vmem:[%s23092_s4 + $0xa0] sm:$0xff]  }
  0x2a   : > { %16341 = vmatprep.subr.bf16.mxu0 %v18498_v11  ;;  %16515 = vmatprep.subr.bf16.mxu1 %v18499_v12  ;;  %v1626_v20 = vld [vmem:[#allocation2] sm:$0xf]  ;;  %v1627_v21 = vld [vmem:[#allocation2 + $0x4] sm:$0xf]  ;;  %vm19234_vm11 = vmor %vm401_vm1, %vm1187_vm10  ;;  %vm2428_vm1 = vcmask 1046528  }
  0x2b   : > { %16312 = vmatmul.mubr.msk.bf16.gmra.mrb[8].mxu0 %vm591_vm5, %v18484_v30  ;;  %16516 = vmatpush3.bf16.msra.mxu1 %v18499_v12  ;;  %v19201_v23 = vcombine.low %v1626_v20, %v1627_v21  ;;  %v19208_v25 = vld [vmem:[%s23091_s3] ss:$0 sm:$0xff]  ;;  %v1585_v12 = vld [vmem:[#allocation2 + $0x8] sm:$0xe] }
  0x2c   : > { %16315 = vmatprep.mubr.msk.bf16.mxu0 %vm591_vm5, %v18485_v31  ;;  %925 = vperm.xlu0 %18474, %v373_v32  }
  0x2d   : > { %930 = vperm.xlu1 %18475, %v374_v33   ;;  %16342 = vmatpush3.bf16.msra.mxu0 %v18498_v11  ;;  %v1777_v27 = vshll.u32 %v19201_v23, 16 }
  0x2e   : > { %16343 = vmatprep.subr.bf16.mxu0 %v18500_v13  ;;  %16517 = vmatprep.subr.bf16.mxu1 %v18501_v14 }
  0x2f   : > { %16518 = vmatpush3.bf16.msra.mxu1 %v18501_v14 }
  0x30   : > { %935 = vperm.xlu0 %18474, %v375_v34   ;;  %16519 = vmatprep.subr.bf16.mxu1 %v18505_v16 }
  0x31   : > { %940 = vperm.xlu1 %18475, %v376_v35   ;;  %16344 = vmatpush3.bf16.msra.mxu0 %v18500_v13 }
  0x32   : > { %16345 = vmatprep.subr.bf16.mxu0 %v18502_v15 }
  0x33   : > { %16316 = vmatmul.mubr.msk.bf16.gmra.mrb[12].mxu0 %vm591_vm5, %v18486_v36  ;;  %16520 = vmatpush3.bf16.msra.mxu1 %v18505_v16  ;;  %v23215_v16 = vmov 0 }
  0x34   : > { %16319 = vmatprep.mubr.msk.bf16.mxu0 %vm591_vm5, %v18487_v37  ;;  %945 = vperm.xlu0 %18474, %v377_v38   ;;  %v23216_v16 = vsel %vm19234_vm11, 4294967295, %v23215_v16 }
  0x35   : > { %950 = vperm.xlu1 %18475, %v378_v39   ;;  %16346 = vmatpush3.bf16.msra.mxu0 %v18502_v15  ;;  %v1775_v39 = vshrl.u32 %v19201_v23, 16  ;;  %23217 = vst [vmem:[#allocation15_spill] sm:$0xff] %v23216_v16 }
  0x36   : > { %16521 = vmatprep.subr.bf16.mxu1 %v18509_v17 }
  0x37   : > { %16522 = vmatpush3.bf16.msra.mxu1 %v18509_v17 }
  0x38   : > { %955 = vperm.xlu0 %18474, %v379_v40   ;;  %16559 = vmatprep.subr.bf16.mxu1 %v19194_v18  ;;  %v1779_v40 = vrot.slane %v1777_v27, 1 }
  0x39   : > { %960 = vperm.xlu1 %18475, %v380_v41  }
  0x3b   : > { %16320 = vmatmul.mubr.msk.bf16.gmra.mrb[16].mxu0 %vm591_vm5, %v18488_v42 }
  0x3c   : > { %16323 = vmatprep.mubr.msk.bf16.mxu0 %vm591_vm5, %v18489_v43  ;;  %965 = vperm.xlu0 %18474, %v381_v44  }
  0x3d   : > { %970 = vperm.xlu1 %18475, %v382_v45  }
  0x40   : > { %975 = vperm.xlu0 %18474, %v383_v46  }
  0x41   : > { %980 = vperm.xlu1 %18475, %v384_v47  }
  0x43   : > { %16324 = vmatmul.mubr.msk.bf16.gmra.mrb[20].mxu0 %vm591_vm5, %v18490_v48 }
  0x44   : > { %16327 = vmatprep.mubr.msk.bf16.mxu0 %vm591_vm5, %v18491_v49  ;;  %985 = vperm.xlu0 %18474, %v385_v50  }
  0x45   : > { %990 = vperm.xlu1 %18475, %v386_v51   ;;  %v19226_v51 = vor.u32 %v1779_v40, %v1775_v39 }
  0x48   : > { %995 = vperm.xlu0 %18474, %v387_v52  }
  0x49   : > { %1000 = vperm.xlu1 %18475, %v388_v53  }
  0x4b   : > { %16328 = vmatmul.mubr.msk.bf16.gmra.mrb[24].mxu0 %vm591_vm5, %v18492_v54 }
  0x4c   : > { %16331 = vmatprep.mubr.msk.bf16.mxu0 %vm591_vm5, %v18493_v55  ;;  %1005 = vperm.xlu0 %18474, %v389_v56  }
  0x4d   : > { %1010 = vperm.xlu1 %18475, %v390_v57  }
  0x50   : > { %1015 = vperm.xlu0 %18474, %v391_v58  }
  0x51   : > { %1020 = vperm.xlu1 %18475, %v392_v59  }
  0x53   : > { %16332 = vmatmul.mubr.msk.bf16.gmra.mrb[28].mxu0 %vm591_vm5, %v18494_v60 }
  0x54   : > { %16335 = vmatprep.mubr.msk.bf16.mxu0 %vm591_vm5, %v18495_v61  ;;  %1025 = vperm.xlu0 %18474, %v393_v62  }
  0x55   : > { %1030 = vperm.xlu1 %18475, %v394_v63  }
  0x58   : > { %1035 = vperm.xlu0 %18474, %v395_v0  }
  0x59   : > { %1040 = vperm.xlu1 %18475, %v396_v1  }
  0x5b   : > { %16336 = vmatmul.mubr.msk.bf16.gmra.mrb[32].mxu0 %vm591_vm5, %v18496_v2  ;;  %vm421_vm5 = vcmask 1043457  }
  0x5c   : > { %vm20485_vm6 = vmand %vm421_vm5, %vm407_vm7 }
  0x93   : > { %v19197_v19 = vpop.permute.xlu0 %865 }
  0x94   : > { %23208 = vst [vmem:[#allocation8_spill] sm:$0xff] %v19197_v19  ;;  %v19199_v22 = vpop.permute.xlu1 %875 }
  0x95   : > { %23209 = vst [vmem:[#allocation9_spill] sm:$0xff] %v19199_v22 }
  0x97   : > { %v19203_v24 = vpop.permute.xlu0 %870 }
  0x98   : > { %23210 = vst [vmem:[#allocation10_spill] sm:$0xff] %v19203_v24  ;;  %v19212_v30 = vpop.permute.xlu1 %880 }
  0x99   : > { %23211 = vst [vmem:[#allocation11_spill] sm:$0xff] %v19212_v30 }
  0x9b   : > { %v19216_v36 = vpop.permute.xlu0 %885 }
  0x9c   : > { %23212 = vst [vmem:[#allocation12_spill] sm:$0xff] %v19216_v36  ;;  %v19223_v47 = vpop.permute.xlu1 %890 }
  0x9d   : > { %23213 = vst [vmem:[#allocation13_spill] sm:$0xff] %v19223_v47 }
  0x9f   : > { %v19229_v57 = vpop.permute.xlu0 %895 }
  0xa0   : > { %23214 = vst [vmem:[#allocation14_spill] sm:$0xff] %v19229_v57  ;;  %v19238_v17 = vpop.permute.xlu1 %900 }
  0xa1   : > { %23218 = vst [vmem:[#allocation16_spill] sm:$0xff] %v19238_v17 }
  0xee   : > { %v16305_v26 = vpop.f32.mrb[0].mxu0 }
  0xef   : > { %v693_v28 = vadd.f32 %v16305_v26, %v19208_v25  ;;  %v684_v29 = vpop.f32.mrb[1].mxu0 }
  0xf0   : > { %v685_v31 = vadd.f32 %v19208_v25, %v684_v29  ;;  %v16306_v32 = vpop.f32.mrb[2].mxu0 }
  0xf1   : > { %v829_v33 = vmax.f32 %v693_v28, 0.0  ;;  %v696_v34 = vadd.f32 %v16306_v32, %v19208_v25  ;;  %v687_v35 = vpop.f32.mrb[3].mxu0 }
  0xf2   : > { %v827_v37 = vmax.f32 %v685_v31, 0.0  ;;  %v688_v38 = vadd.f32 %v19208_v25, %v687_v35 }
  0xf3   : > { %v1045_v41 = vmul.f32 %v19199_v22, %v829_v33  ;;  %v830_v42 = vmax.f32 %v696_v34, 0.0  ;;  %v19242_v33 = vpop.permute.xlu0 %905 }
  0xf4   : > { %v1043_v43 = vmul.f32 %v19197_v19, %v827_v37  ;;  %v828_v44 = vmax.f32 %v688_v38, 0.0  ;;  %23219 = vst [vmem:[#allocation17_spill] sm:$0xff] %v19242_v33 }
  0xf5   : > { %v15397_v45 = vpack.c.bf16 %v1045_v41, %v1045_v41  ;;  %v1046_v46 = vmul.f32 %v19212_v30, %v830_v42 }
  0xf6   : > { %v15395_v48 = vpack.c.bf16 %v1043_v43, %v1043_v43  ;;  %v1044_v49 = vmul.f32 %v19203_v24, %v828_v44  ;;  %v16309_v50 = vpop.f32.mrb[4].mxu0 }
  0xf7   : > { %v1209_v52 = vshrl.u32 %v15397_v45, 16  ;;  %v1212_v53 = vshll.u32 %v15397_v45, 16  ;;  %v15398_v54 = vpack.c.bf16 %v1046_v46, %v1046_v46  ;;  %v709_v55 = vadd.f32 %v16309_v50, %v19208_v25  ;;  %v700_v56 = vpop.f32.mrb[5].mxu0 }
  0xf8   : > { %v1190_v58 = vshrl.u32 %v15395_v48, 16  ;;  %v1193_v59 = vshll.u32 %v15395_v48, 16  ;;  %v15396_v60 = vpack.c.bf16 %v1044_v49, %v1044_v49  ;;  %v701_v61 = vadd.f32 %v19208_v25, %v700_v56  ;;  %v16310_v62 = vpop.f32.mrb[6].mxu0 }
  0xf9   : > { %v1211_v63 = vrot.slane %v1209_v52, 6  ;;  %v1214_v0 = vrot.slane %v1212_v53, 7  ;;  %v1219_v1 = vshrl.u32 %v15398_v54, 16  ;;  %v1222_v2 = vshll.u32 %v15398_v54, 16  ;;  %v703_v5 = vpop.f32.mrb[7].mxu0 }
  0xfa   : > { %v1192_v6 = vrot.slane %v1190_v58, 6  ;;  %v1195_v8 = vrot.slane %v1193_v59, 7  ;;  %v1199_v9 = vshrl.u32 %v15396_v60, 16  ;;  %v1202_v10 = vshll.u32 %v15396_v60, 16  ;;  %v19256_v58 = vpop.permute.xlu1 %910 }
  0xfb   : > { %v1215_v11 = vor.u32 %v1214_v0, %v1211_v63  ;;  %v1221_v13 = vrot.slane %v1219_v1, 6  ;;  %v1224_v14 = vrot.slane %v1222_v2, 7  ;;  %v833_v15 = vmax.f32 %v709_v55, 0.0  ;;  %23220 = vst [vmem:[#allocation18_spill] sm:$0xff] %v19256_v58 }
  0xfc   : > { %v1196_v20 = vor.u32 %v1195_v8, %v1192_v6  ;;  %v1201_v21 = vrot.slane %v1199_v9, 6  ;;  %v1204_v26 = vrot.slane %v1202_v10, 7  ;;  %v831_v27 = vmax.f32 %v701_v61, 0.0 }
  0xfd   : > { %v1217_v28 = vrot.slane %v1215_v11, 4  ;;  %v1225_v29 = vor.u32 %v1224_v14, %v1221_v13  ;;  %v1049_v31 = vmul.f32 %v19229_v57, %v833_v15  ;;  %v712_v32 = vadd.f32 %v16310_v62, %v19208_v25 }
  0xfe   : > { %v1197_v34 = vrot.slane %v1196_v20, 4  ;;  %v1586_v35 = vsel %vm19143_vm8, %v1196_v20, %v1585_v12  ;;  %v1205_v37 = vor.u32 %v1204_v26, %v1201_v21  ;;  %v1047_v38 = vmul.f32 %v19216_v36, %v831_v27  ;;  %v16313_v39 = vpop.f32.mrb[8].mxu0 }
  0xff   : > { %1587 = vst [vmem:[#allocation2 + $0x8] sm:$0xe] %v1586_v35  ;;  %v1226_v40 = vsel %vm19234_vm11, %v1217_v28, %v1225_v29  ;;  %v1227_v41 = vrot.slane %v1225_v29, 4  ;;  %v15401_v42 = vpack.c.bf16 %v1049_v31, %v1049_v31  ;;  %v834_v43 = vmax.f32 %v712_v32, 0.0  ;;  %v716_v44 = vpop.f32.mrb[9].mxu0  ;;  %v19267_v35 = vpop.permute.xlu1 %920 }
 0x100   : > { %1590 = vst.msk [vmem:[#allocation2 + $0x14] sm:$0xf] %vm397_vm9, %v1226_v40  ;;  %v1206_v45 = vsel %vm19234_vm11, %v1197_v34, %v1205_v37  ;;  %v1207_v46 = vrot.slane %v1205_v37, 4  ;;  %v15399_v48 = vpack.c.bf16 %v1047_v38, %v1047_v38  ;;  %v704_v49 = vadd.f32 %v19208_v25, %v703_v5  ;;  %v16314_v50 = vpop.f32.mrb[10].mxu0  ;;  %v19261_v5 = vpop.permute.xlu0 %915  ;;  %23222 = vst [vmem:[#allocation20_spill] sm:$0xff] %v19267_v35 }
 0x101   : > { %1588 = vst.msk [vmem:[#allocation2 + $0xc] sm:$0xf] %vm397_vm9, %v1206_v45  ;;  %v1249_v52 = vshrl.u32 %v15401_v42, 16  ;;  %v1252_v53 = vshll.u32 %v15401_v42, 16  ;;  %v1050_v54 = vmul.f32 %v19238_v17, %v834_v43  ;;  %v725_v55 = vadd.f32 %v16313_v39, %v19208_v25  ;;  %v719_v56 = vpop.f32.mrb[11].mxu0  ;;  %23221 = vst [vmem:[#allocation19_spill] sm:$0xff] %v19261_v5 }
 0x102   : > { %v1216_v59 = vsel %vm19234_vm11, %v1207_v46, %v1215_v11  ;;  %v1229_v60 = vshrl.u32 %v15399_v48, 16  ;;  %v1232_v61 = vshll.u32 %v15399_v48, 16  ;;  %v832_v62 = vmax.f32 %v704_v49, 0.0 }
 0x103   : > { %1589 = vst.msk [vmem:[#allocation2 + $0x10] sm:$0xf] %vm397_vm9, %v1216_v59  ;;  %v1251_v63 = vrot.slane %v1249_v52, 6  ;;  %v1254_v0 = vrot.slane %v1252_v53, 7  ;;  %v15402_v1 = vpack.c.bf16 %v1050_v54, %v1050_v54  ;;  %v837_v2 = vmax.f32 %v725_v55, 0.0 }
 0x104   : > { %v1231_v6 = vrot.slane %v1229_v60, 6  ;;  %v1234_v8 = vrot.slane %v1232_v61, 7  ;;  %v1048_v9 = vmul.f32 %v19223_v47, %v832_v62  ;;  %v717_v10 = vadd.f32 %v19208_v25, %v716_v44  ;;  %v19273_v49 = vpop.permute.xlu0 %925 }
 0x105   : > { %v1255_v12 = vor.u32 %v1254_v0, %v1251_v63  ;;  %v1259_v13 = vshrl.u32 %v15402_v1, 16  ;;  %v1262_v11 = vshll.u32 %v15402_v1, 16  ;;  %v1053_v14 = vmul.f32 %v19261_v5, %v837_v2  ;;  %23223 = vst [vmem:[#allocation21_spill] sm:$0xff] %v19273_v49  ;;  %v19283_v1 = vld [vmem:[%s23092_s4] sm:$0xff]  }
 0x106   : > { %v1235_v15 = vor.u32 %v1234_v8, %v1231_v6  ;;  %v15400_v20 = vpack.c.bf16 %v1048_v9, %v1048_v9  ;;  %v835_v21 = vmax.f32 %v717_v10, 0.0  ;;  %v728_v26 = vadd.f32 %v16314_v50, %v19208_v25  ;;  %v16317_v27 = vpop.f32.mrb[12].mxu0  ;;  %v19290_v9 = vpop.permute.xlu1 %930  ;;  %16383 = vmatprep.subr.bf16.mxu0 %v19283_v1 }
 0x107   : > { %v1257_v28 = vrot.slane %v1255_v12, 4  ;;  %v1261_v29 = vrot.slane %v1259_v13, 6  ;;  %v1264_v31 = vrot.slane %v1262_v11, 7  ;;  %v15405_v32 = vpack.c.bf16 %v1053_v14, %v1053_v14  ;;  %v732_v34 = vpop.f32.mrb[13].mxu0  ;;  %23224 = vst [vmem:[#allocation22_spill] sm:$0xff] %v19290_v9 }
 0x108   : > { %v1236_v37 = vsel %vm19234_vm11, %v1227_v41, %v1235_v15  ;;  %v1237_v38 = vrot.slane %v1235_v15, 4  ;;  %v1239_v39 = vshrl.u32 %v15400_v20, 16  ;;  %v1242_v40 = vshll.u32 %v15400_v20, 16  ;;  %v16318_v42 = vpop.f32.mrb[14].mxu0 }
 0x109   : > { %1591 = vst.msk [vmem:[#allocation2 + $0x18] sm:$0xf] %vm397_vm9, %v1236_v37  ;;  %v1265_v43 = vor.u32 %v1264_v31, %v1261_v29  ;;  %v1289_v44 = vshrl.u32 %v15405_v32, 16  ;;  %v1292_v45 = vshll.u32 %v15405_v32, 16  ;;  %v1051_v46 = vmul.f32 %v19242_v33, %v835_v21  ;;  %v735_v48 = vpop.f32.mrb[15].mxu0  ;;  %v19302_v29 = vpop.permute.xlu0 %935 }
 0x10a   : > { %v1241_v50 = vrot.slane %v1239_v39, 6  ;;  %v1244_v52 = vrot.slane %v1242_v40, 7  ;;  %v838_v53 = vmax.f32 %v728_v26, 0.0  ;;  %v720_v54 = vadd.f32 %v19208_v25, %v719_v56  ;;  %23225 = vst [vmem:[#allocation23_spill] sm:$0xff] %v19302_v29  ;;  %v18508_v7 = vld [vmem:[#allocation2 + $0x10] sm:$0xff]  }
 0x10b   : > { %v1266_v41 = vsel %vm19234_vm11, %v1257_v28, %v1265_v43  ;;  %v1267_v55 = vrot.slane %v1265_v43, 4  ;;  %v1291_v59 = vrot.slane %v1289_v44, 6  ;;  %v1294_v60 = vrot.slane %v1292_v45, 7 }
 0x10c   : > { %1594 = vst.msk [vmem:[#allocation2 + $0x24] sm:$0xf] %vm397_vm9, %v1266_v41  ;;  %v1245_v61 = vor.u32 %v1244_v52, %v1241_v50  ;;  %v15403_v62 = vpack.c.bf16 %v1051_v46, %v1051_v46  ;;  %v1054_v63 = vmul.f32 %v19267_v35, %v838_v53  ;;  %v836_v0 = vmax.f32 %v720_v54, 0.0 }
 0x10d   : > { %v19285_v2 = vor.u32 %v1294_v60, %v1291_v59  ;;  %v741_v56 = vadd.f32 %v16317_v27, %v19208_v25  ;;  %v733_v6 = vadd.f32 %v19208_v25, %v732_v34  ;;  %v744_v8 = vadd.f32 %v16318_v42, %v19208_v25  ;;  %v19314_v59 = vpop.permute.xlu1 %940 }
 0x10e   : > { %v1246_v10 = vsel %vm19234_vm11, %v1237_v38, %v1245_v61  ;;  %v1247_v13 = vrot.slane %v1245_v61, 4  ;;  %v1269_v11 = vshrl.u32 %v15403_v62, 16  ;;  %v1272_v14 = vshll.u32 %v15403_v62, 16  ;;  %v19294_v15 = vpop.f32.mrb[16].mxu0  ;;  %23226 = vst [vmem:[#allocation24_spill] sm:$0xff] %v19314_v59 }
 0x10f   : > { %1592 = vst.msk [vmem:[#allocation2 + $0x1c] sm:$0xf] %vm397_vm9, %v1246_v10  ;;  %v1297_v20 = vrot.slane %v19285_v2, 4  ;;  %v15406_v21 = vpack.c.bf16 %v1054_v63, %v1054_v63  ;;  %v1052_v26 = vmul.f32 %v19256_v58, %v836_v0  ;;  %v841_v27 = vmax.f32 %v741_v56, 0.0  ;;  %v19300_v28 = vpop.f32.mrb[17].mxu0 }
 0x110   : > { %v1256_v31 = vsel %vm19234_vm11, %v1247_v13, %v1255_v12  ;;  %v1271_v32 = vrot.slane %v1269_v11, 6  ;;  %v1274_v34 = vrot.slane %v1272_v14, 7  ;;  %v839_v37 = vmax.f32 %v733_v6, 0.0  ;;  %v19306_v38 = vpop.f32.mrb[18].mxu0 }
 0x111   : > { %1593 = vst.msk [vmem:[#allocation2 + $0x20] sm:$0xf] %vm397_vm9, %v1256_v31  ;;  %v1299_v39 = vshrl.u32 %v15406_v21, 16  ;;  %v1302_v40 = vshll.u32 %v15406_v21, 16  ;;  %v15404_v42 = vpack.c.bf16 %v1052_v26, %v1052_v26  ;;  %v1057_v43 = vmul.f32 %v19302_v29, %v841_v27  ;;  %v19310_v44 = vpop.f32.mrb[19].mxu0 }
 0x112   : > { %v1275_v45 = vor.u32 %v1274_v34, %v1271_v32  ;;  %v1055_v46 = vmul.f32 %v19273_v49, %v839_v37  ;;  %v842_v50 = vmax.f32 %v744_v8, 0.0  ;;  %v736_v12 = vadd.f32 %v19208_v25, %v735_v48  ;;  %v19326_v32 = vpop.permute.xlu0 %945 }
 0x113   : > { %v1301_v52 = vrot.slane %v1299_v39, 6  ;;  %v1304_v53 = vrot.slane %v1302_v40, 7  ;;  %v1279_v54 = vshrl.u32 %v15404_v42, 16  ;;  %v1282_v41 = vshll.u32 %v15404_v42, 16  ;;  %23227 = vst [vmem:[#allocation25_spill] sm:$0xff] %v19326_v32 }
 0x114   : > { %v1276_v60 = vsel %vm19234_vm11, %v1267_v55, %v1275_v45  ;;  %v1277_v61 = vrot.slane %v1275_v45, 4  ;;  %v15409_v62 = vpack.c.bf16 %v1057_v43, %v1057_v43  ;;  %v15407_v63 = vpack.c.bf16 %v1055_v46, %v1055_v46 }
 0x115   : > { %1595 = vst.msk [vmem:[#allocation2 + $0x28] sm:$0xf] %vm397_vm9, %v1276_v60  ;;  %v1305_v0 = vor.u32 %v1304_v53, %v1301_v52  ;;  %v1281_v56 = vrot.slane %v1279_v54, 6  ;;  %v1284_v6 = vrot.slane %v1282_v41, 7  ;;  %v1058_v8 = vmul.f32 %v19314_v59, %v842_v50  ;;  %v18504_v60 = vld [vmem:[#allocation2 + $0x8] sm:$0xff]  }
 0x116   : > { %v1329_v48 = vshrl.u32 %v15409_v62, 16  ;;  %v1332_v10 = vshll.u32 %v15409_v62, 16  ;;  %v1309_v13 = vshrl.u32 %v15407_v63, 16  ;;  %v1312_v11 = vshll.u32 %v15407_v63, 16  ;;  %v19320_v14 = vpop.f32.mrb[20].mxu0  ;;  %v19342_v62 = vpop.permute.xlu1 %950 }
 0x117   : > { %v1306_v21 = vsel %vm19234_vm11, %v1297_v20, %v1305_v0  ;;  %v1307_v55 = vrot.slane %v1305_v0, 4  ;;  %v1285_v26 = vor.u32 %v1284_v6, %v1281_v56  ;;  %v15410_v27 = vpack.c.bf16 %v1058_v8, %v1058_v8  ;;  %v19324_v31 = vpop.f32.mrb[21].mxu0  ;;  %23228 = vst [vmem:[#allocation26_spill] sm:$0xff] %v19342_v62 }
 0x118   : > { %1598 = vst.msk [vmem:[#allocation2 + $0x34] sm:$0xf] %vm397_vm9, %v1306_v21  ;;  %v1331_v34 = vrot.slane %v1329_v48, 6  ;;  %v1334_v37 = vrot.slane %v1332_v10, 7  ;;  %v1311_v39 = vrot.slane %v1309_v13, 6  ;;  %v1314_v40 = vrot.slane %v1312_v11, 7  ;;  %v19363_v11 = vpop.permute.xlu0 %955 }
 0x119   : > { %v19329_v42 = vpop.f32.mrb[22].mxu0  ;;  %v1286_v20 = vsel %vm19234_vm11, %v1277_v61, %v1285_v26  ;;  %v1287_v43 = vrot.slane %v1285_v26, 4  ;;  %v1339_v45 = vshrl.u32 %v15410_v27, 16  ;;  %v1342_v46 = vshll.u32 %v15410_v27, 16  ;;  %v19361_v13 = vld [vmem:[#allocation2 + $0x10] sm:$0xff]   ;;  %23229 = vst [vmem:[#allocation27_spill] sm:$0xff] %v19363_v11 }
 0x11a   : > { %v19333_v50 = vpop.f32.mrb[23].mxu0  ;;  %1596 = vst.msk [vmem:[#allocation2 + $0x2c] sm:$0xf] %vm397_vm9, %v1286_v20  ;;  %v19336_v52 = vor.u32 %v1334_v37, %v1331_v34  ;;  %v19338_v53 = vor.u32 %v1314_v40, %v1311_v39  ;;  %v840_v54 = vmax.f32 %v736_v12, 0.0  ;;  %v757_v41 = vadd.f32 %v19294_v15, %v19208_v25 }
 0x11b   : > { %v1296_v61 = vsel %vm19234_vm11, %v1287_v43, %v19285_v2  ;;  %v1341_v63 = vrot.slane %v1339_v45, 6  ;;  %v1344_v0 = vrot.slane %v1342_v46, 7  ;;  %v749_v56 = vadd.f32 %v19208_v25, %v19300_v28 }
 0x11c   : > { %1597 = vst.msk [vmem:[#allocation2 + $0x30] sm:$0xf] %vm397_vm9, %v1296_v61  ;;  %v1337_v6 = vrot.slane %v19336_v52, 4  ;;  %v1316_v15 = vsel %vm19234_vm11, %v1307_v55, %v19338_v53  ;;  %v1317_v12 = vrot.slane %v19338_v53, 4  ;;  %v1056_v8 = vmul.f32 %v19290_v9, %v840_v54  ;;  %v19380_v54 = vpop.permute.xlu1 %960 }
 0x11d   : > { %1599 = vst.msk [vmem:[#allocation2 + $0x38] sm:$0xf] %vm397_vm9, %v1316_v15  ;;  %v19357_v2 = vor.u32 %v1344_v0, %v1341_v63  ;;  %v845_v48 = vmax.f32 %v757_v41, 0.0  ;;  %v843_v10 = vmax.f32 %v749_v56, 0.0  ;;  %v760_v28 = vadd.f32 %v19306_v38, %v19208_v25  ;;  %23230 = vst [vmem:[#allocation28_spill] sm:$0xff] %v19380_v54 }
 0x11e   : > { %v15408_v21 = vpack.c.bf16 %v1056_v8, %v1056_v8  ;;  %v1782_v26 = vshll.u32 %v18504_v60, 16  ;;  %v1786_v55 = vshrl.u32 %v18504_v60, 16  ;;  %v752_v27 = vadd.f32 %v19208_v25, %v19310_v44  ;;  %v19367_v34 = vpop.f32.mrb[24].mxu0 }
 0x11f   : > { %v1346_v37 = vsel %vm19234_vm11, %v1337_v6, %v19357_v2  ;;  %v1347_v39 = vrot.slane %v19357_v2, 4  ;;  %v1061_v38 = vmul.f32 %v19363_v11, %v845_v48  ;;  %v1059_v40 = vmul.f32 %v19326_v32, %v843_v10  ;;  %v19375_v20 = vpop.f32.mrb[25].mxu0 }
 0x120   : > { %1602 = vst.msk [vmem:[#allocation2 + $0x44] sm:$0xf] %vm397_vm9, %v1346_v37  ;;  %v1319_v43 = vshrl.u32 %v15408_v21, 16  ;;  %v1322_v45 = vshll.u32 %v15408_v21, 16  ;;  %v846_v46 = vmax.f32 %v760_v28, 0.0  ;;  %v1784_v44 = vrot.slane %v1782_v26, 1 }
 0x121   : > { %v19378_v53 = vpop.f32.mrb[26].mxu0  ;;  %v15413_v41 = vpack.c.bf16 %v1061_v38, %v1061_v38  ;;  %v15411_v60 = vpack.c.bf16 %v1059_v40, %v1059_v40  ;;  %v844_v61 = vmax.f32 %v752_v27, 0.0  ;;  %v1790_v63 = vshll.u32 %v19361_v13, 16  ;;  %v2758_v38 = vld [vmem:[#allocation2 + $0xc] sm:$0xf] }
 0x122   : > { %v19383_v0 = vpop.f32.mrb[27].mxu0  ;;  %v1321_v56 = vrot.slane %v1319_v43, 6  ;;  %v1324_v6 = vrot.slane %v1322_v45, 7  ;;  %v1062_v15 = vmul.f32 %v19380_v54, %v846_v46  ;;  %v1785_v8 = vsel %vm1773_vm12, %v19226_v51, %v1784_v44  ;;  %v2757_v46 = vld [vmem:[#allocation2 + $0x8] sm:$0xe] }
 0x123   : > { %v1369_v2 = vshrl.u32 %v15413_v41, 16  ;;  %v1372_v48 = vshll.u32 %v15413_v41, 16  ;;  %v1349_v10 = vshrl.u32 %v15411_v60, 16  ;;  %v1352_v28 = vshll.u32 %v15411_v60, 16  ;;  %16347 = vmatprep.mubr.msk.bf16.mxu0 %vm1946_vm13, %v1785_v8  ;;  %v19934_v5 = vld [vmem:[#allocation2 + $0x30] sm:$0xff]  }
 0x124   : > { %v1325_v21 = vor.u32 %v1324_v6, %v1321_v56  ;;  %v15414_v26 = vpack.c.bf16 %v1062_v15, %v1062_v15  ;;  %v1788_v27 = vor.u32 %v1786_v55, %v1784_v44  ;;  %v1060_v37 = vmul.f32 %v19342_v62, %v844_v61  ;;  %v19455_v62 = vld [vmem:[#allocation2 + $0x18] sm:$0xff]  }
 0x125   : > { %v1371_v40 = vrot.slane %v1369_v2, 6  ;;  %v1374_v43 = vrot.slane %v1372_v48, 7  ;;  %v1351_v45 = vrot.slane %v1349_v10, 6  ;;  %v1354_v3 = vrot.slane %v1352_v28, 7  ;;  %v18542_v28 = vld [vmem:[%s23092_s4 + $0x8] sm:$0xff]  }
 0x126   : > { %v1326_v51 = vsel %vm19234_vm11, %v1317_v12, %v1325_v21  ;;  %v1327_v41 = vrot.slane %v1325_v21, 4  ;;  %v1379_v54 = vshrl.u32 %v15414_v26, 16  ;;  %v1382_v60 = vshll.u32 %v15414_v26, 16  ;;  %v19392_v8 = vpop.f32.mrb[28].mxu0 }
 0x127   : > { %1600 = vst.msk [vmem:[#allocation2 + $0x3c] sm:$0xf] %vm397_vm9, %v1326_v51  ;;  %v19395_v55 = vor.u32 %v1374_v43, %v1371_v40  ;;  %v1355_v44 = vor.u32 %v1354_v3, %v1351_v45  ;;  %v15412_v61 = vpack.c.bf16 %v1060_v37, %v1060_v37  ;;  %v1792_v56 = vrot.slane %v1790_v63, 1  ;;  %v19397_v6 = vpop.f32.mrb[29].mxu0  ;;  %v19417_v37 = vpop.permute.xlu0 %965 }
 0x128   : > { %v1336_v15 = vsel %vm19234_vm11, %v1327_v41, %v19336_v52  ;;  %v1381_v12 = vrot.slane %v1379_v54, 6  ;;  %v1384_v2 = vrot.slane %v1382_v60, 7  ;;  %v19402_v48 = vcombine.low %v2757_v46, %v2758_v38  ;;  %v19404_v10 = vpop.f32.mrb[30].mxu0  ;;  %v19413_v52 = vld [vmem:[#allocation2 + $0x18] sm:$0xff]   ;;  %23231 = vst [vmem:[#allocation29_spill] sm:$0xff] %v19417_v37  ;;  %v19424_v46 = vpop.permute.xlu1 %970 }
 0x129   : > { %1601 = vst.msk [vmem:[#allocation2 + $0x40] sm:$0xf] %vm397_vm9, %v1336_v15  ;;  %v1377_v3 = vrot.slane %v19395_v55, 4  ;;  %v1356_v63 = vsel %vm19234_vm11, %v1347_v39, %v1355_v44  ;;  %v1357_v21 = vrot.slane %v1355_v44, 4  ;;  %v1359_v26 = vshrl.u32 %v15412_v61, 16  ;;  %v19415_v54 = vpop.f32.mrb[31].mxu0 }
 0x12a   : > { %1603 = vst.msk [vmem:[#allocation2 + $0x48] sm:$0xf] %vm397_vm9, %v1356_v63  ;;  %v19420_v38 = vor.u32 %v1384_v2, %v1381_v12  ;;  %v1362_v40 = vshll.u32 %v15412_v61, 16  ;;  %v1793_v43 = vsel %vm1773_vm12, %v1788_v27, %v1792_v56  ;;  %v3239_v45 = vshrl.u32 %v19402_v48, 16  ;;  %23232 = vst [vmem:[#allocation30_spill] sm:$0xff] %v19424_v46 }
 0x12b   : > { %v1361_v39 = vrot.slane %v1359_v26, 6  ;;  %16348 = vmatmul.mubr.msk.bf16.vlgmr.msra.gmra.mrb[36].mxu0 %vm1946_vm13, %v1793_v43  ;;  %v3242_v51 = vshll.u32 %v19402_v48, 16  ;;  %v3247_v41 = vshrl.u32 %v18508_v7, 16  ;;  %v3250_v60 = vshll.u32 %v18508_v7, 16  ;;  %v18546_v7 = vld [vmem:[%s23092_s4 + $0x10] sm:$0xff]   ;;  %v19451_v15 = vpop.permute.xlu0 %975 }
 0x12c   : > { %v1386_v44 = vsel %vm19234_vm11, %v1377_v3, %v19420_v38  ;;  %v1364_v61 = vrot.slane %v1362_v40, 7  ;;  %v3241_v12 = vrot.slane %v3239_v45, 1  ;;  %16384 = vmatpush3.bf16.msra.mxu0 %v19283_v1  ;;  %v773_v26 = vadd.f32 %v19320_v14, %v19208_v25  ;;  %23233 = vst [vmem:[#allocation31_spill] sm:$0xff] %v19451_v15 }
 0x12d   : > { %1606 = vst.msk [vmem:[#allocation2 + $0x54] sm:$0xf] %vm397_vm9, %v1386_v44  ;;  %v3244_v27 = vrot.slane %v3242_v51, 2  ;;  %v3249_v2 = vrot.slane %v3247_v41, 1  ;;  %v3252_v63 = vrot.slane %v3250_v60, 2  ;;  %16385 = vmatprep.subr.bf16.mxu0 %v18542_v28  ;;  %v765_v40 = vadd.f32 %v19208_v25, %v19324_v31  ;;  %v19447_v60 = vld [vmem:[#allocation2 + $0x20] sm:$0xff]  }
 0x12e   : > { %v1365_v3 = vor.u32 %v1364_v61, %v1361_v39  ;;  %v776_v1 = vadd.f32 %v19329_v42, %v19208_v25  ;;  %v1794_v43 = vshrl.u32 %v19361_v13, 16  ;;  %v849_v41 = vmax.f32 %v773_v26, 0.0  ;;  %v19449_v44 = vpop.f32.mrb[32].mxu0  ;;  %v19457_v13 = vpop.permute.xlu1 %980 }
 0x12f   : > { %v3245_v45 = vor.u32 %v3244_v27, %v3241_v12  ;;  %v19444_v51 = vor.u32 %v3252_v63, %v3249_v2  ;;  %v1798_v14 = vshll.u32 %v19413_v52, 16  ;;  %v847_v61 = vmax.f32 %v765_v40, 0.0  ;;  %23234 = vst [vmem:[#allocation32_spill] sm:$0xff] %v19457_v13  ;;  %v19463_v26 = vpop.f32.mrb[33].mxu0 }
 0x130   : > { %v1366_v31 = vsel %vm19234_vm11, %v1357_v21, %v1365_v3  ;;  %v1367_v39 = vrot.slane %v1365_v3, 4  ;;  %v850_v42 = vmax.f32 %v776_v1, 0.0  ;;  %16386 = vmatpush3.bf16.msra.mxu0 %v18542_v28  ;;  %v1065_v27 = vmul.f32 %v19451_v15, %v849_v41  ;;  %v18549_v21 = vld [vmem:[%s23092_s4 + $0x18] sm:$0xff]   ;;  %v19476_v1 = vpop.f32.mrb[34].mxu0 }
 0x131   : > { %1604 = vst.msk [vmem:[#allocation2 + $0x4c] sm:$0xf] %vm397_vm9, %v1366_v31  ;;  %v3254_v12 = vsel %vm3237_vm14, %v3245_v45, %v19444_v51  ;;  %v1796_v2 = vor.u32 %v1794_v43, %v1792_v56  ;;  %v1800_v63 = vrot.slane %v1798_v14, 1  ;;  %16387 = vmatprep.subr.bf16.mxu0 %v18546_v7  ;;  %v1063_v3 = vmul.f32 %v19417_v37, %v847_v61  ;;  %v19482_v14 = vpop.f32.mrb[35].mxu0 }
 0x132   : > { %v1376_v28 = vsel %vm19234_vm11, %v1367_v39, %v19395_v55  ;;  %16523 = vmatprep.mubr.msk.bf16.mxu1 %vm1946_vm13, %v3254_v12  ;;  %v1066_v40 = vmul.f32 %v19457_v13, %v850_v42  ;;  %v768_v56 = vadd.f32 %v19208_v25, %v19333_v50  ;;  %v15417_v43 = vpack.c.bf16 %v1065_v27, %v1065_v27  ;;  %v18514_v13 = vld [vmem:[#allocation2 + $0x20] sm:$0xff]  }
 0x133   : > { %1605 = vst.msk [vmem:[#allocation2 + $0x50] sm:$0xf] %vm397_vm9, %v1376_v28  ;;  %v1801_v45 = vsel %vm1773_vm12, %v1796_v2, %v1800_v63  ;;  %v1802_v41 = vshrl.u32 %v19413_v52, 16  ;;  %v1806_v55 = vshll.u32 %v19447_v60, 16  ;;  %v15415_v31 = vpack.c.bf16 %v1063_v3, %v1063_v3 }
 0x134   : > { %v15418_v39 = vpack.c.bf16 %v1066_v40, %v1066_v40  ;;  %16351 = vmatprep.mubr.msk.bf16.mxu0 %vm1946_vm13, %v1801_v45  ;;  %v848_v61 = vmax.f32 %v768_v56, 0.0  ;;  %v3256_v50 = vshrl.u32 %v19455_v62, 16  ;;  %16388 = vmatpush3.bf16.msra.mxu0 %v18546_v7  ;;  %v1409_v42 = vshrl.u32 %v15417_v43, 16 }
 0x135   : > { %v1412_v12 = vshll.u32 %v15417_v43, 16  ;;  %v1804_v28 = vor.u32 %v1802_v41, %v1800_v63  ;;  %v1808_v27 = vrot.slane %v1806_v55, 1  ;;  %16389 = vmatprep.subr.bf16.mxu0 %v18549_v21  ;;  %v1389_v2 = vshrl.u32 %v15415_v31, 16 }
 0x136   : > { %v1392_v52 = vshll.u32 %v15415_v31, 16  ;;  %v1419_v37 = vshrl.u32 %v15418_v39, 16  ;;  %v1422_v15 = vshll.u32 %v15418_v39, 16  ;;  %v1411_v32 = vrot.slane %v1409_v42, 6 }
 0x137   : > { %v1414_v11 = vrot.slane %v1412_v12, 7  ;;  %v1064_v3 = vmul.f32 %v19424_v46, %v848_v61  ;;  %v1809_v40 = vsel %vm1773_vm12, %v1804_v28, %v1808_v27  ;;  %v1391_v56 = vrot.slane %v1389_v2, 6  ;;  %v18515_v61 = vld [vmem:[#allocation2 + $0x28] sm:$0xff]   ;;  %v19492_v46 = vpop.permute.xlu0 %985  ;;  %v19494_v28 = vpop.permute.xlu1 %990 }
 0x138   : > { %v1394_v45 = vrot.slane %v1392_v52, 7  ;;  %v1421_v9 = vrot.slane %v1419_v37, 6  ;;  %v1424_v7 = vrot.slane %v1422_v15, 7  ;;  %16352 = vmatmul.mubr.msk.bf16.gmra.mrb[40].mxu0 %vm1946_vm13, %v1809_v40  ;;  %v3258_v41 = vrot.slane %v3256_v50, 1  ;;  %23235 = vst [vmem:[#allocation33_spill] sm:$0xff] %v19492_v46  ;;  %23236 = vst [vmem:[#allocation34_spill] sm:$0xff] %v19494_v28 }
 0x139   : > { %v1415_v63 = vor.u32 %v1414_v11, %v1411_v32  ;;  %v15416_v43 = vpack.c.bf16 %v1064_v3, %v1064_v3  ;;  %v3259_v55 = vshll.u32 %v19455_v62, 16  ;;  %16390 = vmatpush3.bf16.msra.mxu0 %v18549_v21  ;;  %v3265_v42 = vshrl.u32 %v18514_v13, 16 }
 0x13a   : > { %v1395_v31 = vor.u32 %v1394_v45, %v1391_v56  ;;  %v19490_v39 = vor.u32 %v1424_v7, %v1421_v9  ;;  %v3268_v12 = vshll.u32 %v18514_v13, 16  ;;  %v23237_v32 = vrot.slane %v19420_v38, 4 }
 0x13b   : > { %v1417_v37 = vrot.slane %v1415_v63, 4  ;;  %v1399_v15 = vshrl.u32 %v15416_v43, 16  ;;  %v1402_v2 = vshll.u32 %v15416_v43, 16  ;;  %v3261_v52 = vrot.slane %v3259_v55, 2  ;;  %v18522_v43 = vld [vmem:[%s23092_s4 + $0xa8] sm:$0xff]  }
 0x13c   : > { %v1396_v62 = vsel %vm19234_vm11, %v23237_v32, %v1395_v31  ;;  %v1397_v11 = vrot.slane %v1395_v31, 4  ;;  %v1427_v9 = vrot.slane %v19490_v39, 4  ;;  %v3267_v21 = vrot.slane %v3265_v42, 1 }
 0x13d   : > { %1607 = vst.msk [vmem:[#allocation2 + $0x58] sm:$0xf] %vm397_vm9, %v1396_v62  ;;  %v1426_v13 = vsel %vm19234_vm11, %v1417_v37, %v19490_v39  ;;  %v1401_v50 = vrot.slane %v1399_v15, 6  ;;  %v1404_v3 = vrot.slane %v1402_v2, 7  ;;  %v3262_v40 = vor.u32 %v3261_v52, %v3258_v41  ;;  %v19521_v15 = vld [vmem:[#allocation2 + $0x30] sm:$0xff]   ;;  %v19525_v2 = vpop.permute.xlu1 %1000  ;;  %v19530_v62 = vld [vmem:[#allocation2 + $0x28] sm:$0xff]  }
 0x13e   : > { %1610 = vst.msk [vmem:[#allocation2 + $0x64] sm:$0xf] %vm397_vm9, %v1426_v13  ;;  %v3270_v56 = vrot.slane %v3268_v12, 2  ;;  %v789_v38 = vadd.f32 %v19367_v34, %v19208_v25  ;;  %v781_v45 = vadd.f32 %v19208_v25, %v19375_v20  ;;  %v792_v7 = vadd.f32 %v19378_v53, %v19208_v25  ;;  %v19523_v53 = vpop.permute.xlu0 %995  ;;  %23239 = vst [vmem:[#allocation36_spill] sm:$0xff] %v19525_v2 }
 0x13f   : > { %v1405_v55 = vor.u32 %v1404_v3, %v1401_v50  ;;  %v3263_v41 = vsel %vm3237_vm14, %v19444_v51, %v3262_v40  ;;  %v1810_v31 = vshrl.u32 %v19447_v60, 16  ;;  %v1814_v42 = vshll.u32 %v18515_v61, 16  ;;  %23238 = vst [vmem:[#allocation35_spill] sm:$0xff] %v19523_v53 }
 0x140   : > { %16524 = vmatmul.mubr.msk.bf16.vlgmr.msra.gmra.mrb[0].mxu1 %vm1946_vm13, %v3263_v41  ;;  %v19519_v34 = vor.u32 %v3270_v56, %v3267_v21  ;;  %v853_v12 = vmax.f32 %v789_v38, 0.0  ;;  %v851_v20 = vmax.f32 %v781_v45, 0.0  ;;  %v854_v37 = vmax.f32 %v792_v7, 0.0 }
 0x141   : > { %v1406_v52 = vsel %vm19234_vm11, %v1397_v11, %v1405_v55  ;;  %v1407_v51 = vrot.slane %v1405_v55, 4  ;;  %16560 = vmatpush3.bf16.msra.mxu1 %v19194_v18  ;;  %v1812_v60 = vor.u32 %v1810_v31, %v1808_v27  ;;  %v1816_v32 = vrot.slane %v1814_v42, 1  ;;  %v18532_v18 = vld [vmem:[%s23092_s4 + $0xb0] sm:$0xff]  }
 0x142   : > { %1608 = vst.msk [vmem:[#allocation2 + $0x5c] sm:$0xf] %vm397_vm9, %v1406_v52  ;;  %v3272_v21 = vsel %vm3237_vm14, %v3262_v40, %v19519_v34  ;;  %v1069_v13 = vmul.f32 %v19523_v53, %v853_v12  ;;  %v1067_v50 = vmul.f32 %v19492_v46, %v851_v20  ;;  %v1070_v3 = vmul.f32 %v19525_v2, %v854_v37 }
 0x143   : > { %16561 = vmatprep.subr.bf16.mxu1 %v18522_v43  ;;  %v1416_v27 = vsel %vm19234_vm11, %v1407_v51, %v1415_v63  ;;  %16527 = vmatprep.mubr.msk.bf16.mxu1 %vm1946_vm13, %v3272_v21  ;;  %v1817_v11 = vsel %vm1773_vm12, %v1812_v60, %v1816_v32  ;;  %v784_v40 = vadd.f32 %v19208_v25, %v19383_v0  ;;  %v1818_v56 = vshrl.u32 %v18515_v61, 16  ;;  %v18543_v25 = vld [vmem:[%s23092_s4 + $0xb8] sm:$0xff]  }
 0x144   : > { %1609 = vst.msk [vmem:[#allocation2 + $0x60] sm:$0xf] %vm397_vm9, %v1416_v27  ;;  %v15421_v38 = vpack.c.bf16 %v1069_v13, %v1069_v13  ;;  %v15419_v45 = vpack.c.bf16 %v1067_v50, %v1067_v50  ;;  %v15422_v7 = vpack.c.bf16 %v1070_v3, %v1070_v3  ;;  %16355 = vmatprep.mubr.msk.bf16.mxu0 %vm1946_vm13, %v1817_v11  ;;  %v1822_v55 = vshll.u32 %v19521_v15, 16 }
 0x145   : > { %v852_v41 = vmax.f32 %v784_v40, 0.0  ;;  %v1820_v31 = vor.u32 %v1818_v56, %v1816_v32  ;;  %v3274_v63 = vshrl.u32 %v19530_v62, 16  ;;  %v3277_v42 = vshll.u32 %v19530_v62, 16  ;;  %16562 = vmatpush3.bf16.msra.mxu1 %v18522_v43  ;;  %v19558_v32 = vld [vmem:[#allocation2 + $0x30] sm:$0xff]   ;;  %v19565_v56 = vld [vmem:[%s23092_s4 + $0xc0] sm:$0xff]  }
 0x146   : > { %v1449_v0 = vshrl.u32 %v15421_v38, 16  ;;  %v1452_v61 = vshll.u32 %v15421_v38, 16  ;;  %v1429_v12 = vshrl.u32 %v15419_v45, 16  ;;  %v1432_v20 = vshll.u32 %v15419_v45, 16  ;;  %16563 = vmatprep.subr.bf16.mxu1 %v18532_v18 }
 0x147   : > { %v1459_v37 = vshrl.u32 %v15422_v7, 16  ;;  %v1462_v52 = vshll.u32 %v15422_v7, 16  ;;  %v1068_v51 = vmul.f32 %v19494_v28, %v852_v41  ;;  %v19556_v60 = vrot.slane %v1822_v55, 1  ;;  %v19568_v41 = vpop.permute.xlu0 %1005 }
 0x148   : > { %v1451_v21 = vrot.slane %v1449_v0, 6  ;;  %v1454_v13 = vrot.slane %v1452_v61, 7  ;;  %v1431_v43 = vrot.slane %v1429_v12, 6  ;;  %v1434_v50 = vrot.slane %v1432_v20, 7  ;;  %23240 = vst [vmem:[#allocation37_spill] sm:$0xff] %v19568_v41 }
 0x149   : > { %v1461_v3 = vrot.slane %v1459_v37, 6  ;;  %v1464_v27 = vrot.slane %v1462_v52, 7  ;;  %v15420_v11 = vpack.c.bf16 %v1068_v51, %v1068_v51  ;;  %v1825_v40 = vsel %vm1773_vm12, %v1820_v31, %v19556_v60  ;;  %16564 = vmatpush3.bf16.msra.mxu1 %v18532_v18  ;;  %v19573_v31 = vpop.permute.xlu1 %1010 }
 0x14a   : > { %v1455_v38 = vor.u32 %v1454_v13, %v1451_v21  ;;  %v1435_v45 = vor.u32 %v1434_v50, %v1431_v43  ;;  %16356 = vmatmul.mubr.msk.bf16.gmra.mrb[44].mxu0 %vm1946_vm13, %v1825_v40  ;;  %v3276_v7 = vrot.slane %v3274_v63, 1  ;;  %v3279_v55 = vrot.slane %v3277_v42, 2  ;;  %16565 = vmatprep.subr.bf16.mxu1 %v18543_v25  ;;  %23241 = vst [vmem:[#allocation38_spill] sm:$0xff] %v19573_v31  ;;  %v19579_v42 = vld [vmem:[#allocation2 + $0x38] sm:$0xff]  }
 0x14b   : > { %v19570_v0 = vor.u32 %v1464_v27, %v1461_v3  ;;  %v1439_v61 = vshrl.u32 %v15420_v11, 16  ;;  %v1442_v12 = vshll.u32 %v15420_v11, 16  ;;  %v3283_v18 = vshrl.u32 %v19558_v32, 16  ;;  %v19592_v3 = vld [vmem:[%s23091_s3] ss:$0 sm:$0xff] }
 0x14c   : > { %v1457_v20 = vrot.slane %v1455_v38, 4  ;;  %v1436_v37 = vsel %vm19234_vm11, %v1427_v9, %v1435_v45  ;;  %v1437_v52 = vrot.slane %v1435_v45, 4  ;;  %v3280_v63 = vor.u32 %v3279_v55, %v3276_v7  ;;  %v19607_v45 = vld [vmem:[%s23092_s4 + $0x40] sm:$0xff]  }
 0x14d   : > { %1611 = vst.msk [vmem:[#allocation2 + $0x68] sm:$0xf] %vm397_vm9, %v1436_v37  ;;  %v1441_v21 = vrot.slane %v1439_v61, 6  ;;  %v1444_v13 = vrot.slane %v1442_v12, 7  ;;  %v3285_v43 = vrot.slane %v3283_v18, 1  ;;  %16566 = vmatpush3.bf16.msra.mxu1 %v18543_v25  ;;  %v3286_v9 = vshll.u32 %v19558_v32, 16  ;;  %v19612_v12 = vpop.permute.xlu0 %1015  ;;  %16427 = vmatprep.subr.bf16.mxu0 %v19607_v45 }
 0x14e   : > { %v1466_v50 = vsel %vm19234_vm11, %v1457_v20, %v19570_v0  ;;  %v3281_v39 = vsel %vm3237_vm14, %v19519_v34, %v3280_v63  ;;  %v805_v27 = vadd.f32 %v19592_v3, %v19392_v8  ;;  %16603 = vmatprep.subr.bf16.mxu1 %v19565_v56  ;;  %v797_v34 = vadd.f32 %v19592_v3, %v19397_v6  ;;  %v19616_v37 = vld [vmem:[#allocation2 + $0x40] sm:$0xff]  }
 0x14f   : > { %1614 = vst.msk [vmem:[#allocation2 + $0x74] sm:$0xf] %vm397_vm9, %v1466_v50  ;;  %v1445_v25 = vor.u32 %v1444_v13, %v1441_v21  ;;  %16528 = vmatmul.mubr.msk.bf16.gmra.mrb[4].mxu1 %vm1946_vm13, %v3281_v39  ;;  %v808_v11 = vadd.f32 %v19592_v3, %v19404_v10  ;;  %v1826_v40 = vshrl.u32 %v19521_v15, 16  ;;  %v3288_v8 = vrot.slane %v3286_v9, 2  ;;  %23242 = vst [vmem:[#allocation39_spill] sm:$0xff] %v19612_v12  ;;  %v19619_v21 = vpop.permute.xlu1 %1020  ;;  %v19626_v9 = vld [vmem:[#allocation2 + $0x38] sm:$0xff]  }
 0x150   : > { %v857_v7 = vmax.f32 %v805_v27, 0.0  ;;  %v1830_v55 = vshll.u32 %v19579_v42, 16  ;;  %v800_v61 = vadd.f32 %v19592_v3, %v19415_v54  ;;  %v855_v18 = vmax.f32 %v797_v34, 0.0  ;;  %23243 = vst [vmem:[#allocation40_spill] sm:$0xff] %v19619_v21 }
 0x151   : > { %v1446_v6 = vsel %vm19234_vm11, %v1437_v52, %v1445_v25  ;;  %v1447_v10 = vrot.slane %v1445_v25, 4  ;;  %v858_v20 = vmax.f32 %v808_v11, 0.0  ;;  %v19622_v13 = vor.u32 %v3288_v8, %v3285_v43 }
 0x152   : > { %1612 = vst.msk [vmem:[#allocation2 + $0x6c] sm:$0xf] %vm397_vm9, %v1446_v6  ;;  %v1073_v54 = vmul.f32 %v19612_v12, %v857_v7  ;;  %v1828_v50 = vor.u32 %v1826_v40, %v19556_v60  ;;  %v1832_v39 = vrot.slane %v1830_v55, 1  ;;  %v1071_v27 = vmul.f32 %v19568_v41, %v855_v18 }
 0x153   : > { %v1456_v52 = vsel %vm19234_vm11, %v1447_v10, %v1455_v38  ;;  %v1074_v25 = vmul.f32 %v19619_v21, %v858_v20  ;;  %v856_v34 = vmax.f32 %v800_v61, 0.0  ;;  %v3290_v43 = vsel %vm3237_vm14, %v3280_v63, %v19622_v13 }
 0x154   : > { %1613 = vst.msk [vmem:[#allocation2 + $0x70] sm:$0xf] %vm397_vm9, %v1456_v52  ;;  %v15425_v11 = vpack.c.bf16 %v1073_v54, %v1073_v54  ;;  %v1833_v8 = vsel %vm1773_vm12, %v1828_v50, %v1832_v39  ;;  %v1834_v60 = vshrl.u32 %v19579_v42, 16  ;;  %16531 = vmatprep.mubr.msk.bf16.mxu1 %vm1946_vm13, %v3290_v43  ;;  %v15423_v40 = vpack.c.bf16 %v1071_v27, %v1071_v27 }
 0x155   : > { %v15426_v7 = vpack.c.bf16 %v1074_v25, %v1074_v25  ;;  %16359 = vmatprep.mubr.msk.bf16.mxu0 %vm1946_vm13, %v1833_v8  ;;  %v1072_v38 = vmul.f32 %v19573_v31, %v856_v34  ;;  %v1838_v55 = vshll.u32 %v19616_v37, 16  ;;  %v3292_v63 = vshrl.u32 %v19626_v9, 16  ;;  %v19642_v25 = vld [vmem:[#allocation2 + $0x40] sm:$0xff]  }
 0x156   : > { %v1489_v61 = vshrl.u32 %v15425_v11, 16  ;;  %v1492_v6 = vshll.u32 %v15425_v11, 16  ;;  %v1836_v10 = vor.u32 %v1834_v60, %v1832_v39  ;;  %v1469_v18 = vshrl.u32 %v15423_v40, 16 }
 0x157   : > { %v1472_v20 = vshll.u32 %v15423_v40, 16  ;;  %v1499_v54 = vshrl.u32 %v15426_v7, 16  ;;  %v1502_v50 = vshll.u32 %v15426_v7, 16  ;;  %v15424_v43 = vpack.c.bf16 %v1072_v38, %v1072_v38  ;;  %v19649_v38 = vpop.permute.xlu0 %1025 }
 0x158   : > { %v1491_v52 = vrot.slane %v1489_v61, 6  ;;  %v1494_v51 = vrot.slane %v1492_v6, 7  ;;  %v1840_v27 = vrot.slane %v1838_v55, 1  ;;  %v1471_v8 = vrot.slane %v1469_v18, 6  ;;  %23244 = vst [vmem:[#allocation41_spill] sm:$0xff] %v19649_v38  ;;  %v19651_v55 = vpop.permute.xlu1 %1030 }
 0x159   : > { %v1474_v21 = vrot.slane %v1472_v20, 7  ;;  %v1501_v34 = vrot.slane %v1499_v54, 6  ;;  %v1504_v31 = vrot.slane %v1502_v50, 7  ;;  %v1479_v12 = vshrl.u32 %v15424_v43, 16  ;;  %23245 = vst [vmem:[#allocation42_spill] sm:$0xff] %v19651_v55 }
 0x15a   : > { %v1495_v41 = vor.u32 %v1494_v51, %v1491_v52  ;;  %v1482_v11 = vshll.u32 %v15424_v43, 16  ;;  %v1841_v39 = vsel %vm1773_vm12, %v1836_v10, %v1840_v27  ;;  %v3294_v40 = vrot.slane %v3292_v63, 1  ;;  %v19664_v43 = vld [vmem:[#allocation2 + $0x48] sm:$0xff]  }
 0x15b   : > { %v1475_v60 = vor.u32 %v1474_v21, %v1471_v8  ;;  %v19645_v28 = vor.u32 %v1504_v31, %v1501_v34  ;;  %16360 = vmatmul.mubr.msk.bf16.gmra.mrb[48].mxu0 %vm1946_vm13, %v1841_v39  ;;  %v3295_v7 = vshll.u32 %v19626_v9, 16  ;;  %v1481_v6 = vrot.slane %v1479_v12, 6 }
 0x15c   : > { %v1497_v61 = vrot.slane %v1495_v41, 4  ;;  %v1484_v18 = vrot.slane %v1482_v11, 7  ;;  %v3301_v51 = vshrl.u32 %v19642_v25, 16  ;;  %v23246_v20 = vrot.slane %v19570_v0, 4 }
 0x15d   : > { %v1477_v21 = vrot.slane %v1475_v60, 4  ;;  %v3297_v63 = vrot.slane %v3295_v7, 2  ;;  %v3304_v52 = vshll.u32 %v19642_v25, 16  ;;  %v821_v8 = vadd.f32 %v19592_v3, %v19449_v44 }
 0x15e   : > { %v1476_v31 = vsel %vm19234_vm11, %v23246_v20, %v1475_v60  ;;  %v1506_v54 = vsel %vm19234_vm11, %v1497_v61, %v19645_v28  ;;  %v1485_v50 = vor.u32 %v1484_v18, %v1481_v6  ;;  %v3303_v12 = vrot.slane %v3301_v51, 1  ;;  %v19676_v6 = vld [vmem:[#allocation2 + $0x50] sm:$0xff]   ;;  %v19681_v51 = vpop.permute.xlu0 %1035 }
 0x15f   : > { %1615 = vst.msk [vmem:[#allocation2 + $0x78] sm:$0xf] %vm397_vm9, %v1476_v31  ;;  %1618 = vst.msk [vmem:[#allocation2 + $0x84] sm:$0xf] %vm397_vm9, %v1506_v54  ;;  %v3298_v0 = vor.u32 %v3297_v63, %v3294_v40  ;;  %v813_v34 = vadd.f32 %v19592_v3, %v19463_v26  ;;  %v824_v11 = vadd.f32 %v19592_v3, %v19476_v1  ;;  %v3306_v7 = vrot.slane %v3304_v52, 2  ;;  %v19683_v1 = vpop.permute.xlu1 %1040  ;;  %v19691_v54 = vld [vmem:[#allocation2 + $0x48] sm:$0xff]  }
 0x160   : > { %v1486_v39 = vsel %vm19234_vm11, %v1477_v21, %v1485_v50  ;;  %v1487_v60 = vrot.slane %v1485_v50, 4  ;;  %v1842_v61 = vshrl.u32 %v19616_v37, 16  ;;  %v861_v40 = vmax.f32 %v821_v8, 0.0  ;;  %23247 = vst [vmem:[#allocation43_spill] sm:$0xff] %v19681_v51  ;;  %23248 = vst [vmem:[#allocation44_spill] sm:$0xff] %v19683_v1 }
 0x161   : > { %1616 = vst.msk [vmem:[#allocation2 + $0x7c] sm:$0xf] %vm397_vm9, %v1486_v39  ;;  %v3299_v44 = vsel %vm3237_vm14, %v19622_v13, %v3298_v0  ;;  %v859_v18 = vmax.f32 %v813_v34, 0.0  ;;  %v862_v26 = vmax.f32 %v824_v11, 0.0  ;;  %v19688_v31 = vor.u32 %v3306_v7, %v3303_v12 }
 0x162   : > { %v1496_v20 = vsel %vm19234_vm11, %v1487_v60, %v1495_v41  ;;  %16532 = vmatmul.mubr.msk.bf16.gmra.mrb[8].mxu1 %vm1946_vm13, %v3299_v44  ;;  %v1844_v21 = vor.u32 %v1842_v61, %v1840_v27  ;;  %v1846_v63 = vshll.u32 %v19664_v43, 16  ;;  %v1077_v13 = vmul.f32 %v19681_v51, %v861_v40  ;;  %v19704_v61 = vld [vmem:[#allocation2 + $0x50] sm:$0xff]   ;;  %v19729_v51 = vld [vmem:[#allocation2 + $0x60] sm:$0xff]  }
 0x163   : > { %1617 = vst.msk [vmem:[#allocation2 + $0x80] sm:$0xf] %vm397_vm9, %v1496_v20  ;;  %v1075_v50 = vmul.f32 %v19649_v38, %v859_v18  ;;  %v1078_v52 = vmul.f32 %v19683_v1, %v862_v26  ;;  %v816_v41 = vadd.f32 %v19592_v3, %v19482_v14  ;;  %v3308_v12 = vsel %vm3237_vm14, %v3298_v0, %v19688_v31  ;;  %v1623_v38 = vld [vmem:[#allocation2 + $0x98] sm:$0x3] }
 0x164   : > { %v1848_v8 = vrot.slane %v1846_v63, 1  ;;  %v1850_v27 = vshrl.u32 %v19664_v43, 16  ;;  %v1854_v34 = vshll.u32 %v19676_v6, 16  ;;  %16535 = vmatprep.mubr.msk.bf16.mxu1 %vm1946_vm13, %v3308_v12  ;;  %v15429_v11 = vpack.c.bf16 %v1077_v13, %v1077_v13 }
 0x165   : > { %v15427_v39 = vpack.c.bf16 %v1075_v50, %v1075_v50  ;;  %v15430_v60 = vpack.c.bf16 %v1078_v52, %v1078_v52  ;;  %v860_v7 = vmax.f32 %v816_v41, 0.0  ;;  %v3310_v3 = vshrl.u32 %v19691_v54, 16 }
 0x166   : > { %v1849_v44 = vsel %vm1773_vm12, %v1844_v21, %v1848_v8  ;;  %v1852_v40 = vor.u32 %v1850_v27, %v1848_v8  ;;  %v1856_v14 = vrot.slane %v1854_v34, 1  ;;  %v1529_v0 = vshrl.u32 %v15429_v11, 16 }
 0x167   : > { %v1532_v18 = vshll.u32 %v15429_v11, 16  ;;  %v1509_v26 = vshrl.u32 %v15427_v39, 16  ;;  %v1512_v20 = vshll.u32 %v15427_v39, 16  ;;  %16363 = vmatprep.mubr.msk.bf16.mxu0 %vm1946_vm13, %v1849_v44  ;;  %v1539_v63 = vshrl.u32 %v15430_v60, 16 }
 0x168   : > { %v1542_v12 = vshll.u32 %v15430_v60, 16  ;;  %v1076_v13 = vmul.f32 %v19651_v55, %v860_v7  ;;  %v1857_v50 = vsel %vm1773_vm12, %v1852_v40, %v1856_v14  ;;  %v1531_v52 = vrot.slane %v1529_v0, 6  ;;  %v19714_v7 = vld [vmem:[#allocation2 + $0x58] sm:$0xff]  }
 0x169   : > { %v1534_v41 = vrot.slane %v1532_v18, 7  ;;  %v1511_v10 = vrot.slane %v1509_v26, 6  ;;  %v1514_v21 = vrot.slane %v1512_v20, 7  ;;  %16364 = vmatmul.mubr.msk.bf16.gmra.mrb[52].mxu0 %vm1946_vm13, %v1857_v50  ;;  %v1541_v8 = vrot.slane %v1539_v63, 6  ;;  %v19717_v20 = vld [vmem:[#allocation2 + $0x58] sm:$0xff]   ;;  %v19723_v50 = vld [vmem:[#allocation2 + $0x60] sm:$0xff]  }
 0x16a   : > { %v1544_v27 = vrot.slane %v1542_v12, 7  ;;  %v15428_v34 = vpack.c.bf16 %v1076_v13, %v1076_v13  ;;  %v3312_v11 = vrot.slane %v3310_v3, 1  ;;  %v3313_v44 = vshll.u32 %v19691_v54, 16  ;;  %v19777_v59 = vld [vmem:[#allocation2 + $0x78] sm:$0xff]  }
 0x16b   : > { %v1535_v1 = vor.u32 %v1534_v41, %v1531_v52  ;;  %v1515_v39 = vor.u32 %v1514_v21, %v1511_v10  ;;  %v3319_v60 = vshrl.u32 %v19704_v61, 16  ;;  %v3322_v26 = vshll.u32 %v19704_v61, 16 }
 0x16c   : > { %v1545_v40 = vor.u32 %v1544_v27, %v1541_v8  ;;  %v1519_v0 = vshrl.u32 %v15428_v34, 16  ;;  %v1522_v18 = vshll.u32 %v15428_v34, 16  ;;  %v23249_v12 = vrot.slane %v19645_v28, 4 }
 0x16d   : > { %v1537_v63 = vrot.slane %v1535_v1, 4  ;;  %v1517_v3 = vrot.slane %v1515_v39, 4  ;;  %v3315_v13 = vrot.slane %v3313_v44, 2  ;;  %v3321_v8 = vrot.slane %v3319_v60, 1 }
 0x16e   : > { %v1516_v10 = vsel %vm19234_vm11, %v23249_v12, %v1515_v39  ;;  %v1547_v52 = vrot.slane %v1545_v40, 4  ;;  %v1521_v41 = vrot.slane %v1519_v0, 6  ;;  %v1524_v21 = vrot.slane %v1522_v18, 7 }
 0x16f   : > { %1619 = vst.msk [vmem:[#allocation2 + $0x88] sm:$0xf] %vm397_vm9, %v1516_v10  ;;  %v1546_v27 = vsel %vm19234_vm11, %v1537_v63, %v1545_v40  ;;  %v3316_v34 = vor.u32 %v3315_v13, %v3312_v11  ;;  %v3324_v55 = vrot.slane %v3322_v26, 2  ;;  %v1858_v28 = vshrl.u32 %v19676_v6, 16  ;;  %v19743_v13 = vld [vmem:[#allocation2 + $0x68] sm:$0xff]  }
 0x170   : > { %1622 = vst.msk [vmem:[#allocation2 + $0x94] sm:$0xf] %vm397_vm9, %v1546_v27  ;;  %v1624_v39 = vsel %vm18961_vm2, %v1547_v52, %v1623_v38  ;;  %v1525_v44 = vor.u32 %v1524_v21, %v1521_v41  ;;  %v1862_v12 = vshll.u32 %v19714_v7, 16  ;;  %v1866_v0 = vshrl.u32 %v19714_v7, 16  ;;  %v19745_v52 = vld [vmem:[#allocation2 + $0x70] sm:$0xff]  }
 0x171   : > { %1625 = vst [vmem:[#allocation2 + $0x98] sm:$0x3] %v1624_v39  ;;  %v3317_v60 = vsel %vm3237_vm14, %v19688_v31, %v3316_v34  ;;  %v3325_v11 = vor.u32 %v3324_v55, %v3321_v8  ;;  %v1860_v40 = vor.u32 %v1858_v28, %v1856_v14  ;;  %v1870_v18 = vshll.u32 %v19723_v50, 16  ;;  %v19757_v39 = vld [vmem:[#allocation2 + $0x70] sm:$0xff]  }
 0x172   : > { %v1526_v26 = vsel %vm19234_vm11, %v1517_v3, %v1525_v44  ;;  %v1527_v63 = vrot.slane %v1525_v44, 4  ;;  %16536 = vmatmul.mubr.msk.bf16.gmra.mrb[12].mxu1 %vm1946_vm13, %v3317_v60  ;;  %v1864_v38 = vrot.slane %v1862_v12, 1  ;;  %v3328_v10 = vshrl.u32 %v19717_v20, 16  ;;  %v19751_v3 = vld [vmem:[#allocation2 + $0x68] sm:$0xff]  }
 0x173   : > { %1620 = vst.msk [vmem:[#allocation2 + $0x8c] sm:$0xf] %vm397_vm9, %v1526_v26  ;;  %v3326_v55 = vsel %vm3237_vm14, %v3316_v34, %v3325_v11  ;;  %v1872_v31 = vrot.slane %v1870_v18, 1  ;;  %v3331_v14 = vshll.u32 %v19717_v20, 16  ;;  %v3337_v41 = vshrl.u32 %v19729_v51, 16  ;;  %v19763_v18 = vld [vmem:[#allocation2 + $0x78] sm:$0xff]  }
 0x174   : > { %v1536_v21 = vsel %vm19234_vm11, %v1527_v63, %v1535_v1  ;;  %16539 = vmatprep.mubr.msk.bf16.mxu1 %vm1946_vm13, %v3326_v55  ;;  %v1865_v8 = vsel %vm1773_vm12, %v1860_v40, %v1864_v38  ;;  %v1868_v27 = vor.u32 %v1866_v0, %v1864_v38  ;;  %v3330_v28 = vrot.slane %v3328_v10, 1  ;;  %v19769_v63 = vld [vmem:[#allocation2 + $0x80] sm:$0xff]  }
 0x175   : > { %1621 = vst.msk [vmem:[#allocation2 + $0x90] sm:$0xf] %vm397_vm9, %v1536_v21  ;;  %16367 = vmatprep.mubr.msk.bf16.mxu0 %vm1946_vm13, %v1865_v8  ;;  %v3333_v34 = vrot.slane %v3331_v14, 2  ;;  %v3339_v44 = vrot.slane %v3337_v41, 1  ;;  %v3340_v12 = vshll.u32 %v19729_v51, 16  ;;  %v1874_v60 = vshrl.u32 %v19723_v50, 16 }
 0x176   : > { %v1873_v1 = vsel %vm1773_vm12, %v1868_v27, %v1872_v31  ;;  %v1878_v40 = vshll.u32 %v19743_v13, 16  ;;  %v1882_v0 = vshrl.u32 %v19743_v13, 16  ;;  %v1886_v26 = vshll.u32 %v19745_v52, 16 }
 0x177   : > { %16368 = vmatmul.mubr.msk.bf16.gmra.mrb[56].mxu0 %vm1946_vm13, %v1873_v1  ;;  %v3334_v38 = vor.u32 %v3333_v34, %v3330_v28  ;;  %v3342_v10 = vrot.slane %v3340_v12, 2  ;;  %v1876_v55 = vor.u32 %v1874_v60, %v1872_v31  ;;  %v3346_v14 = vshrl.u32 %v19751_v3, 16  ;;  %v19781_v60 = vld [vmem:[#allocation2 + $0x80] sm:$0xff]  }
 0x178   : > { %v1880_v41 = vrot.slane %v1878_v40, 1  ;;  %v1888_v21 = vrot.slane %v1886_v26, 1  ;;  %v3349_v8 = vshll.u32 %v19751_v3, 16  ;;  %v3355_v27 = vshrl.u32 %v19757_v39, 16 }
 0x179   : > { %v3335_v4 = vsel %vm3237_vm14, %v3325_v11, %v3334_v38  ;;  %v3343_v2 = vor.u32 %v3342_v10, %v3339_v44  ;;  %v3348_v46 = vrot.slane %v3346_v14, 1  ;;  %v3358_v53 = vshll.u32 %v19757_v39, 16 }
 0x17a   : > { %16540 = vmatmul.mubr.msk.bf16.gmra.mrb[16].mxu1 %vm1946_vm13, %v3335_v4  ;;  %v1881_v31 = vsel %vm1773_vm12, %v1876_v55, %v1880_v41  ;;  %v1884_v28 = vor.u32 %v1882_v0, %v1880_v41  ;;  %v3351_v34 = vrot.slane %v3349_v8, 2  ;;  %v3357_v12 = vrot.slane %v3355_v27, 1 }
 0x17b   : > { %v3344_v1 = vsel %vm3237_vm14, %v3334_v38, %v3343_v2  ;;  %16371 = vmatprep.mubr.msk.bf16.mxu0 %vm1946_vm13, %v1881_v31  ;;  %v3360_v11 = vrot.slane %v3358_v53, 2  ;;  %v1890_v44 = vshrl.u32 %v19745_v52, 16  ;;  %v1894_v40 = vshll.u32 %v19763_v18, 16  ;;  %v19791_v38 = vld [vmem:[#allocation2 + $0x88] sm:$0xff]  }
 0x17c   : > { %16543 = vmatprep.mubr.msk.bf16.mxu1 %vm1946_vm13, %v3344_v1  ;;  %v1889_v4 = vsel %vm1773_vm12, %v1884_v28, %v1888_v21  ;;  %v3352_v26 = vor.u32 %v3351_v34, %v3348_v46  ;;  %v1902_v0 = vshll.u32 %v19769_v63, 16  ;;  %v3364_v41 = vshrl.u32 %v19777_v59, 16  ;;  %v19793_v8 = vld [vmem:[#allocation2 + $0x90] ss:$0 sps:$4 sm:$0x11]   ;;  %v19799_v46 = vld [vmem:[#allocation2 + $0x88] sm:$0xff]  }
 0x17d   : > { %v3361_v10 = vor.u32 %v3360_v11, %v3357_v12  ;;  %v1892_v55 = vor.u32 %v1890_v44, %v1888_v21  ;;  %v1896_v14 = vrot.slane %v1894_v40, 1  ;;  %v1898_v27 = vshrl.u32 %v19763_v18, 16  ;;  %v19806_v49 = vld [vmem:[#allocation2 + $0x90] sm:$0xff]  }
 0x17e   : > { %v3353_v53 = vsel %vm3237_vm14, %v3343_v2, %v3352_v26  ;;  %v3367_v31 = vshll.u32 %v19777_v59, 16  ;;  %v3373_v28 = vshrl.u32 %v19781_v60, 16  ;;  %v1904_v12 = vrot.slane %v1902_v0, 1  ;;  %23250 = vst [vmem:[#allocation45_spill] sm:$0xff] %v19806_v49 }
 0x17f   : > { %16372 = vmatmul.mubr.msk.bf16.gmra.mrb[60].mxu0 %vm1946_vm13, %v1889_v4  ;;  %v3362_v21 = vsel %vm3237_vm14, %v3352_v26, %v3361_v10  ;;  %v1897_v34 = vsel %vm1773_vm12, %v1892_v55, %v1896_v14  ;;  %v3366_v1 = vrot.slane %v3364_v41, 1  ;;  %v1900_v11 = vor.u32 %v1898_v27, %v1896_v14 }
 0x180   : > { %16375 = vmatprep.mubr.msk.bf16.mxu0 %vm1946_vm13, %v1897_v34  ;;  %v3369_v2 = vrot.slane %v3367_v31, 2  ;;  %v3375_v44 = vrot.slane %v3373_v28, 1  ;;  %v3376_v40 = vshll.u32 %v19781_v60, 16  ;;  %v1906_v29 = vshrl.u32 %v19769_v63, 16 }
 0x181   : > { %v1910_v58 = vshll.u32 %v19791_v38, 16  ;;  %v1918_v0 = vshll.u32 %v19793_v8, 16  ;;  %v3382_v41 = vshrl.u32 %v19799_v46, 16  ;;  %v3385_v27 = vshll.u32 %v19799_v46, 16 }
 0x182   : > { %16544 = vmatmul.mubr.msk.bf16.gmra.mrb[20].mxu1 %vm1946_vm13, %v3353_v53  ;;  %v3370_v4 = vor.u32 %v3369_v2, %v3366_v1  ;;  %v3378_v26 = vrot.slane %v3376_v40, 2  ;;  %v1908_v55 = vor.u32 %v1906_v29, %v1904_v12  ;;  %v1905_v31 = vsel %vm1773_vm12, %v1900_v11, %v1904_v12 }
 0x183   : > { %16547 = vmatprep.mubr.msk.bf16.mxu1 %vm1946_vm13, %v3362_v21  ;;  %v1912_v14 = vrot.slane %v1910_v58, 1  ;;  %v3391_v34 = vshrl.u32 %v19806_v49, 16  ;;  %v3394_v35 = vshll.u32 %v19806_v49, 16  ;;  %v1914_v1 = vshrl.u32 %v19791_v38, 16 }
 0x184   : > { %v3379_v28 = vor.u32 %v3378_v26, %v3375_v44  ;;  %v3371_v29 = vsel %vm3237_vm14, %v3361_v10, %v3370_v4  ;;  %v1920_v58 = vrot.slane %v1918_v0, 1  ;;  %v3384_v21 = vrot.slane %v3382_v41, 1  ;;  %v18550_v26 = vld [vmem:[#allocation2 + $0x98] ss:$0 sps:$4 sm:$0x33]  }
 0x185   : > { %v1913_v53 = vsel %vm1773_vm12, %v1908_v55, %v1912_v14  ;;  %v3387_v2 = vrot.slane %v3385_v27, 2  ;;  %v1916_v12 = vor.u32 %v1914_v1, %v1912_v14  ;;  %v3393_v11 = vrot.slane %v3391_v34, 1 }
 0x186   : > { %v3380_v40 = vsel %vm3237_vm14, %v3370_v4, %v3379_v28  ;;  %v3396_v44 = vrot.slane %v3394_v35, 2  ;;  %v3400_v10 = vshrl.u32 %v18550_v26, 16  ;;  %v3403_v0 = vshll.u32 %v18550_v26, 16 }
 0x187   : > { %16376 = vmatmul.mubr.msk.bf16.gmra.mrb[64].mxu0 %vm1946_vm13, %v1905_v31  ;;  %v3388_v55 = vor.u32 %v3387_v2, %v3384_v21  ;;  %v1921_v31 = vsel %vm1773_vm12, %v1916_v12, %v1920_v58  ;;  %v23156_v35 = vrot.slane %v19777_v59, 2  ;;  %v3742_v14 = vrot.slane %v19781_v60, 2 }
 0x188   : > { %16379 = vmatprep.mubr.msk.bf16.mxu0 %vm1946_vm13, %v1913_v53  ;;  %v3397_v33 = vor.u32 %v3396_v44, %v3393_v11  ;;  %v3402_v27 = vrot.slane %v3400_v10, 1  ;;  %v3405_v34 = vrot.slane %v3403_v0, 2  ;;  %v3699_v53 = vld [vmem:[#allocation2 + $0x8] sm:$0xc]  ;;  %v3744_v1 = vrot.slane %v19799_v46, 2 }
 0x189   : > { %v3389_v4 = vsel %vm3237_vm14, %v3379_v28, %v3388_v55  ;;  %v19839_v28 = vsel %vm3712_vm15, %v23156_v35, %v3742_v14  ;;  %v3748_v2 = vrot.slane %v18550_v26, 2  ;;  %v18555_v11 = vld [vmem:[%s23092_s4 + $0x48] sm:$0xff]   ;;  %v19862_v26 = vld [vmem:[#allocation2 + $0x10] sm:$0xff]   ;;  %v3724_v24 = vrot.slane %v19626_v9, 2 }
 0x18a   : > { %16548 = vmatmul.mubr.msk.bf16.gmra.mrb[24].mxu1 %vm1946_vm13, %v3371_v29  ;;  %v3398_v41 = vsel %vm3237_vm14, %v3388_v55, %v3397_v33  ;;  %v18825_v29 = vld [vmem:[#allocation2 + $0xc] sm:$0xf]  ;;  %v19844_v21 = vsel %vm3712_vm15, %v3742_v14, %v3744_v1  ;;  %v3406_v12 = vor.u32 %v3405_v34, %v3402_v27  ;;  %v19874_v27 = vld [vmem:[#allocation2 + $0x18] sm:$0xff]   ;;  %v3726_v22 = vrot.slane %v19642_v25, 2 }
 0x18b   : > { %16551 = vmatprep.mubr.msk.bf16.mxu1 %vm1946_vm13, %v3380_v40  ;;  %v14562_v58 = vcombine.low %v3699_v53, %v18825_v29  ;;  %v19858_v0 = vld [vmem:[#allocation2 + $0x8] sm:$0xff]   ;;  %23252 = vst [vmem:[#allocation47_spill] sm:$0xff] %v19874_v27  ;;  %v3716_v34 = vrot.slane %v19874_v27, 2  ;;  %v19887_v29 = vld [vmem:[#allocation2 + $0x20] sm:$0xff]  }
 0x18d   : > { %v3713_v55 = vrot.slane %v14562_v58, 2  ;;  %v18552_v58 = vld [vmem:[%s23092_s4 + $0xc8] sm:$0xff]  }
 0x18f   : > { %16380 = vmatmul.mubr.msk.bf16.gmra.mrb[68].mxu0 %vm1946_vm13, %v1921_v31  ;;  %v19855_v31 = vld [vmem:[#allocation2 + $0x10] sm:$0xff]  }
 0x190   : > { %16391 = vmatprep.mubr.msk.bf16.mxu0 %vm1946_vm13, %v19201_v23  ;;  %v3746_v23 = vrot.slane %v19806_v49, 2  ;;  %23251 = vst [vmem:[#allocation46_spill] sm:$0xff] %v19855_v31  ;;  %v3714_v10 = vrot.slane %v19855_v31, 2  ;;  %v4561_v31 = vshll.u32 %v19934_v5, 16 }
 0x192   : > { %16552 = vmatmul.mubr.msk.bf16.gmra.mrb[28].mxu1 %vm1946_vm13, %v3389_v4  ;;  %v19847_v40 = vsel %vm3712_vm15, %v3744_v1, %v3746_v23  ;;  %v19853_v44 = vsel %vm3712_vm15, %v3746_v23, %v3748_v2  ;;  %v3407_v4 = vsel %vm3237_vm14, %v3397_v33, %v3406_v12  ;;  %v3715_v14 = vsel %vm3712_vm15, %v3713_v55, %v3714_v10  ;;  %v18558_v33 = vld [vmem:[%s23092_s4 + $0x58] sm:$0xff]   ;;  %v4041_v23 = vld [vmem:[#allocation2 + $0x10] sm:$0xc]  ;;  %v19898_v12 = vld [vmem:[%s23092_s4 + $0x60] sm:$0xff]  }
 0x193   : > { %16555 = vmatprep.mubr.msk.bf16.mxu1 %vm1946_vm13, %v3398_v41  ;;  %v18557_v41 = vld [vmem:[%s23092_s4 + $0x50] sm:$0xff]   ;;  %v19883_v1 = vld [vmem:[#allocation2 + $0x18] sm:$0xff]   ;;  %v3717_v2 = vsel %vm3712_vm15, %v3714_v10, %v3716_v34 }
 0x194   : > { %v19902_v55 = vld [vmem:[#allocation2 + $0x14] sm:$0xf] }
 0x195   : > { %v18553_v10 = vld [vmem:[%s23092_s4 + $0xd0] sm:$0xff]  }
 0x197   : > { %16392 = vmatmul.mubr.msk.bf16.vlgmr.msra.gmra.mrb[36].mxu0 %vm1946_vm13, %v19858_v0 }
 0x198   : > { %16395 = vmatprep.mubr.msk.bf16.mxu0 %vm1946_vm13, %v19862_v26  ;;  %16428 = vmatpush3.bf16.msra.mxu0 %v19607_v45  ;;  %v19880_v45 = vld [vmem:[#allocation2 + $0x20] sm:$0xff]  }
 0x199   : > { %16429 = vmatprep.subr.bf16.mxu0 %v18555_v11  ;;  %23253 = vst [vmem:[#allocation48_spill] sm:$0xff] %v19880_v45  ;;  %v3718_v53 = vrot.slane %v19880_v45, 2 }
 0x19a   : > { %16556 = vmatmul.mubr.msk.bf16.gmra.mrb[32].mxu1 %vm1946_vm13, %v3407_v4  ;;  %v19907_v4 = vcombine.low %v4041_v23, %v19902_v55  ;;  %v19923_v23 = vld [vmem:[#allocation2 + $0x28] sm:$0xff]  }
 0x19b   : > { %16567 = vmatprep.mubr.msk.bf16.mxu1 %vm1946_vm13, %v3715_v14  ;;  %v3720_v14 = vrot.slane %v19530_v62, 2  ;;  %v18556_v62 = vld [vmem:[%s23092_s4 + $0xd8] sm:$0xff]   ;;  %v4552_v30 = vshll.u32 %v19923_v23, 16 }
 0x19c   : > { %16430 = vmatpush3.bf16.msra.mxu0 %v18555_v11  ;;  %v3719_v11 = vsel %vm3712_vm15, %v3716_v34, %v3718_v53  ;;  %v3722_v34 = vrot.slane %v19558_v32, 2 }
 0x19d   : > { %16431 = vmatprep.subr.bf16.mxu0 %v18557_v41  ;;  %v3721_v35 = vsel %vm3712_vm15, %v3718_v53, %v3720_v14  ;;  %v19943_v53 = vld [vmem:[#allocation2 + $0x38] sm:$0xff]   ;;  %v4554_v27 = vrot.slane %v4552_v30, 3 }
 0x19e   : > { %v3723_v16 = vsel %vm3712_vm15, %v3720_v14, %v3722_v34 }
 0x19f   : > { %16396 = vmatmul.mubr.msk.bf16.gmra.mrb[40].mxu0 %vm1946_vm13, %v19883_v1 }
 0x1a0   : > { %16399 = vmatprep.mubr.msk.bf16.mxu0 %vm1946_vm13, %v19887_v29  ;;  %16432 = vmatpush3.bf16.msra.mxu0 %v18557_v41  ;;  %v19912_v41 = vld [vmem:[#allocation2 + $0x18] sm:$0xff]  }
 0x1a1   : > { %16433 = vmatprep.subr.bf16.mxu0 %v18558_v33  ;;  %v4531_v32 = vshrl.u32 %v19912_v41, 16  ;;  %v4534_v17 = vshll.u32 %v19912_v41, 16 }
 0x1a2   : > { %16568 = vmatmul.mubr.msk.bf16.vlgmr.msra.gmra.mrb[0].mxu1 %vm1946_vm13, %v3717_v2  ;;  %v19919_v2 = vld [vmem:[#allocation2 + $0x28] sm:$0xff]  }
 0x1a3   : > { %16604 = vmatpush3.bf16.msra.mxu1 %v19565_v56  ;;  %16571 = vmatprep.mubr.msk.bf16.mxu1 %vm1946_vm13, %v3719_v11  ;;  %v19917_v56 = vld [vmem:[#allocation2 + $0x20] sm:$0xff]   ;;  %v4526_v11 = vshll.u32 %v19907_v4, 16 }
 0x1a4   : > { %16605 = vmatprep.subr.bf16.mxu1 %v18552_v58  ;;  %16434 = vmatpush3.bf16.msra.mxu0 %v18558_v33  ;;  %v4523_v33 = vshrl.u32 %v19907_v4, 16  ;;  %v4540_v36 = vshrl.u32 %v19917_v56, 16  ;;  %v4543_v57 = vshll.u32 %v19917_v56, 16 }
 0x1a5   : > { %16471 = vmatprep.subr.bf16.mxu0 %v19898_v12  ;;  %v4528_v47 = vrot.slane %v4526_v11, 3  ;;  %v4549_v11 = vshrl.u32 %v19923_v23, 16 }
 0x1a6   : > { %v4542_v14 = vrot.slane %v4540_v36, 2  ;;  %v19959_v36 = vld [vmem:[#allocation2 + $0x48] sm:$0xff]  }
 0x1a7   : > { %16400 = vmatmul.mubr.msk.bf16.gmra.mrb[44].mxu0 %vm1946_vm13, %v19919_v2  ;;  %16606 = vmatpush3.bf16.msra.mxu1 %v18552_v58  ;;  %v4525_v58 = vrot.slane %v4523_v33, 2  ;;  %v4536_v33 = vrot.slane %v4534_v17, 3  ;;  %v4551_v19 = vrot.slane %v4549_v11, 2  ;;  %v4558_v17 = vshrl.u32 %v19934_v5, 16 }
 0x1a8   : > { %16403 = vmatprep.mubr.msk.bf16.mxu0 %vm1946_vm13, %v19521_v15  ;;  %16607 = vmatprep.subr.bf16.mxu1 %v18553_v10  ;;  %v4533_v15 = vrot.slane %v4531_v32, 2  ;;  %v4545_v32 = vrot.slane %v4543_v57, 3  ;;  %v4570_v11 = vshll.u32 %v19943_v53, 16 }
 0x1a9   : > { %v4529_v9 = vor.u32 %v4528_v47, %v4525_v58  ;;  %v4560_v47 = vrot.slane %v4558_v17, 2  ;;  %v4567_v58 = vshrl.u32 %v19943_v53, 16  ;;  %v4555_v25 = vor.u32 %v4554_v27, %v4551_v19 }
 0x1aa   : > { %16572 = vmatmul.mubr.msk.bf16.gmra.mrb[4].mxu1 %vm1946_vm13, %v3721_v35  ;;  %v19949_v35 = vld [vmem:[%s23092_s4 + $0xe0] sm:$0xff]   ;;  %v4546_v45 = vor.u32 %v4545_v32, %v4542_v14  ;;  %v4572_v27 = vrot.slane %v4570_v11, 3  ;;  %v3728_v17 = vrot.slane %v19691_v54, 2  ;;  %v3732_v11 = vrot.slane %v19717_v20, 2 }
 0x1ab   : > { %16575 = vmatprep.mubr.msk.bf16.mxu1 %vm1946_vm13, %v3723_v16  ;;  %16608 = vmatpush3.bf16.msra.mxu1 %v18553_v10  ;;  %v19952_v16 = vld [vmem:[#allocation2 + $0x40] sm:$0xff]   ;;  %v4537_v10 = vor.u32 %v4536_v33, %v4533_v15  ;;  %v4563_v15 = vrot.slane %v4561_v31, 3  ;;  %v4569_v33 = vrot.slane %v4567_v58, 2  ;;  %v19983_v31 = vld [vmem:[#allocation2 + $0x58] sm:$0xff]  }
 0x1ac   : > { %16609 = vmatprep.subr.bf16.mxu1 %v18556_v62  ;;  %v4576_v14 = vshrl.u32 %v19952_v16, 16  ;;  %v19979_v32 = vsel %vm4521_vm0, %v4546_v45, %v4555_v25  ;;  %v4579_v19 = vshll.u32 %v19952_v16, 16 }
 0x1ad   : > { %v19962_v57 = vsel %vm4521_vm0, %v4529_v9, %v4537_v10  ;;  %v19969_v30 = vsel %vm4521_vm0, %v4537_v10, %v4546_v45  ;;  %23256 = vst [vmem:[#allocation51_spill] sm:$0xff] %v19979_v32  ;;  %v4564_v9 = vor.u32 %v4563_v15, %v4560_v47  ;;  %v4585_v10 = vshrl.u32 %v19959_v36, 16  ;;  %v19992_v15 = vld [vmem:[#allocation2 + $0x60] sm:$0xff]  }
 0x1ae   : > { %23254 = vst [vmem:[#allocation49_spill] sm:$0xff] %v19962_v57  ;;  %23255 = vst [vmem:[#allocation50_spill] sm:$0xff] %v19969_v30  ;;  %v4588_v45 = vshll.u32 %v19959_v36, 16  ;;  %v3730_v47 = vrot.slane %v19704_v61, 2 }
 0x1af   : > { %16404 = vmatmul.mubr.msk.bf16.gmra.mrb[48].mxu0 %vm1946_vm13, %v19579_v42  ;;  %16610 = vmatpush3.bf16.msra.mxu1 %v18556_v62  ;;  %v3725_v42 = vsel %vm3712_vm15, %v3722_v34, %v3724_v24  ;;  %v19972_v62 = vld [vmem:[#allocation2 + $0x50] sm:$0xff]   ;;  %v4578_v34 = vrot.slane %v4576_v14, 2  ;;  %v19988_v58 = vsel %vm4521_vm0, %v4555_v25, %v4564_v9 }
 0x1b0   : > { %16407 = vmatprep.mubr.msk.bf16.mxu0 %vm1946_vm13, %v19616_v37  ;;  %16647 = vmatprep.subr.bf16.mxu1 %v19949_v35  ;;  %v3727_v37 = vsel %vm3712_vm15, %v3724_v24, %v3726_v22  ;;  %23257 = vst [vmem:[#allocation52_spill] sm:$0xff] %v19988_v58  ;;  %v4581_v24 = vrot.slane %v4579_v19, 3  ;;  %v4594_v32 = vshrl.u32 %v19972_v62, 16  ;;  %v4590_v30 = vrot.slane %v4588_v45, 3  ;;  %v20000_v19 = vld [vmem:[#allocation2 + $0x68] sm:$0xff]   ;;  %v20013_v45 = vld [vmem:[#allocation2 + $0x70] sm:$0xff]  }
 0x1b1   : > { %v4597_v54 = vshll.u32 %v19972_v62, 16  ;;  %v4633_v57 = vshll.u32 %v20013_v45, 16 }
 0x1b2   : > { %16576 = vmatmul.mubr.msk.bf16.gmra.mrb[8].mxu1 %vm1946_vm13, %v3725_v42  ;;  %v4573_v42 = vor.u32 %v4572_v27, %v4569_v33  ;;  %v4582_v14 = vor.u32 %v4581_v24, %v4578_v34  ;;  %v4596_v33 = vrot.slane %v4594_v32, 2  ;;  %v4603_v27 = vshrl.u32 %v19983_v31, 16 }
 0x1b3   : > { %16579 = vmatprep.mubr.msk.bf16.mxu1 %vm1946_vm13, %v3727_v37  ;;  %v4587_v37 = vrot.slane %v4585_v10, 2  ;;  %v3729_v24 = vsel %vm3712_vm15, %v3726_v22, %v3728_v17  ;;  %v4612_v32 = vshrl.u32 %v19992_v15, 16  ;;  %v3733_v22 = vsel %vm3712_vm15, %v3730_v47, %v3732_v11 }
 0x1b4   : > { %v20003_v61 = vsel %vm4521_vm0, %v4564_v9, %v4573_v42  ;;  %v20010_v34 = vsel %vm4521_vm0, %v4573_v42, %v4582_v14  ;;  %v4605_v25 = vrot.slane %v4603_v27, 2  ;;  %v4606_v9 = vshll.u32 %v19983_v31, 16 }
 0x1b5   : > { %23258 = vst [vmem:[#allocation53_spill] sm:$0xff] %v20003_v61  ;;  %23259 = vst [vmem:[#allocation54_spill] sm:$0xff] %v20010_v34  ;;  %v4591_v10 = vor.u32 %v4590_v30, %v4587_v37  ;;  %v4615_v30 = vshll.u32 %v19992_v15, 16  ;;  %v20025_v37 = vld [vmem:[#allocation2 + $0x78] sm:$0xff]   ;;  %v4614_v27 = vrot.slane %v4612_v32, 2  ;;  %v4621_v34 = vshrl.u32 %v20000_v19, 16 }
 0x1b6   : > { %v23180_v61 = vrot.slane %v19777_v59, 1 }
 0x1b7   : > { %16408 = vmatmul.mubr.msk.bf16.gmra.mrb[52].mxu0 %vm1946_vm13, %v19664_v43  ;;  %v4599_v43 = vrot.slane %v4597_v54, 3  ;;  %v20020_v20 = vsel %vm4521_vm0, %v4582_v14, %v4591_v10  ;;  %v4608_v54 = vrot.slane %v4606_v9, 3  ;;  %v4630_v9 = vshrl.u32 %v20013_v45, 16 }
 0x1b8   : > { %16411 = vmatprep.mubr.msk.bf16.mxu0 %vm1946_vm13, %v19676_v6  ;;  %v3731_v6 = vsel %vm3712_vm15, %v3728_v17, %v3730_v47  ;;  %23260 = vst [vmem:[#allocation55_spill] sm:$0xff] %v20020_v20  ;;  %v20035_v20 = vld [vmem:[#allocation2 + $0x80] sm:$0xff]   ;;  %v4623_v47 = vrot.slane %v4621_v34, 2  ;;  %v4639_v34 = vshrl.u32 %v20025_v37, 16 }
 0x1b9   : > { %v4600_v42 = vor.u32 %v4599_v43, %v4596_v33  ;;  %v4617_v33 = vrot.slane %v4615_v30, 3  ;;  %v4624_v43 = vshll.u32 %v20000_v19, 16 }
 0x1ba   : > { %16580 = vmatmul.mubr.msk.bf16.gmra.mrb[12].mxu1 %vm1946_vm13, %v3729_v24  ;;  %v23261_v24 = vrot.slane %v19729_v51, 2 }
 0x1bb   : > { %16583 = vmatprep.mubr.msk.bf16.mxu1 %vm1946_vm13, %v3731_v6  ;;  %v20032_v14 = vsel %vm4521_vm0, %v4591_v10, %v4600_v42  ;;  %v4609_v6 = vor.u32 %v4608_v54, %v4605_v25  ;;  %v4618_v32 = vor.u32 %v4617_v33, %v4614_v27  ;;  %v4626_v58 = vrot.slane %v4624_v43, 3  ;;  %v20043_v10 = vld [vmem:[#allocation2 + $0x88] sm:$0xff]  }
 0x1bc   : > { %v3735_v17 = vsel %vm3712_vm15, %v3732_v11, %v23261_v24  ;;  %v2925_v11 = vrot.slane %v19781_v60, 1  ;;  %v4632_v25 = vrot.slane %v4630_v9, 2  ;;  %v4635_v60 = vrot.slane %v4633_v57, 3  ;;  %v20059_v24 = vld [vmem:[#allocation2 + $0x90] sm:$0xff]  }
 0x1bd   : > { %v20046_v30 = vsel %vm4521_vm0, %v4600_v42, %v4609_v6  ;;  %v20052_v54 = vsel %vm4521_vm0, %v4609_v6, %v4618_v32  ;;  %v4627_v27 = vor.u32 %v4626_v58, %v4623_v47  ;;  %v4641_v42 = vrot.slane %v4639_v34, 2 }
 0x1be   : > { %23262 = vst [vmem:[#allocation56_spill] sm:$0xff] %v20052_v54  ;;  %v4642_v33 = vshll.u32 %v20025_v37, 16  ;;  %v2927_v43 = vrot.slane %v19799_v46, 1  ;;  %v4648_v9 = vshrl.u32 %v20035_v20, 16  ;;  %v4636_v58 = vor.u32 %v4635_v60, %v4632_v25 }
 0x1bf   : > { %16412 = vmatmul.mubr.msk.bf16.gmra.mrb[56].mxu0 %vm1946_vm13, %v19714_v7  ;;  %v20057_v7 = vsel %vm2428_vm1, %v23180_v61, %v2925_v11  ;;  %v20068_v57 = vsel %vm4521_vm0, %v4618_v32, %v4627_v27  ;;  %v4651_v6 = vshll.u32 %v20035_v20, 16  ;;  %v23181_v47 = vrot.slane %v19806_v49, 1 }
 0x1c0   : > { %16415 = vmatprep.mubr.msk.bf16.mxu0 %vm1946_vm13, %v19723_v50  ;;  %23263 = vst [vmem:[#allocation57_spill] sm:$0xff] %v20057_v7  ;;  %v20065_v50 = vld [vmem:[#allocation2 + $0x98] sm:$0xff]   ;;  %23264 = vst [vmem:[#allocation58_spill] sm:$0xff] %v20068_v57  ;;  %v4644_v34 = vrot.slane %v4642_v33, 3  ;;  %v20074_v61 = vsel %vm2428_vm1, %v2925_v11, %v2927_v43  ;;  %v4650_v46 = vrot.slane %v4648_v9, 2  ;;  %v4657_v7 = vshrl.u32 %v20043_v10, 16 }
 0x1c1   : > { %23265 = vst [vmem:[#allocation59_spill] sm:$0xff] %v20074_v61  ;;  %v4653_v54 = vrot.slane %v4651_v6, 3  ;;  %v20083_v32 = vsel %vm2428_vm1, %v2927_v43, %v23181_v47  ;;  %v4660_v25 = vshll.u32 %v20043_v10, 16  ;;  %v4666_v11 = vshrl.u32 %v20059_v24, 16  ;;  %v4983_v6 = vld [vmem:[#allocation2 + $0x10] sm:$0x8] }
 0x1c2   : > { %16584 = vmatmul.mubr.msk.bf16.gmra.mrb[16].mxu1 %vm1946_vm13, %v3733_v22  ;;  %v20078_v22 = vsel %vm4521_vm0, %v4627_v27, %v4636_v58  ;;  %23267 = vst [vmem:[#allocation61_spill] sm:$0xff] %v20083_v32  ;;  %v4645_v60 = vor.u32 %v4644_v34, %v4641_v42  ;;  %v4659_v33 = vrot.slane %v4657_v7, 2  ;;  %v4669_v57 = vshll.u32 %v20059_v24, 16  ;;  %v2415_v7 = vld [vmem:[#allocation2] sm:$0xe] }
 0x1c3   : > { %16587 = vmatprep.mubr.msk.bf16.mxu1 %vm1946_vm13, %v3735_v17  ;;  %23266 = vst [vmem:[#allocation60_spill] sm:$0xff] %v20078_v22  ;;  %v3738_v17 = vrot.slane %v19757_v39, 2  ;;  %v4654_v9 = vor.u32 %v4653_v54, %v4650_v46  ;;  %v4662_v61 = vrot.slane %v4660_v25, 3  ;;  %v4675_v27 = vshrl.u32 %v20065_v50, 16 }
 0x1c4   : > { %v20093_v43 = vsel %vm4521_vm0, %v4636_v58, %v4645_v60  ;;  %v4668_v47 = vrot.slane %v4666_v11, 2  ;;  %v4678_v39 = vshll.u32 %v20065_v50, 16  ;;  %v4671_v34 = vrot.slane %v4669_v57, 3 }
 0x1c5   : > { %23268 = vst [vmem:[#allocation62_spill] sm:$0xff] %v20093_v43  ;;  %v20099_v54 = vsel %vm4521_vm0, %v4645_v60, %v4654_v9  ;;  %v4663_v42 = vor.u32 %v4662_v61, %v4659_v33  ;;  %v4677_v46 = vrot.slane %v4675_v27, 2  ;;  %v23269_v25 = vrot.slane %v19751_v3, 2  ;;  %v18834_v3 = vld [vmem:[#allocation2 + $0x4] sm:$0xf] }
 0x1c6   : > { %v23270_v49 = vrot.slane %v19729_v51, 2  ;;  %v4680_v43 = vrot.slane %v4678_v39, 3  ;;  %v14673_v22 = vcombine.low %v4983_v6, %v19902_v55  ;;  %v4672_v61 = vor.u32 %v4671_v34, %v4668_v47 }
 0x1c7   : > { %16416 = vmatmul.mubr.msk.bf16.gmra.mrb[60].mxu0 %vm1946_vm13, %v19743_v13  ;;  %v23271_v11 = vmov %v23269_v25  ;;  %v20112_v60 = vsel %vm4521_vm0, %v4654_v9, %v4663_v42  ;;  %v4998_v57 = vrot.slane %v19912_v41, 3  ;;  %v14451_v33 = vcombine.low %v2415_v7, %v18834_v3 }
 0x1c8   : > { %16419 = vmatprep.mubr.msk.bf16.mxu0 %vm1946_vm13, %v19745_v52  ;;  %v3737_v58 = vsel %vm3712_vm15, %v23270_v49, %v23269_v25  ;;  %v3739_v32 = vsel %vm3712_vm15, %v23271_v11, %v3738_v17  ;;  %v23272_v49 = vrot.slane %v19777_v59, 2  ;;  %v20119_v27 = vor.u32 %v4680_v43, %v4677_v46 }
 0x1c9   : > { %v4997_v55 = vrot.slane %v14673_v22, 3  ;;  %v20122_v6 = vsel %vm4521_vm0, %v4663_v42, %v4672_v61  ;;  %v5000_v9 = vrot.slane %v19917_v56, 3  ;;  %v5002_v47 = vrot.slane %v19923_v23, 3 }
 0x1ca   : > { %16588 = vmatmul.mubr.msk.bf16.gmra.mrb[20].mxu1 %vm1946_vm13, %v3737_v58  ;;  %v3741_v51 = vsel %vm3712_vm15, %v3738_v17, %v23272_v49  ;;  %v5004_v39 = vrot.slane %v19934_v5, 3  ;;  %v20130_v34 = vsel %vm4521_vm0, %v4672_v61, %v20119_v27  ;;  %v5006_v22 = vrot.slane %v19943_v53, 3  ;;  %v20155_v61 = vld [vmem:[#allocation2 + $0xa0] ss:$0 sps:$4 sm:$0x77]  }
 0x1cb   : > { %16591 = vmatprep.mubr.msk.bf16.mxu1 %vm1946_vm13, %v3739_v32  ;;  %v2430_v32 = vrot.slane %v19858_v0, 1  ;;  %v20133_v17 = vsel %vm4996_vm3, %v4997_v55, %v4998_v57  ;;  %v20137_v43 = vsel %vm4996_vm3, %v4998_v57, %v5000_v9  ;;  %v20140_v7 = vsel %vm4996_vm3, %v5000_v9, %v5002_v47 }
 0x1cc   : > { %v20143_v42 = vsel %vm4996_vm3, %v5002_v47, %v5004_v39  ;;  %v5008_v0 = vrot.slane %v19952_v16, 3  ;;  %v2429_v46 = vrot.slane %v14451_v33, 1  ;;  %v20149_v25 = vsel %vm4996_vm3, %v5004_v39, %v5006_v22 }
 0x1cd   : > { %23273 = vst [vmem:[#allocation63_spill] sm:$0xff] %v20149_v25  ;;  %v5010_v58 = vrot.slane %v19959_v36, 3  ;;  %v5012_v11 = vrot.slane %v19972_v62, 3  ;;  %v5014_v49 = vrot.slane %v19983_v31, 3  ;;  %v5016_v3 = vrot.slane %v19992_v15, 3 }
 0x1ce   : > { %v20158_v57 = vsel %vm4996_vm3, %v5006_v22, %v5008_v0  ;;  %v5018_v33 = vrot.slane %v20000_v19, 3  ;;  %v5020_v47 = vrot.slane %v20013_v45, 3  ;;  %v5022_v39 = vrot.slane %v20025_v37, 3 }
 0x1cf   : > { %16420 = vmatmul.mubr.msk.bf16.gmra.mrb[64].mxu0 %vm1946_vm13, %v19763_v18  ;;  %23274 = vst [vmem:[#allocation64_spill] sm:$0xff] %v20158_v57  ;;  %v20164_v55 = vsel %vm4996_vm3, %v5008_v0, %v5010_v58  ;;  %v20167_v9 = vsel %vm4996_vm3, %v5010_v58, %v5012_v11  ;;  %v20173_v22 = vsel %vm4996_vm3, %v5012_v11, %v5014_v49  ;;  %v5024_v0 = vrot.slane %v20035_v20, 3 }
 0x1d0   : > { %16423 = vmatprep.mubr.msk.bf16.mxu0 %vm1946_vm13, %v19769_v63  ;;  %23275 = vst [vmem:[#allocation65_spill] sm:$0xff] %v20167_v9  ;;  %v20176_v57 = vsel %vm4996_vm3, %v5014_v49, %v5016_v3  ;;  %v20179_v25 = vsel %vm4996_vm3, %v5016_v3, %v5018_v33  ;;  %v20185_v58 = vsel %vm4996_vm3, %v5018_v33, %v5020_v47  ;;  %v5028_v11 = vrot.slane %v20059_v24, 3 }
 0x1d1   : > { %23276 = vst [vmem:[#allocation66_spill] sm:$0xff] %v20176_v57  ;;  %23277 = vst [vmem:[#allocation67_spill] sm:$0xff] %v20179_v25  ;;  %v20188_v9 = vsel %vm4996_vm3, %v5020_v47, %v5022_v39  ;;  %v20193_v49 = vsel %vm4996_vm3, %v5022_v39, %v5024_v0  ;;  %v5030_v3 = vrot.slane %v20065_v50, 3  ;;  %v5032_v25 = vrot.slane %v20155_v61, 3 }
 0x1d2   : > { %16592 = vmatmul.mubr.msk.bf16.gmra.mrb[24].mxu1 %vm1946_vm13, %v3741_v51  ;;  %v5026_v51 = vrot.slane %v20043_v10, 3  ;;  %v2431_v39 = vsel %vm2428_vm1, %v2429_v46, %v2430_v32  ;;  %v4181_v46 = vrot.slane %v19912_v41, 2  ;;  %v2438_v41 = vrot.slane %v19919_v2, 1  ;;  %v18568_v2 = vld [vmem:[%s23092_s4 + $0xe8] sm:$0xff]  }
 0x1d3   : > { %16595 = vmatprep.mubr.msk.bf16.mxu1 %vm1946_vm13, %v19839_v28  ;;  %v20204_v33 = vsel %vm4996_vm3, %v5028_v11, %v5030_v3  ;;  %v20207_v47 = vsel %vm4996_vm3, %v5030_v3, %v5032_v25  ;;  %v18579_v25 = vld [vmem:[%s23092_s4 + $0x68] sm:$0xff]  }
 0x1d4   : > { %v20198_v57 = vsel %vm4996_vm3, %v5024_v0, %v5026_v51  ;;  %v20201_v28 = vsel %vm4996_vm3, %v5026_v51, %v5028_v11  ;;  %v2432_v0 = vrot.slane %v19862_v26, 1  ;;  %v2434_v51 = vrot.slane %v19883_v1, 1 }
 0x1d5   : > { %v2436_v1 = vrot.slane %v19887_v29, 1 }
 0x1d6   : > { %v2433_v11 = vsel %vm2428_vm1, %v2430_v32, %v2432_v0  ;;  %v2435_v3 = vsel %vm2428_vm1, %v2432_v0, %v2434_v51  ;;  %v18835_v0 = vld [vmem:[#allocation2 + $0x30] sm:$0xff]  }
 0x1d7   : > { %16424 = vmatmul.mubr.msk.bf16.gmra.mrb[68].mxu0 %vm1946_vm13, %v19791_v38  ;;  %v2437_v32 = vsel %vm2428_vm1, %v2434_v51, %v2436_v1  ;;  %v2439_v29 = vsel %vm2428_vm1, %v2436_v1, %v2438_v41  ;;  %v18836_v51 = vld [vmem:[#allocation2 + $0x38] sm:$0xff]   ;;  %v18837_v1 = vld [vmem:[#allocation2 + $0x40] sm:$0xff]  }
 0x1d8   : > { %16435 = vmatprep.mubr.msk.bf16.mxu0 %vm1946_vm13, %v2431_v39 }
 0x1da   : > { %16596 = vmatmul.mubr.msk.bf16.gmra.mrb[28].mxu1 %vm1946_vm13, %v19844_v21  ;;  %v4180_v21 = vrot.slane %v19907_v4, 2  ;;  %v4183_v4 = vrot.slane %v19917_v56, 2 }
 0x1db   : > { %16599 = vmatprep.mubr.msk.bf16.mxu1 %vm1946_vm13, %v19847_v40  ;;  %v18581_v40 = vld [vmem:[%s23092_s4 + $0x70] sm:$0xff]  }
 0x1dc   : > { %v4182_v26 = vsel %vm3712_vm15, %v4180_v21, %v4181_v46  ;;  %v4184_v56 = vsel %vm3712_vm15, %v4181_v46, %v4183_v4  ;;  %v4187_v46 = vrot.slane %v19934_v5, 2  ;;  %v4189_v21 = vrot.slane %v19943_v53, 2 }
 0x1dd   : > { %v2444_v53 = vrot.slane %v18837_v1, 1 }
 0x1de   : > { %v4190_v5 = vsel %vm3712_vm15, %v4187_v46, %v4189_v21 }
 0x1df   : > { %16436 = vmatmul.mubr.msk.bf16.vlgmr.msra.gmra.mrb[36].mxu0 %vm1946_vm13, %v2433_v11  ;;  %v18573_v11 = vld [vmem:[%s23092_s4 + $0xf0] sm:$0xff]  }
 0x1e0   : > { %16439 = vmatprep.mubr.msk.bf16.mxu0 %vm1946_vm13, %v2435_v3  ;;  %16472 = vmatpush3.bf16.msra.mxu0 %v19898_v12  ;;  %v18584_v12 = vld [vmem:[%s23092_s4 + $0x78] sm:$0xff]  }
 0x1e1   : > { %16473 = vmatprep.subr.bf16.mxu0 %v18579_v25 }
 0x1e2   : > { %16600 = vmatmul.mubr.msk.bf16.gmra.mrb[32].mxu1 %vm1946_vm13, %v19853_v44  ;;  %v4185_v44 = vrot.slane %v19923_v23, 2  ;;  %v2440_v23 = vrot.slane %v18835_v0, 1 }
 0x1e3   : > { %16611 = vmatprep.mubr.msk.bf16.mxu1 %vm1946_vm13, %v4182_v26 }
 0x1e4   : > { %16474 = vmatpush3.bf16.msra.mxu0 %v18579_v25  ;;  %v4186_v39 = vsel %vm3712_vm15, %v4183_v4, %v4185_v44  ;;  %v2442_v25 = vrot.slane %v18836_v51, 1  ;;  %v2441_v3 = vsel %vm2428_vm1, %v2438_v41, %v2440_v23  ;;  %v4188_v26 = vsel %vm3712_vm15, %v4185_v44, %v4187_v46  ;;  %v18838_v41 = vld [vmem:[#allocation2 + $0x48] sm:$0xff]  }
 0x1e5   : > { %16475 = vmatprep.subr.bf16.mxu0 %v18581_v40  ;;  %v2446_v4 = vrot.slane %v18838_v41, 1  ;;  %v4195_v51 = vrot.slane %v19972_v62, 2  ;;  %v2454_v62 = vrot.slane %v19743_v13, 1  ;;  %v2456_v13 = vrot.slane %v19745_v52, 1 }
 0x1e6   : > { %v2445_v44 = vsel %vm2428_vm1, %v2442_v25, %v2444_v53 }
 0x1e7   : > { %16440 = vmatmul.mubr.msk.bf16.gmra.mrb[40].mxu0 %vm1946_vm13, %v2437_v32  ;;  %v4191_v32 = vrot.slane %v19952_v16, 2  ;;  %v18839_v16 = vld [vmem:[#allocation2 + $0x50] sm:$0xff]  }
 0x1e8   : > { %16443 = vmatprep.mubr.msk.bf16.mxu0 %vm1946_vm13, %v2439_v29  ;;  %16476 = vmatpush3.bf16.msra.mxu0 %v18581_v40  ;;  %v18580_v40 = vld [vmem:[%s23092_s4 + $0xf8] sm:$0xff]   ;;  %v4193_v29 = vrot.slane %v19959_v36, 2  ;;  %v2448_v0 = vrot.slane %v18839_v16, 1 }
 0x1e9   : > { %16477 = vmatprep.subr.bf16.mxu0 %v18584_v12  ;;  %v18840_v36 = vld [vmem:[#allocation2 + $0x58] sm:$0xff]  }
 0x1ea   : > { %16612 = vmatmul.mubr.msk.bf16.vlgmr.msra.gmra.mrb[0].mxu1 %vm1946_vm13, %v4184_v56  ;;  %v4192_v56 = vsel %vm3712_vm15, %v4189_v21, %v4191_v32 }
 0x1eb   : > { %16648 = vmatpush3.bf16.msra.mxu1 %v19949_v35  ;;  %16615 = vmatprep.mubr.msk.bf16.mxu1 %vm1946_vm13, %v4186_v39  ;;  %v2443_v35 = vsel %vm2428_vm1, %v2440_v23, %v2442_v25  ;;  %v4194_v39 = vsel %vm3712_vm15, %v4191_v32, %v4193_v29  ;;  %v2450_v23 = vrot.slane %v18840_v36, 1  ;;  %v2449_v25 = vsel %vm2428_vm1, %v2446_v4, %v2448_v0 }
 0x1ec   : > { %16649 = vmatprep.subr.bf16.mxu1 %v18568_v2  ;;  %16478 = vmatpush3.bf16.msra.mxu0 %v18584_v12  ;;  %v20274_v12 = vld [vmem:[%s23092_s4 + $0x100] sm:$0xff]   ;;  %v4205_v32 = vrot.slane %v20025_v37, 2  ;;  %v4207_v37 = vrot.slane %v20035_v20, 2  ;;  %v2896_v20 = vrot.slane %v19402_v48, 1  ;;  %v4211_v36 = vrot.slane %v20059_v24, 2 }
 0x1ed   : > { %v2451_v46 = vsel %vm2428_vm1, %v2448_v0, %v2450_v23  ;;  %v23278_v0 = vld [vmem:[#allocation46_spill] sm:$0xff]  ;;  %v23280_v24 = vld [vmem:[#allocation48_spill] sm:$0xff] }
 0x1ee   : > { %v4208_v16 = vsel %vm3712_vm15, %v4205_v32, %v4207_v37 }
 0x1ef   : > { %16444 = vmatmul.mubr.msk.bf16.gmra.mrb[44].mxu0 %vm1946_vm13, %v2441_v3  ;;  %16650 = vmatpush3.bf16.msra.mxu1 %v18568_v2  ;;  %v2447_v2 = vsel %vm2428_vm1, %v2444_v53, %v2446_v4  ;;  %v4196_v3 = vsel %vm3712_vm15, %v4193_v29, %v4195_v51  ;;  %v2457_v4 = vsel %vm2428_vm1, %v2454_v62, %v2456_v13 }
 0x1f0   : > { %16447 = vmatprep.mubr.msk.bf16.mxu0 %vm1946_vm13, %v2443_v35  ;;  %16651 = vmatprep.subr.bf16.mxu1 %v18573_v11  ;;  %v18841_v35 = vld [vmem:[#allocation2 + $0x60] sm:$0xff]  }
 0x1f2   : > { %16616 = vmatmul.mubr.msk.bf16.gmra.mrb[4].mxu1 %vm1946_vm13, %v4188_v26 }
 0x1f3   : > { %16619 = vmatprep.mubr.msk.bf16.mxu1 %vm1946_vm13, %v4190_v5  ;;  %16652 = vmatpush3.bf16.msra.mxu1 %v18573_v11  ;;  %v4197_v11 = vrot.slane %v19983_v31, 2  ;;  %v4199_v31 = vrot.slane %v19992_v15, 2  ;;  %v4201_v5 = vrot.slane %v20000_v19, 2  ;;  %v2458_v15 = vrot.slane %v19763_v18, 1 }
 0x1f4   : > { %16653 = vmatprep.subr.bf16.mxu1 %v18580_v40  ;;  %v4203_v19 = vrot.slane %v20013_v45, 2  ;;  %v2460_v18 = vrot.slane %v19769_v63, 1  ;;  %v2462_v45 = vrot.slane %v19791_v38, 1  ;;  %v2464_v38 = vrot.slane %v19793_v8, 1 }
 0x1f5   : > { %v4198_v21 = vsel %vm3712_vm15, %v4195_v51, %v4197_v11  ;;  %v4200_v53 = vsel %vm3712_vm15, %v4197_v11, %v4199_v31  ;;  %v4202_v41 = vsel %vm3712_vm15, %v4199_v31, %v4201_v5  ;;  %v4213_v51 = vrot.slane %v20065_v50, 2  ;;  %v18585_v11 = vld [vmem:[#allocation2 + $0xa0] ss:$0 sps:$4 sm:$0x33]   ;;  %v18842_v31 = vld [vmem:[#allocation2 + $0x28] sm:$0xff]  }
 0x1f6   : > { %v4204_v29 = vsel %vm3712_vm15, %v4201_v5, %v4203_v19  ;;  %v4206_v52 = vsel %vm3712_vm15, %v4203_v19, %v4205_v32  ;;  %v4215_v50 = vrot.slane %v18585_v11, 2  ;;  %v23281_v5 = vld [vmem:[#allocation49_spill] sm:$0xff]  ;;  %v23282_v19 = vld [vmem:[#allocation50_spill] sm:$0xff] }
 0x1f7   : > { %16448 = vmatmul.mubr.msk.bf16.gmra.mrb[48].mxu0 %vm1946_vm13, %v2445_v44  ;;  %16654 = vmatpush3.bf16.msra.mxu1 %v18580_v40  ;;  %v2452_v40 = vrot.slane %v18841_v35, 1  ;;  %v2459_v44 = vsel %vm2428_vm1, %v2456_v13, %v2458_v15  ;;  %v4214_v48 = vsel %vm3712_vm15, %v4211_v36, %v4213_v51 }
 0x1f8   : > { %16451 = vmatprep.mubr.msk.bf16.mxu0 %vm1946_vm13, %v2447_v2  ;;  %16691 = vmatprep.subr.bf16.mxu1 %v20274_v12  ;;  %v2461_v2 = vsel %vm2428_vm1, %v2458_v15, %v2460_v18  ;;  %v18587_v15 = vld [vmem:[%s23092_s4 + $0x108] sm:$0xff]  }
 0x1f9   : > { %v2453_v26 = vsel %vm2428_vm1, %v2450_v23, %v2452_v40  ;;  %v2455_v1 = vsel %vm2428_vm1, %v2452_v40, %v2454_v62  ;;  %v2465_v23 = vsel %vm2428_vm1, %v2462_v45, %v2464_v38  ;;  %v4216_v62 = vsel %vm3712_vm15, %v4213_v51, %v4215_v50  ;;  %v23287_v51 = vld [vmem:[#allocation55_spill] sm:$0xff] }
 0x1fa   : > { %16620 = vmatmul.mubr.msk.bf16.gmra.mrb[8].mxu1 %vm1946_vm13, %v4192_v56  ;;  %v4209_v56 = vrot.slane %v20043_v10, 2  ;;  %v2897_v10 = vrot.slane %v23278_v0, 1 }
 0x1fb   : > { %16623 = vmatprep.mubr.msk.bf16.mxu1 %vm1946_vm13, %v4194_v39  ;;  %v2463_v39 = vsel %vm2428_vm1, %v2460_v18, %v2462_v45  ;;  %v18588_v18 = vld [vmem:[%s23092_s4 + $0x110] sm:$0xff]  }
 0x1fc   : > { %v4210_v63 = vsel %vm3712_vm15, %v4207_v37, %v4209_v56  ;;  %v4212_v8 = vsel %vm3712_vm15, %v4209_v56, %v4211_v36  ;;  %v18846_v56 = vld [vmem:[#allocation2 + $0x48] sm:$0xff]   ;;  %v18848_v36 = vld [vmem:[#allocation2 + $0x58] sm:$0xff]  }
 0x1ff   : > { %16452 = vmatmul.mubr.msk.bf16.gmra.mrb[52].mxu0 %vm1946_vm13, %v2449_v25  ;;  %v2898_v25 = vsel %vm2428_vm1, %v2896_v20, %v2897_v10 }
 0x200   : > { %16455 = vmatprep.mubr.msk.bf16.mxu0 %vm1946_vm13, %v2451_v46  ;;  %v23279_v46 = vld [vmem:[#allocation47_spill] sm:$0xff] }
 0x202   : > { %16624 = vmatmul.mubr.msk.bf16.gmra.mrb[12].mxu1 %vm1946_vm13, %v4196_v3  ;;  %v2899_v3 = vrot.slane %v23279_v46, 1  ;;  %v18850_v46 = vld [vmem:[#allocation2 + $0x68] sm:$0xff]  }
 0x203   : > { %16627 = vmatprep.mubr.msk.bf16.mxu1 %vm1946_vm13, %v4198_v21  ;;  %v2901_v21 = vrot.slane %v23280_v24, 1  ;;  %v18851_v24 = vld [vmem:[#allocation2 + $0x70] sm:$0xff]  }
 0x204   : > { %v2900_v35 = vsel %vm2428_vm1, %v2897_v10, %v2899_v3  ;;  %v23286_v10 = vld [vmem:[#allocation54_spill] sm:$0xff] }
 0x205   : > { %v2902_v40 = vsel %vm2428_vm1, %v2899_v3, %v2901_v21  ;;  %v2919_v3 = vrot.slane %v18850_v46, 1 }
 0x207   : > { %16456 = vmatmul.mubr.msk.bf16.gmra.mrb[56].mxu0 %vm1946_vm13, %v2453_v26  ;;  %v2903_v26 = vrot.slane %v18842_v31, 1  ;;  %v23291_v31 = vld [vmem:[#allocation57_spill] sm:$0xff] }
 0x208   : > { %16459 = vmatprep.mubr.msk.bf16.mxu0 %vm1946_vm13, %v2455_v1  ;;  %v18843_v1 = vld [vmem:[#allocation2 + $0x30] sm:$0xff]  }
 0x20a   : > { %16628 = vmatmul.mubr.msk.bf16.gmra.mrb[16].mxu1 %vm1946_vm13, %v4200_v53  ;;  %v2905_v53 = vrot.slane %v18843_v1, 1  ;;  %v18590_v1 = vld [vmem:[#allocation2 + $0x98] ss:$0 sps:$4 sm:$0x11]  }
 0x20b   : > { %16631 = vmatprep.mubr.msk.bf16.mxu1 %vm1946_vm13, %v4202_v41  ;;  %v2904_v41 = vsel %vm2428_vm1, %v2901_v21, %v2903_v26  ;;  %v2921_v21 = vrot.slane %v18851_v24, 1 }
 0x20c   : > { %v2906_v13 = vsel %vm2428_vm1, %v2903_v26, %v2905_v53  ;;  %v23292_v26 = vld [vmem:[#allocation60_spill] sm:$0xff] }
 0x20f   : > { %16460 = vmatmul.mubr.msk.bf16.gmra.mrb[60].mxu0 %vm1946_vm13, %v2457_v4  ;;  %v18844_v4 = vld [vmem:[#allocation2 + $0x38] sm:$0xff]  }
 0x210   : > { %16463 = vmatprep.mubr.msk.bf16.mxu0 %vm1946_vm13, %v2459_v44  ;;  %v2907_v32 = vrot.slane %v18844_v4, 1  ;;  %v23283_v44 = vld [vmem:[#allocation51_spill] sm:$0xff] }
 0x212   : > { %16632 = vmatmul.mubr.msk.bf16.gmra.mrb[20].mxu1 %vm1946_vm13, %v4204_v29  ;;  %v18845_v29 = vld [vmem:[#allocation2 + $0x40] sm:$0xff]   ;;  %v2908_v45 = vsel %vm2428_vm1, %v2905_v53, %v2907_v32 }
 0x213   : > { %16635 = vmatprep.mubr.msk.bf16.mxu1 %vm1946_vm13, %v4206_v52  ;;  %v2909_v52 = vrot.slane %v18845_v29, 1  ;;  %v23294_v53 = vld [vmem:[#allocation59_spill] sm:$0xff] }
 0x215   : > { %v2910_v37 = vsel %vm2428_vm1, %v2907_v32, %v2909_v52 }
 0x217   : > { %16464 = vmatmul.mubr.msk.bf16.gmra.mrb[64].mxu0 %vm1946_vm13, %v2461_v2  ;;  %v23284_v2 = vld [vmem:[#allocation52_spill] sm:$0xff] }
 0x218   : > { %16467 = vmatprep.mubr.msk.bf16.mxu0 %vm1946_vm13, %v2463_v39  ;;  %v2911_v39 = vrot.slane %v18846_v56, 1 }
 0x21a   : > { %16636 = vmatmul.mubr.msk.bf16.gmra.mrb[24].mxu1 %vm1946_vm13, %v4208_v16  ;;  %v23285_v16 = vld [vmem:[#allocation53_spill] sm:$0xff]  ;;  %v2912_v20 = vsel %vm2428_vm1, %v2909_v52, %v2911_v39 }
 0x21b   : > { %16639 = vmatprep.mubr.msk.bf16.mxu1 %vm1946_vm13, %v4210_v63  ;;  %v18847_v63 = vld [vmem:[#allocation2 + $0x50] sm:$0xff]  }
 0x21c   : > { %v2913_v38 = vrot.slane %v18847_v63, 1 }
 0x21e   : > { %v2914_v0 = vsel %vm2428_vm1, %v2911_v39, %v2913_v38 }
 0x21f   : > { %16468 = vmatmul.mubr.msk.bf16.gmra.mrb[68].mxu0 %vm1946_vm13, %v2465_v23  ;;  %v2915_v23 = vrot.slane %v18848_v36, 1 }
 0x220   : > { %16479 = vmatprep.mubr.msk.bf16.mxu0 %vm1946_vm13, %v2898_v25  ;;  %v18849_v25 = vld [vmem:[#allocation2 + $0x60] sm:$0xff]  }
 0x221   : > { %v2916_v11 = vsel %vm2428_vm1, %v2913_v38, %v2915_v23 }
 0x222   : > { %16640 = vmatmul.mubr.msk.bf16.gmra.mrb[28].mxu1 %vm1946_vm13, %v4212_v8  ;;  %v2917_v8 = vrot.slane %v18849_v25, 1 }
 0x223   : > { %16643 = vmatprep.mubr.msk.bf16.mxu1 %vm1946_vm13, %v4214_v48 }
 0x224   : > { %v2918_v48 = vsel %vm2428_vm1, %v2915_v23, %v2917_v8  ;;  %v2920_v50 = vsel %vm2428_vm1, %v2917_v8, %v2919_v3  ;;  %v20530_v23 = vld [vmem:[%s23094_s6] sm:$0xff]  }
 0x227   : > { %16480 = vmatmul.mubr.msk.bf16.vlgmr.msra.gmra.mrb[36].mxu0 %vm1946_vm13, %v2900_v35  ;;  %v2922_v35 = vsel %vm2428_vm1, %v2919_v3, %v2921_v21 }
 0x228   : > { %16483 = vmatprep.mubr.msk.bf16.mxu0 %vm1946_vm13, %v2902_v40  ;;  %v23288_v40 = vld [vmem:[#allocation56_spill] sm:$0xff] }
 0x22a   : > { %16644 = vmatmul.mubr.msk.bf16.gmra.mrb[32].mxu1 %vm1946_vm13, %v4216_v62  ;;  %v23289_v62 = vld [vmem:[#allocation58_spill] sm:$0xff] }
 0x22b   : > { %16655 = vmatprep.mubr.msk.bf16.mxu1 %vm1946_vm13, %v23281_v5  ;;  %v23293_v5 = vld [vmem:[#allocation62_spill] sm:$0xff] }
 0x22f   : > { %16484 = vmatmul.mubr.msk.bf16.gmra.mrb[40].mxu0 %vm1946_vm13, %v2904_v41  ;;  %v23295_v41 = vld [vmem:[#allocation61_spill] sm:$0xff] }
 0x230   : > { %16487 = vmatprep.mubr.msk.bf16.mxu0 %vm1946_vm13, %v2906_v13  ;;  %v4684_v13 = vshrl.u32 %v20155_v61, 16 }
 0x232   : > { %16656 = vmatmul.mubr.msk.bf16.vlgmr.msra.gmra.mrb[0].mxu1 %vm1946_vm13, %v23282_v19  ;;  %v23296_v19 = vld [vmem:[#allocation45_spill] sm:$0xff] }
 0x233   : > { %16692 = vmatpush3.bf16.msra.mxu1 %v20274_v12  ;;  %16659 = vmatprep.mubr.msk.bf16.mxu1 %vm1946_vm13, %v23283_v44  ;;  %v18589_v12 = vld [vmem:[%s23092_s4 + $0x118] sm:$0xff]   ;;  %v23297_v4 = vrot.slane %v23296_v19, 1  ;;  %v4686_v44 = vrot.slane %v4684_v13, 2  ;;  %v20578_v19 = vld [vmem:[%s23093_s5] ss:$0 sm:$0xff] }
 0x234   : > { %16693 = vmatprep.subr.bf16.mxu1 %v18587_v15 }
 0x237   : > { %16488 = vmatmul.mubr.msk.bf16.gmra.mrb[44].mxu0 %vm1946_vm13, %v2908_v45  ;;  %16694 = vmatpush3.bf16.msra.mxu1 %v18587_v15  ;;  %v4687_v15 = vshll.u32 %v20155_v61, 16  ;;  %v18595_v61 = vld [vmem:[%s23094_s6 + $0x50] sm:$0xff]  }
 0x238   : > { %16491 = vmatprep.mubr.msk.bf16.mxu0 %vm1946_vm13, %v2910_v37  ;;  %16695 = vmatprep.subr.bf16.mxu1 %v18588_v18 }
 0x239   : > { %v4689_v29 = vrot.slane %v4687_v15, 3 }
 0x23a   : > { %16660 = vmatmul.mubr.msk.bf16.gmra.mrb[4].mxu1 %vm1946_vm13, %v23284_v2 }
 0x23b   : > { %16663 = vmatprep.mubr.msk.bf16.mxu1 %vm1946_vm13, %v23285_v16  ;;  %16696 = vmatpush3.bf16.msra.mxu1 %v18588_v18  ;;  %v18599_v18 = vld [vmem:[%s23094_s6 + $0x70] sm:$0xff]   ;;  %v18600_v16 = vld [vmem:[%s23094_s6 + $0x78] sm:$0xff]  }
 0x23c   : > { %16697 = vmatprep.subr.bf16.mxu1 %v18589_v12 }
 0x23f   : > { %16492 = vmatmul.mubr.msk.bf16.gmra.mrb[48].mxu0 %vm1946_vm13, %v2912_v20  ;;  %16698 = vmatpush3.bf16.msra.mxu1 %v18589_v12 }
 0x240   : > { %16495 = vmatprep.mubr.msk.bf16.mxu0 %vm1946_vm13, %v2914_v0 }
 0x242   : > { %16664 = vmatmul.mubr.msk.bf16.gmra.mrb[8].mxu1 %vm1946_vm13, %v23286_v10 }
 0x243   : > { %16667 = vmatprep.mubr.msk.bf16.mxu1 %vm1946_vm13, %v23287_v51 }
 0x247   : > { %16496 = vmatmul.mubr.msk.bf16.gmra.mrb[52].mxu0 %vm1946_vm13, %v2916_v11 }
 0x248   : > { %16499 = vmatprep.mubr.msk.bf16.mxu0 %vm1946_vm13, %v2918_v48 }
 0x24a   : > { %16668 = vmatmul.mubr.msk.bf16.gmra.mrb[12].mxu1 %vm1946_vm13, %v20032_v14  ;;  %v23290_v14 = vrot.slane %v19777_v59, 1  ;;  %v2931_v59 = vrot.slane %v18590_v1, 1 }
 0x24b   : > { %16671 = vmatprep.mubr.msk.bf16.mxu1 %vm1946_vm13, %v20046_v30 }
 0x24c   : > { %v2924_v30 = vsel %vm2428_vm1, %v2921_v21, %v23290_v14  ;;  %v2932_v32 = vsel %vm2428_vm1, %v23297_v4, %v2931_v59  ;;  %v5986_v59 = vld [vmem:[#allocation3 + $0x4] sm:$0xf] }
 0x24f   : > { %16500 = vmatmul.mubr.msk.bf16.gmra.mrb[56].mxu0 %vm1946_vm13, %v2920_v50 }
 0x250   : > { %16503 = vmatprep.mubr.msk.bf16.mxu0 %vm1946_vm13, %v2922_v35 }
 0x252   : > { %16672 = vmatmul.mubr.msk.bf16.gmra.mrb[16].mxu1 %vm1946_vm13, %v23288_v40 }
 0x253   : > { %16675 = vmatprep.mubr.msk.bf16.mxu1 %vm1946_vm13, %v23289_v62 }
 0x257   : > { %16504 = vmatmul.mubr.msk.bf16.gmra.mrb[60].mxu0 %vm1946_vm13, %v2924_v30 }
 0x258   : > { %16507 = vmatprep.mubr.msk.bf16.mxu0 %vm1946_vm13, %v23291_v31 }
 0x25a   : > { %16676 = vmatmul.mubr.msk.bf16.gmra.mrb[20].mxu1 %vm1946_vm13, %v23292_v26 }
 0x25b   : > { %16679 = vmatprep.mubr.msk.bf16.mxu1 %vm1946_vm13, %v23293_v5 }
 0x25f   : > { %16508 = vmatmul.mubr.msk.bf16.gmra.mrb[64].mxu0 %vm1946_vm13, %v23294_v53 }
 0x260   : > { %16511 = vmatprep.mubr.msk.bf16.mxu0 %vm1946_vm13, %v23295_v41  ;;  %v5985_v41 = vld [vmem:[#allocation3] sm:$0xf] }
 0x261   : > { %v20573_v13 = vcombine.low %v5985_v41, %v5986_v59  ;;  %v23308_v41 = vld [vmem:[#allocation11_spill] sm:$0xff] }
 0x262   : > { %16680 = vmatmul.mubr.msk.bf16.gmra.mrb[24].mxu1 %vm1946_vm13, %v20099_v54  ;;  %v4690_v54 = vor.u32 %v4689_v29, %v4686_v44 }
 0x263   : > { %16683 = vmatprep.mubr.msk.bf16.mxu1 %vm1946_vm13, %v20112_v60  ;;  %23305 = vst [vmem:[#allocation46_spill] sm:$0xff] %v20573_v13 }
 0x264   : > { %v4691_v60 = vsel %vm4521_vm0, %v20119_v27, %v4690_v54  ;;  %v23300_v27 = vld [vmem:[#allocation65_spill] sm:$0xff]  ;;  %v6151_v54 = vshll.u32 %v20573_v13, 16 }
 0x267   : > { %16512 = vmatmul.mubr.msk.bf16.gmra.mrb[68].mxu0 %vm1946_vm13, %v2932_v32 }
 0x26a   : > { %16684 = vmatmul.mubr.msk.bf16.gmra.mrb[28].mxu1 %vm1946_vm13, %v20122_v6  ;;  %v23298_v6 = vld [vmem:[#allocation63_spill] sm:$0xff] }
 0x26b   : > { %16687 = vmatprep.mubr.msk.bf16.mxu1 %vm1946_vm13, %v20130_v34  ;;  %v23299_v34 = vld [vmem:[#allocation64_spill] sm:$0xff] }
 0x272   : > { %16688 = vmatmul.mubr.msk.bf16.gmra.mrb[32].mxu1 %vm1946_vm13, %v4691_v60 }
 0x273   : > { %16699 = vmatprep.mubr.msk.bf16.mxu1 %vm1946_vm13, %v20133_v17  ;;  %v23301_v17 = vld [vmem:[#allocation66_spill] sm:$0xff] }
 0x27a   : > { %16700 = vmatmul.mubr.msk.bf16.vlgmr.msra.gmra.mrb[0].mxu1 %vm1946_vm13, %v20137_v43  ;;  %v23302_v43 = vld [vmem:[#allocation67_spill] sm:$0xff] }
 0x27b   : > { %16703 = vmatprep.mubr.msk.bf16.mxu1 %vm1946_vm13, %v20140_v7  ;;  %v18593_v7 = vld [vmem:[%s23094_s6 + $0x40] sm:$0xff]  }
 0x27c   : > { %16735 = vmatprep.subr.bf16.mxu0 %v18593_v7 }
 0x27d   : > { %16736 = vmatpush3.bf16.msra.mxu0 %v18593_v7 }
 0x282   : > { %16704 = vmatmul.mubr.msk.bf16.gmra.mrb[4].mxu1 %vm1946_vm13, %v20143_v42  ;;  %v18594_v42 = vld [vmem:[%s23094_s6 + $0x48] sm:$0xff]  }
 0x283   : > { %16707 = vmatprep.mubr.msk.bf16.mxu1 %vm1946_vm13, %v23298_v6  ;;  %16737 = vmatprep.subr.bf16.mxu0 %v18594_v42 }
 0x284   : > { %16738 = vmatpush3.bf16.msra.mxu0 %v18594_v42 }
 0x285   : > { %16739 = vmatprep.subr.bf16.mxu0 %v18595_v61 }
 0x288   : > { %16740 = vmatpush3.bf16.msra.mxu0 %v18595_v61 }
 0x28a   : > { %16708 = vmatmul.mubr.msk.bf16.gmra.mrb[8].mxu1 %vm1946_vm13, %v23299_v34 }
 0x28b   : > { %16711 = vmatprep.mubr.msk.bf16.mxu1 %vm1946_vm13, %v20164_v55  ;;  %v423_v55 = vld [vmem:[#allocation3 + $0x98] sm:$0xe] }
 0x292   : > { %16712 = vmatmul.mubr.msk.bf16.gmra.mrb[12].mxu1 %vm1946_vm13, %v23300_v27 }
 0x293   : > { %16715 = vmatprep.mubr.msk.bf16.mxu1 %vm1946_vm13, %v20173_v22  ;;  %v424_v22 = vsel %vm20485_vm6, 0, %v423_v55  ;;  %v6153_v55 = vrot.slane %v6151_v54, 1 }
 0x294   : > { %425 = vst [vmem:[#allocation3 + $0x98] sm:$0xe] %v424_v22  ;;  %v23306_v22 = vld [vmem:[#allocation9_spill] sm:$0xff] }
 0x29a   : > { %16716 = vmatmul.mubr.msk.bf16.gmra.mrb[16].mxu1 %vm1946_vm13, %v23301_v17 }
 0x29b   : > { %16719 = vmatprep.mubr.msk.bf16.mxu1 %vm1946_vm13, %v23302_v43 }
 0x2a2   : > { %16720 = vmatmul.mubr.msk.bf16.gmra.mrb[20].mxu1 %vm1946_vm13, %v20185_v58  ;;  %v18597_v58 = vld [vmem:[%s23094_s6 + $0x60] sm:$0xff]  }
 0x2a3   : > { %16723 = vmatprep.mubr.msk.bf16.mxu1 %vm1946_vm13, %v20188_v9 }
 0x2aa   : > { %16724 = vmatmul.mubr.msk.bf16.gmra.mrb[24].mxu1 %vm1946_vm13, %v20193_v49  ;;  %v18598_v49 = vld [vmem:[%s23094_s6 + $0x68] sm:$0xff]  }
 0x2ab   : > { %16727 = vmatprep.mubr.msk.bf16.mxu1 %vm1946_vm13, %v20198_v57  ;;  %v18596_v57 = vld [vmem:[%s23094_s6 + $0x58] sm:$0xff]  }
 0x2ac   : > { %16741 = vmatprep.subr.bf16.mxu0 %v18596_v57 }
 0x2ad   : > { %16742 = vmatpush3.bf16.msra.mxu0 %v18596_v57  ;;  %v6149_v57 = vshrl.u32 %v20573_v13, 16 }
 0x2ae   : > { %16743 = vmatprep.subr.bf16.mxu0 %v18597_v58 }
 0x2af   : > { %v20592_v54 = vor.u32 %v6153_v55, %v6149_v57 }
 0x2b1   : > { %16744 = vmatpush3.bf16.msra.mxu0 %v18597_v58 }
 0x2b2   : > { %16728 = vmatmul.mubr.msk.bf16.gmra.mrb[28].mxu1 %vm1946_vm13, %v20201_v28  ;;  %16745 = vmatprep.subr.bf16.mxu0 %v18598_v49 }
 0x2b3   : > { %16731 = vmatprep.mubr.msk.bf16.mxu1 %vm1946_vm13, %v20204_v33 }
 0x2b5   : > { %16746 = vmatpush3.bf16.msra.mxu0 %v18598_v49 }
 0x2b6   : > { %16747 = vmatprep.subr.bf16.mxu0 %v18599_v18 }
 0x2b9   : > { %16748 = vmatpush3.bf16.msra.mxu0 %v18599_v18 }
 0x2ba   : > { %16732 = vmatmul.mubr.msk.bf16.gmra.mrb[32].mxu1 %vm1946_vm13, %v20207_v47  ;;  %16749 = vmatprep.subr.bf16.mxu0 %v18600_v16 }
 0x2bd   : > { %16750 = vmatpush3.bf16.msra.mxu0 %v18600_v16 }
 0x2be   : > { %16787 = vmatprep.subr.bf16.mxu0 %v20530_v23 }
 0x2fa   : > { %v16481_v28 = vpop.f32.mrb[36].mxu0 }
 0x2fb   : > { %v3045_v33 = vpop.f32.mrb[37].mxu0 }
 0x2fc   : > { %v16482_v47 = vpop.f32.mrb[38].mxu0 }
 0x2fd   : > { %v3048_v52 = vpop.f32.mrb[39].mxu0 }
 0x302   : > { %v20500_v45 = vpop.f32.mrb[40].mxu0 }
 0x303   : > { %v20502_v37 = vpop.f32.mrb[41].mxu0 }
 0x304   : > { %v20504_v12 = vpop.f32.mrb[42].mxu0 }
 0x305   : > { %v20506_v2 = vpop.f32.mrb[43].mxu0 }
 0x30a   : > { %v20508_v56 = vpop.f32.mrb[44].mxu0 }
 0x30b   : > { %v20510_v39 = vpop.f32.mrb[45].mxu0 }
 0x30c   : > { %v20515_v63 = vpop.f32.mrb[46].mxu0 }
 0x30d   : > { %v20517_v38 = vpop.f32.mrb[47].mxu0 }
 0x312   : > { %v20519_v20 = vpop.f32.mrb[48].mxu0 }
 0x313   : > { %v20521_v0 = vpop.f32.mrb[49].mxu0 }
 0x314   : > { %v20523_v10 = vpop.f32.mrb[50].mxu0 }
 0x315   : > { %v20525_v36 = vpop.f32.mrb[51].mxu0 }
 0x31a   : > { %v20533_v51 = vpop.f32.mrb[52].mxu0 }
 0x31b   : > { %v20535_v25 = vpop.f32.mrb[53].mxu0 }
 0x31c   : > { %v20537_v8 = vpop.f32.mrb[54].mxu0 }
 0x31d   : > { %v20539_v11 = vpop.f32.mrb[55].mxu0 }
 0x322   : > { %v20541_v48 = vpop.f32.mrb[56].mxu0 }
 0x323   : > { %v20543_v46 = vpop.f32.mrb[57].mxu0 }
 0x324   : > { %v20545_v3 = vpop.f32.mrb[58].mxu0 }
 0x325   : > { %v20547_v24 = vpop.f32.mrb[59].mxu0 }
 0x32a   : > { %v20549_v21 = vpop.f32.mrb[60].mxu0 }
 0x32b   : > { %v20551_v50 = vpop.f32.mrb[61].mxu0 }
 0x32c   : > { %v20553_v35 = vpop.f32.mrb[62].mxu0 }
 0x32d   : > { %v20555_v40 = vpop.f32.mrb[63].mxu0 }
 0x332   : > { %v20557_v62 = vpop.f32.mrb[64].mxu0 }
 0x333   : > { %v20559_v14 = vpop.f32.mrb[65].mxu0 }
 0x334   : > { %v20561_v30 = vpop.f32.mrb[66].mxu0 }
 0x335   : > { %v20563_v31 = vpop.f32.mrb[67].mxu0 }
 0x33a   : > { %v20565_v26 = vpop.f32.mrb[68].mxu0 }
 0x33b   : > { %v20567_v5 = vpop.f32.mrb[69].mxu0 }
 0x33c   : > { %v20569_v1 = vpop.f32.mrb[70].mxu0 }
 0x33d   : > { %v20571_v53 = vpop.f32.mrb[71].mxu0 }
 0x34d   : > { %v16701_v15 = vpop.f32.mrb[0].mxu1 }
 0x34e   : > { %v17599_v4 = vadd.f32 %v16701_v15, %v16481_v28  ;;  %v5146_v32 = vpop.f32.mrb[1].mxu1  ;;  %v23307_v28 = vld [vmem:[#allocation8_spill] sm:$0xff] }
 0x34f   : > { %v17600_v44 = vadd.f32 %v5146_v32, %v3045_v33  ;;  %v16702_v29 = vpop.f32.mrb[2].mxu1  ;;  %v23309_v32 = vld [vmem:[#allocation10_spill] sm:$0xff] }
 0x350   : > { %v5334_v60 = vadd.f32 %v17599_v4, %v20578_v19  ;;  %v17601_v6 = vadd.f32 %v16702_v29, %v16482_v47  ;;  %v5149_v34 = vpop.f32.mrb[3].mxu1 }
 0x351   : > { %v5332_v27 = vadd.f32 %v17600_v44, %v20578_v19  ;;  %v17602_v17 = vadd.f32 %v5149_v34, %v3048_v52 }
 0x352   : > { %v5370_v43 = vmax.f32 %v5334_v60, 0.0  ;;  %v5335_v7 = vadd.f32 %v17601_v6, %v20578_v19 }
 0x353   : > { %v5368_v42 = vmax.f32 %v5332_v27, 0.0  ;;  %v5333_v61 = vadd.f32 %v17602_v17, %v20578_v19 }
 0x354   : > { %v5406_v58 = vmul.f32 %v5370_v43, %v23306_v22  ;;  %v5371_v49 = vmax.f32 %v5335_v7, 0.0 }
 0x355   : > { %v5404_v33 = vmul.f32 %v5368_v42, %v23307_v28  ;;  %v5369_v18 = vmax.f32 %v5333_v61, 0.0  ;;  %v16705_v47 = vpop.f32.mrb[4].mxu1 }
 0x356   : > { %v15433_v16 = vpack.c.bf16 %v5406_v58, %v5406_v58  ;;  %v5407_v59 = vmul.f32 %v5371_v49, %v23308_v41  ;;  %v17603_v52 = vadd.f32 %v16705_v47, %v20500_v45  ;;  %v5162_v15 = vpop.f32.mrb[5].mxu1 }
 0x357   : > { %v15431_v4 = vpack.c.bf16 %v5404_v33, %v5404_v33  ;;  %v5405_v44 = vmul.f32 %v5369_v18, %v23309_v32  ;;  %v17604_v29 = vadd.f32 %v5162_v15, %v20502_v37  ;;  %v16706_v60 = vpop.f32.mrb[6].mxu1  ;;  %v5944_v32 = vld [vmem:[#allocation3 + $0x8] sm:$0xe] }
 0x358   : > { %v5568_v6 = vshrl.u32 %v15433_v16, 16  ;;  %v5571_v34 = vshll.u32 %v15433_v16, 16  ;;  %v15434_v27 = vpack.c.bf16 %v5407_v59, %v5407_v59  ;;  %v5338_v17 = vadd.f32 %v17603_v52, %v20578_v19  ;;  %v5165_v43 = vpop.f32.mrb[7].mxu1 }
 0x359   : > { %v5549_v7 = vshrl.u32 %v15431_v4, 16  ;;  %v5552_v42 = vshll.u32 %v15431_v4, 16  ;;  %v15432_v61 = vpack.c.bf16 %v5405_v44, %v5405_v44  ;;  %v5336_v45 = vadd.f32 %v17604_v29, %v20578_v19 }
 0x35a   : > { %v5570_v58 = vrot.slane %v5568_v6, 6  ;;  %v5573_v49 = vrot.slane %v5571_v34, 7  ;;  %v5578_v33 = vshrl.u32 %v15434_v27, 16  ;;  %v5581_v18 = vshll.u32 %v15434_v27, 16  ;;  %v23310_v6 = vld [vmem:[#allocation14_spill] sm:$0xff] }
 0x35b   : > { %v5551_v47 = vrot.slane %v5549_v7, 6  ;;  %v5554_v37 = vrot.slane %v5552_v42, 7  ;;  %v5558_v15 = vshrl.u32 %v15432_v61, 16  ;;  %v5561_v57 = vshll.u32 %v15432_v61, 16 }
 0x35c   : > { %v5574_v55 = vor.u32 %v5573_v49, %v5570_v58  ;;  %v5580_v16 = vrot.slane %v5578_v33, 6  ;;  %v5583_v59 = vrot.slane %v5581_v18, 7  ;;  %v5374_v41 = vmax.f32 %v5338_v17, 0.0  ;;  %v23311_v49 = vld [vmem:[#allocation12_spill] sm:$0xff] }
 0x35d   : > { %v5555_v52 = vor.u32 %v5554_v37, %v5551_v47  ;;  %v5560_v28 = vrot.slane %v5558_v15, 6  ;;  %v5563_v22 = vrot.slane %v5561_v57, 7  ;;  %v5372_v4 = vmax.f32 %v5336_v45, 0.0  ;;  %v16709_v44 = vpop.f32.mrb[8].mxu1 }
 0x35e   : > { %v5576_v13 = vrot.slane %v5574_v55, 4  ;;  %v5584_v29 = vor.u32 %v5583_v59, %v5580_v16  ;;  %v5410_v34 = vmul.f32 %v5374_v41, %v23310_v6  ;;  %v17605_v27 = vadd.f32 %v16706_v60, %v20504_v12  ;;  %v5178_v7 = vpop.f32.mrb[9].mxu1 }
 0x35f   : > { %v5556_v42 = vrot.slane %v5555_v52, 4  ;;  %v5945_v61 = vsel %vm20485_vm6, %v5555_v52, %v5944_v32  ;;  %v5564_v58 = vor.u32 %v5563_v22, %v5560_v28  ;;  %v5408_v33 = vmul.f32 %v5372_v4, %v23311_v49  ;;  %v16710_v17 = vpop.f32.mrb[10].mxu1 }
 0x360   : > { %5946 = vst [vmem:[#allocation3 + $0x8] sm:$0xe] %v5945_v61  ;;  %v5585_v45 = vsel %vm19234_vm11, %v5576_v13, %v5584_v29  ;;  %v5586_v47 = vrot.slane %v5584_v29, 4  ;;  %v15437_v37 = vpack.c.bf16 %v5410_v34, %v5410_v34  ;;  %v5339_v15 = vadd.f32 %v17605_v27, %v20578_v19  ;;  %v5181_v41 = vpop.f32.mrb[11].mxu1  ;;  %v23313_v27 = vld [vmem:[#allocation16_spill] sm:$0xff] }
 0x361   : > { %5949 = vst [vmem:[#allocation3 + $0x14] sm:$0xf] %v5585_v45  ;;  %v5565_v12 = vsel %vm19234_vm11, %v5556_v42, %v5564_v58  ;;  %v5566_v60 = vrot.slane %v5564_v58, 4  ;;  %v15435_v9 = vpack.c.bf16 %v5408_v33, %v5408_v33  ;;  %v17606_v22 = vadd.f32 %v5165_v43, %v20506_v2 }
 0x362   : > { %5947 = vst [vmem:[#allocation3 + $0xc] sm:$0xf] %v5565_v12  ;;  %v5608_v28 = vshrl.u32 %v15437_v37, 16  ;;  %v5611_v32 = vshll.u32 %v15437_v37, 16  ;;  %v5375_v57 = vmax.f32 %v5339_v15, 0.0  ;;  %v17607_v16 = vadd.f32 %v16709_v44, %v20508_v56 }
 0x363   : > { %v5575_v13 = vsel %vm19234_vm11, %v5566_v60, %v5574_v55  ;;  %v5588_v59 = vshrl.u32 %v15435_v9, 16  ;;  %v5591_v52 = vshll.u32 %v15435_v9, 16  ;;  %v5337_v4 = vadd.f32 %v17606_v22, %v20578_v19  ;;  %v23314_v60 = vld [vmem:[#allocation13_spill] sm:$0xff] }
 0x364   : > { %5948 = vst [vmem:[#allocation3 + $0x10] sm:$0xf] %v5575_v13  ;;  %v5610_v29 = vrot.slane %v5608_v28, 6  ;;  %v5613_v34 = vrot.slane %v5611_v32, 7  ;;  %v5411_v42 = vmul.f32 %v5375_v57, %v23313_v27  ;;  %v5342_v2 = vadd.f32 %v17607_v16, %v20578_v19 }
 0x365   : > { %v5590_v43 = vrot.slane %v5588_v59, 6  ;;  %v5593_v61 = vrot.slane %v5591_v52, 7  ;;  %v5373_v58 = vmax.f32 %v5337_v4, 0.0  ;;  %v17608_v33 = vadd.f32 %v5178_v7, %v20510_v39  ;;  %v16713_v56 = vpop.f32.mrb[12].mxu1  ;;  %v23315_v7 = vld [vmem:[#allocation19_spill] sm:$0xff] }
 0x366   : > { %v20614_v44 = vor.u32 %v5613_v34, %v5610_v29  ;;  %v15438_v55 = vpack.c.bf16 %v5411_v42, %v5411_v42  ;;  %v5378_v45 = vmax.f32 %v5342_v2, 0.0  ;;  %v17609_v37 = vadd.f32 %v16710_v17, %v20515_v63  ;;  %v5194_v15 = vpop.f32.mrb[13].mxu1 }
 0x367   : > { %v5594_v12 = vor.u32 %v5593_v61, %v5590_v43  ;;  %v5409_v9 = vmul.f32 %v5373_v58, %v23314_v60  ;;  %v5340_v22 = vadd.f32 %v17608_v33, %v20578_v19  ;;  %v17610_v28 = vadd.f32 %v5181_v41, %v20517_v38  ;;  %v16714_v32 = vpop.f32.mrb[14].mxu1  ;;  %v23316_v43 = vld [vmem:[#allocation17_spill] sm:$0xff] }
 0x368   : > { %v5616_v57 = vrot.slane %v20614_v44, 4  ;;  %v5618_v16 = vshrl.u32 %v15438_v55, 16  ;;  %v5621_v39 = vshll.u32 %v15438_v55, 16  ;;  %v5414_v13 = vmul.f32 %v5378_v45, %v23315_v7  ;;  %v20622_v59 = vpop.f32.mrb[15].mxu1 }
 0x369   : > { %v5595_v63 = vsel %vm19234_vm11, %v5586_v47, %v5594_v12  ;;  %v5596_v17 = vrot.slane %v5594_v12, 4  ;;  %v15436_v52 = vpack.c.bf16 %v5409_v9, %v5409_v9  ;;  %v5376_v4 = vmax.f32 %v5340_v22, 0.0 }
 0x36a   : > { %5950 = vst [vmem:[#allocation3 + $0x18] sm:$0xf] %v5595_v63  ;;  %v5620_v29 = vrot.slane %v5618_v16, 6  ;;  %v5623_v34 = vrot.slane %v5621_v39, 7  ;;  %v15441_v42 = vpack.c.bf16 %v5414_v13, %v5414_v13  ;;  %v5343_v38 = vadd.f32 %v17609_v37, %v20578_v19 }
 0x36b   : > { %v5598_v41 = vshrl.u32 %v15436_v52, 16  ;;  %v5601_v2 = vshll.u32 %v15436_v52, 16  ;;  %v5412_v61 = vmul.f32 %v5376_v4, %v23316_v43  ;;  %v5341_v58 = vadd.f32 %v17610_v28, %v20578_v19 }
 0x36c   : > { %v5624_v33 = vor.u32 %v5623_v34, %v5620_v29  ;;  %v5648_v55 = vshrl.u32 %v15441_v42, 16  ;;  %v5651_v45 = vshll.u32 %v15441_v42, 16  ;;  %v5379_v7 = vmax.f32 %v5343_v38, 0.0  ;;  %v23317_v29 = vld [vmem:[#allocation20_spill] sm:$0xff] }
 0x36d   : > { %v5600_v47 = vrot.slane %v5598_v41, 6  ;;  %v5603_v12 = vrot.slane %v5601_v2, 7  ;;  %v15439_v9 = vpack.c.bf16 %v5412_v61, %v5412_v61  ;;  %v5377_v22 = vmax.f32 %v5341_v58, 0.0  ;;  %v16717_v63 = vpop.f32.mrb[16].mxu1  ;;  %v23318_v41 = vld [vmem:[#allocation18_spill] sm:$0xff] }
 0x36e   : > { %v5625_v16 = vsel %vm19234_vm11, %v5616_v57, %v5624_v33  ;;  %v5626_v39 = vrot.slane %v5624_v33, 4  ;;  %v5650_v37 = vrot.slane %v5648_v55, 6  ;;  %v5653_v13 = vrot.slane %v5651_v45, 7  ;;  %v5210_v52 = vpop.f32.mrb[17].mxu1 }
 0x36f   : > { %5953 = vst [vmem:[#allocation3 + $0x24] sm:$0xf] %v5625_v16  ;;  %v5604_v4 = vor.u32 %v5603_v12, %v5600_v47  ;;  %v5628_v43 = vshrl.u32 %v15439_v9, 16  ;;  %v5631_v28 = vshll.u32 %v15439_v9, 16  ;;  %v5415_v34 = vmul.f32 %v5379_v7, %v23317_v29  ;;  %v20632_v42 = vpop.f32.mrb[18].mxu1 }
 0x370   : > { %v5654_v38 = vor.u32 %v5653_v13, %v5650_v37  ;;  %v5413_v2 = vmul.f32 %v5377_v22, %v23318_v41  ;;  %v17611_v61 = vadd.f32 %v16713_v56, %v20519_v20  ;;  %v17612_v58 = vadd.f32 %v5194_v15, %v20521_v0  ;;  %v20637_v57 = vpop.f32.mrb[19].mxu1 }
 0x371   : > { %v5605_v33 = vsel %vm19234_vm11, %v5596_v17, %v5604_v4  ;;  %v5606_v55 = vrot.slane %v5604_v4, 4  ;;  %v5630_v45 = vrot.slane %v5628_v43, 6  ;;  %v5633_v47 = vrot.slane %v5631_v28, 7 }
 0x372   : > { %5951 = vst [vmem:[#allocation3 + $0x1c] sm:$0xf] %v5605_v33  ;;  %v5656_v12 = vrot.slane %v5654_v38, 4  ;;  %v15442_v7 = vpack.c.bf16 %v5415_v34, %v5415_v34  ;;  %v15440_v9 = vpack.c.bf16 %v5413_v2, %v5413_v2  ;;  %v5346_v16 = vadd.f32 %v17611_v61, %v20578_v19 }
 0x373   : > { %v5615_v20 = vsel %vm19234_vm11, %v5606_v55, %v20614_v44  ;;  %v5634_v56 = vor.u32 %v5633_v47, %v5630_v45  ;;  %v5344_v0 = vadd.f32 %v17612_v58, %v20578_v19  ;;  %v17613_v15 = vadd.f32 %v16714_v32, %v20523_v10  ;;  %v23319_v10 = vld [vmem:[#allocation23_spill] sm:$0xff]  ;;  %v23320_v45 = vld [vmem:[#allocation21_spill] sm:$0xff] }
 0x374   : > { %5952 = vst [vmem:[#allocation3 + $0x20] sm:$0xf] %v5615_v20  ;;  %v5658_v17 = vshrl.u32 %v15442_v7, 16  ;;  %v5661_v22 = vshll.u32 %v15442_v7, 16  ;;  %v5638_v43 = vshrl.u32 %v15440_v9, 16  ;;  %v5641_v37 = vshll.u32 %v15440_v9, 16 }
 0x375   : > { %v5635_v13 = vsel %vm19234_vm11, %v5626_v39, %v5634_v56  ;;  %v5636_v4 = vrot.slane %v5634_v56, 4  ;;  %v5382_v28 = vmax.f32 %v5346_v16, 0.0  ;;  %v5380_v34 = vmax.f32 %v5344_v0, 0.0  ;;  %v20649_v2 = vpop.f32.mrb[20].mxu1 }
 0x376   : > { %5954 = vst [vmem:[#allocation3 + $0x28] sm:$0xf] %v5635_v13  ;;  %v5660_v44 = vrot.slane %v5658_v17, 6  ;;  %v5663_v61 = vrot.slane %v5661_v22, 7  ;;  %v5640_v33 = vrot.slane %v5638_v43, 6  ;;  %v5643_v58 = vrot.slane %v5641_v37, 7 }
 0x377   : > { %v20651_v55 = vpop.f32.mrb[21].mxu1  ;;  %v5418_v32 = vmul.f32 %v5382_v28, %v23319_v10  ;;  %v5416_v47 = vmul.f32 %v5380_v34, %v23320_v45  ;;  %v5347_v7 = vadd.f32 %v17613_v15, %v20578_v19  ;;  %v17614_v39 = vadd.f32 %v20622_v59, %v20525_v36 }
 0x378   : > { %v20658_v9 = vpop.f32.mrb[22].mxu1  ;;  %v5664_v16 = vor.u32 %v5663_v61, %v5660_v44  ;;  %v5644_v20 = vor.u32 %v5643_v58, %v5640_v33  ;;  %v17615_v56 = vadd.f32 %v16717_v63, %v20533_v51  ;;  %v17616_v0 = vadd.f32 %v5210_v52, %v20535_v25  ;;  %v23321_v44 = vld [vmem:[#allocation24_spill] sm:$0xff] }
 0x379   : > { %v20662_v17 = vpop.f32.mrb[23].mxu1  ;;  %v15445_v22 = vpack.c.bf16 %v5418_v32, %v5418_v32  ;;  %v15443_v43 = vpack.c.bf16 %v5416_v47, %v5416_v47  ;;  %v5383_v37 = vmax.f32 %v5347_v7, 0.0  ;;  %v5345_v13 = vadd.f32 %v17614_v39, %v20578_v19  ;;  %v21069_v18 = vld [vmem:[#allocation3 + $0x18] sm:$0xff]  }
 0x37a   : > { %v5665_v15 = vsel %vm19234_vm11, %v5656_v12, %v5664_v16  ;;  %v5666_v28 = vrot.slane %v5664_v16, 4  ;;  %v5645_v36 = vsel %vm19234_vm11, %v5636_v4, %v5644_v20  ;;  %v5646_v59 = vrot.slane %v5644_v20, 4  ;;  %v23322_v16 = vld [vmem:[#allocation22_spill] sm:$0xff] }
 0x37b   : > { %5957 = vst [vmem:[#allocation3 + $0x34] sm:$0xf] %v5665_v15  ;;  %5955 = vst [vmem:[#allocation3 + $0x2c] sm:$0xf] %v5645_v36  ;;  %v5688_v51 = vshrl.u32 %v15445_v22, 16  ;;  %v5691_v63 = vshll.u32 %v15445_v22, 16  ;;  %v5419_v61 = vmul.f32 %v5383_v37, %v23321_v44  ;;  %v5350_v58 = vadd.f32 %v17615_v56, %v20578_v19 }
 0x37c   : > { %v5668_v25 = vshrl.u32 %v15443_v43, 16  ;;  %v5671_v52 = vshll.u32 %v15443_v43, 16  ;;  %v5655_v34 = vsel %vm19234_vm11, %v5646_v59, %v5654_v38  ;;  %v5381_v33 = vmax.f32 %v5345_v13, 0.0 }
 0x37d   : > { %5956 = vst [vmem:[#allocation3 + $0x30] sm:$0xf] %v5655_v34  ;;  %v5690_v12 = vrot.slane %v5688_v51, 6  ;;  %v5693_v32 = vrot.slane %v5691_v63, 7  ;;  %v20673_v7 = vpop.f32.mrb[24].mxu1  ;;  %v15446_v39 = vpack.c.bf16 %v5419_v61, %v5419_v61  ;;  %v5386_v22 = vmax.f32 %v5350_v58, 0.0 }
 0x37e   : > { %v5670_v47 = vrot.slane %v5668_v25, 6  ;;  %v5673_v4 = vrot.slane %v5671_v52, 7  ;;  %v5417_v20 = vmul.f32 %v5381_v33, %v23322_v16  ;;  %v5348_v43 = vadd.f32 %v17616_v0, %v20578_v19  ;;  %v20677_v15 = vpop.f32.mrb[25].mxu1  ;;  %v23323_v25 = vld [vmem:[#allocation27_spill] sm:$0xff]  ;;  %v20686_v34 = vld [vmem:[#allocation3 + $0x8] sm:$0xff]  }
 0x37f   : > { %v5694_v38 = vor.u32 %v5693_v32, %v5690_v12  ;;  %v17617_v56 = vadd.f32 %v20632_v42, %v20537_v8  ;;  %v17618_v13 = vadd.f32 %v20637_v57, %v20539_v11  ;;  %v20683_v36 = vpop.f32.mrb[26].mxu1  ;;  %v5698_v59 = vshrl.u32 %v15446_v39, 16 }
 0x380   : > { %v5674_v37 = vor.u32 %v5673_v4, %v5670_v47  ;;  %v5701_v51 = vshll.u32 %v15446_v39, 16  ;;  %v15444_v63 = vpack.c.bf16 %v5417_v20, %v5417_v20  ;;  %v5422_v52 = vmul.f32 %v5386_v22, %v23323_v25  ;;  %v20688_v0 = vpop.f32.mrb[27].mxu1  ;;  %v23324_v47 = vld [vmem:[#allocation25_spill] sm:$0xff] }
 0x381   : > { %v5696_v61 = vrot.slane %v5694_v38, 4  ;;  %v5384_v8 = vmax.f32 %v5348_v43, 0.0  ;;  %v5700_v42 = vrot.slane %v5698_v59, 6  ;;  %v5351_v39 = vadd.f32 %v17617_v56, %v20578_v19 }
 0x382   : > { %v5675_v33 = vsel %vm19234_vm11, %v5666_v28, %v5674_v37  ;;  %v5676_v58 = vrot.slane %v5674_v37, 4  ;;  %v5703_v11 = vrot.slane %v5701_v51, 7  ;;  %v5678_v57 = vshrl.u32 %v15444_v63, 16 }
 0x383   : > { %5958 = vst [vmem:[#allocation3 + $0x38] sm:$0xf] %v5675_v33  ;;  %v5681_v12 = vshll.u32 %v15444_v63, 16  ;;  %v15449_v32 = vpack.c.bf16 %v5422_v52, %v5422_v52  ;;  %v5420_v4 = vmul.f32 %v5384_v8, %v23324_v47  ;;  %v5349_v20 = vadd.f32 %v17618_v13, %v20578_v19  ;;  %v23325_v47 = vld [vmem:[#allocation28_spill] sm:$0xff] }
 0x384   : > { %v5704_v22 = vor.u32 %v5703_v11, %v5700_v42  ;;  %v5680_v25 = vrot.slane %v5678_v57, 6  ;;  %v6156_v44 = vshll.u32 %v20686_v34, 16  ;;  %v5387_v33 = vmax.f32 %v5351_v39, 0.0 }
 0x385   : > { %v5683_v16 = vrot.slane %v5681_v12, 7  ;;  %v5728_v28 = vshrl.u32 %v15449_v32, 16  ;;  %v5731_v37 = vshll.u32 %v15449_v32, 16  ;;  %v15447_v43 = vpack.c.bf16 %v5420_v4, %v5420_v4  ;;  %v20696_v59 = vpop.f32.mrb[28].mxu1  ;;  %v20702_v12 = vld [vmem:[#allocation3 + $0x10] sm:$0xff]  }
 0x386   : > { %v5705_v51 = vsel %vm19234_vm11, %v5696_v61, %v5704_v22  ;;  %v5706_v63 = vrot.slane %v5704_v22, 4  ;;  %v5385_v8 = vmax.f32 %v5349_v20, 0.0  ;;  %v20700_v56 = vpop.f32.mrb[29].mxu1  ;;  %v5423_v61 = vmul.f32 %v5387_v33, %v23325_v47  ;;  %v23326_v22 = vld [vmem:[#allocation26_spill] sm:$0xff] }
 0x387   : > { %v5684_v52 = vor.u32 %v5683_v16, %v5680_v25  ;;  %5961 = vst [vmem:[#allocation3 + $0x44] sm:$0xf] %v5705_v51  ;;  %v5730_v13 = vrot.slane %v5728_v28, 6  ;;  %v5733_v42 = vrot.slane %v5731_v37, 7  ;;  %v5708_v11 = vshrl.u32 %v15447_v43, 16  ;;  %v20704_v32 = vpop.f32.mrb[30].mxu1 }
 0x388   : > { %v5711_v57 = vshll.u32 %v15447_v43, 16  ;;  %v5421_v16 = vmul.f32 %v5385_v8, %v23326_v22  ;;  %v20710_v25 = vpop.f32.mrb[31].mxu1  ;;  %v6158_v51 = vrot.slane %v6156_v44, 1  ;;  %v15450_v45 = vpack.c.bf16 %v5423_v61, %v5423_v61  ;;  %v18607_v44 = vld [vmem:[%s23094_s6 + $0x8] sm:$0xff]   ;;  %v18605_v61 = vld [vmem:[#allocation3 + $0x18] sm:$0xff]  }
 0x389   : > { %v5685_v4 = vsel %vm19234_vm11, %v5676_v58, %v5684_v52  ;;  %v5686_v39 = vrot.slane %v5684_v52, 4  ;;  %v5734_v20 = vor.u32 %v5733_v42, %v5730_v13  ;;  %v5710_v28 = vrot.slane %v5708_v11, 6 }
 0x38a   : > { %5959 = vst [vmem:[#allocation3 + $0x3c] sm:$0xf] %v5685_v4  ;;  %v5713_v37 = vrot.slane %v5711_v57, 7  ;;  %v15448_v10 = vpack.c.bf16 %v5421_v16, %v5421_v16  ;;  %v6160_v41 = vshrl.u32 %v20686_v34, 16  ;;  %v6159_v33 = vsel %vm1773_vm12, %v20592_v54, %v6158_v51 }
 0x38b   : > { %v5695_v43 = vsel %vm19234_vm11, %v5686_v39, %v5694_v38  ;;  %v5736_v58 = vrot.slane %v5734_v20, 4  ;;  %v6164_v8 = vshll.u32 %v20702_v12, 16  ;;  %v5738_v4 = vshrl.u32 %v15450_v45, 16  ;;  %16751 = vmatprep.mubr.bf16.mxu0 %v6159_v33 }
 0x38c   : > { %5960 = vst [vmem:[#allocation3 + $0x40] sm:$0xf] %v5695_v43  ;;  %v5714_v52 = vor.u32 %v5713_v37, %v5710_v28  ;;  %v5741_v13 = vshll.u32 %v15450_v45, 16  ;;  %v5718_v42 = vshrl.u32 %v15448_v10, 16  ;;  %v5721_v11 = vshll.u32 %v15448_v10, 16 }
 0x38d   : > { %v6162_v57 = vor.u32 %v6160_v41, %v6158_v51  ;;  %v6166_v39 = vrot.slane %v6164_v8, 1  ;;  %v20723_v16 = vpop.f32.mrb[32].mxu1  ;;  %v5740_v54 = vrot.slane %v5738_v4, 6  ;;  %v17619_v43 = vadd.f32 %v20649_v2, %v20541_v48 }
 0x38e   : > { %v5715_v38 = vsel %vm19234_vm11, %v5706_v63, %v5714_v52  ;;  %v5716_v34 = vrot.slane %v5714_v52, 4  ;;  %v5743_v28 = vrot.slane %v5741_v13, 7  ;;  %v5720_v45 = vrot.slane %v5718_v42, 6  ;;  %v20732_v63 = vpop.f32.mrb[33].mxu1  ;;  %v18610_v42 = vld [vmem:[%s23094_s6 + $0x10] sm:$0xff]  }
 0x38f   : > { %5962 = vst [vmem:[#allocation3 + $0x48] sm:$0xf] %v5715_v38  ;;  %v5723_v37 = vrot.slane %v5721_v11, 7  ;;  %v6167_v10 = vsel %vm1773_vm12, %v6162_v57, %v6166_v39  ;;  %v17620_v33 = vadd.f32 %v20651_v55, %v20543_v46  ;;  %v17621_v41 = vadd.f32 %v20658_v9, %v20545_v3  ;;  %v20739_v13 = vpop.f32.mrb[34].mxu1 }
 0x390   : > { %v20734_v51 = vor.u32 %v5743_v28, %v5740_v54  ;;  %16752 = vmatmul.mubr.bf16.vlgmr.msra.gmra.mrb[72].mxu0 %v6167_v10  ;;  %v17622_v8 = vadd.f32 %v20662_v17, %v20547_v24  ;;  %v6168_v4 = vshrl.u32 %v20702_v12, 16  ;;  %v5354_v48 = vadd.f32 %v17619_v43, %v20578_v19  ;;  %v20745_v55 = vpop.f32.mrb[35].mxu1  ;;  %v23328_v43 = vld [vmem:[#allocation29_spill] sm:$0xff] }
 0x391   : > { %v5724_v52 = vor.u32 %v5723_v37, %v5720_v45  ;;  %16788 = vmatpush3.bf16.msra.mxu0 %v20530_v23  ;;  %v5352_v46 = vadd.f32 %v17620_v33, %v20578_v19  ;;  %v5355_v3 = vadd.f32 %v17621_v41, %v20578_v19  ;;  %v6172_v2 = vshll.u32 %v18605_v61, 16  ;;  %v20753_v23 = vld [vmem:[#allocation3 + $0x20] sm:$0xff]   ;;  %v23327_v37 = vld [vmem:[#allocation31_spill] sm:$0xff] }
 0x392   : > { %v5745_v9 = vsel %vm19234_vm11, %v5736_v58, %v20734_v51  ;;  %v5746_v24 = vrot.slane %v20734_v51, 4  ;;  %16789 = vmatprep.subr.bf16.mxu0 %v18607_v44  ;;  %v5390_v11 = vmax.f32 %v5354_v48, 0.0  ;;  %v5353_v58 = vadd.f32 %v17622_v8, %v20578_v19  ;;  %v23329_v41 = vld [vmem:[#allocation32_spill] sm:$0xff] }
 0x393   : > { %v5725_v17 = vsel %vm19234_vm11, %v5716_v34, %v5724_v52  ;;  %v5726_v12 = vrot.slane %v5724_v52, 4  ;;  %5965 = vst [vmem:[#allocation3 + $0x54] sm:$0xf] %v5745_v9  ;;  %v5388_v38 = vmax.f32 %v5352_v46, 0.0  ;;  %v5391_v57 = vmax.f32 %v5355_v3, 0.0 }
 0x394   : > { %5963 = vst [vmem:[#allocation3 + $0x4c] sm:$0xf] %v5725_v17  ;;  %v6170_v28 = vor.u32 %v6168_v4, %v6166_v39  ;;  %v6174_v34 = vrot.slane %v6172_v2, 1  ;;  %v6176_v45 = vshrl.u32 %v18605_v61, 16  ;;  %v5426_v10 = vmul.f32 %v5390_v11, %v23327_v37  ;;  %v18613_v39 = vld [vmem:[%s23094_s6 + $0x18] sm:$0xff]  }
 0x395   : > { %v5735_v54 = vsel %vm19234_vm11, %v5726_v12, %v5734_v20  ;;  %v5424_v33 = vmul.f32 %v5388_v38, %v23328_v43  ;;  %v5427_v52 = vmul.f32 %v5391_v57, %v23329_v41  ;;  %v5389_v9 = vmax.f32 %v5353_v58, 0.0  ;;  %16790 = vmatpush3.bf16.msra.mxu0 %v18607_v44  ;;  %v23330_v2 = vld [vmem:[#allocation30_spill] sm:$0xff] }
 0x396   : > { %5964 = vst [vmem:[#allocation3 + $0x50] sm:$0xf] %v5735_v54  ;;  %v6175_v48 = vsel %vm1773_vm12, %v6170_v28, %v6174_v34  ;;  %v6178_v46 = vor.u32 %v6176_v45, %v6174_v34  ;;  %v6180_v8 = vshll.u32 %v20753_v23, 16  ;;  %v17623_v20 = vadd.f32 %v20673_v7, %v20549_v21  ;;  %16791 = vmatprep.subr.bf16.mxu0 %v18610_v42 }
 0x397   : > { %v15453_v61 = vpack.c.bf16 %v5426_v10, %v5426_v10  ;;  %v15451_v4 = vpack.c.bf16 %v5424_v33, %v5424_v33  ;;  %v15454_v3 = vpack.c.bf16 %v5427_v52, %v5427_v52  ;;  %v5425_v17 = vmul.f32 %v5389_v9, %v23330_v2  ;;  %16755 = vmatprep.mubr.bf16.mxu0 %v6175_v48  ;;  %v18616_v10 = vld [vmem:[%s23094_s6 + $0x20] sm:$0xff]  }
 0x398   : > { %v6182_v44 = vrot.slane %v6180_v8, 1  ;;  %v5358_v12 = vadd.f32 %v17623_v20, %v20578_v19  ;;  %v17624_v11 = vadd.f32 %v20677_v15, %v20551_v50  ;;  %v17625_v21 = vadd.f32 %v20683_v36, %v20553_v35 }
 0x399   : > { %v5768_v7 = vshrl.u32 %v15453_v61, 16  ;;  %v5771_v38 = vshll.u32 %v15453_v61, 16  ;;  %v5748_v57 = vshrl.u32 %v15451_v4, 16  ;;  %v5751_v58 = vshll.u32 %v15451_v4, 16  ;;  %16792 = vmatpush3.bf16.msra.mxu0 %v18610_v42 }
 0x39a   : > { %v5778_v54 = vshrl.u32 %v15454_v3, 16  ;;  %v5781_v28 = vshll.u32 %v15454_v3, 16  ;;  %v15452_v34 = vpack.c.bf16 %v5425_v17, %v5425_v17  ;;  %v6183_v45 = vsel %vm1773_vm12, %v6178_v46, %v6182_v44  ;;  %16793 = vmatprep.subr.bf16.mxu0 %v18613_v39  ;;  %v18619_v46 = vld [vmem:[%s23094_s6 + $0x28] sm:$0xff]  }
 0x39b   : > { %v5770_v33 = vrot.slane %v5768_v7, 6  ;;  %v5773_v50 = vrot.slane %v5771_v38, 7  ;;  %v5750_v15 = vrot.slane %v5748_v57, 6  ;;  %v5753_v52 = vrot.slane %v5751_v58, 7  ;;  %16756 = vmatmul.mubr.bf16.gmra.mrb[76].mxu0 %v6183_v45  ;;  %v20794_v45 = vld [vmem:[#allocation3 + $0x28] sm:$0xff]  }
 0x39c   : > { %v5780_v35 = vrot.slane %v5778_v54, 6  ;;  %v5783_v36 = vrot.slane %v5781_v28, 7  ;;  %v5758_v9 = vshrl.u32 %v15452_v34, 16  ;;  %v5761_v48 = vshll.u32 %v15452_v34, 16 }
 0x39d   : > { %v5774_v42 = vor.u32 %v5773_v50, %v5770_v33  ;;  %v5754_v8 = vor.u32 %v5753_v52, %v5750_v15  ;;  %v5394_v20 = vmax.f32 %v5358_v12, 0.0  ;;  %v5356_v61 = vadd.f32 %v17624_v11, %v20578_v19  ;;  %16794 = vmatpush3.bf16.msra.mxu0 %v18613_v39  ;;  %v23331_v11 = vld [vmem:[#allocation35_spill] sm:$0xff]  ;;  %v23332_v52 = vld [vmem:[#allocation33_spill] sm:$0xff] }
 0x39e   : > { %v20785_v4 = vor.u32 %v5783_v36, %v5780_v35  ;;  %v5760_v3 = vrot.slane %v5758_v9, 6  ;;  %v5763_v17 = vrot.slane %v5761_v48, 7  ;;  %v5359_v7 = vadd.f32 %v17625_v21, %v20578_v19  ;;  %16795 = vmatprep.subr.bf16.mxu0 %v18616_v10  ;;  %v23333_v36 = vld [vmem:[#allocation36_spill] sm:$0xff]  ;;  %v18622_v48 = vld [vmem:[%s23094_s6 + $0x30] sm:$0xff]  }
 0x39f   : > { %v5776_v38 = vrot.slane %v5774_v42, 4  ;;  %v5755_v12 = vsel %vm19234_vm11, %v5746_v24, %v5754_v8  ;;  %v5756_v57 = vrot.slane %v5754_v8, 4  ;;  %v5430_v39 = vmul.f32 %v5394_v20, %v23331_v11  ;;  %v20810_v20 = vld [vmem:[#allocation3 + $0x30] sm:$0xff]  }
 0x3a0   : > { %5966 = vst [vmem:[#allocation3 + $0x58] sm:$0xf] %v5755_v12  ;;  %v5786_v58 = vrot.slane %v20785_v4, 4  ;;  %v5764_v54 = vor.u32 %v5763_v17, %v5760_v3  ;;  %v5392_v28 = vmax.f32 %v5356_v61, 0.0  ;;  %v5395_v34 = vmax.f32 %v5359_v7, 0.0 }
 0x3a1   : > { %v5785_v21 = vsel %vm19234_vm11, %v5776_v38, %v20785_v4  ;;  %v15457_v33 = vpack.c.bf16 %v5430_v39, %v5430_v39  ;;  %v17626_v51 = vadd.f32 %v20688_v0, %v20555_v40  ;;  %v6184_v24 = vshrl.u32 %v20753_v23, 16  ;;  %16796 = vmatpush3.bf16.msra.mxu0 %v18616_v10 }
 0x3a2   : > { %5969 = vst [vmem:[#allocation3 + $0x64] sm:$0xf] %v5785_v21  ;;  %v5765_v50 = vsel %vm19234_vm11, %v5756_v57, %v5764_v54  ;;  %v5766_v15 = vrot.slane %v5764_v54, 4  ;;  %v5428_v35 = vmul.f32 %v5392_v28, %v23332_v52  ;;  %v5431_v9 = vmul.f32 %v5395_v34, %v23333_v36  ;;  %16797 = vmatprep.subr.bf16.mxu0 %v18619_v46  ;;  %v23334_v21 = vld [vmem:[#allocation34_spill] sm:$0xff] }
 0x3a3   : > { %5967 = vst [vmem:[#allocation3 + $0x5c] sm:$0xf] %v5765_v50  ;;  %v5808_v8 = vshrl.u32 %v15457_v33, 16  ;;  %v5811_v40 = vshll.u32 %v15457_v33, 16  ;;  %v5357_v0 = vadd.f32 %v17626_v51, %v20578_v19  ;;  %v6186_v10 = vor.u32 %v6184_v24, %v6182_v44 }
 0x3a4   : > { %v5775_v61 = vsel %vm19234_vm11, %v5766_v15, %v5774_v42  ;;  %v15455_v3 = vpack.c.bf16 %v5428_v35, %v5428_v35  ;;  %v15458_v17 = vpack.c.bf16 %v5431_v9, %v5431_v9  ;;  %v6188_v7 = vshll.u32 %v20794_v45, 16  ;;  %v18626_v42 = vld [vmem:[%s23094_s6 + $0x38] sm:$0xff]  }
 0x3a5   : > { %5968 = vst [vmem:[#allocation3 + $0x60] sm:$0xf] %v5775_v61  ;;  %v5810_v38 = vrot.slane %v5808_v8, 6  ;;  %v5813_v12 = vrot.slane %v5811_v40, 7  ;;  %v5393_v57 = vmax.f32 %v5357_v0, 0.0  ;;  %v6192_v39 = vshrl.u32 %v20794_v45, 16  ;;  %16798 = vmatpush3.bf16.msra.mxu0 %v18619_v46 }
 0x3a6   : > { %v5788_v54 = vshrl.u32 %v15455_v3, 16  ;;  %v5791_v28 = vshll.u32 %v15455_v3, 16  ;;  %v5818_v19 = vshrl.u32 %v15458_v17, 16  ;;  %v5821_v44 = vshll.u32 %v15458_v17, 16  ;;  %16799 = vmatprep.subr.bf16.mxu0 %v18622_v48 }
 0x3a7   : > { %v5814_v34 = vor.u32 %v5813_v12, %v5810_v38  ;;  %v5429_v33 = vmul.f32 %v5393_v57, %v23334_v21  ;;  %v6190_v51 = vrot.slane %v6188_v7, 1  ;;  %v6196_v24 = vshll.u32 %v20810_v20, 16  ;;  %v20829_v38 = vld [vmem:[%s23094_s6 + $0x80] sm:$0xff]  }
 0x3a8   : > { %v5790_v50 = vrot.slane %v5788_v54, 6  ;;  %v5793_v15 = vrot.slane %v5791_v28, 7  ;;  %v5820_v35 = vrot.slane %v5818_v19, 6  ;;  %v5823_v9 = vrot.slane %v5821_v44, 7 }
 0x3a9   : > { %v5816_v46 = vrot.slane %v5814_v34, 4  ;;  %v15456_v8 = vpack.c.bf16 %v5429_v33, %v5429_v33  ;;  %v6191_v40 = vsel %vm1773_vm12, %v6186_v10, %v6190_v51  ;;  %v6194_v0 = vor.u32 %v6192_v39, %v6190_v51  ;;  %16800 = vmatpush3.bf16.msra.mxu0 %v18622_v48  ;;  %v20835_v39 = vld [vmem:[#allocation3 + $0x38] sm:$0xff]   ;;  %v20857_v51 = vld [vmem:[#allocation3 + $0x40] sm:$0xff]  }
 0x3aa   : > { %v5794_v61 = vor.u32 %v5793_v15, %v5790_v50  ;;  %v20822_v3 = vor.u32 %v5823_v9, %v5820_v35  ;;  %16759 = vmatprep.mubr.bf16.mxu0 %v6191_v40  ;;  %v6198_v17 = vrot.slane %v6196_v24, 1  ;;  %v17627_v7 = vadd.f32 %v20696_v59, %v20557_v62  ;;  %16801 = vmatprep.subr.bf16.mxu0 %v18626_v42  ;;  %v23335_v40 = vld [vmem:[#allocation39_spill] sm:$0xff] }
 0x3ab   : > { %v5798_v12 = vshrl.u32 %v15456_v8, 16  ;;  %v5801_v57 = vshll.u32 %v15456_v8, 16  ;;  %v17628_v10 = vadd.f32 %v20700_v56, %v20559_v14  ;;  %v17629_v48 = vadd.f32 %v20704_v32, %v20561_v30  ;;  %v20849_v32 = vld [vmem:[%s23093_s5] ss:$0 sm:$0xff] }
 0x3ac   : > { %v5795_v62 = vsel %vm19234_vm11, %v5786_v58, %v5794_v61  ;;  %v5796_v59 = vrot.slane %v5794_v61, 4  ;;  %v5825_v54 = vsel %vm19234_vm11, %v5816_v46, %v20822_v3  ;;  %v5826_v28 = vrot.slane %v20822_v3, 4  ;;  %v21021_v21 = vld [vmem:[#allocation3 + $0x60] sm:$0xff]  }
 0x3ad   : > { %5970 = vst [vmem:[#allocation3 + $0x68] sm:$0xf] %v5795_v62  ;;  %5973 = vst [vmem:[#allocation3 + $0x74] sm:$0xf] %v5825_v54  ;;  %v5800_v14 = vrot.slane %v5798_v12, 6  ;;  %v5803_v56 = vrot.slane %v5801_v57, 7  ;;  %v6199_v30 = vsel %vm1773_vm12, %v6194_v0, %v6198_v17  ;;  %v5362_v4 = vadd.f32 %v20849_v32, %v17627_v7  ;;  %16802 = vmatpush3.bf16.msra.mxu0 %v18626_v42 }
 0x3ae   : > { %16760 = vmatmul.mubr.bf16.gmra.mrb[80].mxu0 %v6199_v30  ;;  %v5360_v58 = vadd.f32 %v20849_v32, %v17628_v10  ;;  %v5363_v19 = vadd.f32 %v20849_v32, %v17629_v48  ;;  %v17630_v44 = vadd.f32 %v20710_v25, %v20563_v31  ;;  %v6200_v33 = vshrl.u32 %v20810_v20, 16  ;;  %16839 = vmatprep.subr.bf16.mxu0 %v20829_v38  ;;  %v23336_v7 = vld [vmem:[#allocation37_spill] sm:$0xff]  ;;  %v23337_v57 = vld [vmem:[#allocation40_spill] sm:$0xff] }
 0x3af   : > { %v5804_v24 = vor.u32 %v5803_v56, %v5800_v14  ;;  %v5398_v50 = vmax.f32 %v5362_v4, 0.0  ;;  %v6204_v15 = vshll.u32 %v20835_v39, 16  ;;  %v6208_v42 = vshrl.u32 %v20835_v39, 16  ;;  %v23338_v4 = vld [vmem:[#allocation38_spill] sm:$0xff] }
 0x3b0   : > { %v5396_v35 = vmax.f32 %v5360_v58, 0.0  ;;  %v5399_v9 = vmax.f32 %v5363_v19, 0.0  ;;  %v5361_v46 = vadd.f32 %v20849_v32, %v17630_v44  ;;  %v6202_v8 = vor.u32 %v6200_v33, %v6198_v17 }
 0x3b1   : > { %v5805_v31 = vsel %vm19234_vm11, %v5796_v59, %v5804_v24  ;;  %v5806_v25 = vrot.slane %v5804_v24, 4  ;;  %v5434_v0 = vmul.f32 %v5398_v50, %v23335_v40  ;;  %v6206_v61 = vrot.slane %v6204_v15, 1  ;;  %v21018_v40 = vld [vmem:[#allocation3 + $0x8] sm:$0xff]  }
 0x3b2   : > { %5971 = vst [vmem:[#allocation3 + $0x6c] sm:$0xf] %v5805_v31  ;;  %v5432_v12 = vmul.f32 %v5396_v35, %v23336_v7  ;;  %v5435_v10 = vmul.f32 %v5399_v9, %v23337_v57  ;;  %v5397_v48 = vmax.f32 %v5361_v46, 0.0  ;;  %v6212_v62 = vshll.u32 %v20857_v51, 16  ;;  %v21001_v7 = vld [vmem:[#allocation3 + $0x50] sm:$0xff]  }
 0x3b3   : > { %v5815_v54 = vsel %vm19234_vm11, %v5806_v25, %v5814_v34  ;;  %v15461_v14 = vpack.c.bf16 %v5434_v0, %v5434_v0  ;;  %v6207_v17 = vsel %vm1773_vm12, %v6202_v8, %v6206_v61  ;;  %v6210_v56 = vor.u32 %v6208_v42, %v6206_v61 }
 0x3b4   : > { %5972 = vst [vmem:[#allocation3 + $0x70] sm:$0xf] %v5815_v54  ;;  %v15459_v59 = vpack.c.bf16 %v5432_v12, %v5432_v12  ;;  %v15462_v30 = vpack.c.bf16 %v5435_v10, %v5435_v10  ;;  %v5433_v58 = vmul.f32 %v5397_v48, %v23338_v4  ;;  %16763 = vmatprep.mubr.bf16.mxu0 %v6207_v17  ;;  %v6214_v19 = vrot.slane %v6212_v62, 1 }
 0x3b5   : > { %v5848_v44 = vshrl.u32 %v15461_v14, 16  ;;  %v5851_v33 = vshll.u32 %v15461_v14, 16  ;;  %v17631_v24 = vadd.f32 %v20723_v16, %v20565_v26  ;;  %v17632_v50 = vadd.f32 %v20732_v63, %v20567_v5  ;;  %v20884_v14 = vld [vmem:[#allocation3 + $0x48] sm:$0xff]  }
 0x3b6   : > { %v5828_v34 = vshrl.u32 %v15459_v59, 16  ;;  %v5831_v15 = vshll.u32 %v15459_v59, 16  ;;  %v5858_v35 = vshrl.u32 %v15462_v30, 16  ;;  %v5861_v9 = vshll.u32 %v15462_v30, 16 }
 0x3b7   : > { %v5850_v42 = vrot.slane %v5848_v44, 6  ;;  %v5853_v46 = vrot.slane %v5851_v33, 7  ;;  %v15460_v8 = vpack.c.bf16 %v5433_v58, %v5433_v58  ;;  %v6215_v31 = vsel %vm1773_vm12, %v6210_v56, %v6214_v19 }
 0x3b8   : > { %v5830_v25 = vrot.slane %v5828_v34, 6  ;;  %v5833_v0 = vrot.slane %v5831_v15, 7  ;;  %v5860_v61 = vrot.slane %v5858_v35, 6  ;;  %v5863_v12 = vrot.slane %v5861_v9, 7  ;;  %16764 = vmatmul.mubr.bf16.gmra.mrb[84].mxu0 %v6215_v31  ;;  %v23340_v35 = vld [vmem:[#allocation41_spill] sm:$0xff] }
 0x3b9   : > { %v5854_v10 = vor.u32 %v5853_v46, %v5850_v42  ;;  %v5838_v48 = vshrl.u32 %v15460_v8, 16  ;;  %v5841_v26 = vshll.u32 %v15460_v8, 16  ;;  %v5366_v16 = vadd.f32 %v20849_v32, %v17631_v24 }
 0x3ba   : > { %v5834_v5 = vor.u32 %v5833_v0, %v5830_v25  ;;  %v20879_v63 = vor.u32 %v5863_v12, %v5860_v61  ;;  %v5364_v62 = vadd.f32 %v20849_v32, %v17632_v50  ;;  %v17633_v54 = vadd.f32 %v20739_v13, %v20569_v1  ;;  %v23339_v50 = vld [vmem:[#allocation43_spill] sm:$0xff] }
 0x3bb   : > { %v5856_v17 = vrot.slane %v5854_v10, 4  ;;  %v5840_v56 = vrot.slane %v5838_v48, 6  ;;  %v5843_v59 = vrot.slane %v5841_v26, 7  ;;  %v5402_v30 = vmax.f32 %v5366_v16, 0.0  ;;  %v20904_v26 = vld [vmem:[#allocation3 + $0x50] sm:$0xff]  }
 0x3bc   : > { %v5835_v58 = vsel %vm19234_vm11, %v5826_v28, %v5834_v5  ;;  %v5836_v44 = vrot.slane %v5834_v5, 4  ;;  %v5866_v33 = vrot.slane %v20879_v63, 4  ;;  %v5400_v24 = vmax.f32 %v5364_v62, 0.0  ;;  %v23341_v5 = vld [vmem:[#allocation44_spill] sm:$0xff] }
 0x3bd   : > { %5974 = vst [vmem:[#allocation3 + $0x78] sm:$0xf] %v5835_v58  ;;  %v5865_v1 = vsel %vm19234_vm11, %v5856_v17, %v20879_v63  ;;  %v5844_v13 = vor.u32 %v5843_v59, %v5840_v56  ;;  %v5438_v34 = vmul.f32 %v5402_v30, %v23339_v50  ;;  %v5367_v15 = vadd.f32 %v20849_v32, %v17633_v54  ;;  %v20911_v58 = vld [vmem:[#allocation3 + $0x58] sm:$0xff]  }
 0x3be   : > { %5977 = vst [vmem:[#allocation3 + $0x84] sm:$0xf] %v5865_v1  ;;  %v5436_v3 = vmul.f32 %v5400_v24, %v23340_v35  ;;  %v17634_v28 = vadd.f32 %v20745_v55, %v20571_v53  ;;  %v6216_v9 = vshrl.u32 %v20857_v51, 16  ;;  %v6220_v42 = vshll.u32 %v20884_v14, 16  ;;  %v23342_v24 = vld [vmem:[#allocation42_spill] sm:$0xff] }
 0x3bf   : > { %v5845_v46 = vsel %vm19234_vm11, %v5836_v44, %v5844_v13  ;;  %v5846_v8 = vrot.slane %v5844_v13, 4  ;;  %v15465_v31 = vpack.c.bf16 %v5438_v34, %v5438_v34  ;;  %v5403_v25 = vmax.f32 %v5367_v15, 0.0  ;;  %v20915_v34 = vld [vmem:[#allocation3 + $0x60] sm:$0xff]  }
 0x3c0   : > { %5975 = vst [vmem:[#allocation3 + $0x7c] sm:$0xf] %v5845_v46  ;;  %v15463_v0 = vpack.c.bf16 %v5436_v3, %v5436_v3  ;;  %v5365_v61 = vadd.f32 %v20849_v32, %v17634_v28  ;;  %v6218_v12 = vor.u32 %v6216_v9, %v6214_v19  ;;  %v6222_v48 = vrot.slane %v6220_v42, 1 }
 0x3c1   : > { %v5855_v53 = vsel %vm19234_vm11, %v5846_v8, %v5854_v10  ;;  %v5888_v55 = vshrl.u32 %v15465_v31, 16  ;;  %v5891_v16 = vshll.u32 %v15465_v31, 16  ;;  %v5439_v63 = vmul.f32 %v5403_v25, %v23341_v5  ;;  %v20991_v5 = vld [vmem:[#allocation3 + $0x40] sm:$0xff]  }
 0x3c2   : > { %5976 = vst [vmem:[#allocation3 + $0x80] sm:$0xf] %v5855_v53  ;;  %v5868_v62 = vshrl.u32 %v15463_v0, 16  ;;  %v5871_v54 = vshll.u32 %v15463_v0, 16  ;;  %v5401_v17 = vmax.f32 %v5365_v61, 0.0  ;;  %v6223_v56 = vsel %vm1773_vm12, %v6218_v12, %v6222_v48 }
 0x3c3   : > { %v5890_v59 = vrot.slane %v5888_v55, 6  ;;  %v5893_v30 = vrot.slane %v5891_v16, 7  ;;  %v15466_v32 = vpack.c.bf16 %v5439_v63, %v5439_v63  ;;  %16767 = vmatprep.mubr.bf16.mxu0 %v6223_v56  ;;  %v6224_v19 = vshrl.u32 %v20884_v14, 16 }
 0x3c4   : > { %v5870_v44 = vrot.slane %v5868_v62, 6  ;;  %v5873_v10 = vrot.slane %v5871_v54, 7  ;;  %v5437_v1 = vmul.f32 %v5401_v17, %v23342_v24  ;;  %v6228_v13 = vshll.u32 %v20904_v26, 16  ;;  %v20921_v62 = vld [vmem:[#allocation3 + $0x68] sm:$0xff]   ;;  %v5982_v54 = vld [vmem:[#allocation3 + $0x98] sm:$0x3] }
 0x3c5   : > { %v5894_v15 = vor.u32 %v5893_v30, %v5890_v59  ;;  %v5898_v3 = vshrl.u32 %v15466_v32, 16  ;;  %v5901_v28 = vshll.u32 %v15466_v32, 16  ;;  %v6226_v9 = vor.u32 %v6224_v19, %v6222_v48  ;;  %v20924_v30 = vld [vmem:[#allocation3 + $0x70] sm:$0xff]  }
 0x3c6   : > { %v5874_v42 = vor.u32 %v5873_v10, %v5870_v44  ;;  %v15464_v46 = vpack.c.bf16 %v5437_v1, %v5437_v1  ;;  %v6230_v8 = vrot.slane %v6228_v13, 1  ;;  %v6232_v31 = vshrl.u32 %v20904_v26, 16 }
 0x3c7   : > { %v5896_v25 = vrot.slane %v5894_v15, 4  ;;  %v5900_v0 = vrot.slane %v5898_v3, 6  ;;  %v5903_v61 = vrot.slane %v5901_v28, 7  ;;  %v6236_v12 = vshll.u32 %v20911_v58, 16 }
 0x3c8   : > { %v5875_v53 = vsel %vm19234_vm11, %v5866_v33, %v5874_v42  ;;  %v5876_v55 = vrot.slane %v5874_v42, 4  ;;  %v5878_v16 = vshrl.u32 %v15464_v46, 16  ;;  %v5881_v63 = vshll.u32 %v15464_v46, 16  ;;  %v20932_v46 = vld [vmem:[#allocation3 + $0x78] sm:$0xff]  }
 0x3c9   : > { %5978 = vst [vmem:[#allocation3 + $0x88] sm:$0xf] %v5875_v53  ;;  %v5904_v48 = vor.u32 %v5903_v61, %v5900_v0  ;;  %v6231_v17 = vsel %vm1773_vm12, %v6226_v9, %v6230_v8  ;;  %v6234_v56 = vor.u32 %v6232_v31, %v6230_v8  ;;  %v6238_v59 = vrot.slane %v6236_v12, 1 }
 0x3ca   : > { %v5880_v32 = vrot.slane %v5878_v16, 6  ;;  %v5883_v19 = vrot.slane %v5881_v63, 7  ;;  %16768 = vmatmul.mubr.bf16.gmra.mrb[88].mxu0 %v6231_v17  ;;  %v6240_v44 = vshrl.u32 %v20911_v58, 16  ;;  %v6244_v33 = vshll.u32 %v20915_v34, 16 }
 0x3cb   : > { %v5905_v10 = vsel %vm19234_vm11, %v5896_v25, %v5904_v48  ;;  %v5906_v1 = vrot.slane %v5904_v48, 4  ;;  %v6239_v13 = vsel %vm1773_vm12, %v6234_v56, %v6238_v59  ;;  %v6252_v42 = vshll.u32 %v20921_v62, 16 }
 0x3cc   : > { %5981 = vst [vmem:[#allocation3 + $0x94] sm:$0xf] %v5905_v10  ;;  %v5884_v3 = vor.u32 %v5883_v19, %v5880_v32  ;;  %16771 = vmatprep.mubr.bf16.mxu0 %v6239_v13  ;;  %v6242_v28 = vor.u32 %v6240_v44, %v6238_v59  ;;  %v6246_v9 = vrot.slane %v6244_v33, 1  ;;  %v6248_v0 = vshrl.u32 %v20915_v34, 16  ;;  %v20946_v59 = vld [vmem:[#allocation3 + $0x80] sm:$0xff]  }
 0x3cd   : > { %v5983_v31 = vsel %vm18969_vm4, %v5906_v1, %v5982_v54  ;;  %v6260_v12 = vshll.u32 %v20924_v30, 16  ;;  %v6254_v63 = vrot.slane %v6252_v42, 1  ;;  %v6268_v17 = vshll.u32 %v20932_v46, 16 }
 0x3ce   : > { %5984 = vst [vmem:[#allocation3 + $0x98] sm:$0x3] %v5983_v31  ;;  %v5885_v25 = vsel %vm19234_vm11, %v5876_v55, %v5884_v3  ;;  %v5886_v61 = vrot.slane %v5884_v3, 4  ;;  %v6247_v53 = vsel %vm1773_vm12, %v6242_v28, %v6246_v9  ;;  %v6250_v16 = vor.u32 %v6248_v0, %v6246_v9 }
 0x3cf   : > { %5979 = vst [vmem:[#allocation3 + $0x8c] sm:$0xf] %v5885_v25  ;;  %v6256_v56 = vshrl.u32 %v20921_v62, 16  ;;  %v6262_v55 = vrot.slane %v6260_v12, 1  ;;  %v6264_v19 = vshrl.u32 %v20924_v30, 16  ;;  %v6270_v44 = vrot.slane %v6268_v17, 1 }
 0x3d0   : > { %v5895_v48 = vsel %vm19234_vm11, %v5886_v61, %v5894_v15  ;;  %v6255_v54 = vsel %vm1773_vm12, %v6250_v16, %v6254_v63  ;;  %v6276_v10 = vshll.u32 %v20946_v59, 16  ;;  %v6272_v28 = vshrl.u32 %v20932_v46, 16  ;;  %v20962_v16 = vld [vmem:[#allocation3 + $0xc] sm:$0xf] }
 0x3d1   : > { %5980 = vst [vmem:[#allocation3 + $0x90] sm:$0xf] %v5895_v48  ;;  %v6258_v32 = vor.u32 %v6256_v56, %v6254_v63  ;;  %v6266_v33 = vor.u32 %v6264_v19, %v6262_v55  ;;  %v6280_v31 = vshrl.u32 %v20946_v59, 16  ;;  %v7119_v48 = vld [vmem:[#allocation3 + $0x8] sm:$0xe]  ;;  %v7687_v11 = vshll.u32 %v21001_v7, 16 }
 0x3d2   : > { %16772 = vmatmul.mubr.bf16.gmra.mrb[92].mxu0 %v6247_v53  ;;  %v6278_v9 = vrot.slane %v6276_v10, 1  ;;  %v6274_v42 = vor.u32 %v6272_v28, %v6270_v44  ;;  %v20966_v56 = vcombine.low %v7119_v48, %v20962_v16  ;;  %v7702_v47 = vshrl.u32 %v21021_v21, 16 }
 0x3d3   : > { %16775 = vmatprep.mubr.bf16.mxu0 %v6255_v54  ;;  %v6263_v1 = vsel %vm1773_vm12, %v6258_v32, %v6262_v55  ;;  %v6271_v13 = vsel %vm1773_vm12, %v6266_v33, %v6270_v44  ;;  %v20968_v55 = vld [vmem:[#allocation3 + $0x10] sm:$0xff]   ;;  %v20970_v32 = vld [vmem:[#allocation3 + $0x18] sm:$0xff]   ;;  %v20973_v44 = vld [vmem:[#allocation3 + $0x20] sm:$0xff]   ;;  %v7689_v37 = vrot.slane %v7687_v11, 2  ;;  %v7705_v29 = vshll.u32 %v21021_v21, 16 }
 0x3d4   : > { %v6282_v25 = vor.u32 %v6280_v31, %v6278_v9  ;;  %v6279_v61 = vsel %vm1773_vm12, %v6274_v42, %v6278_v9  ;;  %v20975_v33 = vld [vmem:[#allocation3 + $0x28] sm:$0xff]   ;;  %v7604_v10 = vshrl.u32 %v20966_v56, 16  ;;  %v7615_v28 = vshll.u32 %v20968_v55, 16 }
 0x3d5   : > { %v7621_v9 = vshrl.u32 %v20970_v32, 16  ;;  %v7639_v24 = vshrl.u32 %v20975_v33, 16 }
 0x3d6   : > { %v20950_v15 = vld [vmem:[#allocation3 + $0x88] sm:$0xff]   ;;  %v7606_v42 = vrot.slane %v7604_v10, 1 }
 0x3d7   : > { %v6284_v3 = vshll.u32 %v20950_v15, 16  ;;  %v6288_v63 = vshrl.u32 %v20950_v15, 16  ;;  %v21064_v60 = vld [vmem:[#allocation3 + $0x88] sm:$0xff]  }
 0x3d8   : > { %v20956_v8 = vld [vmem:[#allocation3 + $0x90] ss:$0 sps:$4 sm:$0x11]   ;;  %23353 = vst [vmem:[#allocation55_spill] sm:$0xff] %v21064_v60 }
 0x3d9   : > { %v6286_v0 = vrot.slane %v6284_v3, 1  ;;  %v6292_v12 = vshll.u32 %v20956_v8, 16  ;;  %v7612_v3 = vshrl.u32 %v20968_v55, 16  ;;  %v21077_v6 = vld [vmem:[#allocation3 + $0x90] sm:$0xff]  }
 0x3da   : > { %16776 = vmatmul.mubr.bf16.gmra.mrb[96].mxu0 %v6263_v1  ;;  %v7607_v1 = vshll.u32 %v20966_v56, 16  ;;  %23356 = vst [vmem:[#allocation57_spill] sm:$0xff] %v21077_v6 }
 0x3db   : > { %16779 = vmatprep.mubr.bf16.mxu0 %v6271_v13  ;;  %v6287_v53 = vsel %vm1773_vm12, %v6282_v25, %v6286_v0  ;;  %v6290_v17 = vor.u32 %v6288_v63, %v6286_v0  ;;  %v6294_v54 = vrot.slane %v6292_v12, 1  ;;  %v20979_v13 = vld [vmem:[#allocation3 + $0x30] sm:$0xff]   ;;  %v7614_v0 = vrot.slane %v7612_v3, 1  ;;  %v20986_v63 = vld [vmem:[#allocation3 + $0x38] sm:$0xff]  }
 0x3dc   : > { %v7609_v31 = vrot.slane %v7607_v1, 2  ;;  %v7617_v25 = vrot.slane %v7615_v28, 2  ;;  %v7624_v12 = vshll.u32 %v20970_v32, 16  ;;  %v7642_v1 = vshll.u32 %v20975_v33, 16 }
 0x3dd   : > { %v6295_v19 = vsel %vm1773_vm12, %v6290_v17, %v6294_v54  ;;  %v7630_v17 = vshrl.u32 %v20973_v44, 16  ;;  %v7633_v54 = vshll.u32 %v20973_v44, 16  ;;  %v7648_v3 = vshrl.u32 %v20979_v13, 16 }
 0x3de   : > { %v7610_v48 = vor.u32 %v7609_v31, %v7606_v42  ;;  %v7618_v10 = vor.u32 %v7617_v25, %v7614_v0  ;;  %v7651_v35 = vshll.u32 %v20979_v13, 16  ;;  %v20996_v42 = vld [vmem:[#allocation3 + $0x48] sm:$0xff]   ;;  %v7644_v4 = vrot.slane %v7642_v1, 2 }
 0x3df   : > { %v7632_v28 = vrot.slane %v7630_v17, 1  ;;  %v7650_v57 = vrot.slane %v7648_v3, 1  ;;  %v7660_v17 = vshll.u32 %v20986_v63, 16  ;;  %v7669_v1 = vshll.u32 %v20991_v5, 16 }
 0x3e0   : > { %v20999_v31 = vsel %vm3237_vm14, %v7610_v48, %v7618_v10  ;;  %v7653_v25 = vrot.slane %v7651_v35, 2  ;;  %v7675_v36 = vshrl.u32 %v20996_v42, 16 }
 0x3e1   : > { %23345 = vst [vmem:[#allocation47_spill] sm:$0xff] %v20999_v31 }
 0x3e2   : > { %16780 = vmatmul.mubr.bf16.gmra.mrb[100].mxu0 %v6279_v61  ;;  %v7623_v61 = vrot.slane %v7621_v9, 1  ;;  %v7635_v9 = vrot.slane %v7633_v54, 2  ;;  %v21008_v54 = vld [vmem:[#allocation3 + $0x58] sm:$0xff]   ;;  %v7654_v3 = vor.u32 %v7653_v25, %v7650_v57  ;;  %v21031_v57 = vld [vmem:[#allocation3 + $0x68] sm:$0xff]   ;;  %v7677_v52 = vrot.slane %v7675_v36, 1 }
 0x3e3   : > { %16783 = vmatprep.mubr.bf16.mxu0 %v6287_v53  ;;  %v23344_v53 = vld [vmem:[#allocation46_spill] sm:$0xff]  ;;  %v7693_v2 = vshrl.u32 %v21008_v54, 16  ;;  %v7696_v41 = vshll.u32 %v21008_v54, 16  ;;  %v21053_v36 = vld [vmem:[#allocation3 + $0x78] sm:$0xff]  }
 0x3e4   : > { %v7636_v0 = vor.u32 %v7635_v9, %v7632_v28  ;;  %v7662_v9 = vrot.slane %v7660_v17, 2  ;;  %v7678_v17 = vshll.u32 %v20996_v42, 16 }
 0x3e5   : > { %v7695_v22 = vrot.slane %v7693_v2, 1  ;;  %v7704_v2 = vrot.slane %v7702_v47, 1 }
 0x3ea   : > { %16784 = vmatmul.mubr.bf16.gmra.mrb[104].mxu0 %v6295_v19  ;;  %v7626_v19 = vrot.slane %v7624_v12, 2  ;;  %v7657_v12 = vshrl.u32 %v20986_v63, 16 }
 0x3eb   : > { %16803 = vmatprep.mubr.bf16.mxu0 %v23344_v53  ;;  %v7641_v53 = vrot.slane %v7639_v24, 1  ;;  %v18629_v24 = vld [vmem:[%s23094_s6 + $0x88] sm:$0xff]  }
 0x3ec   : > { %v7627_v50 = vor.u32 %v7626_v19, %v7623_v61  ;;  %v7666_v19 = vshrl.u32 %v20991_v5, 16  ;;  %v7659_v28 = vrot.slane %v7657_v12, 1 }
 0x3ed   : > { %v7645_v61 = vor.u32 %v7644_v4, %v7641_v53  ;;  %v7671_v53 = vrot.slane %v7669_v1, 2 }
 0x3ee   : > { %v21011_v48 = vsel %vm3237_vm14, %v7618_v10, %v7627_v50  ;;  %v21016_v35 = vsel %vm3237_vm14, %v7627_v50, %v7636_v0  ;;  %v7668_v4 = vrot.slane %v7666_v19, 1  ;;  %v21028_v50 = vld [vmem:[#allocation3 + $0x10] sm:$0xff]   ;;  %v7663_v12 = vor.u32 %v7662_v9, %v7659_v28 }
 0x3ef   : > { %23346 = vst [vmem:[#allocation48_spill] sm:$0xff] %v21011_v48  ;;  %23347 = vst [vmem:[#allocation49_spill] sm:$0xff] %v21016_v35  ;;  %v21024_v10 = vsel %vm3237_vm14, %v7636_v0, %v7645_v61  ;;  %v21034_v25 = vsel %vm3237_vm14, %v7645_v61, %v7654_v3  ;;  %v7684_v0 = vshrl.u32 %v21001_v7, 16  ;;  %v18630_v19 = vld [vmem:[%s23094_s6 + $0x90] sm:$0xff]   ;;  %v7680_v28 = vrot.slane %v7678_v17, 2  ;;  %v18631_v17 = vld [vmem:[%s23094_s6 + $0x98] sm:$0xff]  }
 0x3f0   : > { %23348 = vst [vmem:[#allocation50_spill] sm:$0xff] %v21024_v10  ;;  %23349 = vst [vmem:[#allocation51_spill] sm:$0xff] %v21034_v25  ;;  %v7672_v1 = vor.u32 %v7671_v53, %v7668_v4  ;;  %v21046_v61 = vsel %vm3237_vm14, %v7654_v3, %v7663_v12  ;;  %v7698_v53 = vrot.slane %v7696_v41, 2  ;;  %v7711_v3 = vshrl.u32 %v21031_v57, 16 }
 0x3f1   : > { %23350 = vst [vmem:[#allocation52_spill] sm:$0xff] %v21046_v61  ;;  %v7686_v9 = vrot.slane %v7684_v0, 1  ;;  %v7681_v4 = vor.u32 %v7680_v28, %v7677_v52  ;;  %v7714_v0 = vshll.u32 %v21031_v57, 16  ;;  %v7707_v28 = vrot.slane %v7705_v29, 2 }
 0x3f2   : > { %16804 = vmatmul.mubr.bf16.vlgmr.msra.gmra.mrb[72].mxu0 %v21018_v40  ;;  %v21050_v43 = vsel %vm3237_vm14, %v7663_v12, %v7672_v1  ;;  %v21060_v12 = vld [vmem:[#allocation3 + $0x80] sm:$0xff]   ;;  %v7699_v52 = vor.u32 %v7698_v53, %v7695_v22  ;;  %v7713_v27 = vrot.slane %v7711_v3, 1  ;;  %v7732_v53 = vshll.u32 %v21053_v36, 16 }
 0x3f3   : > { %16840 = vmatpush3.bf16.msra.mxu0 %v20829_v38  ;;  %16807 = vmatprep.mubr.bf16.mxu0 %v21028_v50  ;;  %v21041_v38 = vld [vmem:[#allocation3 + $0x70] sm:$0xff]   ;;  %23351 = vst [vmem:[#allocation53_spill] sm:$0xff] %v21050_v43  ;;  %23352 = vst [vmem:[#allocation54_spill] sm:$0xff] %v21060_v12  ;;  %v7690_v11 = vor.u32 %v7689_v37, %v7686_v9  ;;  %v21067_v41 = vsel %vm3237_vm14, %v7672_v1, %v7681_v4  ;;  %v7716_v47 = vrot.slane %v7714_v0, 2 }
 0x3f4   : > { %16841 = vmatprep.subr.bf16.mxu0 %v18629_v24  ;;  %23354 = vst [vmem:[#allocation56_spill] sm:$0xff] %v21067_v41  ;;  %v7723_v9 = vshll.u32 %v21041_v38, 16  ;;  %v7708_v29 = vor.u32 %v7707_v28, %v7704_v2  ;;  %v7729_v1 = vshrl.u32 %v21053_v36, 16  ;;  %v7734_v2 = vrot.slane %v7732_v53, 2 }
 0x3f5   : > { %v21073_v49 = vsel %vm3237_vm14, %v7681_v4, %v7690_v11  ;;  %v21080_v22 = vsel %vm3237_vm14, %v7690_v11, %v7699_v52  ;;  %v18632_v4 = vld [vmem:[%s23094_s6 + $0xa0] sm:$0xff]   ;;  %v7717_v3 = vor.u32 %v7716_v47, %v7713_v27  ;;  %v7747_v28 = vshrl.u32 %v21064_v60, 16 }
 0x3f6   : > { %23355 = vst [vmem:[#allocation58_spill] sm:$0xff] %v21073_v49  ;;  %23357 = vst [vmem:[#allocation60_spill] sm:$0xff] %v21080_v22  ;;  %v7725_v0 = vrot.slane %v7723_v9, 2  ;;  %v7731_v11 = vrot.slane %v7729_v1, 1  ;;  %v7750_v9 = vshll.u32 %v21064_v60, 16  ;;  %v7756_v61 = vshrl.u32 %v21077_v6, 16 }
 0x3f7   : > { %16842 = vmatpush3.bf16.msra.mxu0 %v18629_v24  ;;  %v7720_v24 = vshrl.u32 %v21041_v38, 16  ;;  %v21094_v22 = vsel %vm3237_vm14, %v7708_v29, %v7717_v3  ;;  %v7749_v47 = vrot.slane %v7747_v28, 1  ;;  %v8078_v28 = vrot.slane %v20973_v44, 2 }
 0x3f8   : > { %16843 = vmatprep.subr.bf16.mxu0 %v18630_v19  ;;  %23359 = vst [vmem:[#allocation59_spill] sm:$0xff] %v21094_v22  ;;  %v7735_v27 = vor.u32 %v7734_v2, %v7731_v11 }
 0x3f9   : > { %v7722_v37 = vrot.slane %v7720_v24, 1  ;;  %v21090_v24 = vsel %vm3237_vm14, %v7699_v52, %v7708_v29  ;;  %v18633_v52 = vld [vmem:[%s23094_s6 + $0xa8] sm:$0xff]  }
 0x3fa   : > { %16808 = vmatmul.mubr.bf16.gmra.mrb[76].mxu0 %v21069_v18  ;;  %23358 = vst [vmem:[#allocation62_spill] sm:$0xff] %v21090_v24 }
 0x3fb   : > { %16811 = vmatprep.mubr.bf16.mxu0 %v20753_v23  ;;  %16844 = vmatpush3.bf16.msra.mxu0 %v18630_v19  ;;  %v7738_v23 = vshrl.u32 %v21060_v12, 16  ;;  %v7741_v19 = vshll.u32 %v21060_v12, 16  ;;  %v7726_v49 = vor.u32 %v7725_v0, %v7722_v37  ;;  %v7759_v37 = vshll.u32 %v21077_v6, 16 }
 0x3fc   : > { %16845 = vmatprep.subr.bf16.mxu0 %v18631_v17  ;;  %v7758_v0 = vrot.slane %v7756_v61, 1  ;;  %v18634_v61 = vld [vmem:[%s23094_s6 + $0xb0] sm:$0xff]  }
 0x3fd   : > { %v7740_v41 = vrot.slane %v7738_v23, 1  ;;  %v7743_v43 = vrot.slane %v7741_v19, 2  ;;  %v21102_v1 = vsel %vm3237_vm14, %v7717_v3, %v7726_v49  ;;  %v21106_v53 = vsel %vm3237_vm14, %v7726_v49, %v7735_v27  ;;  %v8052_v23 = vld [vmem:[#allocation3 + $0x8] sm:$0xc] }
 0x3fe   : > { %23360 = vst [vmem:[#allocation61_spill] sm:$0xff] %v21102_v1  ;;  %23361 = vst [vmem:[#allocation45_spill] sm:$0xff] %v21106_v53  ;;  %v7761_v11 = vrot.slane %v7759_v37, 2  ;;  %v14893_v2 = vcombine.low %v8052_v23, %v20962_v16  ;;  %v8076_v49 = vrot.slane %v20970_v32, 2  ;;  %v8080_v16 = vrot.slane %v20975_v33, 2 }
 0x3ff   : > { %16846 = vmatpush3.bf16.msra.mxu0 %v18631_v17  ;;  %v7744_v29 = vor.u32 %v7743_v43, %v7740_v41  ;;  %v7752_v17 = vrot.slane %v7750_v9, 2  ;;  %v8074_v41 = vrot.slane %v20968_v55, 2  ;;  %v8084_v23 = vrot.slane %v20986_v63, 2 }
 0x400   : > { %16847 = vmatprep.subr.bf16.mxu0 %v18632_v4  ;;  %v8073_v3 = vrot.slane %v14893_v2, 2  ;;  %v21138_v37 = vsel %vm3712_vm15, %v8076_v49, %v8078_v28  ;;  %v18635_v2 = vld [vmem:[%s23094_s6 + $0xb8] sm:$0xff]  }
 0x401   : > { %v21110_v19 = vsel %vm3237_vm14, %v7735_v27, %v7744_v29  ;;  %v7753_v43 = vor.u32 %v7752_v17, %v7749_v47  ;;  %v8082_v27 = vrot.slane %v20979_v13, 2  ;;  %23368 = vst [vmem:[#allocation46_spill] sm:$0xff] %v21138_v37  ;;  %v21141_v17 = vsel %vm3712_vm15, %v8078_v28, %v8080_v16 }
 0x402   : > { %16812 = vmatmul.mubr.bf16.gmra.mrb[80].mxu0 %v20794_v45  ;;  %23362 = vst [vmem:[#allocation63_spill] sm:$0xff] %v21110_v19  ;;  %v21119_v45 = vor.u32 %v7761_v11, %v7758_v0  ;;  %v21135_v9 = vsel %vm3712_vm15, %v8073_v3, %v8074_v41  ;;  %23369 = vst [vmem:[#allocation68_spill] sm:$0xff] %v21141_v17  ;;  %v8086_v11 = vrot.slane %v20991_v5, 2 }
 0x403   : > { %16815 = vmatprep.mubr.bf16.mxu0 %v20810_v20  ;;  %16848 = vmatpush3.bf16.msra.mxu0 %v18632_v4  ;;  %v21124_v20 = vsel %vm3237_vm14, %v7744_v29, %v7753_v43  ;;  %v21127_v4 = vsel %vm3712_vm15, %v8074_v41, %v8076_v49  ;;  %23367 = vst [vmem:[#allocation6_spill] sm:$0xff] %v21135_v9  ;;  %v21143_v29 = vld [vmem:[#allocation3 + $0x98] ss:$0 sps:$4 sm:$0x33]   ;;  %v8090_v41 = vrot.slane %v21001_v7, 2  ;;  %v8094_v49 = vrot.slane %v21021_v21, 2 }
 0x404   : > { %16849 = vmatprep.subr.bf16.mxu0 %v18633_v52  ;;  %23363 = vst [vmem:[#allocation64_spill] sm:$0xff] %v21119_v45  ;;  %23364 = vst [vmem:[#allocation65_spill] sm:$0xff] %v21124_v20  ;;  %v21132_v47 = vsel %vm3237_vm14, %v7753_v43, %v21119_v45  ;;  %v21146_v0 = vsel %vm3712_vm15, %v8080_v16, %v8082_v27  ;;  %v8088_v43 = vrot.slane %v20996_v42, 2  ;;  %v8096_v16 = vrot.slane %v21031_v57, 2 }
 0x405   : > { %23365 = vst [vmem:[#allocation66_spill] sm:$0xff] %v21127_v4  ;;  %23366 = vst [vmem:[#allocation67_spill] sm:$0xff] %v21132_v47  ;;  %v21158_v3 = vsel %vm3712_vm15, %v8082_v27, %v8084_v23  ;;  %v21161_v28 = vsel %vm3712_vm15, %v8084_v23, %v8086_v11 }
 0x406   : > { %23370 = vst [vmem:[#allocation69_spill] sm:$0xff] %v21143_v29  ;;  %23371 = vst [vmem:[#allocation70_spill] sm:$0xff] %v21146_v0  ;;  %v8098_v0 = vrot.slane %v21041_v38, 2  ;;  %v21167_v17 = vsel %vm3712_vm15, %v8086_v11, %v8088_v43  ;;  %v21170_v37 = vsel %vm3712_vm15, %v8088_v43, %v8090_v41  ;;  %v21180_v23 = vsel %vm3712_vm15, %v8094_v49, %v8096_v16 }
 0x407   : > { %16850 = vmatpush3.bf16.msra.mxu0 %v18633_v52  ;;  %v8092_v52 = vrot.slane %v21008_v54, 2  ;;  %23372 = vst [vmem:[#allocation71_spill] sm:$0xff] %v21158_v3  ;;  %23373 = vst [vmem:[#allocation72_spill] sm:$0xff] %v21161_v28  ;;  %v8100_v11 = vrot.slane %v21053_v36, 2  ;;  %v8102_v43 = vrot.slane %v21060_v12, 2 }
 0x408   : > { %16851 = vmatprep.subr.bf16.mxu0 %v18634_v61  ;;  %23374 = vst [vmem:[#allocation73_spill] sm:$0xff] %v21167_v17  ;;  %23375 = vst [vmem:[#allocation74_spill] sm:$0xff] %v21170_v37  ;;  %v8389_v37 = vld [vmem:[#allocation3 + $0x10] sm:$0xc] }
 0x409   : > { %v21173_v4 = vsel %vm3712_vm15, %v8090_v41, %v8092_v52  ;;  %v21176_v27 = vsel %vm3712_vm15, %v8092_v52, %v8094_v49  ;;  %23378 = vst [vmem:[#allocation77_spill] sm:$0xff] %v21180_v23  ;;  %v21190_v41 = vld [vmem:[%s23094_s6 + $0xc0] sm:$0xff]   ;;  %v8104_v52 = vrot.slane %v21064_v60, 2  ;;  %v21196_v49 = vsel %vm3712_vm15, %v8098_v0, %v8100_v11  ;;  %v9322_v12 = vld [vmem:[#allocation3 + $0x10] sm:$0x8] }
 0x40a   : > { %16816 = vmatmul.mubr.bf16.gmra.mrb[84].mxu0 %v20835_v39  ;;  %23376 = vst [vmem:[#allocation75_spill] sm:$0xff] %v21173_v4  ;;  %23377 = vst [vmem:[#allocation76_spill] sm:$0xff] %v21176_v27  ;;  %v21183_v39 = vsel %vm3712_vm15, %v8096_v16, %v8098_v0  ;;  %v21199_v16 = vsel %vm3712_vm15, %v8100_v11, %v8102_v43  ;;  %v6782_v4 = vld [vmem:[#allocation3] sm:$0xe]  ;;  %v21212_v0 = vld [vmem:[#allocation3 + $0x14] sm:$0xf] }
 0x40b   : > { %16819 = vmatprep.mubr.bf16.mxu0 %v20857_v51  ;;  %16852 = vmatpush3.bf16.msra.mxu0 %v18634_v61  ;;  %23379 = vst [vmem:[#allocation78_spill] sm:$0xff] %v21183_v39  ;;  %v8106_v51 = vrot.slane %v21077_v6, 2  ;;  %v8108_v61 = vrot.slane %v21143_v29, 2  ;;  %23380 = vst [vmem:[#allocation79_spill] sm:$0xff] %v21196_v49  ;;  %v21202_v39 = vsel %vm3712_vm15, %v8102_v43, %v8104_v52  ;;  %v18856_v11 = vld [vmem:[#allocation3 + $0x4] sm:$0xf] }
 0x40c   : > { %16853 = vmatprep.subr.bf16.mxu0 %v18635_v2  ;;  %23381 = vst [vmem:[#allocation80_spill] sm:$0xff] %v21199_v16  ;;  %23382 = vst [vmem:[#allocation81_spill] sm:$0xff] %v21202_v39  ;;  %v14800_v43 = vcombine.low %v6782_v4, %v18856_v11  ;;  %v21216_v39 = vcombine.low %v8389_v37, %v21212_v0  ;;  %v21232_v37 = vld [vmem:[#allocation3 + $0x38] sm:$0xff]  }
 0x40d   : > { %v21205_v23 = vsel %vm3712_vm15, %v8104_v52, %v8106_v51  ;;  %v21208_v27 = vsel %vm3712_vm15, %v8106_v51, %v8108_v61  ;;  %v21218_v52 = vld [vmem:[#allocation3 + $0x18] sm:$0xff]   ;;  %v21220_v51 = vld [vmem:[#allocation3 + $0x20] sm:$0xff]   ;;  %v8921_v22 = vshll.u32 %v21232_v37, 16 }
 0x40e   : > { %23383 = vst [vmem:[#allocation82_spill] sm:$0xff] %v21205_v23  ;;  %23384 = vst [vmem:[#allocation83_spill] sm:$0xff] %v21208_v27  ;;  %v21224_v61 = vrot.slane %v14800_v43, 1  ;;  %v21226_v27 = vld [vmem:[#allocation3 + $0x30] sm:$0xff]   ;;  %v8877_v23 = vshll.u32 %v21216_v39, 16  ;;  %v8885_v11 = vshll.u32 %v21218_v52, 16 }
 0x40f   : > { %16854 = vmatpush3.bf16.msra.mxu0 %v18635_v2  ;;  %23385 = vst [vmem:[#allocation84_spill] sm:$0xff] %v21216_v39  ;;  %v21222_v2 = vld [vmem:[#allocation3 + $0x28] sm:$0xff]   ;;  %v8891_v16 = vshrl.u32 %v21220_v51, 16  ;;  %v8894_v49 = vshll.u32 %v21220_v51, 16  ;;  %v21237_v43 = vld [vmem:[#allocation3 + $0x40] sm:$0xff]   ;;  %v8909_v19 = vshrl.u32 %v21226_v27, 16 }
 0x410   : > { %16891 = vmatprep.subr.bf16.mxu0 %v21190_v41  ;;  %v8879_v28 = vrot.slane %v8877_v23, 3  ;;  %v8900_v9 = vshrl.u32 %v21222_v2, 16  ;;  %v8903_v47 = vshll.u32 %v21222_v2, 16  ;;  %v8912_v53 = vshll.u32 %v21226_v27, 16  ;;  %v21247_v23 = vld [vmem:[#allocation3 + $0x50] sm:$0xff]  }
 0x411   : > { %v8893_v45 = vrot.slane %v8891_v16, 2  ;;  %v8896_v4 = vrot.slane %v8894_v49, 3  ;;  %v8918_v16 = vshrl.u32 %v21232_v37, 16  ;;  %v8911_v49 = vrot.slane %v8909_v19, 2 }
 0x412   : > { %16820 = vmatmul.mubr.bf16.gmra.mrb[88].mxu0 %v20884_v14  ;;  %v8874_v14 = vshrl.u32 %v21216_v39, 16  ;;  %v8887_v39 = vrot.slane %v8885_v11, 3  ;;  %v8902_v29 = vrot.slane %v8900_v9, 2  ;;  %v8914_v11 = vrot.slane %v8912_v53, 3  ;;  %v21252_v9 = vld [vmem:[#allocation3 + $0x58] sm:$0xff]   ;;  %v21261_v53 = vld [vmem:[#allocation3 + $0x60] sm:$0xff]  }
 0x413   : > { %16823 = vmatprep.mubr.bf16.mxu0 %v20904_v26  ;;  %v8882_v26 = vshrl.u32 %v21218_v52, 16  ;;  %v8897_v1 = vor.u32 %v8896_v4, %v8893_v45  ;;  %v8930_v19 = vshll.u32 %v21237_v43, 16 }
 0x414   : > { %v8876_v17 = vrot.slane %v8874_v14, 2  ;;  %v21245_v14 = vld [vmem:[#allocation3 + $0x48] sm:$0xff]   ;;  %v8915_v45 = vor.u32 %v8914_v11, %v8911_v49 }
 0x415   : > { %v8884_v3 = vrot.slane %v8882_v26, 2  ;;  %v8936_v25 = vshrl.u32 %v21245_v14, 16 }
 0x416   : > { %v8880_v20 = vor.u32 %v8879_v28, %v8876_v17 }
 0x417   : > { %v8888_v26 = vor.u32 %v8887_v39, %v8884_v3  ;;  %v8920_v3 = vrot.slane %v8918_v16, 2  ;;  %v8948_v16 = vshll.u32 %v21247_v23, 16  ;;  %v8938_v49 = vrot.slane %v8936_v25, 2 }
 0x418   : > { %v8963_v25 = vshrl.u32 %v21261_v53, 16 }
 0x419   : > { %v21255_v17 = vsel %vm4521_vm0, %v8880_v20, %v8888_v26  ;;  %v21258_v28 = vsel %vm4521_vm0, %v8888_v26, %v8897_v1  ;;  %v8939_v20 = vshll.u32 %v21245_v14, 16  ;;  %v21269_v26 = vld [vmem:[#allocation3 + $0x68] sm:$0xff]  }
 0x41a   : > { %16824 = vmatmul.mubr.bf16.gmra.mrb[92].mxu0 %v20911_v58  ;;  %v8905_v58 = vrot.slane %v8903_v47, 3  ;;  %23386 = vst [vmem:[#allocation85_spill] sm:$0xff] %v21255_v17  ;;  %23387 = vst [vmem:[#allocation86_spill] sm:$0xff] %v21258_v28  ;;  %v8923_v47 = vrot.slane %v8921_v22, 3  ;;  %v8945_v17 = vshrl.u32 %v21247_v23, 16 }
 0x41b   : > { %16827 = vmatprep.mubr.bf16.mxu0 %v20915_v34  ;;  %v8927_v34 = vshrl.u32 %v21237_v43, 16 }
 0x41c   : > { %v8906_v24 = vor.u32 %v8905_v58, %v8902_v29  ;;  %v8924_v22 = vor.u32 %v8923_v47, %v8920_v3  ;;  %v8932_v58 = vrot.slane %v8930_v19, 3  ;;  %v8947_v11 = vrot.slane %v8945_v17, 2  ;;  %v21284_v47 = vld [vmem:[#allocation3 + $0x78] sm:$0xff]  }
 0x41d   : > { %v8929_v39 = vrot.slane %v8927_v34, 2  ;;  %v8954_v34 = vshrl.u32 %v21252_v9, 16  ;;  %v8957_v3 = vshll.u32 %v21252_v9, 16  ;;  %v8966_v17 = vshll.u32 %v21261_v53, 16 }
 0x41e   : > { %v21264_v4 = vsel %vm4521_vm0, %v8897_v1, %v8906_v24  ;;  %v21272_v29 = vsel %vm4521_vm0, %v8906_v24, %v8915_v45  ;;  %v8941_v1 = vrot.slane %v8939_v20, 3  ;;  %v21281_v28 = vsel %vm4521_vm0, %v8915_v45, %v8924_v22  ;;  %v21288_v20 = vld [vmem:[#allocation3 + $0x80] sm:$0xff]  }
 0x41f   : > { %23388 = vst [vmem:[#allocation87_spill] sm:$0xff] %v21264_v4  ;;  %23389 = vst [vmem:[#allocation88_spill] sm:$0xff] %v21272_v29  ;;  %v21278_v4 = vld [vmem:[#allocation3 + $0x70] sm:$0xff]   ;;  %v8933_v24 = vor.u32 %v8932_v58, %v8929_v39  ;;  %v8950_v29 = vrot.slane %v8948_v16, 3  ;;  %v8959_v45 = vrot.slane %v8957_v3, 3  ;;  %v8972_v39 = vshrl.u32 %v21269_v26, 16 }
 0x420   : > { %23390 = vst [vmem:[#allocation89_spill] sm:$0xff] %v21281_v28  ;;  %v8942_v19 = vor.u32 %v8941_v1, %v8938_v49  ;;  %v8965_v16 = vrot.slane %v8963_v25, 2  ;;  %v8968_v28 = vrot.slane %v8966_v17, 3  ;;  %v8975_v49 = vshll.u32 %v21269_v26, 16  ;;  %v21298_v1 = vld [vmem:[#allocation3 + $0x88] sm:$0xff]  }
 0x421   : > { %v8951_v10 = vor.u32 %v8950_v29, %v8947_v11  ;;  %v8974_v48 = vrot.slane %v8972_v39, 2  ;;  %v21304_v29 = vld [vmem:[#allocation3 + $0x90] sm:$0xff]   ;;  %v8990_v25 = vshrl.u32 %v21284_v47, 16  ;;  %v9011_v6 = vshll.u32 %v21298_v1, 16 }
 0x422   : > { %16828 = vmatmul.mubr.bf16.gmra.mrb[96].mxu0 %v20921_v62  ;;  %v8956_v62 = vrot.slane %v8954_v34, 2  ;;  %v21295_v58 = vsel %vm4521_vm0, %v8933_v24, %v8942_v19  ;;  %v8969_v11 = vor.u32 %v8968_v28, %v8965_v16  ;;  %v8977_v3 = vrot.slane %v8975_v49, 3 }
 0x423   : > { %16831 = vmatprep.mubr.bf16.mxu0 %v20924_v30  ;;  %v21291_v30 = vsel %vm4521_vm0, %v8924_v22, %v8933_v24  ;;  %23392 = vst [vmem:[#allocation91_spill] sm:$0xff] %v21295_v58  ;;  %v21301_v34 = vsel %vm4521_vm0, %v8942_v19, %v8951_v10  ;;  %v8981_v22 = vshrl.u32 %v21278_v4, 16  ;;  %v8984_v24 = vshll.u32 %v21278_v4, 16 }
 0x424   : > { %23391 = vst [vmem:[#allocation90_spill] sm:$0xff] %v21291_v30  ;;  %23393 = vst [vmem:[#allocation92_spill] sm:$0xff] %v21301_v34  ;;  %v8960_v35 = vor.u32 %v8959_v45, %v8956_v62  ;;  %v8993_v30 = vshll.u32 %v21284_v47, 16  ;;  %v8999_v19 = vshrl.u32 %v21288_v20, 16  ;;  %v21314_v62 = vld [vmem:[#allocation3 + $0x98] sm:$0xff]   ;;  %v8978_v28 = vor.u32 %v8977_v3, %v8974_v48 }
 0x425   : > { %v8983_v58 = vrot.slane %v8981_v22, 2  ;;  %v8986_v39 = vrot.slane %v8984_v24, 3  ;;  %v8992_v16 = vrot.slane %v8990_v25, 2  ;;  %v9002_v22 = vshll.u32 %v21288_v20, 16 }
 0x426   : > { %v21309_v17 = vsel %vm4521_vm0, %v8951_v10, %v8960_v35  ;;  %v21317_v45 = vsel %vm4521_vm0, %v8960_v35, %v8969_v11  ;;  %v8995_v49 = vrot.slane %v8993_v30, 3  ;;  %v9001_v10 = vrot.slane %v8999_v19, 2 }
 0x427   : > { %23394 = vst [vmem:[#allocation93_spill] sm:$0xff] %v21309_v17  ;;  %23395 = vst [vmem:[#allocation94_spill] sm:$0xff] %v21317_v45  ;;  %v9008_v17 = vshrl.u32 %v21298_v1, 16  ;;  %v21323_v34 = vsel %vm4521_vm0, %v8969_v11, %v8978_v28  ;;  %v8987_v31 = vor.u32 %v8986_v39, %v8983_v58  ;;  %v9017_v35 = vshrl.u32 %v21304_v29, 16 }
 0x428   : > { %23396 = vst [vmem:[#allocation95_spill] sm:$0xff] %v21323_v34  ;;  %v8996_v45 = vor.u32 %v8995_v49, %v8992_v16  ;;  %v9004_v48 = vrot.slane %v9002_v22, 3  ;;  %v9020_v24 = vshll.u32 %v21304_v29, 16  ;;  %v9013_v25 = vrot.slane %v9011_v6, 3 }
 0x429   : > { %v9010_v3 = vrot.slane %v9008_v17, 2  ;;  %v21329_v30 = vsel %vm4521_vm0, %v8978_v28, %v8987_v31  ;;  %v9019_v19 = vrot.slane %v9017_v35, 2  ;;  %v9026_v60 = vshrl.u32 %v21314_v62, 16 }
 0x42a   : > { %16832 = vmatmul.mubr.bf16.gmra.mrb[100].mxu0 %v20932_v46  ;;  %v21333_v11 = vsel %vm4521_vm0, %v8987_v31, %v8996_v45  ;;  %v9005_v58 = vor.u32 %v9004_v48, %v9001_v10  ;;  %v9022_v39 = vrot.slane %v9020_v24, 3  ;;  %v9029_v34 = vshll.u32 %v21314_v62, 16 }
 0x42b   : > { %16835 = vmatprep.mubr.bf16.mxu0 %v20946_v59  ;;  %v6806_v16 = vrot.slane %v21028_v50, 1  ;;  %v9014_v17 = vor.u32 %v9013_v25, %v9010_v3  ;;  %v9028_v49 = vrot.slane %v9026_v60, 2  ;;  %v14986_v35 = vcombine.low %v9322_v12, %v21212_v0 }
 0x42c   : > { %v21338_v22 = vsel %vm4521_vm0, %v8996_v45, %v9005_v58  ;;  %v9023_v28 = vor.u32 %v9022_v39, %v9019_v19  ;;  %v9031_v6 = vrot.slane %v9029_v34, 3  ;;  %v23397_v31 = vrot.slane %v21018_v40, 1 }
 0x42d   : > { %v6808_v48 = vrot.slane %v21069_v18, 1  ;;  %v21348_v50 = vsel %vm4521_vm0, %v9005_v58, %v9014_v17  ;;  %v9344_v60 = vrot.slane %v21218_v52, 3  ;;  %v9343_v12 = vrot.slane %v14986_v35, 3 }
 0x42e   : > { %v6805_v10 = vsel %vm2428_vm1, %v21224_v61, %v23397_v31  ;;  %v21352_v45 = vsel %vm4521_vm0, %v9014_v17, %v9023_v28  ;;  %v21354_v34 = vor.u32 %v9031_v6, %v9028_v49  ;;  %v9346_v0 = vrot.slane %v21220_v51, 3 }
 0x42f   : > { %v23398_v3 = vmov %v23397_v31  ;;  %v9348_v18 = vrot.slane %v21222_v2, 3  ;;  %v9350_v24 = vrot.slane %v21226_v27, 3  ;;  %v9352_v25 = vrot.slane %v21232_v37, 3 }
 0x430   : > { %v6807_v61 = vsel %vm2428_vm1, %v23398_v3, %v6806_v16  ;;  %v21365_v19 = vsel %vm4521_vm0, %v9023_v28, %v21354_v34  ;;  %v21368_v58 = vsel %vm4996_vm3, %v9343_v12, %v9344_v60  ;;  %v21371_v39 = vsel %vm4996_vm3, %v9344_v60, %v9346_v0  ;;  %v21384_v28 = vld [vmem:[#allocation3 + $0xa0] ss:$0 sps:$4 sm:$0x77]   ;;  %v18638_v12 = vld [vmem:[%s23094_s6 + $0xc8] sm:$0xff]  }
 0x431   : > { %23399 = vst [vmem:[#allocation96_spill] sm:$0xff] %v21368_v58  ;;  %23400 = vst [vmem:[#allocation97_spill] sm:$0xff] %v21371_v39  ;;  %v9354_v40 = vrot.slane %v21237_v43, 3  ;;  %v6809_v17 = vsel %vm2428_vm1, %v6806_v16, %v6808_v48  ;;  %v21376_v49 = vsel %vm4996_vm3, %v9346_v0, %v9348_v18  ;;  %v21379_v6 = vsel %vm4996_vm3, %v9348_v18, %v9350_v24 }
 0x432   : > { %16836 = vmatmul.mubr.bf16.gmra.mrb[104].mxu0 %v20950_v15  ;;  %23401 = vst [vmem:[#allocation98_spill] sm:$0xff] %v21376_v49  ;;  %23402 = vst [vmem:[#allocation99_spill] sm:$0xff] %v21379_v6  ;;  %v21382_v35 = vsel %vm4996_vm3, %v9350_v24, %v9352_v25  ;;  %v9358_v60 = vrot.slane %v21247_v23, 3  ;;  %v9360_v16 = vrot.slane %v21252_v9, 3  ;;  %v9362_v0 = vrot.slane %v21261_v53, 3 }
 0x433   : > { %16855 = vmatprep.mubr.bf16.mxu0 %v6805_v10  ;;  %23403 = vst [vmem:[#allocation100_spill] sm:$0xff] %v21382_v35  ;;  %v21387_v31 = vsel %vm4996_vm3, %v9352_v25, %v9354_v40  ;;  %v9356_v10 = vrot.slane %v21245_v14, 3  ;;  %v9364_v3 = vrot.slane %v21269_v26, 3  ;;  %v9366_v18 = vrot.slane %v21278_v4, 3 }
 0x434   : > { %23404 = vst [vmem:[#allocation101_spill] sm:$0xff] %v21387_v31  ;;  %v9368_v24 = vrot.slane %v21284_v47, 3  ;;  %v21406_v35 = vsel %vm4996_vm3, %v9358_v60, %v9360_v16  ;;  %v9370_v6 = vrot.slane %v21288_v20, 3  ;;  %v21410_v49 = vsel %vm4996_vm3, %v9360_v16, %v9362_v0 }
 0x435   : > { %v21400_v25 = vsel %vm4996_vm3, %v9354_v40, %v9356_v10  ;;  %v21403_v31 = vsel %vm4996_vm3, %v9356_v10, %v9358_v60  ;;  %v21413_v39 = vsel %vm4996_vm3, %v9362_v0, %v9364_v3  ;;  %v21416_v58 = vsel %vm4996_vm3, %v9364_v3, %v9366_v18  ;;  %v18639_v0 = vld [vmem:[%s23094_s6 + $0xd0] sm:$0xff]  }
 0x436   : > { %23405 = vst [vmem:[#allocation102_spill] sm:$0xff] %v21413_v39  ;;  %23406 = vst [vmem:[#allocation103_spill] sm:$0xff] %v21416_v58  ;;  %v21419_v40 = vsel %vm4996_vm3, %v9366_v18, %v9368_v24  ;;  %v21423_v10 = vsel %vm4996_vm3, %v9368_v24, %v9370_v6  ;;  %v9374_v60 = vrot.slane %v21304_v29, 3  ;;  %v9376_v16 = vrot.slane %v21314_v62, 3  ;;  %v18857_v18 = vld [vmem:[#allocation3 + $0x20] sm:$0xff]  }
 0x437   : > { %23407 = vst [vmem:[#allocation104_spill] sm:$0xff] %v21419_v40  ;;  %23408 = vst [vmem:[#allocation105_spill] sm:$0xff] %v21423_v10  ;;  %v9378_v3 = vrot.slane %v21384_v28, 3  ;;  %v6810_v40 = vrot.slane %v18857_v18, 1  ;;  %v18858_v10 = vld [vmem:[#allocation3 + $0x28] sm:$0xff]   ;;  %v18640_v18 = vld [vmem:[%s23094_s6 + $0xd8] sm:$0xff]  }
 0x438   : > { %v21439_v24 = vsel %vm4996_vm3, %v9374_v60, %v9376_v16  ;;  %v6812_v58 = vrot.slane %v18858_v10, 1  ;;  %v18641_v10 = vld [vmem:[%s23094_s6 + $0xe0] sm:$0xff]  }
 0x439   : > { %23410 = vst [vmem:[#allocation107_spill] sm:$0xff] %v21439_v24  ;;  %v21442_v39 = vsel %vm4996_vm3, %v9376_v16, %v9378_v3 }
 0x43a   : > { %16856 = vmatmul.mubr.bf16.vlgmr.msra.gmra.mrb[72].mxu0 %v6807_v61  ;;  %v9372_v61 = vrot.slane %v21298_v1, 3  ;;  %23411 = vst [vmem:[#allocation108_spill] sm:$0xff] %v21442_v39 }
 0x43b   : > { %16892 = vmatpush3.bf16.msra.mxu0 %v21190_v41  ;;  %16859 = vmatprep.mubr.bf16.mxu0 %v6809_v17 }
 0x43c   : > { %16893 = vmatprep.subr.bf16.mxu0 %v18638_v12  ;;  %v21433_v41 = vsel %vm4996_vm3, %v9370_v6, %v9372_v61  ;;  %v21436_v17 = vsel %vm4996_vm3, %v9372_v61, %v9374_v60  ;;  %v6811_v6 = vsel %vm2428_vm1, %v6808_v48, %v6810_v40  ;;  %v6813_v61 = vsel %vm2428_vm1, %v6810_v40, %v6812_v58  ;;  %v18859_v60 = vld [vmem:[#allocation3 + $0x30] sm:$0xff]   ;;  %v18642_v48 = vld [vmem:[%s23094_s6 + $0xe8] sm:$0xff]  }
 0x43d   : > { %23409 = vst [vmem:[#allocation106_spill] sm:$0xff] %v21436_v17  ;;  %v6814_v16 = vrot.slane %v18859_v60, 1 }
 0x43f   : > { %16894 = vmatpush3.bf16.msra.mxu0 %v18638_v12  ;;  %v18860_v12 = vld [vmem:[#allocation3 + $0x38] sm:$0xff]  }
 0x440   : > { %16895 = vmatprep.subr.bf16.mxu0 %v18639_v0  ;;  %v6816_v3 = vrot.slane %v18860_v12, 1 }
 0x442   : > { %16860 = vmatmul.mubr.bf16.gmra.mrb[76].mxu0 %v6811_v6  ;;  %v6815_v6 = vsel %vm2428_vm1, %v6812_v58, %v6814_v16  ;;  %v6817_v40 = vsel %vm2428_vm1, %v6814_v16, %v6816_v3  ;;  %v18644_v58 = vld [vmem:[%s23094_s6 + $0xf8] sm:$0xff]   ;;  %v18647_v16 = vld [vmem:[%s23094_s6 + $0x100] sm:$0xff]  }
 0x443   : > { %16863 = vmatprep.mubr.bf16.mxu0 %v6813_v61  ;;  %16896 = vmatpush3.bf16.msra.mxu0 %v18639_v0  ;;  %v18643_v0 = vld [vmem:[%s23094_s6 + $0xf0] sm:$0xff]   ;;  %v18861_v61 = vld [vmem:[#allocation3 + $0x40] sm:$0xff]  }
 0x444   : > { %16897 = vmatprep.subr.bf16.mxu0 %v18640_v18  ;;  %v6818_v60 = vrot.slane %v18861_v61, 1 }
 0x447   : > { %16898 = vmatpush3.bf16.msra.mxu0 %v18640_v18  ;;  %v18862_v18 = vld [vmem:[#allocation3 + $0x48] sm:$0xff]  }
 0x448   : > { %16899 = vmatprep.subr.bf16.mxu0 %v18641_v10  ;;  %v6820_v12 = vrot.slane %v18862_v18, 1 }
 0x44a   : > { %16864 = vmatmul.mubr.bf16.gmra.mrb[80].mxu0 %v6815_v6  ;;  %v6819_v6 = vsel %vm2428_vm1, %v6816_v3, %v6818_v60 }
 0x44b   : > { %16867 = vmatprep.mubr.bf16.mxu0 %v6817_v40  ;;  %16900 = vmatpush3.bf16.msra.mxu0 %v18641_v10  ;;  %v6821_v10 = vsel %vm2428_vm1, %v6818_v60, %v6820_v12  ;;  %v18863_v40 = vld [vmem:[#allocation3 + $0x50] sm:$0xff]   ;;  %v18865_v60 = vld [vmem:[#allocation3 + $0x60] sm:$0xff]  }
 0x44c   : > { %16901 = vmatprep.subr.bf16.mxu0 %v18642_v48  ;;  %v6822_v61 = vrot.slane %v18863_v40, 1  ;;  %v18867_v40 = vld [vmem:[#allocation3 + $0x70] sm:$0xff]  }
 0x44e   : > { %v6823_v39 = vsel %vm2428_vm1, %v6820_v12, %v6822_v61 }
 0x44f   : > { %16902 = vmatpush3.bf16.msra.mxu0 %v18642_v48  ;;  %v18864_v48 = vld [vmem:[#allocation3 + $0x58] sm:$0xff]  }
 0x450   : > { %16903 = vmatprep.subr.bf16.mxu0 %v18643_v0  ;;  %v6824_v18 = vrot.slane %v18864_v48, 1  ;;  %v6830_v48 = vrot.slane %v18867_v40, 1  ;;  %v18658_v40 = vld [vmem:[%s23094_s6 + $0x118] sm:$0xff]  }
 0x452   : > { %16868 = vmatmul.mubr.bf16.gmra.mrb[84].mxu0 %v6819_v6  ;;  %v6825_v3 = vsel %vm2428_vm1, %v6822_v61, %v6824_v18  ;;  %v6826_v6 = vrot.slane %v18865_v60, 1  ;;  %v6834_v61 = vrot.slane %v20946_v59, 1  ;;  %v7267_v60 = vrot.slane %v20968_v55, 1  ;;  %v18655_v55 = vld [vmem:[%s23094_s6 + $0x110] sm:$0xff]  }
 0x453   : > { %16871 = vmatprep.mubr.bf16.mxu0 %v6821_v10  ;;  %16904 = vmatpush3.bf16.msra.mxu0 %v18643_v0  ;;  %v18866_v0 = vld [vmem:[#allocation3 + $0x68] sm:$0xff]   ;;  %v7269_v59 = vrot.slane %v20970_v32, 1  ;;  %v7273_v32 = vrot.slane %v20975_v33, 1  ;;  %v18661_v33 = vld [vmem:[%s23094_s6 + $0x120] sm:$0xff]  }
 0x454   : > { %16905 = vmatprep.subr.bf16.mxu0 %v18644_v58  ;;  %v6828_v10 = vrot.slane %v18866_v0, 1  ;;  %v6827_v24 = vsel %vm2428_vm1, %v6824_v18, %v6826_v6 }
 0x456   : > { %v6829_v17 = vsel %vm2428_vm1, %v6826_v6, %v6828_v10  ;;  %v6831_v12 = vsel %vm2428_vm1, %v6828_v10, %v6830_v48  ;;  %v18651_v10 = vld [vmem:[%s23094_s6 + $0x108] sm:$0xff]  }
 0x457   : > { %16906 = vmatpush3.bf16.msra.mxu0 %v18644_v58  ;;  %v6832_v58 = vrot.slane %v20932_v46, 1  ;;  %v7266_v46 = vrot.slane %v20966_v56, 1 }
 0x458   : > { %16943 = vmatprep.subr.bf16.mxu0 %v18647_v16 }
 0x459   : > { %v6835_v18 = vsel %vm2428_vm1, %v6832_v58, %v6834_v61  ;;  %v7268_v0 = vsel %vm2428_vm1, %v7266_v46, %v7267_v60  ;;  %v7287_v46 = vrot.slane %v21021_v21, 1  ;;  %v7293_v21 = vrot.slane %v21053_v36, 1 }
 0x45a   : > { %16872 = vmatmul.mubr.bf16.gmra.mrb[88].mxu0 %v6823_v39  ;;  %v6833_v39 = vsel %vm2428_vm1, %v6830_v48, %v6832_v58  ;;  %v7279_v58 = vrot.slane %v20991_v5, 1  ;;  %v7281_v5 = vrot.slane %v20996_v42, 1  ;;  %v18672_v42 = vld [vmem:[%s23094_s6 + $0x140] sm:$0xff]  }
 0x45b   : > { %16875 = vmatprep.mubr.bf16.mxu0 %v6825_v3  ;;  %v6836_v3 = vrot.slane %v20950_v15, 1  ;;  %v7271_v15 = vrot.slane %v20973_v44, 1  ;;  %v7275_v44 = vrot.slane %v20979_v13, 1  ;;  %v7277_v13 = vrot.slane %v20986_v63, 1  ;;  %v18667_v63 = vld [vmem:[%s23094_s6 + $0x130] sm:$0xff]  }
 0x45d   : > { %v7272_v56 = vsel %vm2428_vm1, %v7269_v59, %v7271_v15  ;;  %v7274_v48 = vsel %vm2428_vm1, %v7271_v15, %v7273_v32 }
 0x462   : > { %16876 = vmatmul.mubr.bf16.gmra.mrb[92].mxu0 %v6827_v24  ;;  %v6837_v24 = vsel %vm2428_vm1, %v6834_v61, %v6836_v3  ;;  %v7280_v61 = vsel %vm2428_vm1, %v7277_v13, %v7279_v58 }
 0x463   : > { %16879 = vmatprep.mubr.bf16.mxu0 %v6829_v17  ;;  %v6838_v17 = vrot.slane %v20956_v8, 1  ;;  %v7270_v8 = vsel %vm2428_vm1, %v7267_v60, %v7269_v59  ;;  %v7291_v59 = vrot.slane %v21041_v38, 1 }
 0x465   : > { %v6839_v6 = vsel %vm2428_vm1, %v6836_v3, %v6838_v17  ;;  %v7283_v3 = vrot.slane %v21001_v7, 1  ;;  %v7285_v7 = vrot.slane %v21008_v54, 1  ;;  %v23412_v54 = vld [vmem:[#allocation54_spill] sm:$0xff] }
 0x467   : > { %v7284_v17 = vsel %vm2428_vm1, %v7281_v5, %v7283_v3  ;;  %v7286_v60 = vsel %vm2428_vm1, %v7283_v3, %v7285_v7  ;;  %v23419_v3 = vld [vmem:[#allocation51_spill] sm:$0xff] }
 0x46a   : > { %16880 = vmatmul.mubr.bf16.gmra.mrb[96].mxu0 %v6831_v12  ;;  %v18664_v12 = vld [vmem:[%s23094_s6 + $0x128] sm:$0xff]  }
 0x46b   : > { %16883 = vmatprep.mubr.bf16.mxu0 %v6833_v39  ;;  %v7278_v39 = vsel %vm2428_vm1, %v7275_v44, %v7277_v13  ;;  %v23415_v13 = vld [vmem:[#allocation47_spill] sm:$0xff] }
 0x472   : > { %16884 = vmatmul.mubr.bf16.gmra.mrb[100].mxu0 %v6835_v18  ;;  %v18670_v18 = vld [vmem:[%s23094_s6 + $0x138] sm:$0xff]  }
 0x473   : > { %16887 = vmatprep.mubr.bf16.mxu0 %v6837_v24  ;;  %v7282_v24 = vsel %vm2428_vm1, %v7279_v58, %v7281_v5  ;;  %v18673_v58 = vld [vmem:[%s23094_s6 + $0x148] sm:$0xff]   ;;  %v23418_v5 = vld [vmem:[#allocation50_spill] sm:$0xff] }
 0x47a   : > { %16888 = vmatmul.mubr.bf16.gmra.mrb[104].mxu0 %v6839_v6  ;;  %v7288_v6 = vsel %vm2428_vm1, %v7285_v7, %v7287_v46  ;;  %v18678_v7 = vld [vmem:[%s23094_s6 + $0x170] sm:$0xff]  }
 0x47b   : > { %16907 = vmatprep.mubr.bf16.mxu0 %v7268_v0  ;;  %v7289_v0 = vrot.slane %v21031_v57, 1 }
 0x47d   : > { %v7290_v15 = vsel %vm2428_vm1, %v7287_v46, %v7289_v0  ;;  %v18679_v46 = vld [vmem:[%s23094_s6 + $0x178] sm:$0xff]  }
 0x482   : > { %16908 = vmatmul.mubr.bf16.vlgmr.msra.gmra.mrb[72].mxu0 %v7270_v8  ;;  %v7295_v8 = vrot.slane %v23412_v54, 1  ;;  %v23428_v54 = vld [vmem:[#allocation45_spill] sm:$0xff] }
 0x483   : > { %16944 = vmatpush3.bf16.msra.mxu0 %v18647_v16  ;;  %16911 = vmatprep.mubr.bf16.mxu0 %v7272_v56  ;;  %v7276_v16 = vsel %vm2428_vm1, %v7273_v32, %v7275_v44  ;;  %v7294_v56 = vsel %vm2428_vm1, %v7291_v59, %v7293_v21  ;;  %v23413_v32 = vld [vmem:[#allocation55_spill] sm:$0xff]  ;;  %v23414_v44 = vld [vmem:[#allocation57_spill] sm:$0xff] }
 0x484   : > { %16945 = vmatprep.subr.bf16.mxu0 %v18651_v10  ;;  %v7297_v57 = vrot.slane %v23413_v32, 1  ;;  %v7299_v38 = vrot.slane %v23414_v44, 1 }
 0x487   : > { %16946 = vmatpush3.bf16.msra.mxu0 %v18651_v10  ;;  %v7292_v10 = vsel %vm2428_vm1, %v7289_v0, %v7291_v59  ;;  %v18682_v0 = vld [vmem:[%s23094_s6 + $0x180] sm:$0xff]  }
 0x488   : > { %16947 = vmatprep.subr.bf16.mxu0 %v18655_v55  ;;  %v23424_v59 = vld [vmem:[#allocation60_spill] sm:$0xff] }
 0x48a   : > { %16912 = vmatmul.mubr.bf16.gmra.mrb[76].mxu0 %v7274_v48  ;;  %v18671_v48 = vld [vmem:[#allocation3 + $0x98] ss:$0 sps:$4 sm:$0x11]  }
 0x48b   : > { %16915 = vmatprep.mubr.bf16.mxu0 %v7276_v16  ;;  %16948 = vmatpush3.bf16.msra.mxu0 %v18655_v55  ;;  %v7296_v55 = vsel %vm2428_vm1, %v7293_v21, %v7295_v8  ;;  %v7300_v16 = vsel %vm2428_vm1, %v7297_v57, %v7299_v38  ;;  %v7301_v36 = vrot.slane %v18671_v48, 1  ;;  %v23427_v21 = vld [vmem:[#allocation61_spill] sm:$0xff] }
 0x48c   : > { %16949 = vmatprep.subr.bf16.mxu0 %v18658_v40 }
 0x48f   : > { %16950 = vmatpush3.bf16.msra.mxu0 %v18658_v40  ;;  %v7298_v40 = vsel %vm2428_vm1, %v7295_v8, %v7297_v57  ;;  %v23429_v8 = vld [vmem:[#allocation63_spill] sm:$0xff] }
 0x490   : > { %16951 = vmatprep.subr.bf16.mxu0 %v18661_v33 }
 0x492   : > { %16916 = vmatmul.mubr.bf16.gmra.mrb[80].mxu0 %v7278_v39  ;;  %v23417_v39 = vld [vmem:[#allocation49_spill] sm:$0xff] }
 0x493   : > { %16919 = vmatprep.mubr.bf16.mxu0 %v7280_v61  ;;  %16952 = vmatpush3.bf16.msra.mxu0 %v18661_v33  ;;  %v7302_v33 = vsel %vm2428_vm1, %v7299_v38, %v7301_v36  ;;  %v18674_v61 = vld [vmem:[%s23094_s6 + $0x150] sm:$0xff]  }
 0x494   : > { %16953 = vmatprep.subr.bf16.mxu0 %v18664_v12  ;;  %v23431_v38 = vld [vmem:[#allocation65_spill] sm:$0xff] }
 0x497   : > { %16954 = vmatpush3.bf16.msra.mxu0 %v18664_v12  ;;  %v23416_v12 = vld [vmem:[#allocation48_spill] sm:$0xff] }
 0x498   : > { %16955 = vmatprep.subr.bf16.mxu0 %v18667_v63 }
 0x49a   : > { %16920 = vmatmul.mubr.bf16.gmra.mrb[84].mxu0 %v7282_v24  ;;  %v18677_v24 = vld [vmem:[%s23094_s6 + $0x168] sm:$0xff]  }
 0x49b   : > { %16923 = vmatprep.mubr.bf16.mxu0 %v7284_v17  ;;  %16956 = vmatpush3.bf16.msra.mxu0 %v18667_v63  ;;  %v18675_v63 = vld [vmem:[%s23094_s6 + $0x158] sm:$0xff]   ;;  %v23420_v17 = vld [vmem:[#allocation52_spill] sm:$0xff] }
 0x49c   : > { %16957 = vmatprep.subr.bf16.mxu0 %v18670_v18 }
 0x49f   : > { %16958 = vmatpush3.bf16.msra.mxu0 %v18670_v18  ;;  %v18676_v18 = vld [vmem:[%s23094_s6 + $0x160] sm:$0xff]  }
 0x4a0   : > { %16995 = vmatprep.subr.bf16.mxu0 %v18672_v42 }
 0x4a2   : > { %16924 = vmatmul.mubr.bf16.gmra.mrb[88].mxu0 %v7286_v60  ;;  %v23422_v60 = vld [vmem:[#allocation56_spill] sm:$0xff] }
 0x4a3   : > { %16927 = vmatprep.mubr.bf16.mxu0 %v7288_v6  ;;  %v23423_v6 = vld [vmem:[#allocation58_spill] sm:$0xff] }
 0x4aa   : > { %16928 = vmatmul.mubr.bf16.gmra.mrb[92].mxu0 %v7290_v15  ;;  %v23425_v15 = vld [vmem:[#allocation62_spill] sm:$0xff] }
 0x4ab   : > { %16931 = vmatprep.mubr.bf16.mxu0 %v7292_v10  ;;  %v23426_v10 = vld [vmem:[#allocation59_spill] sm:$0xff] }
 0x4b2   : > { %16932 = vmatmul.mubr.bf16.gmra.mrb[96].mxu0 %v7294_v56  ;;  %v23430_v56 = vld [vmem:[#allocation69_spill] sm:$0xff] }
 0x4b3   : > { %16935 = vmatprep.mubr.bf16.mxu0 %v7296_v55  ;;  %v7765_v55 = vshrl.u32 %v23430_v56, 16  ;;  %v7768_v32 = vshll.u32 %v23430_v56, 16  ;;  %v23450_v56 = vld [vmem:[#allocation82_spill] sm:$0xff] }
 0x4b5   : > { %v7767_v57 = vrot.slane %v7765_v55, 1  ;;  %v7770_v44 = vrot.slane %v7768_v32, 2  ;;  %v8537_v55 = vrot.slane %v21218_v52, 2  ;;  %v23451_v32 = vld [vmem:[#allocation84_spill] sm:$0xff] }
 0x4b7   : > { %v7771_v48 = vor.u32 %v7770_v44, %v7767_v57  ;;  %v8536_v57 = vrot.slane %v23451_v32, 2  ;;  %v23452_v44 = vld [vmem:[#allocation83_spill] sm:$0xff]  ;;  %v18719_v32 = vld [vmem:[%s23094_s6 + $0x210] sm:$0xff]  }
 0x4ba   : > { %16936 = vmatmul.mubr.bf16.gmra.mrb[100].mxu0 %v7298_v40  ;;  %v23432_v40 = vld [vmem:[#allocation67_spill] sm:$0xff] }
 0x4bb   : > { %16939 = vmatprep.mubr.bf16.mxu0 %v7300_v16  ;;  %v23433_v16 = vld [vmem:[#allocation64_spill] sm:$0xff] }
 0x4bc   : > { %v7772_v36 = vsel %vm3237_vm14, %v23433_v16, %v7771_v48  ;;  %v8541_v48 = vrot.slane %v21222_v2, 2  ;;  %v18696_v16 = vld [vmem:[%s23094_s6 + $0x1c8] sm:$0xff]   ;;  %v8545_v2 = vrot.slane %v21232_v37, 2  ;;  %v8547_v37 = vrot.slane %v21237_v43, 2  ;;  %v18712_v43 = vld [vmem:[%s23094_s6 + $0x1f0] sm:$0xff]  }
 0x4c2   : > { %16940 = vmatmul.mubr.bf16.gmra.mrb[104].mxu0 %v7302_v33  ;;  %v23434_v33 = vld [vmem:[#allocation6_spill] sm:$0xff] }
 0x4c3   : > { %16959 = vmatprep.mubr.bf16.mxu0 %v23415_v13  ;;  %v18683_v13 = vld [vmem:[%s23094_s6 + $0x188] sm:$0xff]  }
 0x4ca   : > { %16960 = vmatmul.mubr.bf16.vlgmr.msra.gmra.mrb[72].mxu0 %v23416_v12  ;;  %v23436_v12 = vld [vmem:[#allocation46_spill] sm:$0xff] }
 0x4cb   : > { %16996 = vmatpush3.bf16.msra.mxu0 %v18672_v42  ;;  %16963 = vmatprep.mubr.bf16.mxu0 %v23417_v39  ;;  %v23421_v42 = vld [vmem:[#allocation53_spill] sm:$0xff] }
 0x4cc   : > { %16997 = vmatprep.subr.bf16.mxu0 %v18673_v58  ;;  %v18684_v39 = vld [vmem:[%s23094_s6 + $0x190] sm:$0xff]  }
 0x4cf   : > { %16998 = vmatpush3.bf16.msra.mxu0 %v18673_v58  ;;  %v23435_v58 = vld [vmem:[#allocation66_spill] sm:$0xff] }
 0x4d0   : > { %16999 = vmatprep.subr.bf16.mxu0 %v18674_v61 }
 0x4d2   : > { %16964 = vmatmul.mubr.bf16.gmra.mrb[76].mxu0 %v23418_v5  ;;  %v23438_v5 = vld [vmem:[#allocation70_spill] sm:$0xff] }
 0x4d3   : > { %16967 = vmatprep.mubr.bf16.mxu0 %v23419_v3  ;;  %17000 = vmatpush3.bf16.msra.mxu0 %v18674_v61  ;;  %v18685_v61 = vld [vmem:[%s23094_s6 + $0x198] sm:$0xff]   ;;  %v18686_v3 = vld [vmem:[%s23094_s6 + $0x1a0] sm:$0xff]  }
 0x4d4   : > { %17001 = vmatprep.subr.bf16.mxu0 %v18675_v63 }
 0x4d7   : > { %17002 = vmatpush3.bf16.msra.mxu0 %v18675_v63  ;;  %v23437_v63 = vld [vmem:[#allocation68_spill] sm:$0xff] }
 0x4d8   : > { %17003 = vmatprep.subr.bf16.mxu0 %v18676_v18 }
 0x4da   : > { %16968 = vmatmul.mubr.bf16.gmra.mrb[80].mxu0 %v23420_v17  ;;  %v23440_v17 = vld [vmem:[#allocation72_spill] sm:$0xff] }
 0x4db   : > { %16971 = vmatprep.mubr.bf16.mxu0 %v23421_v42  ;;  %17004 = vmatpush3.bf16.msra.mxu0 %v18676_v18  ;;  %v18687_v18 = vld [vmem:[%s23094_s6 + $0x1a8] sm:$0xff]   ;;  %v18688_v42 = vld [vmem:[%s23094_s6 + $0x1b0] sm:$0xff]  }
 0x4dc   : > { %17005 = vmatprep.subr.bf16.mxu0 %v18677_v24 }
 0x4df   : > { %17006 = vmatpush3.bf16.msra.mxu0 %v18677_v24  ;;  %v23439_v24 = vld [vmem:[#allocation71_spill] sm:$0xff] }
 0x4e0   : > { %17007 = vmatprep.subr.bf16.mxu0 %v18678_v7 }
 0x4e2   : > { %16972 = vmatmul.mubr.bf16.gmra.mrb[84].mxu0 %v23422_v60  ;;  %v23442_v60 = vld [vmem:[#allocation74_spill] sm:$0xff] }
 0x4e3   : > { %16975 = vmatprep.mubr.bf16.mxu0 %v23423_v6  ;;  %17008 = vmatpush3.bf16.msra.mxu0 %v18678_v7  ;;  %v18689_v7 = vld [vmem:[%s23094_s6 + $0x1b8] sm:$0xff]   ;;  %v18692_v6 = vld [vmem:[%s23094_s6 + $0x1c0] sm:$0xff]  }
 0x4e4   : > { %17009 = vmatprep.subr.bf16.mxu0 %v18679_v46 }
 0x4e7   : > { %17010 = vmatpush3.bf16.msra.mxu0 %v18679_v46  ;;  %v23441_v46 = vld [vmem:[#allocation73_spill] sm:$0xff] }
 0x4e8   : > { %17047 = vmatprep.subr.bf16.mxu0 %v18682_v0 }
 0x4ea   : > { %16976 = vmatmul.mubr.bf16.gmra.mrb[88].mxu0 %v23424_v59  ;;  %v23444_v59 = vld [vmem:[#allocation76_spill] sm:$0xff] }
 0x4eb   : > { %16979 = vmatprep.mubr.bf16.mxu0 %v23425_v15  ;;  %v23445_v15 = vld [vmem:[#allocation77_spill] sm:$0xff] }
 0x4f2   : > { %16980 = vmatmul.mubr.bf16.gmra.mrb[92].mxu0 %v23426_v10  ;;  %v23446_v10 = vld [vmem:[#allocation78_spill] sm:$0xff] }
 0x4f3   : > { %16983 = vmatprep.mubr.bf16.mxu0 %v23427_v21  ;;  %v23447_v21 = vld [vmem:[#allocation79_spill] sm:$0xff] }
 0x4fa   : > { %16984 = vmatmul.mubr.bf16.gmra.mrb[96].mxu0 %v23428_v54  ;;  %v23448_v54 = vld [vmem:[#allocation80_spill] sm:$0xff] }
 0x4fb   : > { %16987 = vmatprep.mubr.bf16.mxu0 %v23429_v8  ;;  %v23449_v8 = vld [vmem:[#allocation81_spill] sm:$0xff] }
 0x502   : > { %16988 = vmatmul.mubr.bf16.gmra.mrb[100].mxu0 %v23431_v38  ;;  %v8538_v38 = vsel %vm3712_vm15, %v8536_v57, %v8537_v55  ;;  %v18720_v57 = vld [vmem:[%s23094_s6 + $0x218] sm:$0xff]  }
 0x503   : > { %16991 = vmatprep.mubr.bf16.mxu0 %v23432_v40  ;;  %v8539_v40 = vrot.slane %v21220_v51, 2  ;;  %v8543_v51 = vrot.slane %v21226_v27, 2  ;;  %v18706_v27 = vld [vmem:[%s23094_s6 + $0x1e0] sm:$0xff]  }
 0x505   : > { %v8542_v52 = vsel %vm3712_vm15, %v8539_v40, %v8541_v48 }
 0x50a   : > { %16992 = vmatmul.mubr.bf16.gmra.mrb[104].mxu0 %v7772_v36  ;;  %v8540_v36 = vsel %vm3712_vm15, %v8537_v55, %v8539_v40  ;;  %v18718_v55 = vld [vmem:[%s23094_s6 + $0x208] sm:$0xff]  }
 0x50b   : > { %17011 = vmatprep.mubr.bf16.mxu0 %v23434_v33  ;;  %v18700_v33 = vld [vmem:[%s23094_s6 + $0x1d0] sm:$0xff]   ;;  %v18728_v40 = vld [vmem:[%s23096_s8 + $0x28] sm:$0xff]  }
 0x512   : > { %17012 = vmatmul.mubr.bf16.vlgmr.msra.gmra.mrb[72].mxu0 %v23435_v58  ;;  %v8544_v58 = vsel %vm3712_vm15, %v8541_v48, %v8543_v51  ;;  %v23457_v48 = vld [vmem:[#allocation89_spill] sm:$0xff] }
 0x513   : > { %17048 = vmatpush3.bf16.msra.mxu0 %v18682_v0  ;;  %17015 = vmatprep.mubr.bf16.mxu0 %v23436_v12  ;;  %v23443_v0 = vld [vmem:[#allocation75_spill] sm:$0xff]  ;;  %v8546_v12 = vsel %vm3712_vm15, %v8543_v51, %v8545_v2 }
 0x514   : > { %17049 = vmatprep.subr.bf16.mxu0 %v18683_v13  ;;  %v23459_v51 = vld [vmem:[#allocation91_spill] sm:$0xff] }
 0x517   : > { %17050 = vmatpush3.bf16.msra.mxu0 %v18683_v13  ;;  %v18703_v13 = vld [vmem:[%s23094_s6 + $0x1d8] sm:$0xff]  }
 0x518   : > { %17051 = vmatprep.subr.bf16.mxu0 %v18684_v39 }
 0x51a   : > { %17016 = vmatmul.mubr.bf16.gmra.mrb[76].mxu0 %v23437_v63  ;;  %v8548_v63 = vsel %vm3712_vm15, %v8545_v2, %v8547_v37  ;;  %v18723_v2 = vld [vmem:[%s23094_s6 + $0x230] sm:$0xff]  }
 0x51b   : > { %17019 = vmatprep.mubr.bf16.mxu0 %v23438_v5  ;;  %17052 = vmatpush3.bf16.msra.mxu0 %v18684_v39  ;;  %v8549_v39 = vrot.slane %v21245_v14, 2  ;;  %v8551_v14 = vrot.slane %v21247_v23, 2  ;;  %v18717_v23 = vld [vmem:[%s23094_s6 + $0x200] sm:$0xff]  }
 0x51c   : > { %17053 = vmatprep.subr.bf16.mxu0 %v18685_v61 }
 0x51d   : > { %v8550_v5 = vsel %vm3712_vm15, %v8547_v37, %v8549_v39  ;;  %v23463_v37 = vld [vmem:[#allocation95_spill] sm:$0xff] }
 0x51f   : > { %17054 = vmatpush3.bf16.msra.mxu0 %v18685_v61  ;;  %v18709_v61 = vld [vmem:[%s23094_s6 + $0x1e8] sm:$0xff]  }
 0x520   : > { %17055 = vmatprep.subr.bf16.mxu0 %v18686_v3 }
 0x522   : > { %17020 = vmatmul.mubr.bf16.gmra.mrb[80].mxu0 %v23439_v24  ;;  %v8552_v24 = vsel %vm3712_vm15, %v8549_v39, %v8551_v14  ;;  %v9035_v39 = vshrl.u32 %v21384_v28, 16 }
 0x523   : > { %17023 = vmatprep.mubr.bf16.mxu0 %v23440_v17  ;;  %17056 = vmatpush3.bf16.msra.mxu0 %v18686_v3  ;;  %v8553_v3 = vrot.slane %v21252_v9, 2  ;;  %v8555_v9 = vrot.slane %v21261_v53, 2  ;;  %v8563_v53 = vrot.slane %v21288_v20, 2 }
 0x524   : > { %17057 = vmatprep.subr.bf16.mxu0 %v18687_v18 }
 0x525   : > { %v8554_v17 = vsel %vm3712_vm15, %v8551_v14, %v8553_v3  ;;  %v23467_v14 = vld [vmem:[#allocation99_spill] sm:$0xff] }
 0x527   : > { %17058 = vmatpush3.bf16.msra.mxu0 %v18687_v18  ;;  %v18715_v18 = vld [vmem:[%s23094_s6 + $0x1f8] sm:$0xff]  }
 0x528   : > { %17059 = vmatprep.subr.bf16.mxu0 %v18688_v42 }
 0x52a   : > { %17024 = vmatmul.mubr.bf16.gmra.mrb[84].mxu0 %v23441_v46 }
 0x52b   : > { %17027 = vmatprep.mubr.bf16.mxu0 %v23442_v60  ;;  %17060 = vmatpush3.bf16.msra.mxu0 %v18688_v42  ;;  %v8557_v42 = vrot.slane %v21269_v26, 2  ;;  %v8559_v60 = vrot.slane %v21278_v4, 2  ;;  %v8565_v26 = vrot.slane %v21298_v1, 2  ;;  %v8567_v4 = vrot.slane %v21304_v29, 2  ;;  %v23454_v29 = vld [vmem:[#allocation86_spill] sm:$0xff] }
 0x52c   : > { %17061 = vmatprep.subr.bf16.mxu0 %v18689_v7 }
 0x52d   : > { %v8558_v46 = vsel %vm3712_vm15, %v8555_v9, %v8557_v42 }
 0x52f   : > { %17062 = vmatpush3.bf16.msra.mxu0 %v18689_v7  ;;  %v8556_v7 = vsel %vm3712_vm15, %v8553_v3, %v8555_v9  ;;  %v23469_v3 = vld [vmem:[#allocation101_spill] sm:$0xff]  ;;  %v21771_v9 = vld [vmem:[%s23095_s7] ss:$0 sm:$0xff] }
 0x530   : > { %17099 = vmatprep.subr.bf16.mxu0 %v18692_v6 }
 0x532   : > { %17028 = vmatmul.mubr.bf16.gmra.mrb[88].mxu0 %v23443_v0  ;;  %v8560_v0 = vsel %vm3712_vm15, %v8557_v42, %v8559_v60 }
 0x533   : > { %17031 = vmatprep.mubr.bf16.mxu0 %v23444_v59 }
 0x53a   : > { %17032 = vmatmul.mubr.bf16.gmra.mrb[92].mxu0 %v23445_v15 }
 0x53b   : > { %17035 = vmatprep.mubr.bf16.mxu0 %v23446_v10  ;;  %v8566_v10 = vsel %vm3712_vm15, %v8563_v53, %v8565_v26 }
 0x542   : > { %17036 = vmatmul.mubr.bf16.gmra.mrb[96].mxu0 %v23447_v21  ;;  %v8568_v21 = vsel %vm3712_vm15, %v8565_v26, %v8567_v4 }
 0x543   : > { %17039 = vmatprep.mubr.bf16.mxu0 %v23448_v54  ;;  %v18716_v54 = vld [vmem:[#allocation3 + $0xa0] ss:$0 sps:$4 sm:$0x33]  }
 0x544   : > { %v8571_v20 = vrot.slane %v18716_v54, 2 }
 0x54a   : > { %17040 = vmatmul.mubr.bf16.gmra.mrb[100].mxu0 %v23449_v8 }
 0x54b   : > { %17043 = vmatprep.mubr.bf16.mxu0 %v23450_v56  ;;  %v23453_v56 = vld [vmem:[#allocation85_spill] sm:$0xff] }
 0x552   : > { %17044 = vmatmul.mubr.bf16.gmra.mrb[104].mxu0 %v23452_v44  ;;  %v23456_v44 = vld [vmem:[#allocation88_spill] sm:$0xff] }
 0x553   : > { %17063 = vmatprep.mubr.bf16.mxu0 %v8538_v38  ;;  %v18727_v38 = vld [vmem:[%s23096_s8 + $0x20] sm:$0xff]  }
 0x554   : > { %17203 = vmatprep.subr.bf16.mxu1 %v18727_v38 }
 0x555   : > { %17204 = vmatpush3.bf16.msra.mxu1 %v18727_v38 }
 0x556   : > { %17205 = vmatprep.subr.bf16.mxu1 %v18728_v40 }
 0x559   : > { %17206 = vmatpush3.bf16.msra.mxu1 %v18728_v40 }
 0x55a   : > { %17064 = vmatmul.mubr.bf16.vlgmr.msra.gmra.mrb[72].mxu0 %v8540_v36  ;;  %v18729_v36 = vld [vmem:[%s23096_s8 + $0x30] sm:$0xff]  }
 0x55b   : > { %17100 = vmatpush3.bf16.msra.mxu0 %v18692_v6  ;;  %17067 = vmatprep.mubr.bf16.mxu0 %v8542_v52  ;;  %v8561_v6 = vrot.slane %v21284_v47, 2  ;;  %v8569_v47 = vrot.slane %v21314_v62, 2  ;;  %v23455_v62 = vld [vmem:[#allocation87_spill] sm:$0xff]  ;;  %v18722_v52 = vld [vmem:[%s23094_s6 + $0x228] sm:$0xff]  }
 0x55c   : > { %17101 = vmatprep.subr.bf16.mxu0 %v18696_v16  ;;  %17207 = vmatprep.subr.bf16.mxu1 %v18729_v36 }
 0x55d   : > { %v8562_v59 = vsel %vm3712_vm15, %v8559_v60, %v8561_v6  ;;  %v8564_v15 = vsel %vm3712_vm15, %v8561_v6, %v8563_v53  ;;  %v8570_v8 = vsel %vm3712_vm15, %v8567_v4, %v8569_v47  ;;  %v8572_v1 = vsel %vm3712_vm15, %v8569_v47, %v8571_v20  ;;  %17208 = vmatpush3.bf16.msra.mxu1 %v18729_v36  ;;  %v23478_v20 = vld [vmem:[#allocation8_spill] sm:$0xff] }
 0x55f   : > { %17102 = vmatpush3.bf16.msra.mxu0 %v18696_v16  ;;  %v18721_v16 = vld [vmem:[%s23094_s6 + $0x220] sm:$0xff]  }
 0x560   : > { %17103 = vmatprep.subr.bf16.mxu0 %v18700_v33 }
 0x562   : > { %17068 = vmatmul.mubr.bf16.gmra.mrb[76].mxu0 %v8544_v58  ;;  %v23460_v58 = vld [vmem:[#allocation92_spill] sm:$0xff] }
 0x563   : > { %17071 = vmatprep.mubr.bf16.mxu0 %v8546_v12  ;;  %17104 = vmatpush3.bf16.msra.mxu0 %v18700_v33  ;;  %v23458_v33 = vld [vmem:[#allocation90_spill] sm:$0xff]  ;;  %v23461_v12 = vld [vmem:[#allocation93_spill] sm:$0xff] }
 0x564   : > { %17105 = vmatprep.subr.bf16.mxu0 %v18703_v13 }
 0x567   : > { %17106 = vmatpush3.bf16.msra.mxu0 %v18703_v13  ;;  %v18724_v13 = vld [vmem:[%s23094_s6 + $0x238] sm:$0xff]  }
 0x568   : > { %17107 = vmatprep.subr.bf16.mxu0 %v18706_v27 }
 0x56a   : > { %17072 = vmatmul.mubr.bf16.gmra.mrb[80].mxu0 %v8548_v63  ;;  %v9037_v63 = vrot.slane %v9035_v39, 2 }
 0x56b   : > { %17075 = vmatprep.mubr.bf16.mxu0 %v8550_v5  ;;  %17108 = vmatpush3.bf16.msra.mxu0 %v18706_v27  ;;  %v23462_v27 = vld [vmem:[#allocation94_spill] sm:$0xff] }
 0x56c   : > { %17109 = vmatprep.subr.bf16.mxu0 %v18709_v61 }
 0x56f   : > { %17110 = vmatpush3.bf16.msra.mxu0 %v18709_v61  ;;  %v9038_v61 = vshll.u32 %v21384_v28, 16  ;;  %v23468_v28 = vld [vmem:[#allocation100_spill] sm:$0xff] }
 0x570   : > { %17111 = vmatprep.subr.bf16.mxu0 %v18712_v43 }
 0x571   : > { %v9040_v5 = vrot.slane %v9038_v61, 3 }
 0x572   : > { %17076 = vmatmul.mubr.bf16.gmra.mrb[84].mxu0 %v8552_v24  ;;  %v23474_v24 = vld [vmem:[#allocation106_spill] sm:$0xff] }
 0x573   : > { %17079 = vmatprep.mubr.bf16.mxu0 %v8554_v17  ;;  %17112 = vmatpush3.bf16.msra.mxu0 %v18712_v43  ;;  %v9041_v43 = vor.u32 %v9040_v5, %v9037_v63  ;;  %v23475_v17 = vld [vmem:[#allocation107_spill] sm:$0xff] }
 0x574   : > { %17113 = vmatprep.subr.bf16.mxu0 %v18715_v18 }
 0x577   : > { %17114 = vmatpush3.bf16.msra.mxu0 %v18715_v18  ;;  %v23473_v18 = vld [vmem:[#allocation105_spill] sm:$0xff] }
 0x578   : > { %17151 = vmatprep.subr.bf16.mxu0 %v18717_v23 }
 0x57a   : > { %17080 = vmatmul.mubr.bf16.gmra.mrb[88].mxu0 %v8556_v7 }
 0x57b   : > { %17083 = vmatprep.mubr.bf16.mxu0 %v8558_v46 }
 0x582   : > { %17084 = vmatmul.mubr.bf16.gmra.mrb[92].mxu0 %v8560_v0 }
 0x583   : > { %17087 = vmatprep.mubr.bf16.mxu0 %v8562_v59 }
 0x58a   : > { %17088 = vmatmul.mubr.bf16.gmra.mrb[96].mxu0 %v8564_v15 }
 0x58b   : > { %17091 = vmatprep.mubr.bf16.mxu0 %v8566_v10 }
 0x592   : > { %17092 = vmatmul.mubr.bf16.gmra.mrb[100].mxu0 %v8568_v21  ;;  %v23477_v21 = vld [vmem:[#allocation9_spill] sm:$0xff] }
 0x593   : > { %17095 = vmatprep.mubr.bf16.mxu0 %v8570_v8 }
 0x59a   : > { %17096 = vmatmul.mubr.bf16.gmra.mrb[104].mxu0 %v8572_v1 }
 0x59b   : > { %17115 = vmatprep.mubr.bf16.mxu0 %v23453_v56 }
 0x5a2   : > { %17116 = vmatmul.mubr.bf16.vlgmr.msra.gmra.mrb[72].mxu0 %v23454_v29  ;;  %v23479_v29 = vld [vmem:[#allocation11_spill] sm:$0xff] }
 0x5a3   : > { %17152 = vmatpush3.bf16.msra.mxu0 %v18717_v23  ;;  %17119 = vmatprep.mubr.bf16.mxu0 %v23455_v62 }
 0x5a4   : > { %17153 = vmatprep.subr.bf16.mxu0 %v18718_v55 }
 0x5a7   : > { %17154 = vmatpush3.bf16.msra.mxu0 %v18718_v55 }
 0x5a8   : > { %17155 = vmatprep.subr.bf16.mxu0 %v18719_v32 }
 0x5aa   : > { %17120 = vmatmul.mubr.bf16.gmra.mrb[76].mxu0 %v23456_v44 }
 0x5ab   : > { %17123 = vmatprep.mubr.bf16.mxu0 %v23457_v48  ;;  %17156 = vmatpush3.bf16.msra.mxu0 %v18719_v32 }
 0x5ac   : > { %17157 = vmatprep.subr.bf16.mxu0 %v18720_v57 }
 0x5af   : > { %17158 = vmatpush3.bf16.msra.mxu0 %v18720_v57  ;;  %v23480_v57 = vld [vmem:[#allocation10_spill] sm:$0xff] }
 0x5b0   : > { %17159 = vmatprep.subr.bf16.mxu0 %v18721_v16 }
 0x5b2   : > { %17124 = vmatmul.mubr.bf16.gmra.mrb[80].mxu0 %v23458_v33 }
 0x5b3   : > { %17127 = vmatprep.mubr.bf16.mxu0 %v23459_v51  ;;  %17160 = vmatpush3.bf16.msra.mxu0 %v18721_v16 }
 0x5b4   : > { %17161 = vmatprep.subr.bf16.mxu0 %v18722_v52 }
 0x5b7   : > { %17162 = vmatpush3.bf16.msra.mxu0 %v18722_v52 }
 0x5b8   : > { %17163 = vmatprep.subr.bf16.mxu0 %v18723_v2 }
 0x5ba   : > { %17128 = vmatmul.mubr.bf16.gmra.mrb[84].mxu0 %v23460_v58 }
 0x5bb   : > { %17131 = vmatprep.mubr.bf16.mxu0 %v23461_v12  ;;  %17164 = vmatpush3.bf16.msra.mxu0 %v18723_v2 }
 0x5bc   : > { %17165 = vmatprep.subr.bf16.mxu0 %v18724_v13 }
 0x5bf   : > { %17166 = vmatpush3.bf16.msra.mxu0 %v18724_v13 }
 0x5c2   : > { %17132 = vmatmul.mubr.bf16.gmra.mrb[88].mxu0 %v23462_v27 }
 0x5c3   : > { %17135 = vmatprep.mubr.bf16.mxu0 %v23463_v37 }
 0x5ca   : > { %17136 = vmatmul.mubr.bf16.gmra.mrb[92].mxu0 %v21329_v30  ;;  %v9042_v30 = vsel %vm4521_vm0, %v21354_v34, %v9041_v43  ;;  %v23471_v34 = vld [vmem:[#allocation103_spill] sm:$0xff] }
 0x5cb   : > { %17139 = vmatprep.mubr.bf16.mxu0 %v21333_v11  ;;  %v23464_v11 = vld [vmem:[#allocation96_spill] sm:$0xff] }
 0x5d2   : > { %17140 = vmatmul.mubr.bf16.gmra.mrb[96].mxu0 %v21338_v22  ;;  %v23465_v22 = vld [vmem:[#allocation97_spill] sm:$0xff] }
 0x5d3   : > { %17143 = vmatprep.mubr.bf16.mxu0 %v21348_v50  ;;  %v23466_v50 = vld [vmem:[#allocation98_spill] sm:$0xff] }
 0x5da   : > { %17144 = vmatmul.mubr.bf16.gmra.mrb[100].mxu0 %v21352_v45  ;;  %v23470_v45 = vld [vmem:[#allocation102_spill] sm:$0xff] }
 0x5db   : > { %17147 = vmatprep.mubr.bf16.mxu0 %v21365_v19  ;;  %v23472_v19 = vld [vmem:[#allocation104_spill] sm:$0xff] }
 0x5e2   : > { %17148 = vmatmul.mubr.bf16.gmra.mrb[104].mxu0 %v9042_v30 }
 0x5e3   : > { %17167 = vmatprep.mubr.bf16.mxu0 %v23464_v11 }
 0x5ea   : > { %17168 = vmatmul.mubr.bf16.vlgmr.msra.gmra.mrb[72].mxu0 %v23465_v22 }
 0x5eb   : > { %17171 = vmatprep.mubr.bf16.mxu0 %v23466_v50  ;;  %v10278_v50 = vld [vmem:[#allocation4 + $0x8] sm:$0xe] }
 0x5f2   : > { %17172 = vmatmul.mubr.bf16.gmra.mrb[76].mxu0 %v23467_v14 }
 0x5f3   : > { %17175 = vmatprep.mubr.bf16.mxu0 %v23468_v28 }
 0x5fa   : > { %17176 = vmatmul.mubr.bf16.gmra.mrb[80].mxu0 %v23469_v3 }
 0x5fb   : > { %17179 = vmatprep.mubr.bf16.mxu0 %v21400_v25  ;;  %v23476_v25 = vld [vmem:[#allocation108_spill] sm:$0xff] }
 0x602   : > { %17180 = vmatmul.mubr.bf16.gmra.mrb[84].mxu0 %v21403_v31  ;;  %v10319_v31 = vld [vmem:[#allocation4] sm:$0xf] }
 0x603   : > { %17183 = vmatprep.mubr.bf16.mxu0 %v21406_v35  ;;  %v21763_v35 = vld [vmem:[%s23096_s8] sm:$0xff]  }
 0x60a   : > { %17184 = vmatmul.mubr.bf16.gmra.mrb[88].mxu0 %v21410_v49  ;;  %v18730_v49 = vld [vmem:[%s23096_s8 + $0x38] sm:$0xff]  }
 0x60b   : > { %17187 = vmatprep.mubr.bf16.mxu0 %v23470_v45  ;;  %17209 = vmatprep.subr.bf16.mxu1 %v18730_v49 }
 0x60c   : > { %17210 = vmatpush3.bf16.msra.mxu1 %v18730_v49 }
 0x60d   : > { %17247 = vmatprep.subr.bf16.mxu1 %v21763_v35 }
 0x612   : > { %17188 = vmatmul.mubr.bf16.gmra.mrb[92].mxu0 %v23471_v34 }
 0x613   : > { %17191 = vmatprep.mubr.bf16.mxu0 %v23472_v19 }
 0x61a   : > { %17192 = vmatmul.mubr.bf16.gmra.mrb[96].mxu0 %v23473_v18 }
 0x61b   : > { %17195 = vmatprep.mubr.bf16.mxu0 %v21433_v41  ;;  %v10320_v41 = vld [vmem:[#allocation4 + $0x4] sm:$0xf] }
 0x61c   : > { %v21766_v23 = vcombine.low %v10319_v31, %v10320_v41 }
 0x61e   : > { %v10469_v7 = vshll.u32 %v21766_v23, 16  ;;  %v10467_v4 = vshrl.u32 %v21766_v23, 16 }
 0x620   : > { %v10471_v47 = vrot.slane %v10469_v7, 1 }
 0x622   : > { %17196 = vmatmul.mubr.bf16.gmra.mrb[100].mxu0 %v23474_v24  ;;  %v21783_v40 = vor.u32 %v10471_v47, %v10467_v4 }
 0x623   : > { %17199 = vmatprep.mubr.bf16.mxu0 %v23475_v17 }
 0x62a   : > { %17200 = vmatmul.mubr.bf16.gmra.mrb[104].mxu0 %v23476_v25  ;;  %v23481_v25 = vld [vmem:[#allocation14_spill] sm:$0xff] }
 0x6bd   : > { %v17169_v42 = vpop.f32.mrb[72].mxu0 }
 0x6be   : > { %v9668_v46 = vadd.f32 %v17169_v42, %v21771_v9  ;;  %v9480_v60 = vpop.f32.mrb[73].mxu0 }
 0x6bf   : > { %v9666_v6 = vadd.f32 %v21771_v9, %v9480_v60  ;;  %v17170_v0 = vpop.f32.mrb[74].mxu0  ;;  %v23483_v60 = vld [vmem:[#allocation12_spill] sm:$0xff] }
 0x6c0   : > { %v9704_v59 = vmax.f32 %v9668_v46, 0.0  ;;  %v9669_v53 = vadd.f32 %v17170_v0, %v21771_v9  ;;  %v9483_v26 = vpop.f32.mrb[75].mxu0 }
 0x6c1   : > { %v9702_v15 = vmax.f32 %v9666_v6, 0.0  ;;  %v9667_v10 = vadd.f32 %v21771_v9, %v9483_v26 }
 0x6c2   : > { %v9740_v54 = vmul.f32 %v9704_v59, %v23477_v21  ;;  %v9705_v8 = vmax.f32 %v9669_v53, 0.0 }
 0x6c3   : > { %v9738_v1 = vmul.f32 %v9702_v15, %v23478_v20  ;;  %v9703_v56 = vmax.f32 %v9667_v10, 0.0 }
 0x6c4   : > { %v15469_v55 = vpack.c.bf16 %v9740_v54, %v9740_v54  ;;  %v9741_v62 = vmul.f32 %v9705_v8, %v23479_v29 }
 0x6c5   : > { %v15467_v32 = vpack.c.bf16 %v9738_v1, %v9738_v1  ;;  %v9739_v44 = vmul.f32 %v9703_v56, %v23480_v57  ;;  %v17173_v38 = vpop.f32.mrb[76].mxu0 }
 0x6c6   : > { %v9902_v48 = vshrl.u32 %v15469_v55, 16  ;;  %v9905_v16 = vshll.u32 %v15469_v55, 16  ;;  %v15470_v36 = vpack.c.bf16 %v9741_v62, %v9741_v62  ;;  %v9672_v52 = vadd.f32 %v17173_v38, %v21771_v9  ;;  %v9496_v33 = vpop.f32.mrb[77].mxu0  ;;  %v23485_v55 = vld [vmem:[#allocation16_spill] sm:$0xff] }
 0x6c7   : > { %v9883_v51 = vshrl.u32 %v15467_v32, 16  ;;  %v9886_v2 = vshll.u32 %v15467_v32, 16  ;;  %v15468_v13 = vpack.c.bf16 %v9739_v44, %v9739_v44  ;;  %v9670_v58 = vadd.f32 %v21771_v9, %v9496_v33  ;;  %v17174_v12 = vpop.f32.mrb[78].mxu0 }
 0x6c8   : > { %v9904_v27 = vrot.slane %v9902_v48, 6  ;;  %v9907_v37 = vrot.slane %v9905_v16, 7  ;;  %v9912_v39 = vshrl.u32 %v15470_v36, 16  ;;  %v9915_v61 = vshll.u32 %v15470_v36, 16  ;;  %v9499_v63 = vpop.f32.mrb[79].mxu0 }
 0x6c9   : > { %v9885_v5 = vrot.slane %v9883_v51, 6  ;;  %v9888_v43 = vrot.slane %v9886_v2, 7  ;;  %v9892_v30 = vshrl.u32 %v15468_v13, 16  ;;  %v9895_v11 = vshll.u32 %v15468_v13, 16  ;;  %v23486_v13 = vld [vmem:[#allocation13_spill] sm:$0xff] }
 0x6ca   : > { %v9908_v22 = vor.u32 %v9907_v37, %v9904_v27  ;;  %v9914_v14 = vrot.slane %v9912_v39, 6  ;;  %v9917_v28 = vrot.slane %v9915_v61, 7  ;;  %v9708_v3 = vmax.f32 %v9672_v52, 0.0  ;;  %v23487_v61 = vld [vmem:[#allocation19_spill] sm:$0xff] }
 0x6cb   : > { %v9889_v45 = vor.u32 %v9888_v43, %v9885_v5  ;;  %v9894_v34 = vrot.slane %v9892_v30, 6  ;;  %v9897_v19 = vrot.slane %v9895_v11, 7  ;;  %v9706_v18 = vmax.f32 %v9670_v58, 0.0 }
 0x6cc   : > { %v9910_v24 = vrot.slane %v9908_v22, 4  ;;  %v9918_v17 = vor.u32 %v9917_v28, %v9914_v14  ;;  %v9744_v49 = vmul.f32 %v9708_v3, %v23481_v25  ;;  %v9673_v31 = vadd.f32 %v17174_v12, %v21771_v9 }
 0x6cd   : > { %v9890_v41 = vrot.slane %v9889_v45, 4  ;;  %v10279_v7 = vsel %vm19143_vm8, %v9889_v45, %v10278_v50  ;;  %v9898_v46 = vor.u32 %v9897_v19, %v9894_v34  ;;  %v9742_v6 = vmul.f32 %v9706_v18, %v23483_v60  ;;  %v17177_v0 = vpop.f32.mrb[80].mxu0 }
 0x6ce   : > { %10280 = vst [vmem:[#allocation4 + $0x8] sm:$0xe] %v10279_v7  ;;  %v9919_v53 = vsel %vm19234_vm11, %v9910_v24, %v9918_v17  ;;  %v9920_v26 = vrot.slane %v9918_v17, 4  ;;  %v15473_v15 = vpack.c.bf16 %v9744_v49, %v9744_v49  ;;  %v9709_v10 = vmax.f32 %v9673_v31, 0.0  ;;  %v9512_v4 = vpop.f32.mrb[81].mxu0 }
 0x6cf   : > { %10283 = vst.msk [vmem:[#allocation4 + $0x14] sm:$0xf] %vm397_vm9, %v9919_v53  ;;  %v9899_v47 = vsel %vm19234_vm11, %v9890_v41, %v9898_v46  ;;  %v9900_v21 = vrot.slane %v9898_v46, 4  ;;  %v15471_v54 = vpack.c.bf16 %v9742_v6, %v9742_v6  ;;  %v9671_v8 = vadd.f32 %v21771_v9, %v9499_v63  ;;  %v17178_v20 = vpop.f32.mrb[82].mxu0  ;;  %v23488_v41 = vld [vmem:[#allocation17_spill] sm:$0xff] }
 0x6d0   : > { %10281 = vst.msk [vmem:[#allocation4 + $0xc] sm:$0xf] %vm397_vm9, %v9899_v47  ;;  %v9942_v1 = vshrl.u32 %v15473_v15, 16  ;;  %v9945_v56 = vshll.u32 %v15473_v15, 16  ;;  %v9745_v29 = vmul.f32 %v9709_v10, %v23485_v55  ;;  %v9676_v62 = vadd.f32 %v17177_v0, %v21771_v9  ;;  %v9515_v32 = vpop.f32.mrb[83].mxu0 }
 0x6d1   : > { %v9909_v57 = vsel %vm19234_vm11, %v9900_v21, %v9908_v22  ;;  %v9922_v44 = vshrl.u32 %v15471_v54, 16  ;;  %v9925_v38 = vshll.u32 %v15471_v54, 16  ;;  %v9707_v48 = vmax.f32 %v9671_v8, 0.0  ;;  %v23489_v21 = vld [vmem:[#allocation20_spill] sm:$0xff] }
 0x6d2   : > { %10282 = vst.msk [vmem:[#allocation4 + $0x10] sm:$0xf] %vm397_vm9, %v9909_v57  ;;  %v9944_v16 = vrot.slane %v9942_v1, 6  ;;  %v9947_v36 = vrot.slane %v9945_v56, 7  ;;  %v15474_v52 = vpack.c.bf16 %v9745_v29, %v9745_v29  ;;  %v9712_v33 = vmax.f32 %v9676_v62, 0.0 }
 0x6d3   : > { %v9924_v51 = vrot.slane %v9922_v44, 6  ;;  %v9927_v2 = vrot.slane %v9925_v38, 7  ;;  %v9743_v58 = vmul.f32 %v9707_v48, %v23486_v13  ;;  %v9674_v12 = vadd.f32 %v21771_v9, %v9512_v4 }
 0x6d4   : > { %v9948_v27 = vor.u32 %v9947_v36, %v9944_v16  ;;  %v9952_v37 = vshrl.u32 %v15474_v52, 16  ;;  %v9955_v39 = vshll.u32 %v15474_v52, 16  ;;  %v9748_v63 = vmul.f32 %v9712_v33, %v23487_v61  ;;  %v23490_v16 = vld [vmem:[#allocation18_spill] sm:$0xff] }
 0x6d5   : > { %v9928_v5 = vor.u32 %v9927_v2, %v9924_v51  ;;  %v15472_v43 = vpack.c.bf16 %v9743_v58, %v9743_v58  ;;  %v9710_v30 = vmax.f32 %v9674_v12, 0.0  ;;  %v9677_v11 = vadd.f32 %v17178_v20, %v21771_v9  ;;  %v17181_v22 = vpop.f32.mrb[84].mxu0 }
 0x6d6   : > { %v9950_v50 = vrot.slane %v9948_v27, 4  ;;  %v9954_v14 = vrot.slane %v9952_v37, 6  ;;  %v9957_v28 = vrot.slane %v9955_v39, 7  ;;  %v15477_v3 = vpack.c.bf16 %v9748_v63, %v9748_v63  ;;  %v9528_v45 = vpop.f32.mrb[85].mxu0  ;;  %v23491_v63 = vld [vmem:[#allocation23_spill] sm:$0xff] }
 0x6d7   : > { %v9929_v34 = vsel %vm19234_vm11, %v9920_v26, %v9928_v5  ;;  %v9930_v19 = vrot.slane %v9928_v5, 4  ;;  %v9932_v18 = vshrl.u32 %v15472_v43, 16  ;;  %v9935_v24 = vshll.u32 %v15472_v43, 16  ;;  %v17182_v17 = vpop.f32.mrb[86].mxu0 }
 0x6d8   : > { %10284 = vst.msk [vmem:[#allocation4 + $0x18] sm:$0xf] %vm397_vm9, %v9929_v34  ;;  %v9958_v25 = vor.u32 %v9957_v28, %v9954_v14  ;;  %v9982_v49 = vshrl.u32 %v15477_v3, 16  ;;  %v9985_v31 = vshll.u32 %v15477_v3, 16  ;;  %v9746_v42 = vmul.f32 %v9710_v30, %v23488_v41  ;;  %v9531_v7 = vpop.f32.mrb[87].mxu0 }
 0x6d9   : > { %v9934_v46 = vrot.slane %v9932_v18, 6  ;;  %v9937_v60 = vrot.slane %v9935_v24, 7  ;;  %v9713_v6 = vmax.f32 %v9677_v11, 0.0  ;;  %v9675_v0 = vadd.f32 %v21771_v9, %v9515_v32  ;;  %v23492_v11 = vld [vmem:[#allocation21_spill] sm:$0xff] }
 0x6da   : > { %v9959_v53 = vsel %vm19234_vm11, %v9950_v50, %v9958_v25  ;;  %v9960_v26 = vrot.slane %v9958_v25, 4  ;;  %v9984_v15 = vrot.slane %v9982_v49, 6  ;;  %v9987_v10 = vrot.slane %v9985_v31, 7  ;;  %v23493_v31 = vld [vmem:[#allocation24_spill] sm:$0xff] }
 0x6db   : > { %10287 = vst.msk [vmem:[#allocation4 + $0x24] sm:$0xf] %vm397_vm9, %v9959_v53  ;;  %v9938_v4 = vor.u32 %v9937_v60, %v9934_v46  ;;  %v15475_v47 = vpack.c.bf16 %v9746_v42, %v9746_v42  ;;  %v9749_v54 = vmul.f32 %v9713_v6, %v23489_v21  ;;  %v9711_v8 = vmax.f32 %v9675_v0, 0.0 }
 0x6dc   : > { %v21817_v20 = vor.u32 %v9987_v10, %v9984_v15  ;;  %v9680_v1 = vadd.f32 %v17181_v22, %v21771_v9  ;;  %v9678_v56 = vadd.f32 %v21771_v9, %v9528_v45  ;;  %v9681_v55 = vadd.f32 %v17182_v17, %v21771_v9 }
 0x6dd   : > { %v9939_v29 = vsel %vm19234_vm11, %v9930_v19, %v9938_v4  ;;  %v9940_v62 = vrot.slane %v9938_v4, 4  ;;  %v9962_v32 = vshrl.u32 %v15475_v47, 16  ;;  %v9965_v57 = vshll.u32 %v15475_v47, 16  ;;  %v17185_v44 = vpop.f32.mrb[88].mxu0 }
 0x6de   : > { %10285 = vst.msk [vmem:[#allocation4 + $0x1c] sm:$0xf] %vm397_vm9, %v9939_v29  ;;  %v9990_v38 = vrot.slane %v21817_v20, 4  ;;  %v15478_v48 = vpack.c.bf16 %v9749_v54, %v9749_v54  ;;  %v9747_v36 = vmul.f32 %v9711_v8, %v23490_v16  ;;  %v9716_v52 = vmax.f32 %v9680_v1, 0.0  ;;  %v9544_v33 = vpop.f32.mrb[89].mxu0  ;;  %v18732_v16 = vld [vmem:[#allocation4 + $0x8] sm:$0xff]  }
 0x6df   : > { %v9949_v51 = vsel %vm19234_vm11, %v9940_v62, %v9948_v27  ;;  %v9964_v2 = vrot.slane %v9962_v32, 6  ;;  %v9967_v13 = vrot.slane %v9965_v57, 7  ;;  %v9714_v58 = vmax.f32 %v9678_v56, 0.0  ;;  %v21829_v12 = vpop.f32.mrb[90].mxu0 }
 0x6e0   : > { %10286 = vst.msk [vmem:[#allocation4 + $0x20] sm:$0xf] %vm397_vm9, %v9949_v51  ;;  %v9992_v37 = vshrl.u32 %v15478_v48, 16  ;;  %v9995_v39 = vshll.u32 %v15478_v48, 16  ;;  %v15476_v61 = vpack.c.bf16 %v9747_v36, %v9747_v36  ;;  %v9752_v5 = vmul.f32 %v9716_v52, %v23491_v63  ;;  %v21833_v43 = vpop.f32.mrb[91].mxu0 }
 0x6e1   : > { %v9968_v30 = vor.u32 %v9967_v13, %v9964_v2  ;;  %v9750_v22 = vmul.f32 %v9714_v58, %v23492_v11  ;;  %v9717_v50 = vmax.f32 %v9681_v55, 0.0  ;;  %v9679_v27 = vadd.f32 %v21771_v9, %v9531_v7 }
 0x6e2   : > { %v9994_v14 = vrot.slane %v9992_v37, 6  ;;  %v9997_v28 = vrot.slane %v9995_v39, 7  ;;  %v9972_v3 = vshrl.u32 %v15476_v61, 16  ;;  %v9975_v45 = vshll.u32 %v15476_v61, 16  ;;  %v23494_v39 = vld [vmem:[#allocation22_spill] sm:$0xff] }
 0x6e3   : > { %v9969_v34 = vsel %vm19234_vm11, %v9960_v26, %v9968_v30  ;;  %v9970_v19 = vrot.slane %v9968_v30, 4  ;;  %v15481_v18 = vpack.c.bf16 %v9752_v5, %v9752_v5  ;;  %v15479_v24 = vpack.c.bf16 %v9750_v22, %v9750_v22 }
 0x6e4   : > { %10288 = vst.msk [vmem:[#allocation4 + $0x28] sm:$0xf] %vm397_vm9, %v9969_v34  ;;  %v9998_v17 = vor.u32 %v9997_v28, %v9994_v14  ;;  %v9974_v25 = vrot.slane %v9972_v3, 6  ;;  %v9977_v49 = vrot.slane %v9975_v45, 7  ;;  %v9753_v41 = vmul.f32 %v9717_v50, %v23493_v31  ;;  %v23495_v3 = vld [vmem:[#allocation27_spill] sm:$0xff]  ;;  %v23496_v34 = vld [vmem:[#allocation25_spill] sm:$0xff] }
 0x6e5   : > { %v10022_v42 = vshrl.u32 %v15481_v18, 16  ;;  %v10025_v46 = vshll.u32 %v15481_v18, 16  ;;  %v10002_v7 = vshrl.u32 %v15479_v24, 16  ;;  %v10005_v60 = vshll.u32 %v15479_v24, 16  ;;  %v21841_v6 = vpop.f32.mrb[92].mxu0 }
 0x6e6   : > { %v9999_v0 = vsel %vm19234_vm11, %v9990_v38, %v9998_v17  ;;  %v10000_v53 = vrot.slane %v9998_v17, 4  ;;  %v9978_v26 = vor.u32 %v9977_v49, %v9974_v25  ;;  %v15482_v15 = vpack.c.bf16 %v9753_v41, %v9753_v41  ;;  %v21845_v10 = vpop.f32.mrb[93].mxu0 }
 0x6e7   : > { %10291 = vst.msk [vmem:[#allocation4 + $0x34] sm:$0xf] %vm397_vm9, %v9999_v0  ;;  %v10024_v4 = vrot.slane %v10022_v42, 6  ;;  %v10027_v47 = vrot.slane %v10025_v46, 7  ;;  %v10004_v21 = vrot.slane %v10002_v7, 6  ;;  %v10007_v54 = vrot.slane %v10005_v60, 7 }
 0x6e8   : > { %v21848_v8 = vpop.f32.mrb[94].mxu0  ;;  %v9979_v1 = vsel %vm19234_vm11, %v9970_v19, %v9978_v26  ;;  %v9980_v56 = vrot.slane %v9978_v26, 4  ;;  %v10032_v55 = vshrl.u32 %v15482_v15, 16  ;;  %v10035_v29 = vshll.u32 %v15482_v15, 16  ;;  %v23497_v0 = vld [vmem:[#allocation28_spill] sm:$0xff] }
 0x6e9   : > { %v21852_v62 = vpop.f32.mrb[95].mxu0  ;;  %10289 = vst.msk [vmem:[#allocation4 + $0x2c] sm:$0xf] %vm397_vm9, %v9979_v1  ;;  %v21855_v32 = vor.u32 %v10027_v47, %v10024_v4  ;;  %v10008_v57 = vor.u32 %v10007_v54, %v10004_v21  ;;  %v9715_v38 = vmax.f32 %v9679_v27, 0.0  ;;  %v9684_v48 = vadd.f32 %v17185_v44, %v21771_v9 }
 0x6ea   : > { %v9989_v36 = vsel %vm19234_vm11, %v9980_v56, %v21817_v20  ;;  %v10034_v52 = vrot.slane %v10032_v55, 6  ;;  %v10037_v51 = vrot.slane %v10035_v29, 7  ;;  %v9682_v2 = vadd.f32 %v21771_v9, %v9544_v33  ;;  %v21872_v33 = vld [vmem:[#allocation4 + $0x10] sm:$0xff]  }
 0x6eb   : > { %10290 = vst.msk [vmem:[#allocation4 + $0x30] sm:$0xf] %vm397_vm9, %v9989_v36  ;;  %v10030_v13 = vrot.slane %v21855_v32, 4  ;;  %v10009_v58 = vsel %vm19234_vm11, %v10000_v53, %v10008_v57  ;;  %v10010_v37 = vrot.slane %v10008_v57, 4  ;;  %v9751_v61 = vmul.f32 %v9715_v38, %v23494_v39  ;;  %v23498_v55 = vld [vmem:[#allocation26_spill] sm:$0xff] }
 0x6ec   : > { %10292 = vst.msk [vmem:[#allocation4 + $0x38] sm:$0xf] %vm397_vm9, %v10009_v58  ;;  %v21868_v44 = vor.u32 %v10037_v51, %v10034_v52  ;;  %v9720_v63 = vmax.f32 %v9684_v48, 0.0  ;;  %v9718_v20 = vmax.f32 %v9682_v2, 0.0  ;;  %v9685_v5 = vadd.f32 %v21829_v12, %v21771_v9 }
 0x6ed   : > { %v15480_v30 = vpack.c.bf16 %v9751_v61, %v9751_v61  ;;  %v10474_v11 = vshll.u32 %v18732_v16, 16  ;;  %v10478_v22 = vshrl.u32 %v18732_v16, 16  ;;  %v9683_v50 = vadd.f32 %v21771_v9, %v21833_v43  ;;  %v21876_v27 = vpop.f32.mrb[96].mxu0 }
 0x6ee   : > { %v10039_v14 = vsel %vm19234_vm11, %v10030_v13, %v21868_v44  ;;  %v10040_v28 = vrot.slane %v21868_v44, 4  ;;  %v9756_v45 = vmul.f32 %v9720_v63, %v23495_v3  ;;  %v9754_v12 = vmul.f32 %v9718_v20, %v23496_v34  ;;  %v21884_v19 = vpop.f32.mrb[97].mxu0  ;;  %v21917_v3 = vld [vmem:[#allocation4 + $0x18] sm:$0xff]  }
 0x6ef   : > { %10295 = vst.msk [vmem:[#allocation4 + $0x44] sm:$0xf] %vm397_vm9, %v10039_v14  ;;  %v10012_v18 = vshrl.u32 %v15480_v30, 16  ;;  %v10015_v24 = vshll.u32 %v15480_v30, 16  ;;  %v9721_v17 = vmax.f32 %v9685_v5, 0.0  ;;  %v10476_v43 = vrot.slane %v10474_v11, 1 }
 0x6f0   : > { %v21887_v25 = vpop.f32.mrb[98].mxu0  ;;  %v15485_v49 = vpack.c.bf16 %v9756_v45, %v9756_v45  ;;  %v15483_v31 = vpack.c.bf16 %v9754_v12, %v9754_v12  ;;  %v9719_v41 = vmax.f32 %v9683_v50, 0.0  ;;  %v10482_v42 = vshll.u32 %v21872_v33, 16 }
 0x6f1   : > { %v21890_v46 = vpop.f32.mrb[99].mxu0  ;;  %v10014_v7 = vrot.slane %v10012_v18, 6  ;;  %v10017_v60 = vrot.slane %v10015_v24, 7  ;;  %v9757_v53 = vmul.f32 %v9721_v17, %v23497_v0  ;;  %v10477_v26 = vsel %vm1773_vm12, %v21783_v40, %v10476_v43 }
 0x6f2   : > { %v10062_v15 = vshrl.u32 %v15485_v49, 16  ;;  %v10065_v4 = vshll.u32 %v15485_v49, 16  ;;  %v10042_v47 = vshrl.u32 %v15483_v31, 16  ;;  %v10045_v21 = vshll.u32 %v15483_v31, 16  ;;  %17211 = vmatprep.mubr.msk.bf16.mxu1 %vm1946_vm13, %v10477_v26  ;;  %v21934_v49 = vld [vmem:[#allocation4 + $0x20] sm:$0xff]  }
 0x6f3   : > { %v10018_v54 = vor.u32 %v10017_v60, %v10014_v7  ;;  %v15486_v1 = vpack.c.bf16 %v9757_v53, %v9757_v53  ;;  %v10480_v56 = vor.u32 %v10478_v22, %v10476_v43  ;;  %v9755_v29 = vmul.f32 %v9719_v41, %v23498_v55  ;;  %v23499_v7 = vld [vmem:[#allocation31_spill] sm:$0xff]  ;;  %v18744_v53 = vld [vmem:[%s23096_s8 + $0x10] sm:$0xff]  }
 0x6f4   : > { %v10064_v57 = vrot.slane %v10062_v15, 6  ;;  %v10067_v38 = vrot.slane %v10065_v4, 7  ;;  %v10044_v48 = vrot.slane %v10042_v47, 6  ;;  %v10047_v16 = vrot.slane %v10045_v21, 7  ;;  %v23500_v21 = vld [vmem:[#allocation29_spill] sm:$0xff] }
 0x6f5   : > { %v10019_v36 = vsel %vm19234_vm11, %v10010_v37, %v10018_v54  ;;  %v10020_v52 = vrot.slane %v10018_v54, 4  ;;  %v10072_v40 = vshrl.u32 %v15486_v1, 16  ;;  %v10075_v51 = vshll.u32 %v15486_v1, 16  ;;  %v21899_v2 = vpop.f32.mrb[100].mxu0  ;;  %v23501_v1 = vld [vmem:[#allocation32_spill] sm:$0xff] }
 0x6f6   : > { %10293 = vst.msk [vmem:[#allocation4 + $0x3c] sm:$0xf] %vm397_vm9, %v10019_v36  ;;  %v21902_v13 = vor.u32 %v10067_v38, %v10064_v57  ;;  %v10048_v58 = vor.u32 %v10047_v16, %v10044_v48  ;;  %v15484_v39 = vpack.c.bf16 %v9755_v29, %v9755_v29  ;;  %v10484_v61 = vrot.slane %v10482_v42, 1  ;;  %v21904_v44 = vpop.f32.mrb[101].mxu0 }
 0x6f7   : > { %v10029_v63 = vsel %vm19234_vm11, %v10020_v52, %v21855_v32  ;;  %v10074_v20 = vrot.slane %v10072_v40, 6  ;;  %v10077_v37 = vrot.slane %v10075_v51, 7  ;;  %v9688_v5 = vadd.f32 %v21841_v6, %v21771_v9  ;;  %v21911_v30 = vpop.f32.mrb[102].mxu0  ;;  %v18739_v32 = vld [vmem:[%s23096_s8 + $0x8] sm:$0xff]  }
 0x6f8   : > { %10294 = vst.msk [vmem:[#allocation4 + $0x40] sm:$0xf] %vm397_vm9, %v10029_v63  ;;  %v10070_v11 = vrot.slane %v21902_v13, 4  ;;  %v10049_v22 = vsel %vm19234_vm11, %v10040_v28, %v10048_v58  ;;  %v10050_v50 = vrot.slane %v10048_v58, 4  ;;  %v10052_v14 = vshrl.u32 %v15484_v39, 16  ;;  %v21922_v45 = vpop.f32.mrb[103].mxu0 }
 0x6f9   : > { %10296 = vst.msk [vmem:[#allocation4 + $0x48] sm:$0xf] %vm397_vm9, %v10049_v22  ;;  %v21925_v6 = vor.u32 %v10077_v37, %v10074_v20  ;;  %v10055_v34 = vshll.u32 %v15484_v39, 16  ;;  %v10485_v12 = vsel %vm1773_vm12, %v10480_v56, %v10484_v61  ;;  %v9724_v18 = vmax.f32 %v9688_v5, 0.0 }
 0x6fa   : > { %v10054_v24 = vrot.slane %v10052_v14, 6  ;;  %17212 = vmatmul.mubr.msk.bf16.vlgmr.msra.gmra.mrb[36].mxu1 %vm1946_vm13, %v10485_v12  ;;  %v9686_v28 = vadd.f32 %v21771_v9, %v21845_v10  ;;  %v9689_v17 = vadd.f32 %v21848_v8, %v21771_v9  ;;  %v10486_v43 = vshrl.u32 %v21872_v33, 16 }
 0x6fb   : > { %v10079_v31 = vsel %vm19234_vm11, %v10070_v11, %v21925_v6  ;;  %v10080_v41 = vrot.slane %v21925_v6, 4  ;;  %v10057_v42 = vrot.slane %v10055_v34, 7  ;;  %17248 = vmatpush3.bf16.msra.mxu1 %v21763_v35  ;;  %v9760_v60 = vmul.f32 %v9724_v18, %v23499_v7  ;;  %v23502_v34 = vld [vmem:[#allocation30_spill] sm:$0xff] }
 0x6fc   : > { %10299 = vst.msk [vmem:[#allocation4 + $0x54] sm:$0xf] %vm397_vm9, %v10079_v31  ;;  %v9722_v10 = vmax.f32 %v9686_v28, 0.0  ;;  %v9725_v0 = vmax.f32 %v9689_v17, 0.0  ;;  %v10488_v8 = vor.u32 %v10486_v43, %v10484_v61  ;;  %v10490_v33 = vshll.u32 %v21917_v3, 16  ;;  %17249 = vmatprep.subr.bf16.mxu1 %v18739_v32 }
 0x6fd   : > { %v10058_v26 = vor.u32 %v10057_v42, %v10054_v24  ;;  %v15489_v15 = vpack.c.bf16 %v9760_v60, %v9760_v60  ;;  %v9687_v4 = vadd.f32 %v21771_v9, %v21852_v62  ;;  %v10494_v35 = vshrl.u32 %v21917_v3, 16  ;;  %v21950_v47 = vpop.f32.mrb[104].mxu0  ;;  %v18749_v62 = vld [vmem:[%s23096_s8 + $0x18] sm:$0xff]   ;;  %v21979_v24 = vld [vmem:[%s23096_s8 + $0x40] sm:$0xff]   ;;  %v21981_v42 = vld [vmem:[#allocation4 + $0x28] sm:$0xff]  }
 0x6fe   : > { %v9758_v54 = vmul.f32 %v9722_v10, %v23500_v21  ;;  %v9761_v56 = vmul.f32 %v9725_v0, %v23501_v1  ;;  %v10492_v55 = vrot.slane %v10490_v33, 1  ;;  %v10498_v29 = vshll.u32 %v21934_v49, 16  ;;  %v21955_v57 = vpop.f32.mrb[105].mxu0 }
 0x6ff   : > { %v10059_v38 = vsel %vm19234_vm11, %v10050_v50, %v10058_v26  ;;  %v10060_v48 = vrot.slane %v10058_v26, 4  ;;  %v10102_v16 = vshrl.u32 %v15489_v15, 16  ;;  %v10105_v36 = vshll.u32 %v15489_v15, 16  ;;  %17250 = vmatpush3.bf16.msra.mxu1 %v18739_v32  ;;  %v21964_v39 = vpop.f32.mrb[106].mxu0 }
 0x700   : > { %10297 = vst.msk [vmem:[#allocation4 + $0x4c] sm:$0xf] %vm397_vm9, %v10059_v38  ;;  %v15487_v52 = vpack.c.bf16 %v9758_v54, %v9758_v54  ;;  %v15490_v40 = vpack.c.bf16 %v9761_v56, %v9761_v56  ;;  %v10493_v51 = vsel %vm1773_vm12, %v10488_v8, %v10492_v55  ;;  %v9723_v58 = vmax.f32 %v9687_v4, 0.0  ;;  %17251 = vmatprep.subr.bf16.mxu1 %v18744_v53  ;;  %v21970_v5 = vpop.f32.mrb[107].mxu0  ;;  %v23503_v4 = vld [vmem:[#allocation35_spill] sm:$0xff] }
 0x701   : > { %v10069_v61 = vsel %vm19234_vm11, %v10060_v48, %v21902_v13  ;;  %v10104_v63 = vrot.slane %v10102_v16, 6  ;;  %v10107_v20 = vrot.slane %v10105_v36, 7  ;;  %17215 = vmatprep.mubr.msk.bf16.mxu1 %vm1946_vm13, %v10493_v51  ;;  %v10496_v37 = vor.u32 %v10494_v35, %v10492_v55 }
 0x702   : > { %10298 = vst.msk [vmem:[#allocation4 + $0x50] sm:$0xf] %vm397_vm9, %v10069_v61  ;;  %v10082_v11 = vshrl.u32 %v15487_v52, 16  ;;  %v10085_v22 = vshll.u32 %v15487_v52, 16  ;;  %v10112_v50 = vshrl.u32 %v15490_v40, 16  ;;  %v10115_v14 = vshll.u32 %v15490_v40, 16 }
 0x703   : > { %v10108_v32 = vor.u32 %v10107_v20, %v10104_v63  ;;  %v9759_v12 = vmul.f32 %v9723_v58, %v23502_v34  ;;  %v10500_v18 = vrot.slane %v10498_v29, 1  ;;  %v9692_v13 = vadd.f32 %v21876_v27, %v21771_v9  ;;  %17252 = vmatpush3.bf16.msra.mxu1 %v18744_v53  ;;  %v23504_v40 = vld [vmem:[#allocation33_spill] sm:$0xff]  ;;  %v22008_v58 = vld [vmem:[#allocation4 + $0x30] sm:$0xff]   ;;  %v23505_v61 = vld [vmem:[#allocation36_spill] sm:$0xff] }
 0x704   : > { %v10084_v28 = vrot.slane %v10082_v11, 6  ;;  %v10087_v17 = vrot.slane %v10085_v22, 7  ;;  %v10114_v43 = vrot.slane %v10112_v50, 6  ;;  %v10117_v31 = vrot.slane %v10115_v14, 7  ;;  %17253 = vmatprep.subr.bf16.mxu1 %v18749_v62 }
 0x705   : > { %v10110_v7 = vrot.slane %v10108_v32, 4  ;;  %v15488_v60 = vpack.c.bf16 %v9759_v12, %v9759_v12  ;;  %v10501_v10 = vsel %vm1773_vm12, %v10496_v37, %v10500_v18  ;;  %v9728_v0 = vmax.f32 %v9692_v13, 0.0  ;;  %v23506_v13 = vld [vmem:[#allocation34_spill] sm:$0xff] }
 0x706   : > { %v10088_v8 = vor.u32 %v10087_v17, %v10084_v28  ;;  %v21984_v27 = vor.u32 %v10117_v31, %v10114_v43  ;;  %17216 = vmatmul.mubr.msk.bf16.gmra.mrb[40].mxu1 %vm1946_vm13, %v10501_v10  ;;  %v9690_v33 = vadd.f32 %v21771_v9, %v21884_v19  ;;  %v9693_v53 = vadd.f32 %v21887_v25, %v21771_v9 }
 0x707   : > { %v10092_v26 = vshrl.u32 %v15488_v60, 16  ;;  %v10095_v15 = vshll.u32 %v15488_v60, 16  ;;  %v9764_v35 = vmul.f32 %v9728_v0, %v23503_v4  ;;  %v10502_v21 = vshrl.u32 %v21934_v49, 16  ;;  %17254 = vmatpush3.bf16.msra.mxu1 %v18749_v62 }
 0x708   : > { %v10089_v54 = vsel %vm19234_vm11, %v10080_v41, %v10088_v8  ;;  %v10090_v1 = vrot.slane %v10088_v8, 4  ;;  %v10119_v19 = vsel %vm19234_vm11, %v10110_v7, %v21984_v27  ;;  %v10120_v56 = vrot.slane %v21984_v27, 4  ;;  %17291 = vmatprep.subr.bf16.mxu1 %v21979_v24 }
 0x709   : > { %10300 = vst.msk [vmem:[#allocation4 + $0x58] sm:$0xf] %vm397_vm9, %v10089_v54  ;;  %10303 = vst.msk [vmem:[#allocation4 + $0x64] sm:$0xf] %vm397_vm9, %v10119_v19  ;;  %v10094_v25 = vrot.slane %v10092_v26, 6  ;;  %v10097_v55 = vrot.slane %v10095_v15, 7  ;;  %v15493_v29 = vpack.c.bf16 %v9764_v35, %v9764_v35  ;;  %v10504_v48 = vor.u32 %v10502_v21, %v10500_v18 }
 0x70a   : > { %v9726_v6 = vmax.f32 %v9690_v33, 0.0  ;;  %v9729_v38 = vmax.f32 %v9693_v53, 0.0  ;;  %v10506_v41 = vshll.u32 %v21981_v42, 16  ;;  %v9691_v16 = vadd.f32 %v21771_v9, %v21890_v46 }
 0x70b   : > { %v10098_v36 = vor.u32 %v10097_v55, %v10094_v25  ;;  %v10142_v62 = vshrl.u32 %v15493_v29, 16  ;;  %v10145_v52 = vshll.u32 %v15493_v29, 16  ;;  %v10510_v11 = vshrl.u32 %v21981_v42, 16 }
 0x70c   : > { %v9762_v51 = vmul.f32 %v9726_v6, %v23504_v40  ;;  %v9765_v63 = vmul.f32 %v9729_v38, %v23505_v61  ;;  %v10508_v20 = vrot.slane %v10506_v41, 1  ;;  %v9727_v37 = vmax.f32 %v9691_v16, 0.0  ;;  %v22032_v38 = vld [vmem:[#allocation4 + $0x38] sm:$0xff]  }
 0x70d   : > { %v10099_v22 = vsel %vm19234_vm11, %v10090_v1, %v10098_v36  ;;  %v10100_v50 = vrot.slane %v10098_v36, 4  ;;  %v10144_v14 = vrot.slane %v10142_v62, 6  ;;  %v10147_v34 = vrot.slane %v10145_v52, 7  ;;  %v23507_v16 = vld [vmem:[#allocation39_spill] sm:$0xff] }
 0x70e   : > { %10301 = vst.msk [vmem:[#allocation4 + $0x5c] sm:$0xf] %vm397_vm9, %v10099_v22  ;;  %v15491_v46 = vpack.c.bf16 %v9762_v51, %v9762_v51  ;;  %v15494_v12 = vpack.c.bf16 %v9765_v63, %v9765_v63  ;;  %v10509_v18 = vsel %vm1773_vm12, %v10504_v48, %v10508_v20  ;;  %v9763_v28 = vmul.f32 %v9727_v37, %v23506_v13  ;;  %v22046_v37 = vld [vmem:[#allocation4 + $0x40] sm:$0xff]  }
 0x70f   : > { %v10109_v17 = vsel %vm19234_vm11, %v10100_v50, %v10108_v32  ;;  %v10148_v43 = vor.u32 %v10147_v34, %v10144_v14  ;;  %17219 = vmatprep.mubr.msk.bf16.mxu1 %vm1946_vm13, %v10509_v18  ;;  %v10512_v31 = vor.u32 %v10510_v11, %v10508_v20  ;;  %v10514_v7 = vshll.u32 %v22008_v58, 16  ;;  %v23509_v13 = vld [vmem:[#allocation40_spill] sm:$0xff] }
 0x710   : > { %10302 = vst.msk [vmem:[#allocation4 + $0x60] sm:$0xf] %vm397_vm9, %v10109_v17  ;;  %v10122_v60 = vshrl.u32 %v15491_v46, 16  ;;  %v10125_v10 = vshll.u32 %v15491_v46, 16  ;;  %v10152_v0 = vshrl.u32 %v15494_v12, 16  ;;  %v10155_v8 = vshll.u32 %v15494_v12, 16 }
 0x711   : > { %v10150_v33 = vrot.slane %v10148_v43, 4  ;;  %v15492_v53 = vpack.c.bf16 %v9763_v28, %v9763_v28  ;;  %v10516_v26 = vrot.slane %v10514_v7, 1  ;;  %v9696_v15 = vadd.f32 %v21899_v2, %v21771_v9  ;;  %v23508_v12 = vld [vmem:[#allocation37_spill] sm:$0xff] }
 0x712   : > { %v10124_v4 = vrot.slane %v10122_v60, 6  ;;  %v10127_v32 = vrot.slane %v10125_v10, 7  ;;  %v10154_v35 = vrot.slane %v10152_v0, 6  ;;  %v10157_v21 = vrot.slane %v10155_v8, 7 }
 0x713   : > { %v10132_v54 = vshrl.u32 %v15492_v53, 16  ;;  %v10135_v1 = vshll.u32 %v15492_v53, 16  ;;  %v10517_v19 = vsel %vm1773_vm12, %v10512_v31, %v10516_v26  ;;  %v9732_v25 = vmax.f32 %v9696_v15, 0.0 }
 0x714   : > { %v10128_v55 = vor.u32 %v10127_v32, %v10124_v4  ;;  %v22025_v29 = vor.u32 %v10157_v21, %v10154_v35  ;;  %17220 = vmatmul.mubr.msk.bf16.gmra.mrb[44].mxu1 %vm1946_vm13, %v10517_v19  ;;  %v9694_v6 = vadd.f32 %v21771_v9, %v21904_v44  ;;  %v9697_v2 = vadd.f32 %v21911_v30, %v21771_v9 }
 0x715   : > { %v10134_v48 = vrot.slane %v10132_v54, 6  ;;  %v10137_v41 = vrot.slane %v10135_v1, 7  ;;  %v9768_v36 = vmul.f32 %v9732_v25, %v23507_v16  ;;  %v10518_v62 = vshrl.u32 %v22008_v58, 16 }
 0x716   : > { %v10129_v52 = vsel %vm19234_vm11, %v10120_v56, %v10128_v55  ;;  %v10130_v40 = vrot.slane %v10128_v55, 4  ;;  %v10159_v44 = vsel %vm19234_vm11, %v10150_v33, %v22025_v29  ;;  %v10160_v30 = vrot.slane %v22025_v29, 4  ;;  %v23510_v33 = vld [vmem:[#allocation38_spill] sm:$0xff]  ;;  %v23512_v29 = vld [vmem:[#allocation41_spill] sm:$0xff] }
 0x717   : > { %10304 = vst.msk [vmem:[#allocation4 + $0x68] sm:$0xf] %vm397_vm9, %v10129_v52  ;;  %10307 = vst.msk [vmem:[#allocation4 + $0x74] sm:$0xf] %vm397_vm9, %v10159_v44  ;;  %v10138_v51 = vor.u32 %v10137_v41, %v10134_v48  ;;  %v15497_v61 = vpack.c.bf16 %v9768_v36, %v9768_v36  ;;  %v9730_v63 = vmax.f32 %v9694_v6, 0.0  ;;  %v9733_v20 = vmax.f32 %v9697_v2, 0.0 }
 0x718   : > { %v10520_v27 = vor.u32 %v10518_v62, %v10516_v26  ;;  %v10522_v56 = vshll.u32 %v22032_v38, 16  ;;  %v9695_v11 = vadd.f32 %v21771_v9, %v21922_v45  ;;  %v10526_v22 = vshrl.u32 %v22032_v38, 16  ;;  %v23511_v52 = vld [vmem:[#allocation43_spill] sm:$0xff] }
 0x719   : > { %v10139_v50 = vsel %vm19234_vm11, %v10130_v40, %v10138_v51  ;;  %v10140_v14 = vrot.slane %v10138_v51, 4  ;;  %v10182_v34 = vshrl.u32 %v15497_v61, 16  ;;  %v10185_v46 = vshll.u32 %v15497_v61, 16 }
 0x71a   : > { %10305 = vst.msk [vmem:[#allocation4 + $0x6c] sm:$0xf] %vm397_vm9, %v10139_v50  ;;  %v9766_v18 = vmul.f32 %v9730_v63, %v23508_v12  ;;  %v9769_v28 = vmul.f32 %v9733_v20, %v23509_v13  ;;  %v10524_v17 = vrot.slane %v10522_v56, 1  ;;  %v9731_v31 = vmax.f32 %v9695_v11, 0.0  ;;  %v22075_v63 = vld [vmem:[#allocation4 + $0x48] sm:$0xff]  }
 0x71b   : > { %v10149_v7 = vsel %vm19234_vm11, %v10140_v14, %v10148_v43  ;;  %v10184_v9 = vrot.slane %v10182_v34, 6  ;;  %v10187_v45 = vrot.slane %v10185_v46, 7  ;;  %v10530_v60 = vshll.u32 %v22046_v37, 16  ;;  %v18868_v43 = vld [vmem:[%s23095_s7] ss:$0 sm:$0xff]  ;;  %v22086_v34 = vld [vmem:[#allocation4 + $0x50] sm:$0xff]  }
 0x71c   : > { %10306 = vst.msk [vmem:[#allocation4 + $0x70] sm:$0xf] %vm397_vm9, %v10149_v7  ;;  %v15495_v10 = vpack.c.bf16 %v9766_v18, %v9766_v18  ;;  %v15498_v0 = vpack.c.bf16 %v9769_v28, %v9769_v28  ;;  %v10525_v8 = vsel %vm1773_vm12, %v10520_v27, %v10524_v17  ;;  %v9767_v53 = vmul.f32 %v9731_v31, %v23510_v33 }
 0x71d   : > { %v10188_v26 = vor.u32 %v10187_v45, %v10184_v9  ;;  %17223 = vmatprep.mubr.msk.bf16.mxu1 %vm1946_vm13, %v10525_v8  ;;  %v10528_v15 = vor.u32 %v10526_v22, %v10524_v17  ;;  %v10532_v4 = vrot.slane %v10530_v60, 1  ;;  %v9700_v32 = vadd.f32 %v18868_v43, %v21950_v47 }
 0x71e   : > { %v10162_v35 = vshrl.u32 %v15495_v10, 16  ;;  %v10165_v21 = vshll.u32 %v15495_v10, 16  ;;  %v10192_v54 = vshrl.u32 %v15498_v0, 16  ;;  %v10195_v1 = vshll.u32 %v15498_v0, 16  ;;  %v23513_v0 = vld [vmem:[#allocation44_spill] sm:$0xff] }
 0x71f   : > { %v10190_v19 = vrot.slane %v10188_v26, 4  ;;  %v15496_v25 = vpack.c.bf16 %v9767_v53, %v9767_v53  ;;  %v10533_v55 = vsel %vm1773_vm12, %v10528_v15, %v10532_v4  ;;  %v9736_v6 = vmax.f32 %v9700_v32, 0.0  ;;  %v22103_v32 = vld [vmem:[#allocation4 + $0x58] sm:$0xff]  }
 0x720   : > { %v10164_v2 = vrot.slane %v10162_v35, 6  ;;  %v10167_v48 = vrot.slane %v10165_v21, 7  ;;  %v10194_v41 = vrot.slane %v10192_v54, 6  ;;  %v10197_v16 = vrot.slane %v10195_v1, 7  ;;  %17224 = vmatmul.mubr.msk.bf16.gmra.mrb[48].mxu1 %vm1946_vm13, %v10533_v55 }
 0x721   : > { %v10172_v36 = vshrl.u32 %v15496_v25, 16  ;;  %v10175_v62 = vshll.u32 %v15496_v25, 16  ;;  %v9772_v40 = vmul.f32 %v9736_v6, %v23511_v52  ;;  %v9698_v47 = vadd.f32 %v18868_v43, %v21955_v57 }
 0x722   : > { %v10168_v44 = vor.u32 %v10167_v48, %v10164_v2  ;;  %v22072_v51 = vor.u32 %v10197_v16, %v10194_v41  ;;  %v9701_v61 = vadd.f32 %v18868_v43, %v21964_v39  ;;  %v10534_v20 = vshrl.u32 %v22046_v37, 16  ;;  %v22110_v2 = vld [vmem:[#allocation4 + $0x60] sm:$0xff]  }
 0x723   : > { %v10174_v27 = vrot.slane %v10172_v36, 6  ;;  %v10177_v56 = vrot.slane %v10175_v62, 7  ;;  %v15501_v11 = vpack.c.bf16 %v9772_v40, %v9772_v40  ;;  %v9734_v22 = vmax.f32 %v9698_v47, 0.0 }
 0x724   : > { %v10169_v50 = vsel %vm19234_vm11, %v10160_v30, %v10168_v44  ;;  %v10170_v14 = vrot.slane %v10168_v44, 4  ;;  %v10199_v57 = vsel %vm19234_vm11, %v10190_v19, %v22072_v51  ;;  %v10200_v39 = vrot.slane %v22072_v51, 4 }
 0x725   : > { %10308 = vst.msk [vmem:[#allocation4 + $0x78] sm:$0xf] %vm397_vm9, %v10169_v50  ;;  %10311 = vst.msk [vmem:[#allocation4 + $0x84] sm:$0xf] %vm397_vm9, %v10199_v57  ;;  %v10178_v46 = vor.u32 %v10177_v56, %v10174_v27  ;;  %v10222_v12 = vshrl.u32 %v15501_v11, 16  ;;  %v10225_v18 = vshll.u32 %v15501_v11, 16  ;;  %v9770_v13 = vmul.f32 %v9734_v22, %v23512_v29 }
 0x726   : > { %v9737_v28 = vmax.f32 %v9701_v61, 0.0  ;;  %v10536_v30 = vor.u32 %v10534_v20, %v10532_v4  ;;  %v10538_v17 = vshll.u32 %v22075_v63, 16  ;;  %v9699_v31 = vadd.f32 %v18868_v43, %v21970_v5  ;;  %v22117_v27 = vld [vmem:[#allocation4 + $0x68] sm:$0xff]   ;;  %v10316_v29 = vld [vmem:[#allocation4 + $0x98] sm:$0x3] }
 0x727   : > { %v10179_v7 = vsel %vm19234_vm11, %v10170_v14, %v10178_v46  ;;  %v10180_v9 = vrot.slane %v10178_v46, 4  ;;  %v10224_v45 = vrot.slane %v10222_v12, 6  ;;  %v10227_v60 = vrot.slane %v10225_v18, 7  ;;  %v22119_v14 = vld [vmem:[#allocation4 + $0x70] sm:$0xff]  }
 0x728   : > { %10309 = vst.msk [vmem:[#allocation4 + $0x7c] sm:$0xf] %vm397_vm9, %v10179_v7  ;;  %v15499_v10 = vpack.c.bf16 %v9770_v13, %v9770_v13  ;;  %v9773_v8 = vmul.f32 %v9737_v28, %v23513_v0  ;;  %v10540_v33 = vrot.slane %v10538_v17, 1  ;;  %v9735_v53 = vmax.f32 %v9699_v31, 0.0 }
 0x729   : > { %v10189_v15 = vsel %vm19234_vm11, %v10180_v9, %v10188_v26  ;;  %v22099_v4 = vor.u32 %v10227_v60, %v10224_v45  ;;  %v10542_v5 = vshrl.u32 %v22075_v63, 16  ;;  %v10546_v43 = vshll.u32 %v22086_v34, 16  ;;  %v23514_v26 = vld [vmem:[#allocation42_spill] sm:$0xff] }
 0x72a   : > { %10310 = vst.msk [vmem:[#allocation4 + $0x80] sm:$0xf] %vm397_vm9, %v10189_v15  ;;  %v10202_v35 = vshrl.u32 %v15499_v10, 16  ;;  %v10205_v21 = vshll.u32 %v15499_v10, 16  ;;  %v15502_v54 = vpack.c.bf16 %v9773_v8, %v9773_v8  ;;  %v10541_v1 = vsel %vm1773_vm12, %v10536_v30, %v10540_v33 }
 0x72b   : > { %v10230_v19 = vrot.slane %v22099_v4, 4  ;;  %17227 = vmatprep.mubr.msk.bf16.mxu1 %vm1946_vm13, %v10541_v1  ;;  %v9771_v25 = vmul.f32 %v9735_v53, %v23514_v26  ;;  %v10544_v55 = vor.u32 %v10542_v5, %v10540_v33  ;;  %v10548_v6 = vrot.slane %v10546_v43, 1 }
 0x72c   : > { %v10204_v48 = vrot.slane %v10202_v35, 6  ;;  %v10207_v41 = vrot.slane %v10205_v21, 7  ;;  %v10232_v16 = vshrl.u32 %v15502_v54, 16  ;;  %v10235_v36 = vshll.u32 %v15502_v54, 16 }
 0x72d   : > { %v15500_v62 = vpack.c.bf16 %v9771_v25, %v9771_v25  ;;  %v10549_v52 = vsel %vm1773_vm12, %v10544_v55, %v10548_v6  ;;  %v10550_v40 = vshrl.u32 %v22086_v34, 16  ;;  %v10554_v47 = vshll.u32 %v22103_v32, 16 }
 0x72e   : > { %v10208_v44 = vor.u32 %v10207_v41, %v10204_v48  ;;  %v10234_v51 = vrot.slane %v10232_v16, 6  ;;  %v10237_v61 = vrot.slane %v10235_v36, 7  ;;  %17228 = vmatmul.mubr.msk.bf16.gmra.mrb[52].mxu1 %vm1946_vm13, %v10549_v52  ;;  %v10558_v20 = vshrl.u32 %v22103_v32, 16 }
 0x72f   : > { %v10212_v56 = vshrl.u32 %v15500_v62, 16  ;;  %v10215_v11 = vshll.u32 %v15500_v62, 16  ;;  %v10552_v22 = vor.u32 %v10550_v40, %v10548_v6  ;;  %v10556_v50 = vrot.slane %v10554_v47, 1 }
 0x730   : > { %v10209_v57 = vsel %vm19234_vm11, %v10200_v39, %v10208_v44  ;;  %v10210_v46 = vrot.slane %v10208_v44, 4  ;;  %v10238_v12 = vor.u32 %v10237_v61, %v10234_v51  ;;  %v10562_v18 = vshll.u32 %v22110_v2, 16  ;;  %v22129_v39 = vld [vmem:[#allocation4 + $0x78] sm:$0xff]  }
 0x731   : > { %10312 = vst.msk [vmem:[#allocation4 + $0x88] sm:$0xf] %vm397_vm9, %v10209_v57  ;;  %v10214_v13 = vrot.slane %v10212_v56, 6  ;;  %v10217_v28 = vrot.slane %v10215_v11, 7  ;;  %v10557_v30 = vsel %vm1773_vm12, %v10552_v22, %v10556_v50  ;;  %v10560_v17 = vor.u32 %v10558_v20, %v10556_v50 }
 0x732   : > { %v10239_v31 = vsel %vm19234_vm11, %v10230_v19, %v10238_v12  ;;  %v10240_v7 = vrot.slane %v10238_v12, 4  ;;  %17231 = vmatprep.mubr.msk.bf16.mxu1 %vm1946_vm13, %v10557_v30  ;;  %v10564_v9 = vrot.slane %v10562_v18, 1  ;;  %v10566_v60 = vshrl.u32 %v22110_v2, 16  ;;  %v22144_v19 = vld [vmem:[#allocation4 + $0x80] sm:$0xff]   ;;  %v22171_v12 = vld [vmem:[#allocation4 + $0xc] sm:$0xf] }
 0x733   : > { %10315 = vst.msk [vmem:[#allocation4 + $0x94] sm:$0xf] %vm397_vm9, %v10239_v31  ;;  %v10218_v45 = vor.u32 %v10217_v28, %v10214_v13  ;;  %v10570_v10 = vshll.u32 %v22117_v27, 16  ;;  %v10578_v0 = vshll.u32 %v22119_v14, 16  ;;  %v10574_v15 = vshrl.u32 %v22117_v27, 16  ;;  %v22176_v13 = vld [vmem:[#allocation4 + $0x10] sm:$0xff]  }
 0x734   : > { %v10317_v33 = vsel %vm18961_vm2, %v10240_v7, %v10316_v29  ;;  %v10565_v53 = vsel %vm1773_vm12, %v10560_v17, %v10564_v9  ;;  %v10568_v35 = vor.u32 %v10566_v60, %v10564_v9  ;;  %v10586_v1 = vshll.u32 %v22129_v39, 16  ;;  %v11447_v18 = vld [vmem:[#allocation4 + $0x8] sm:$0xe]  ;;  %v22179_v30 = vld [vmem:[#allocation4 + $0x18] sm:$0xff]   ;;  %v22181_v17 = vld [vmem:[#allocation4 + $0x20] sm:$0xff]  }
 0x735   : > { %10318 = vst [vmem:[#allocation4 + $0x98] sm:$0x3] %v10317_v33  ;;  %v10219_v5 = vsel %vm19234_vm11, %v10210_v46, %v10218_v45  ;;  %v10220_v43 = vrot.slane %v10218_v45, 4  ;;  %v10572_v21 = vrot.slane %v10570_v10, 1  ;;  %v10580_v54 = vrot.slane %v10578_v0, 1  ;;  %v22184_v31 = vld [vmem:[#allocation4 + $0x28] sm:$0xff]  }
 0x736   : > { %10313 = vst.msk [vmem:[#allocation4 + $0x8c] sm:$0xf] %vm397_vm9, %v10219_v5  ;;  %17232 = vmatmul.mubr.msk.bf16.gmra.mrb[56].mxu1 %vm1946_vm13, %v10565_v53  ;;  %v10582_v6 = vshrl.u32 %v22119_v14, 16  ;;  %v10588_v48 = vrot.slane %v10586_v1, 1  ;;  %v10594_v16 = vshll.u32 %v22144_v19, 16  ;;  %v10590_v59 = vshrl.u32 %v22129_v39, 16 }
 0x737   : > { %v10229_v26 = vsel %vm19234_vm11, %v10220_v43, %v22099_v4  ;;  %v10573_v25 = vsel %vm1773_vm12, %v10568_v35, %v10572_v21  ;;  %v10576_v55 = vor.u32 %v10574_v15, %v10572_v21  ;;  %v10598_v51 = vshrl.u32 %v22144_v19, 16  ;;  %v22191_v60 = vld [vmem:[#allocation4 + $0x30] sm:$0xff]   ;;  %v22196_v5 = vld [vmem:[#allocation4 + $0x38] sm:$0xff]  }
 0x738   : > { %10314 = vst.msk [vmem:[#allocation4 + $0x90] sm:$0xf] %vm397_vm9, %v10229_v26  ;;  %17235 = vmatprep.mubr.msk.bf16.mxu1 %vm1946_vm13, %v10573_v25  ;;  %v10584_v41 = vor.u32 %v10582_v6, %v10580_v54  ;;  %v10596_v52 = vrot.slane %v10594_v16, 1  ;;  %v10592_v40 = vor.u32 %v10590_v59, %v10588_v48  ;;  %v22174_v29 = vcombine.low %v11447_v18, %v22171_v12  ;;  %v22204_v6 = vld [vmem:[#allocation4 + $0x48] sm:$0xff]  }
 0x739   : > { %v10581_v36 = vsel %vm1773_vm12, %v10576_v55, %v10580_v54  ;;  %v11936_v45 = vshrl.u32 %v22176_v13, 16  ;;  %v11939_v10 = vshll.u32 %v22176_v13, 16  ;;  %v11945_v0 = vshrl.u32 %v22179_v30, 16  ;;  %v22202_v55 = vld [vmem:[#allocation4 + $0x40] sm:$0xff]  }
 0x73a   : > { %v10589_v62 = vsel %vm1773_vm12, %v10584_v41, %v10588_v48  ;;  %v10600_v20 = vor.u32 %v10598_v51, %v10596_v52  ;;  %v10597_v56 = vsel %vm1773_vm12, %v10592_v40, %v10596_v52  ;;  %v11928_v7 = vshrl.u32 %v22174_v29, 16 }
 0x73b   : > { %v11931_v9 = vshll.u32 %v22174_v29, 16  ;;  %v11948_v8 = vshll.u32 %v22179_v30, 16  ;;  %v11938_v15 = vrot.slane %v11936_v45, 1  ;;  %v11941_v43 = vrot.slane %v11939_v10, 2 }
 0x73c   : > { %v11930_v33 = vrot.slane %v11928_v7, 1  ;;  %v11947_v35 = vrot.slane %v11945_v0, 1  ;;  %v11954_v54 = vshrl.u32 %v22181_v17, 16  ;;  %v11963_v26 = vshrl.u32 %v22184_v31, 16  ;;  %v22230_v7 = vld [vmem:[#allocation4 + $0x58] sm:$0xff]  }
 0x73d   : > { %v22157_v4 = vld [vmem:[#allocation4 + $0x88] sm:$0xff]   ;;  %v11933_v53 = vrot.slane %v11931_v9, 2  ;;  %v11950_v21 = vrot.slane %v11948_v8, 2  ;;  %v11966_v25 = vshll.u32 %v22184_v31, 16  ;;  %v11942_v48 = vor.u32 %v11941_v43, %v11938_v15 }
 0x73e   : > { %17236 = vmatmul.mubr.msk.bf16.gmra.mrb[60].mxu1 %vm1946_vm13, %v10581_v36  ;;  %v10602_v47 = vshll.u32 %v22157_v4, 16  ;;  %v10606_v50 = vshrl.u32 %v22157_v4, 16  ;;  %v11956_v16 = vrot.slane %v11954_v54, 1  ;;  %v11972_v36 = vshrl.u32 %v22191_v60, 16  ;;  %v18756_v8 = vld [vmem:[%s23096_s8 + $0x50] sm:$0xff]  }
 0x73f   : > { %17239 = vmatprep.mubr.msk.bf16.mxu1 %vm1946_vm13, %v10589_v62  ;;  %v22162_v44 = vld [vmem:[#allocation4 + $0x90] ss:$0 sps:$4 sm:$0x11]   ;;  %v11934_v1 = vor.u32 %v11933_v53, %v11930_v33  ;;  %v11951_v41 = vor.u32 %v11950_v21, %v11947_v35  ;;  %v18755_v62 = vld [vmem:[%s23096_s8 + $0x48] sm:$0xff]   ;;  %v11965_v52 = vrot.slane %v11963_v26, 1  ;;  %v11968_v40 = vrot.slane %v11966_v25, 2 }
 0x740   : > { %v10604_v61 = vrot.slane %v10602_v47, 1  ;;  %v10610_v11 = vshll.u32 %v22162_v44, 16  ;;  %v11975_v47 = vshll.u32 %v22191_v60, 16  ;;  %v11984_v18 = vshll.u32 %v22196_v5, 16 }
 0x741   : > { %v22212_v51 = vsel %vm3237_vm14, %v11934_v1, %v11942_v48  ;;  %v11990_v45 = vshrl.u32 %v22202_v55, 16  ;;  %v11993_v10 = vshll.u32 %v22202_v55, 16  ;;  %v11999_v0 = vshrl.u32 %v22204_v6, 16 }
 0x742   : > { %v10605_v22 = vsel %vm1773_vm12, %v10600_v20, %v10604_v61  ;;  %v10608_v57 = vor.u32 %v10606_v50, %v10604_v61  ;;  %v10612_v46 = vrot.slane %v10610_v11, 1  ;;  %23516 = vst [vmem:[#allocation54_spill] sm:$0xff] %v22212_v51  ;;  %v22215_v61 = vsel %vm3237_vm14, %v11942_v48, %v11951_v41  ;;  %v22218_v11 = vld [vmem:[#allocation4 + $0x8] sm:$0xff]  }
 0x743   : > { %23517 = vst [vmem:[#allocation55_spill] sm:$0xff] %v22215_v61  ;;  %v11974_v20 = vrot.slane %v11972_v36, 1  ;;  %v11986_v43 = vrot.slane %v11984_v18, 2  ;;  %v11992_v35 = vrot.slane %v11990_v45, 1  ;;  %v11995_v21 = vrot.slane %v11993_v10, 2  ;;  %v22272_v10 = vld [vmem:[#allocation4 + $0x80] sm:$0xff]  }
 0x744   : > { %v10613_v28 = vsel %vm1773_vm12, %v10608_v57, %v10612_v46  ;;  %v11969_v57 = vor.u32 %v11968_v40, %v11965_v52  ;;  %v11977_v46 = vrot.slane %v11975_v47, 2  ;;  %v12001_v54 = vrot.slane %v11999_v0, 1  ;;  %v18757_v47 = vld [vmem:[%s23096_s8 + $0x58] sm:$0xff]   ;;  %23523 = vst [vmem:[#allocation51_spill] sm:$0xff] %v22272_v10 }
 0x745   : > { %v12002_v1 = vshll.u32 %v22204_v6, 16  ;;  %v11996_v36 = vor.u32 %v11995_v21, %v11992_v35  ;;  %v12017_v52 = vshrl.u32 %v22230_v7, 16  ;;  %v12020_v40 = vshll.u32 %v22230_v7, 16  ;;  %v22278_v21 = vld [vmem:[#allocation4 + $0x88] sm:$0xff]  }
 0x746   : > { %17240 = vmatmul.mubr.msk.bf16.gmra.mrb[64].mxu1 %vm1946_vm13, %v10597_v56  ;;  %v11981_v56 = vshrl.u32 %v22196_v5, 16  ;;  %v11978_v15 = vor.u32 %v11977_v46, %v11974_v20  ;;  %23524 = vst [vmem:[#allocation52_spill] sm:$0xff] %v22278_v21 }
 0x747   : > { %17243 = vmatprep.mubr.msk.bf16.mxu1 %vm1946_vm13, %v10605_v22  ;;  %v22222_v22 = vld [vmem:[#allocation4 + $0x50] sm:$0xff]   ;;  %v12022_v45 = vrot.slane %v12020_v40, 2 }
 0x748   : > { %v11983_v9 = vrot.slane %v11981_v56, 1  ;;  %v22250_v26 = vsel %vm3237_vm14, %v11969_v57, %v11978_v15  ;;  %v12008_v48 = vshrl.u32 %v22222_v22, 16 }
 0x749   : > { %23520 = vst [vmem:[#allocation48_spill] sm:$0xff] %v22250_v26 }
 0x74a   : > { %v11987_v25 = vor.u32 %v11986_v43, %v11983_v9  ;;  %v12010_v56 = vrot.slane %v12008_v48, 1  ;;  %v12019_v9 = vrot.slane %v12017_v52, 1  ;;  %v22288_v48 = vld [vmem:[%s23096_s8 + $0x60] sm:$0xff]  }
 0x74c   : > { %v22262_v20 = vsel %vm3237_vm14, %v11978_v15, %v11987_v25  ;;  %v22268_v46 = vsel %vm3237_vm14, %v11987_v25, %v11996_v36 }
 0x74d   : > { %23521 = vst [vmem:[#allocation49_spill] sm:$0xff] %v22262_v20  ;;  %23522 = vst [vmem:[#allocation50_spill] sm:$0xff] %v22268_v46 }
 0x74e   : > { %17244 = vmatmul.mubr.msk.bf16.gmra.mrb[68].mxu1 %vm1946_vm13, %v10613_v28  ;;  %v22226_v28 = vld [vmem:[#allocation4 + $0x10] sm:$0xff]  }
 0x74f   : > { %17255 = vmatprep.mubr.msk.bf16.mxu1 %vm1946_vm13, %v21766_v23  ;;  %v11957_v23 = vshll.u32 %v22181_v17, 16 }
 0x751   : > { %v11959_v59 = vrot.slane %v11957_v23, 2  ;;  %v22247_v23 = vld [vmem:[#allocation4 + $0x68] sm:$0xff]  }
 0x752   : > { %v12035_v35 = vshrl.u32 %v22247_v23, 16 }
 0x753   : > { %v11960_v50 = vor.u32 %v11959_v59, %v11956_v16  ;;  %v22254_v16 = vld [vmem:[#allocation4 + $0x70] sm:$0xff]   ;;  %v12004_v59 = vrot.slane %v12002_v1, 2  ;;  %v12023_v1 = vor.u32 %v12022_v45, %v12019_v9 }
 0x754   : > { %v12044_v25 = vshrl.u32 %v22254_v16, 16 }
 0x755   : > { %v22241_v33 = vsel %vm3237_vm14, %v11951_v41, %v11960_v50  ;;  %v22244_v53 = vsel %vm3237_vm14, %v11960_v50, %v11969_v57  ;;  %v12011_v41 = vshll.u32 %v22222_v22, 16  ;;  %v22265_v57 = vld [vmem:[#allocation4 + $0x78] sm:$0xff]   ;;  %v12005_v18 = vor.u32 %v12004_v59, %v12001_v54 }
 0x756   : > { %17256 = vmatmul.mubr.msk.bf16.vlgmr.msra.gmra.mrb[36].mxu1 %vm1946_vm13, %v22218_v11  ;;  %23518 = vst [vmem:[#allocation57_spill] sm:$0xff] %v22241_v33  ;;  %23519 = vst [vmem:[#allocation47_spill] sm:$0xff] %v22244_v53  ;;  %v12047_v59 = vshll.u32 %v22254_v16, 16  ;;  %v12046_v40 = vrot.slane %v12044_v25, 1  ;;  %v12056_v45 = vshll.u32 %v22265_v57, 16 }
 0x757   : > { %17292 = vmatpush3.bf16.msra.mxu1 %v21979_v24  ;;  %17259 = vmatprep.mubr.msk.bf16.mxu1 %vm1946_vm13, %v22226_v28  ;;  %v22238_v24 = vld [vmem:[#allocation4 + $0x60] sm:$0xff]   ;;  %v12013_v50 = vrot.slane %v12011_v41, 2  ;;  %v22281_v54 = vsel %vm3237_vm14, %v11996_v36, %v12005_v18 }
 0x758   : > { %17293 = vmatprep.subr.bf16.mxu1 %v18755_v62  ;;  %v12029_v43 = vshll.u32 %v22238_v24, 16  ;;  %23525 = vst [vmem:[#allocation53_spill] sm:$0xff] %v22281_v54  ;;  %v12049_v9 = vrot.slane %v12047_v59, 2 }
 0x759   : > { %v12014_v0 = vor.u32 %v12013_v50, %v12010_v56  ;;  %v12053_v56 = vshrl.u32 %v22265_v57, 16  ;;  %v22298_v50 = vld [vmem:[#allocation4 + $0x90] sm:$0xff]  }
 0x75a   : > { %23528 = vst [vmem:[#allocation60_spill] sm:$0xff] %v22298_v50  ;;  %v12050_v25 = vor.u32 %v12049_v9, %v12046_v40  ;;  %v12083_v40 = vshll.u32 %v22298_v50, 16 }
 0x75b   : > { %17294 = vmatpush3.bf16.msra.mxu1 %v18755_v62  ;;  %v12026_v62 = vshrl.u32 %v22238_v24, 16  ;;  %v22291_v41 = vsel %vm3237_vm14, %v12005_v18, %v12014_v0  ;;  %v22295_v36 = vsel %vm3237_vm14, %v12014_v0, %v12023_v1  ;;  %v12062_v18 = vshrl.u32 %v22272_v10, 16 }
 0x75c   : > { %17295 = vmatprep.subr.bf16.mxu1 %v18756_v8  ;;  %23526 = vst [vmem:[#allocation56_spill] sm:$0xff] %v22291_v41  ;;  %23527 = vst [vmem:[#allocation58_spill] sm:$0xff] %v22295_v36  ;;  %v12065_v41 = vshll.u32 %v22272_v10, 16  ;;  %v12071_v0 = vshrl.u32 %v22278_v21, 16  ;;  %v12058_v36 = vrot.slane %v12056_v45, 2 }
 0x75d   : > { %v12028_v15 = vrot.slane %v12026_v62, 1 }
 0x75e   : > { %17260 = vmatmul.mubr.msk.bf16.gmra.mrb[40].mxu1 %vm1946_vm13, %v21917_v3  ;;  %v12038_v3 = vshll.u32 %v22247_v23, 16  ;;  %v12067_v59 = vrot.slane %v12065_v41, 2  ;;  %v12073_v54 = vrot.slane %v12071_v0, 1  ;;  %v12388_v41 = vld [vmem:[#allocation4 + $0x8] sm:$0xc] }
 0x75f   : > { %17263 = vmatprep.mubr.msk.bf16.mxu1 %vm1946_vm13, %v21934_v49  ;;  %17296 = vmatpush3.bf16.msra.mxu1 %v18756_v8  ;;  %v12031_v49 = vrot.slane %v12029_v43, 2  ;;  %v12037_v8 = vrot.slane %v12035_v35, 1  ;;  %v12055_v35 = vrot.slane %v12053_v56, 1 }
 0x760   : > { %17297 = vmatprep.subr.bf16.mxu1 %v18757_v47  ;;  %v12040_v52 = vrot.slane %v12038_v3, 2 }
 0x761   : > { %v12032_v62 = vor.u32 %v12031_v49, %v12028_v15  ;;  %v12064_v15 = vrot.slane %v12062_v18, 1  ;;  %v12085_v18 = vrot.slane %v12083_v40, 2 }
 0x762   : > { %v12041_v43 = vor.u32 %v12040_v52, %v12037_v8  ;;  %v12059_v52 = vor.u32 %v12058_v36, %v12055_v35 }
 0x763   : > { %17298 = vmatpush3.bf16.msra.mxu1 %v18757_v47  ;;  %v22306_v3 = vsel %vm3237_vm14, %v12023_v1, %v12032_v62  ;;  %v12074_v47 = vshll.u32 %v22278_v21, 16  ;;  %v12080_v1 = vshrl.u32 %v22298_v50, 16  ;;  %v12068_v56 = vor.u32 %v12067_v59, %v12064_v15 }
 0x764   : > { %17335 = vmatprep.subr.bf16.mxu1 %v22288_v48  ;;  %23529 = vst [vmem:[#allocation62_spill] sm:$0xff] %v22306_v3  ;;  %v22309_v49 = vsel %vm3237_vm14, %v12032_v62, %v12041_v43  ;;  %v22315_v8 = vsel %vm3237_vm14, %v12041_v43, %v12050_v25  ;;  %v22322_v9 = vsel %vm3237_vm14, %v12050_v25, %v12059_v52  ;;  %v12406_v25 = vrot.slane %v22181_v17, 2 }
 0x765   : > { %23530 = vst [vmem:[#allocation59_spill] sm:$0xff] %v22309_v49  ;;  %23531 = vst [vmem:[#allocation61_spill] sm:$0xff] %v22315_v8  ;;  %v12076_v62 = vrot.slane %v12074_v47, 2  ;;  %v12082_v45 = vrot.slane %v12080_v1, 1  ;;  %v22326_v43 = vsel %vm3237_vm14, %v12059_v52, %v12068_v56  ;;  %v12402_v8 = vrot.slane %v22176_v13, 2 }
 0x766   : > { %17264 = vmatmul.mubr.msk.bf16.gmra.mrb[44].mxu1 %vm1946_vm13, %v21981_v42  ;;  %23532 = vst [vmem:[#allocation45_spill] sm:$0xff] %v22322_v9  ;;  %v15222_v42 = vcombine.low %v12388_v41, %v22171_v12  ;;  %23533 = vst [vmem:[#allocation63_spill] sm:$0xff] %v22326_v43  ;;  %v12408_v59 = vrot.slane %v22184_v31, 2  ;;  %v12410_v52 = vrot.slane %v22191_v60, 2  ;;  %v12414_v41 = vrot.slane %v22202_v55, 2  ;;  %v22456_v9 = vld [vmem:[#allocation4 + $0x50] sm:$0xff]  }
 0x767   : > { %17267 = vmatprep.mubr.msk.bf16.mxu1 %vm1946_vm13, %v22008_v58  ;;  %v12077_v36 = vor.u32 %v12076_v62, %v12073_v54  ;;  %v22328_v35 = vor.u32 %v12085_v18, %v12082_v45  ;;  %v12404_v58 = vrot.slane %v22179_v30, 2  ;;  %v12418_v45 = vrot.slane %v22222_v22, 2  ;;  %v22365_v18 = vld [vmem:[#allocation4 + $0x98] ss:$0 sps:$4 sm:$0x33]  }
 0x768   : > { %v12401_v0 = vrot.slane %v15222_v42, 2  ;;  %v22352_v40 = vsel %vm3712_vm15, %v12406_v25, %v12408_v59  ;;  %v22358_v62 = vsel %vm3712_vm15, %v12408_v59, %v12410_v52  ;;  %23542 = vst [vmem:[#allocation70_spill] sm:$0xff] %v22365_v18 }
 0x769   : > { %23534 = vst [vmem:[#allocation69_spill] sm:$0xff] %v22328_v35  ;;  %v22333_v15 = vsel %vm3237_vm14, %v12068_v56, %v12077_v36  ;;  %v22339_v12 = vsel %vm3237_vm14, %v12077_v36, %v22328_v35  ;;  %v22345_v47 = vsel %vm3712_vm15, %v12402_v8, %v12404_v58  ;;  %v22349_v1 = vsel %vm3712_vm15, %v12404_v58, %v12406_v25 }
 0x76a   : > { %23535 = vst [vmem:[#allocation65_spill] sm:$0xff] %v22333_v15  ;;  %23536 = vst [vmem:[#allocation67_spill] sm:$0xff] %v22339_v12  ;;  %v22342_v54 = vsel %vm3712_vm15, %v12401_v0, %v12402_v8  ;;  %v12412_v56 = vrot.slane %v22196_v5, 2  ;;  %v12416_v8 = vrot.slane %v22204_v6, 2  ;;  %v12420_v36 = vrot.slane %v22230_v7, 2 }
 0x76b   : > { %23537 = vst [vmem:[#allocation64_spill] sm:$0xff] %v22342_v54  ;;  %23538 = vst [vmem:[#allocation6_spill] sm:$0xff] %v22345_v47  ;;  %v12424_v0 = vrot.slane %v22247_v23, 2 }
 0x76c   : > { %23539 = vst [vmem:[#allocation66_spill] sm:$0xff] %v22349_v1  ;;  %23540 = vst [vmem:[#allocation46_spill] sm:$0xff] %v22352_v40  ;;  %v22368_v42 = vsel %vm3712_vm15, %v12410_v52, %v12412_v56  ;;  %v22374_v58 = vsel %vm3712_vm15, %v12412_v56, %v12414_v41  ;;  %v22377_v25 = vsel %vm3712_vm15, %v12414_v41, %v12416_v8  ;;  %v12428_v56 = vrot.slane %v22265_v57, 2 }
 0x76d   : > { %23541 = vst [vmem:[#allocation68_spill] sm:$0xff] %v22358_v62  ;;  %23543 = vst [vmem:[#allocation71_spill] sm:$0xff] %v22368_v42  ;;  %v22380_v59 = vsel %vm3712_vm15, %v12416_v8, %v12418_v45  ;;  %v22384_v52 = vsel %vm3712_vm15, %v12418_v45, %v12420_v36  ;;  %v12430_v41 = vrot.slane %v22272_v10, 2  ;;  %v12432_v8 = vrot.slane %v22278_v21, 2 }
 0x76e   : > { %17268 = vmatmul.mubr.msk.bf16.gmra.mrb[48].mxu1 %vm1946_vm13, %v22032_v38  ;;  %v12422_v38 = vrot.slane %v22238_v24, 2  ;;  %23544 = vst [vmem:[#allocation72_spill] sm:$0xff] %v22374_v58  ;;  %23545 = vst [vmem:[#allocation73_spill] sm:$0xff] %v22377_v25 }
 0x76f   : > { %17271 = vmatprep.mubr.msk.bf16.mxu1 %vm1946_vm13, %v22046_v37  ;;  %23546 = vst [vmem:[#allocation74_spill] sm:$0xff] %v22380_v59  ;;  %v12426_v37 = vrot.slane %v22254_v16, 2  ;;  %23547 = vst [vmem:[#allocation75_spill] sm:$0xff] %v22384_v52  ;;  %v12434_v59 = vrot.slane %v22298_v50, 2 }
 0x770   : > { %v22387_v42 = vsel %vm3712_vm15, %v12420_v36, %v12422_v38  ;;  %v22390_v62 = vsel %vm3712_vm15, %v12422_v38, %v12424_v0  ;;  %v12436_v36 = vrot.slane %v22365_v18, 2  ;;  %v22407_v38 = vsel %vm3712_vm15, %v12430_v41, %v12432_v8 }
 0x771   : > { %23548 = vst [vmem:[#allocation76_spill] sm:$0xff] %v22387_v42  ;;  %23549 = vst [vmem:[#allocation77_spill] sm:$0xff] %v22390_v62  ;;  %v22394_v58 = vsel %vm3712_vm15, %v12424_v0, %v12426_v37  ;;  %v22400_v45 = vsel %vm3712_vm15, %v12426_v37, %v12428_v56  ;;  %v22404_v42 = vsel %vm3712_vm15, %v12428_v56, %v12430_v41  ;;  %v12729_v62 = vld [vmem:[#allocation4 + $0x10] sm:$0xc]  ;;  %v11106_v37 = vld [vmem:[#allocation4] sm:$0xe] }
 0x772   : > { %23550 = vst [vmem:[#allocation78_spill] sm:$0xff] %v22394_v58  ;;  %23551 = vst [vmem:[#allocation79_spill] sm:$0xff] %v22400_v45  ;;  %v22410_v0 = vsel %vm3712_vm15, %v12432_v8, %v12434_v59  ;;  %v22413_v58 = vsel %vm3712_vm15, %v12434_v59, %v12436_v36  ;;  %v22419_v45 = vld [vmem:[#allocation4 + $0x14] sm:$0xf]  ;;  %v22424_v41 = vld [vmem:[#allocation4 + $0x18] sm:$0xff]  }
 0x773   : > { %23552 = vst [vmem:[#allocation80_spill] sm:$0xff] %v22404_v42  ;;  %23553 = vst [vmem:[#allocation81_spill] sm:$0xff] %v22407_v38  ;;  %v22422_v56 = vcombine.low %v12729_v62, %v22419_v45  ;;  %v22426_v8 = vld [vmem:[#allocation4 + $0x20] sm:$0xff]   ;;  %v22428_v36 = vld [vmem:[#allocation4 + $0x28] sm:$0xff]   ;;  %v13218_v42 = vshrl.u32 %v22424_v41, 16  ;;  %v13221_v52 = vshll.u32 %v22424_v41, 16 }
 0x774   : > { %23554 = vst [vmem:[#allocation82_spill] sm:$0xff] %v22410_v0  ;;  %23555 = vst [vmem:[#allocation84_spill] sm:$0xff] %v22413_v58  ;;  %v18871_v0 = vld [vmem:[#allocation4 + $0x4] sm:$0xf]  ;;  %v22430_v58 = vld [vmem:[#allocation4 + $0x30] sm:$0xff]   ;;  %v13230_v40 = vshll.u32 %v22426_v8, 16 }
 0x775   : > { %23556 = vst [vmem:[#allocation83_spill] sm:$0xff] %v22422_v56  ;;  %v15111_v59 = vcombine.low %v11106_v37, %v18871_v0  ;;  %v22437_v38 = vld [vmem:[#allocation4 + $0x38] sm:$0xff]   ;;  %v13227_v0 = vshrl.u32 %v22426_v8, 16  ;;  %v13220_v62 = vrot.slane %v13218_v42, 2  ;;  %v13223_v1 = vrot.slane %v13221_v52, 3 }
 0x776   : > { %17272 = vmatmul.mubr.msk.bf16.gmra.mrb[52].mxu1 %vm1946_vm13, %v22075_v63  ;;  %v13210_v63 = vshrl.u32 %v22422_v56, 16  ;;  %v13236_v54 = vshrl.u32 %v22428_v36, 16  ;;  %v13232_v12 = vrot.slane %v13230_v40, 3  ;;  %v13239_v15 = vshll.u32 %v22428_v36, 16 }
 0x777   : > { %17275 = vmatprep.mubr.msk.bf16.mxu1 %vm1946_vm13, %v22086_v34  ;;  %v13213_v34 = vshll.u32 %v22422_v56, 16  ;;  %v22444_v37 = vrot.slane %v15111_v59, 1  ;;  %v13229_v47 = vrot.slane %v13227_v0, 2  ;;  %v13245_v18 = vshrl.u32 %v22430_v58, 16 }
 0x778   : > { %v13212_v25 = vrot.slane %v13210_v63, 2  ;;  %v13224_v59 = vor.u32 %v13223_v1, %v13220_v62  ;;  %v13238_v63 = vrot.slane %v13236_v54, 2  ;;  %v13254_v43 = vshrl.u32 %v22437_v38, 16  ;;  %v22463_v1 = vld [vmem:[#allocation4 + $0x58] sm:$0xff]  }
 0x779   : > { %v13215_v56 = vrot.slane %v13213_v34, 3  ;;  %v13248_v34 = vshll.u32 %v22430_v58, 16  ;;  %v13233_v42 = vor.u32 %v13232_v12, %v13229_v47  ;;  %v13241_v52 = vrot.slane %v13239_v15, 3  ;;  %v22471_v15 = vld [vmem:[#allocation4 + $0x60] sm:$0xff]  }
 0x77a   : > { %v13247_v0 = vrot.slane %v13245_v18, 2  ;;  %v13256_v49 = vrot.slane %v13254_v43, 2 }
 0x77b   : > { %v13216_v35 = vor.u32 %v13215_v56, %v13212_v25  ;;  %v13257_v25 = vshll.u32 %v22437_v38, 16  ;;  %v13250_v56 = vrot.slane %v13248_v34, 3  ;;  %v22466_v54 = vsel %vm4521_vm0, %v13224_v59, %v13233_v42 }
 0x77c   : > { %23558 = vst [vmem:[#allocation86_spill] sm:$0xff] %v22466_v54  ;;  %v13242_v62 = vor.u32 %v13241_v52, %v13238_v63 }
 0x77d   : > { %v22460_v40 = vsel %vm4521_vm0, %v13216_v35, %v13224_v59  ;;  %v13259_v46 = vrot.slane %v13257_v25, 3  ;;  %v13251_v35 = vor.u32 %v13250_v56, %v13247_v0  ;;  %v22477_v59 = vld [vmem:[#allocation4 + $0x68] sm:$0xff]   ;;  %v13281_v25 = vshrl.u32 %v22456_v9, 16 }
 0x77e   : > { %17276 = vmatmul.mubr.msk.bf16.gmra.mrb[56].mxu1 %vm1946_vm13, %v22103_v32  ;;  %v22447_v32 = vld [vmem:[#allocation4 + $0x40] sm:$0xff]   ;;  %23557 = vst [vmem:[#allocation85_spill] sm:$0xff] %v22460_v40  ;;  %v22480_v63 = vsel %vm4521_vm0, %v13233_v42, %v13242_v62  ;;  %v13284_v56 = vshll.u32 %v22456_v9, 16  ;;  %v22487_v40 = vld [vmem:[#allocation4 + $0x70] sm:$0xff]   ;;  %v13290_v42 = vshrl.u32 %v22463_v1, 16  ;;  %v13311_v33 = vshll.u32 %v22477_v59, 16 }
 0x77f   : > { %17279 = vmatprep.mubr.msk.bf16.mxu1 %vm1946_vm13, %v22110_v2  ;;  %v22452_v2 = vld [vmem:[#allocation4 + $0x48] sm:$0xff]   ;;  %v13263_v3 = vshrl.u32 %v22447_v32, 16  ;;  %v13266_v12 = vshll.u32 %v22447_v32, 16  ;;  %23559 = vst [vmem:[#allocation87_spill] sm:$0xff] %v22480_v63  ;;  %v13260_v34 = vor.u32 %v13259_v46, %v13256_v49  ;;  %v22484_v54 = vsel %vm4521_vm0, %v13242_v62, %v13251_v35  ;;  %v22493_v46 = vld [vmem:[#allocation4 + $0x78] sm:$0xff]  }
 0x780   : > { %v13272_v43 = vshrl.u32 %v22452_v2, 16  ;;  %v13275_v18 = vshll.u32 %v22452_v2, 16  ;;  %23560 = vst [vmem:[#allocation88_spill] sm:$0xff] %v22484_v54  ;;  %v13283_v53 = vrot.slane %v13281_v25, 2  ;;  %v13293_v62 = vshll.u32 %v22463_v1, 16 }
 0x781   : > { %v13265_v47 = vrot.slane %v13263_v3, 2  ;;  %v13268_v52 = vrot.slane %v13266_v12, 3  ;;  %v22490_v20 = vsel %vm4521_vm0, %v13251_v35, %v13260_v34  ;;  %v13286_v12 = vrot.slane %v13284_v56, 3 }
 0x782   : > { %v13274_v3 = vrot.slane %v13272_v43, 2  ;;  %v13277_v0 = vrot.slane %v13275_v18, 3  ;;  %23561 = vst [vmem:[#allocation89_spill] sm:$0xff] %v22490_v20  ;;  %v13299_v43 = vshrl.u32 %v22471_v15, 16  ;;  %v13292_v54 = vrot.slane %v13290_v42, 2  ;;  %v22511_v42 = vld [vmem:[#allocation4 + $0x88] sm:$0xff]  }
 0x783   : > { %v13269_v26 = vor.u32 %v13268_v52, %v13265_v47  ;;  %v13302_v63 = vshll.u32 %v22471_v15, 16  ;;  %v13308_v35 = vshrl.u32 %v22477_v59, 16  ;;  %v22502_v47 = vld [vmem:[#allocation4 + $0x80] sm:$0xff]   ;;  %v13287_v25 = vor.u32 %v13286_v12, %v13283_v53 }
 0x784   : > { %v13278_v49 = vor.u32 %v13277_v0, %v13274_v3  ;;  %v13295_v3 = vrot.slane %v13293_v62, 3  ;;  %v13301_v0 = vrot.slane %v13299_v43, 2  ;;  %v13326_v53 = vshrl.u32 %v22493_v46, 16 }
 0x785   : > { %v22498_v18 = vsel %vm4521_vm0, %v13260_v34, %v13269_v26  ;;  %v13304_v56 = vrot.slane %v13302_v63, 3  ;;  %v13310_v20 = vrot.slane %v13308_v35, 2  ;;  %v13317_v34 = vshrl.u32 %v22487_v40, 16  ;;  %v22520_v63 = vld [vmem:[#allocation4 + $0x90] sm:$0xff]  }
 0x786   : > { %17280 = vmatmul.mubr.msk.bf16.gmra.mrb[60].mxu1 %vm1946_vm13, %v22117_v27  ;;  %23562 = vst [vmem:[#allocation90_spill] sm:$0xff] %v22498_v18  ;;  %v22505_v52 = vsel %vm4521_vm0, %v13269_v26, %v13278_v49  ;;  %v22514_v18 = vsel %vm4521_vm0, %v13278_v49, %v13287_v25  ;;  %v13296_v61 = vor.u32 %v13295_v3, %v13292_v54  ;;  %v13320_v26 = vshll.u32 %v22487_v40, 16  ;;  %v22527_v3 = vld [vmem:[#allocation4 + $0x98] sm:$0xff]  }
 0x787   : > { %17283 = vmatprep.mubr.msk.bf16.mxu1 %vm1946_vm13, %v22119_v14  ;;  %23563 = vst [vmem:[#allocation91_spill] sm:$0xff] %v22505_v52  ;;  %23564 = vst [vmem:[#allocation92_spill] sm:$0xff] %v22514_v18  ;;  %v13305_v12 = vor.u32 %v13304_v56, %v13301_v0  ;;  %v13313_v62 = vrot.slane %v13311_v33, 3  ;;  %v13319_v43 = vrot.slane %v13317_v34, 2  ;;  %v13329_v35 = vshll.u32 %v22493_v46, 16 }
 0x788   : > { %v22524_v52 = vsel %vm4521_vm0, %v13287_v25, %v13296_v61  ;;  %v13322_v49 = vrot.slane %v13320_v26, 3  ;;  %v13328_v18 = vrot.slane %v13326_v53, 2  ;;  %v13335_v54 = vshrl.u32 %v22502_v47, 16 }
 0x789   : > { %23565 = vst [vmem:[#allocation93_spill] sm:$0xff] %v22524_v52  ;;  %v22530_v51 = vsel %vm4521_vm0, %v13296_v61, %v13305_v12  ;;  %v13314_v50 = vor.u32 %v13313_v62, %v13310_v20  ;;  %v13331_v21 = vrot.slane %v13329_v35, 3  ;;  %v13338_v0 = vshll.u32 %v22502_v47, 16 }
 0x78a   : > { %23566 = vst [vmem:[#allocation94_spill] sm:$0xff] %v22530_v51  ;;  %v13323_v33 = vor.u32 %v13322_v49, %v13319_v43  ;;  %v13337_v56 = vrot.slane %v13335_v54, 2  ;;  %v13344_v34 = vshrl.u32 %v22511_v42, 16  ;;  %v13347_v25 = vshll.u32 %v22511_v42, 16  ;;  %v13670_v43 = vld [vmem:[#allocation4 + $0x10] sm:$0x8] }
 0x78b   : > { %v22536_v26 = vsel %vm4521_vm0, %v13305_v12, %v13314_v50  ;;  %v13332_v53 = vor.u32 %v13331_v21, %v13328_v18  ;;  %v13340_v52 = vrot.slane %v13338_v0, 3  ;;  %v13353_v10 = vshrl.u32 %v22520_v63, 16 }
 0x78c   : > { %v22540_v61 = vsel %vm4521_vm0, %v13314_v50, %v13323_v33  ;;  %v13346_v20 = vrot.slane %v13344_v34, 2  ;;  %v13349_v62 = vrot.slane %v13347_v25, 3  ;;  %v13356_v35 = vshll.u32 %v22520_v63, 16  ;;  %v22560_v25 = vld [vmem:[#allocation4 + $0x18] sm:$0xff]  }
 0x78d   : > { %v22544_v49 = vsel %vm4521_vm0, %v13323_v33, %v13332_v53  ;;  %v13341_v54 = vor.u32 %v13340_v52, %v13337_v56  ;;  %v13355_v51 = vrot.slane %v13353_v10, 2  ;;  %v13362_v12 = vshrl.u32 %v22527_v3, 16 }
 0x78e   : > { %17284 = vmatmul.mubr.msk.bf16.gmra.mrb[64].mxu1 %vm1946_vm13, %v22129_v39  ;;  %23567 = vst [vmem:[#allocation95_spill] sm:$0xff] %v22544_v49  ;;  %v23568_v21 = vrot.slane %v22218_v11, 1  ;;  %v13350_v18 = vor.u32 %v13349_v62, %v13346_v20  ;;  %v13358_v0 = vrot.slane %v13356_v35, 3  ;;  %v13365_v34 = vshll.u32 %v22527_v3, 16  ;;  %v18873_v35 = vld [vmem:[#allocation4 + $0x20] sm:$0xff]  }
 0x78f   : > { %17287 = vmatprep.mubr.msk.bf16.mxu1 %vm1946_vm13, %v22144_v19  ;;  %v11122_v33 = vrot.slane %v22226_v28, 1  ;;  %v22557_v10 = vsel %vm4521_vm0, %v13332_v53, %v13341_v54  ;;  %v13364_v52 = vrot.slane %v13362_v12, 2  ;;  %v15333_v56 = vcombine.low %v13670_v43, %v22419_v45 }
 0x790   : > { %v11121_v50 = vsel %vm2428_vm1, %v22444_v37, %v23568_v21  ;;  %v11124_v49 = vrot.slane %v22560_v25, 1  ;;  %v22564_v37 = vsel %vm4521_vm0, %v13341_v54, %v13350_v18  ;;  %v13359_v20 = vor.u32 %v13358_v0, %v13355_v51 }
 0x791   : > { %v13367_v62 = vrot.slane %v13365_v34, 3  ;;  %v11126_v21 = vrot.slane %v18873_v35, 1  ;;  %v13684_v28 = vrot.slane %v22424_v41, 3  ;;  %v13686_v53 = vrot.slane %v22426_v8, 3 }
 0x792   : > { %v22569_v12 = vsel %vm4521_vm0, %v13350_v18, %v13359_v20  ;;  %v13688_v43 = vrot.slane %v22428_v36, 3  ;;  %v13690_v25 = vrot.slane %v22430_v58, 3  ;;  %v23569_v54 = vrot.slane %v22218_v11, 1  ;;  %v18759_v18 = vld [vmem:[%s23096_s8 + $0x68] sm:$0xff]  }
 0x793   : > { %v22571_v45 = vor.u32 %v13367_v62, %v13364_v52  ;;  %v22582_v34 = vsel %vm4996_vm3, %v13684_v28, %v13686_v53  ;;  %v13694_v35 = vrot.slane %v22447_v32, 3 }
 0x794   : > { %v11123_v51 = vsel %vm2428_vm1, %v23569_v54, %v11122_v33  ;;  %23571 = vst [vmem:[#allocation97_spill] sm:$0xff] %v22582_v34  ;;  %v22593_v11 = vsel %vm4996_vm3, %v13686_v53, %v13688_v43  ;;  %v22596_v62 = vsel %vm4996_vm3, %v13688_v43, %v13690_v25  ;;  %v13696_v54 = vrot.slane %v22452_v2, 3 }
 0x795   : > { %v22590_v52 = vsel %vm4521_vm0, %v13359_v20, %v22571_v45  ;;  %23572 = vst [vmem:[#allocation98_spill] sm:$0xff] %v22593_v11  ;;  %23573 = vst [vmem:[#allocation99_spill] sm:$0xff] %v22596_v62  ;;  %v13698_v34 = vrot.slane %v22456_v9, 3  ;;  %v22606_v20 = vld [vmem:[#allocation4 + $0xa0] ss:$0 sps:$4 sm:$0x77]  }
 0x796   : > { %17288 = vmatmul.mubr.msk.bf16.gmra.mrb[68].mxu1 %vm1946_vm13, %v22157_v4  ;;  %v13700_v43 = vrot.slane %v22463_v1, 3  ;;  %v13702_v62 = vrot.slane %v22471_v15, 3 }
 0x797   : > { %17299 = vmatprep.mubr.msk.bf16.mxu1 %vm1946_vm13, %v11121_v50  ;;  %v13683_v50 = vrot.slane %v15333_v56, 3  ;;  %v13692_v56 = vrot.slane %v22437_v38, 3 }
 0x798   : > { %v22628_v11 = vsel %vm4996_vm3, %v13698_v34, %v13700_v43 }
 0x799   : > { %v22579_v0 = vsel %vm4996_vm3, %v13683_v50, %v13684_v28  ;;  %v11125_v50 = vsel %vm2428_vm1, %v11122_v33, %v11124_v49  ;;  %v22601_v28 = vsel %vm4996_vm3, %v13690_v25, %v13692_v56  ;;  %v22609_v53 = vsel %vm4996_vm3, %v13692_v56, %v13694_v35  ;;  %23578 = vst [vmem:[#allocation104_spill] sm:$0xff] %v22628_v11 }
 0x79a   : > { %23570 = vst [vmem:[#allocation96_spill] sm:$0xff] %v22579_v0  ;;  %23574 = vst [vmem:[#allocation100_spill] sm:$0xff] %v22601_v28  ;;  %v13704_v33 = vrot.slane %v22477_v59, 3  ;;  %v22617_v25 = vsel %vm4996_vm3, %v13694_v35, %v13696_v54  ;;  %v13706_v28 = vrot.slane %v22487_v40, 3  ;;  %v13708_v56 = vrot.slane %v22493_v46, 3 }
 0x79b   : > { %23575 = vst [vmem:[#allocation101_spill] sm:$0xff] %v22609_v53  ;;  %23576 = vst [vmem:[#allocation102_spill] sm:$0xff] %v22617_v25  ;;  %v18760_v53 = vld [vmem:[%s23096_s8 + $0x70] sm:$0xff]   ;;  %v13712_v25 = vrot.slane %v22511_v42, 3  ;;  %v13714_v0 = vrot.slane %v22520_v63, 3 }
 0x79c   : > { %v22634_v35 = vsel %vm4996_vm3, %v13702_v62, %v13704_v33 }
 0x79d   : > { %23579 = vst [vmem:[#allocation105_spill] sm:$0xff] %v22634_v35  ;;  %v13718_v35 = vrot.slane %v22606_v20, 3 }
 0x79e   : > { %17300 = vmatmul.mubr.msk.bf16.vlgmr.msra.gmra.mrb[36].mxu1 %vm1946_vm13, %v11123_v51  ;;  %v22620_v51 = vsel %vm4996_vm3, %v13696_v54, %v13698_v34  ;;  %v22638_v54 = vsel %vm4996_vm3, %v13704_v33, %v13706_v28  ;;  %v18874_v34 = vld [vmem:[#allocation4 + $0x28] sm:$0xff]  }
 0x79f   : > { %17336 = vmatpush3.bf16.msra.mxu1 %v22288_v48  ;;  %17303 = vmatprep.mubr.msk.bf16.mxu1 %vm1946_vm13, %v11125_v50  ;;  %23577 = vst [vmem:[#allocation103_spill] sm:$0xff] %v22620_v51  ;;  %v22631_v48 = vsel %vm4996_vm3, %v13700_v43, %v13702_v62  ;;  %v13710_v50 = vrot.slane %v22502_v47, 3  ;;  %v22641_v51 = vsel %vm4996_vm3, %v13706_v28, %v13708_v56  ;;  %v11128_v11 = vrot.slane %v18874_v34, 1 }
 0x7a0   : > { %17337 = vmatprep.subr.bf16.mxu1 %v18759_v18  ;;  %23580 = vst [vmem:[#allocation106_spill] sm:$0xff] %v22641_v51  ;;  %v13716_v62 = vrot.slane %v22527_v3, 3  ;;  %v22654_v28 = vsel %vm4996_vm3, %v13712_v25, %v13714_v0  ;;  %v18761_v51 = vld [vmem:[%s23096_s8 + $0x78] sm:$0xff]  }
 0x7a1   : > { %v22646_v43 = vsel %vm4996_vm3, %v13708_v56, %v13710_v50  ;;  %v22651_v33 = vsel %vm4996_vm3, %v13710_v50, %v13712_v25  ;;  %23582 = vst [vmem:[#allocation108_spill] sm:$0xff] %v22654_v28  ;;  %v18764_v25 = vld [vmem:[%s23096_s8 + $0x80] sm:$0xff]   ;;  %v18875_v50 = vld [vmem:[#allocation4 + $0x30] sm:$0xff]  }
 0x7a2   : > { %23581 = vst [vmem:[#allocation107_spill] sm:$0xff] %v22646_v43  ;;  %v22660_v34 = vsel %vm4996_vm3, %v13714_v0, %v13716_v62  ;;  %v22663_v56 = vsel %vm4996_vm3, %v13716_v62, %v13718_v35  ;;  %v11127_v43 = vsel %vm2428_vm1, %v11124_v49, %v11126_v21  ;;  %v11130_v0 = vrot.slane %v18875_v50, 1  ;;  %v18880_v50 = vld [vmem:[#allocation4 + $0x58] sm:$0xff]  }
 0x7a3   : > { %17338 = vmatpush3.bf16.msra.mxu1 %v18759_v18  ;;  %23583 = vst [vmem:[#allocation9_spill] sm:$0xff] %v22660_v34  ;;  %v11129_v18 = vsel %vm2428_vm1, %v11126_v21, %v11128_v11  ;;  %v18876_v34 = vld [vmem:[#allocation4 + $0x38] sm:$0xff]  }
 0x7a4   : > { %17339 = vmatprep.subr.bf16.mxu1 %v18760_v53  ;;  %v11132_v28 = vrot.slane %v18876_v34, 1  ;;  %v11131_v49 = vsel %vm2428_vm1, %v11128_v11, %v11130_v0 }
 0x7a6   : > { %17304 = vmatmul.mubr.msk.bf16.gmra.mrb[40].mxu1 %vm1946_vm13, %v11127_v43  ;;  %v11133_v21 = vsel %vm2428_vm1, %v11130_v0, %v11132_v28  ;;  %v18878_v43 = vld [vmem:[#allocation4 + $0x48] sm:$0xff]  }
 0x7a7   : > { %17307 = vmatprep.mubr.msk.bf16.mxu1 %vm1946_vm13, %v11129_v18  ;;  %17340 = vmatpush3.bf16.msra.mxu1 %v18760_v53  ;;  %v18877_v53 = vld [vmem:[#allocation4 + $0x40] sm:$0xff]   ;;  %v11136_v62 = vrot.slane %v18878_v43, 1  ;;  %v11144_v43 = vrot.slane %v22117_v27, 1  ;;  %v11150_v27 = vrot.slane %v22144_v19, 1 }
 0x7a8   : > { %17341 = vmatprep.subr.bf16.mxu1 %v18761_v51  ;;  %v11134_v35 = vrot.slane %v18877_v53, 1  ;;  %v18881_v53 = vld [vmem:[#allocation4 + $0x60] sm:$0xff]  }
 0x7aa   : > { %v11135_v18 = vsel %vm2428_vm1, %v11132_v28, %v11134_v35  ;;  %v11137_v34 = vsel %vm2428_vm1, %v11134_v35, %v11136_v62  ;;  %v11142_v28 = vrot.slane %v18881_v53, 1 }
 0x7ab   : > { %17342 = vmatpush3.bf16.msra.mxu1 %v18761_v51  ;;  %v18879_v51 = vld [vmem:[#allocation4 + $0x50] sm:$0xff]  }
 0x7ac   : > { %17379 = vmatprep.subr.bf16.mxu1 %v18764_v25  ;;  %v11138_v11 = vrot.slane %v18879_v51, 1 }
 0x7ae   : > { %17308 = vmatmul.mubr.msk.bf16.gmra.mrb[44].mxu1 %vm1946_vm13, %v11131_v49  ;;  %v11140_v49 = vrot.slane %v18880_v50, 1  ;;  %v11139_v0 = vsel %vm2428_vm1, %v11136_v62, %v11138_v11  ;;  %v11146_v62 = vrot.slane %v22119_v14, 1  ;;  %v11152_v50 = vrot.slane %v22157_v4, 1 }
 0x7af   : > { %17311 = vmatprep.mubr.msk.bf16.mxu1 %vm1946_vm13, %v11133_v21  ;;  %v11589_v4 = vrot.slane %v22179_v30, 1  ;;  %v18776_v30 = vld [vmem:[%s23096_s8 + $0x90] sm:$0xff]  }
 0x7b0   : > { %v11141_v21 = vsel %vm2428_vm1, %v11138_v11, %v11140_v49  ;;  %v11143_v35 = vsel %vm2428_vm1, %v11140_v49, %v11142_v28  ;;  %v11147_v51 = vsel %vm2428_vm1, %v11144_v43, %v11146_v62  ;;  %v11153_v14 = vsel %vm2428_vm1, %v11150_v27, %v11152_v50 }
 0x7b6   : > { %17312 = vmatmul.mubr.msk.bf16.gmra.mrb[48].mxu1 %vm1946_vm13, %v11135_v18  ;;  %v11145_v18 = vsel %vm2428_vm1, %v11142_v28, %v11144_v43  ;;  %v11591_v28 = vrot.slane %v22181_v17, 1  ;;  %v11593_v17 = vrot.slane %v22184_v31, 1  ;;  %v11595_v43 = vrot.slane %v22191_v60, 1  ;;  %v18785_v31 = vld [vmem:[%s23096_s8 + $0xa0] sm:$0xff]  }
 0x7b7   : > { %17315 = vmatprep.mubr.msk.bf16.mxu1 %vm1946_vm13, %v11137_v34  ;;  %v11148_v34 = vrot.slane %v22129_v39, 1  ;;  %v11154_v39 = vrot.slane %v22162_v44, 1  ;;  %v18771_v44 = vld [vmem:[%s23096_s8 + $0x88] sm:$0xff]   ;;  %v11597_v60 = vrot.slane %v22196_v5, 1 }
 0x7b9   : > { %v11149_v11 = vsel %vm2428_vm1, %v11146_v62, %v11148_v34  ;;  %v11151_v49 = vsel %vm2428_vm1, %v11148_v34, %v11150_v27  ;;  %v11155_v53 = vsel %vm2428_vm1, %v11152_v50, %v11154_v39  ;;  %v11599_v62 = vrot.slane %v22202_v55, 1 }
 0x7ba   : > { %v11598_v34 = vsel %vm2428_vm1, %v11595_v43, %v11597_v60  ;;  %v11603_v27 = vrot.slane %v22222_v22, 1  ;;  %v11605_v55 = vrot.slane %v22230_v7, 1  ;;  %v11609_v22 = vrot.slane %v22247_v23, 1 }
 0x7bb   : > { %v11611_v39 = vrot.slane %v22254_v16, 1  ;;  %v23585_v16 = vld [vmem:[#allocation52_spill] sm:$0xff] }
 0x7bd   : > { %v11612_v7 = vsel %vm2428_vm1, %v11609_v22, %v11611_v39 }
 0x7be   : > { %17316 = vmatmul.mubr.msk.bf16.gmra.mrb[52].mxu1 %vm1946_vm13, %v11139_v0  ;;  %v11586_v0 = vrot.slane %v22174_v29, 1 }
 0x7bf   : > { %17319 = vmatprep.mubr.msk.bf16.mxu1 %vm1946_vm13, %v11141_v21  ;;  %v11587_v21 = vrot.slane %v22176_v13, 1  ;;  %v11592_v13 = vsel %vm2428_vm1, %v11589_v4, %v11591_v28 }
 0x7c1   : > { %v11588_v19 = vsel %vm2428_vm1, %v11586_v0, %v11587_v21  ;;  %v11590_v29 = vsel %vm2428_vm1, %v11587_v21, %v11589_v4  ;;  %v23584_v21 = vld [vmem:[#allocation51_spill] sm:$0xff]  ;;  %v11617_v4 = vrot.slane %v23585_v16, 1 }
 0x7c6   : > { %17320 = vmatmul.mubr.msk.bf16.gmra.mrb[56].mxu1 %vm1946_vm13, %v11143_v35  ;;  %v18781_v35 = vld [vmem:[%s23096_s8 + $0x98] sm:$0xff]  }
 0x7c7   : > { %17323 = vmatprep.mubr.msk.bf16.mxu1 %vm1946_vm13, %v11145_v18  ;;  %v11594_v18 = vsel %vm2428_vm1, %v11591_v28, %v11593_v17  ;;  %v23586_v28 = vld [vmem:[#allocation60_spill] sm:$0xff] }
 0x7ce   : > { %17324 = vmatmul.mubr.msk.bf16.gmra.mrb[60].mxu1 %vm1946_vm13, %v11147_v51  ;;  %v11600_v51 = vsel %vm2428_vm1, %v11597_v60, %v11599_v62  ;;  %v18787_v60 = vld [vmem:[%s23096_s8 + $0xb0] sm:$0xff]  }
 0x7cf   : > { %17327 = vmatprep.mubr.msk.bf16.mxu1 %vm1946_vm13, %v11149_v11  ;;  %v11601_v11 = vrot.slane %v22204_v6, 1 }
 0x7d1   : > { %v11602_v50 = vsel %vm2428_vm1, %v11599_v62, %v11601_v11  ;;  %v11604_v5 = vsel %vm2428_vm1, %v11601_v11, %v11603_v27  ;;  %v18788_v62 = vld [vmem:[%s23096_s8 + $0xb8] sm:$0xff]   ;;  %v23592_v11 = vld [vmem:[#allocation49_spill] sm:$0xff] }
 0x7d6   : > { %17328 = vmatmul.mubr.msk.bf16.gmra.mrb[64].mxu1 %vm1946_vm13, %v11151_v49  ;;  %v11607_v49 = vrot.slane %v22238_v24, 1  ;;  %v11613_v24 = vrot.slane %v22265_v57, 1 }
 0x7d7   : > { %17331 = vmatprep.mubr.msk.bf16.mxu1 %vm1946_vm13, %v11153_v14  ;;  %v11606_v14 = vsel %vm2428_vm1, %v11603_v27, %v11605_v55  ;;  %v23593_v27 = vld [vmem:[#allocation50_spill] sm:$0xff] }
 0x7d8   : > { %v11608_v6 = vsel %vm2428_vm1, %v11605_v55, %v11607_v49  ;;  %v11610_v0 = vsel %vm2428_vm1, %v11607_v49, %v11609_v22  ;;  %v23596_v55 = vld [vmem:[#allocation58_spill] sm:$0xff]  ;;  %v23600_v22 = vld [vmem:[#allocation45_spill] sm:$0xff] }
 0x7d9   : > { %v23597_v49 = vld [vmem:[#allocation62_spill] sm:$0xff] }
 0x7de   : > { %17332 = vmatmul.mubr.msk.bf16.gmra.mrb[68].mxu1 %vm1946_vm13, %v11155_v53  ;;  %v11615_v53 = vrot.slane %v23584_v21, 1 }
 0x7df   : > { %17343 = vmatprep.mubr.msk.bf16.mxu1 %vm1946_vm13, %v11588_v19  ;;  %v11614_v19 = vsel %vm2428_vm1, %v11611_v39, %v11613_v24  ;;  %v23601_v39 = vld [vmem:[#allocation63_spill] sm:$0xff] }
 0x7e0   : > { %v11616_v23 = vsel %vm2428_vm1, %v11613_v24, %v11615_v53 }
 0x7e6   : > { %17344 = vmatmul.mubr.msk.bf16.vlgmr.msra.gmra.mrb[36].mxu1 %vm1946_vm13, %v11590_v29  ;;  %v11618_v29 = vsel %vm2428_vm1, %v11615_v53, %v11617_v4 }
 0x7e7   : > { %17380 = vmatpush3.bf16.msra.mxu1 %v18764_v25  ;;  %17347 = vmatprep.mubr.msk.bf16.mxu1 %vm1946_vm13, %v11592_v13  ;;  %v11596_v25 = vsel %vm2428_vm1, %v11593_v17, %v11595_v43  ;;  %v18784_v13 = vld [vmem:[#allocation4 + $0x98] ss:$0 sps:$4 sm:$0x11]   ;;  %v23587_v43 = vld [vmem:[#allocation54_spill] sm:$0xff] }
 0x7e8   : > { %17381 = vmatprep.subr.bf16.mxu1 %v18771_v44 }
 0x7eb   : > { %17382 = vmatpush3.bf16.msra.mxu1 %v18771_v44  ;;  %v11619_v44 = vrot.slane %v23586_v28, 1 }
 0x7ec   : > { %17383 = vmatprep.subr.bf16.mxu1 %v18776_v30 }
 0x7ed   : > { %v11620_v57 = vsel %vm2428_vm1, %v11617_v4, %v11619_v44  ;;  %v23605_v4 = vld [vmem:[#allocation69_spill] sm:$0xff] }
 0x7ee   : > { %17348 = vmatmul.mubr.msk.bf16.gmra.mrb[40].mxu1 %vm1946_vm13, %v11594_v18  ;;  %v23588_v18 = vld [vmem:[#allocation55_spill] sm:$0xff] }
 0x7ef   : > { %17351 = vmatprep.mubr.msk.bf16.mxu1 %vm1946_vm13, %v11596_v25  ;;  %17384 = vmatpush3.bf16.msra.mxu1 %v18776_v30  ;;  %v11621_v30 = vrot.slane %v18784_v13, 1  ;;  %v23589_v25 = vld [vmem:[#allocation57_spill] sm:$0xff]  ;;  %v23607_v13 = vld [vmem:[#allocation6_spill] sm:$0xff] }
 0x7f0   : > { %17385 = vmatprep.subr.bf16.mxu1 %v18781_v35 }
 0x7f1   : > { %v11622_v17 = vsel %vm2428_vm1, %v11619_v44, %v11621_v30  ;;  %v23606_v44 = vld [vmem:[#allocation64_spill] sm:$0xff]  ;;  %v18793_v30 = vld [vmem:[%s23096_s8 + $0xd0] sm:$0xff]  }
 0x7f3   : > { %17386 = vmatpush3.bf16.msra.mxu1 %v18781_v35  ;;  %v18786_v35 = vld [vmem:[%s23096_s8 + $0xa8] sm:$0xff]  }
 0x7f4   : > { %17423 = vmatprep.subr.bf16.mxu1 %v18785_v31 }
 0x7f6   : > { %17352 = vmatmul.mubr.msk.bf16.gmra.mrb[44].mxu1 %vm1946_vm13, %v11598_v34  ;;  %v23590_v34 = vld [vmem:[#allocation47_spill] sm:$0xff] }
 0x7f7   : > { %17355 = vmatprep.mubr.msk.bf16.mxu1 %vm1946_vm13, %v11600_v51  ;;  %v23591_v51 = vld [vmem:[#allocation48_spill] sm:$0xff] }
 0x7fe   : > { %17356 = vmatmul.mubr.msk.bf16.gmra.mrb[48].mxu1 %vm1946_vm13, %v11602_v50  ;;  %v23594_v50 = vld [vmem:[#allocation53_spill] sm:$0xff] }
 0x7ff   : > { %17359 = vmatprep.mubr.msk.bf16.mxu1 %vm1946_vm13, %v11604_v5  ;;  %v23595_v5 = vld [vmem:[#allocation56_spill] sm:$0xff] }
 0x806   : > { %17360 = vmatmul.mubr.msk.bf16.gmra.mrb[52].mxu1 %vm1946_vm13, %v11606_v14  ;;  %v23598_v14 = vld [vmem:[#allocation59_spill] sm:$0xff] }
 0x807   : > { %17363 = vmatprep.mubr.msk.bf16.mxu1 %vm1946_vm13, %v11608_v6  ;;  %v23599_v6 = vld [vmem:[#allocation61_spill] sm:$0xff] }
 0x80e   : > { %17364 = vmatmul.mubr.msk.bf16.gmra.mrb[56].mxu1 %vm1946_vm13, %v11610_v0  ;;  %v23602_v0 = vld [vmem:[#allocation70_spill] sm:$0xff] }
 0x80f   : > { %17367 = vmatprep.mubr.msk.bf16.mxu1 %vm1946_vm13, %v11612_v7  ;;  %v12089_v7 = vshrl.u32 %v23602_v0, 16  ;;  %v12092_v24 = vshll.u32 %v23602_v0, 16 }
 0x811   : > { %v12091_v21 = vrot.slane %v12089_v7, 1  ;;  %v12094_v53 = vrot.slane %v12092_v24, 2  ;;  %v12871_v7 = vrot.slane %v22426_v8, 2  ;;  %v12873_v24 = vrot.slane %v22428_v36, 2  ;;  %v18809_v8 = vld [vmem:[%s23096_s8 + $0xf0] sm:$0xff]  }
 0x812   : > { %v12875_v36 = vrot.slane %v22430_v58, 2  ;;  %v18818_v58 = vld [vmem:[%s23096_s8 + $0x100] sm:$0xff]  }
 0x813   : > { %v12095_v16 = vor.u32 %v12094_v53, %v12091_v21  ;;  %v18804_v21 = vld [vmem:[%s23096_s8 + $0xe8] sm:$0xff]  }
 0x815   : > { %v12096_v28 = vsel %vm3237_vm14, %v23605_v4, %v12095_v16  ;;  %v12876_v16 = vsel %vm3712_vm15, %v12873_v24, %v12875_v36 }
 0x816   : > { %17368 = vmatmul.mubr.msk.bf16.gmra.mrb[60].mxu1 %vm1946_vm13, %v11614_v19  ;;  %v23603_v19 = vld [vmem:[#allocation65_spill] sm:$0xff] }
 0x817   : > { %17371 = vmatprep.mubr.msk.bf16.mxu1 %vm1946_vm13, %v11616_v23  ;;  %v23604_v23 = vld [vmem:[#allocation67_spill] sm:$0xff] }
 0x81e   : > { %17372 = vmatmul.mubr.msk.bf16.gmra.mrb[64].mxu1 %vm1946_vm13, %v11618_v29  ;;  %v18792_v29 = vld [vmem:[%s23096_s8 + $0xc8] sm:$0xff]  }
 0x81f   : > { %17375 = vmatprep.mubr.msk.bf16.mxu1 %vm1946_vm13, %v11620_v57  ;;  %v23608_v57 = vld [vmem:[#allocation66_spill] sm:$0xff] }
 0x826   : > { %17376 = vmatmul.mubr.msk.bf16.gmra.mrb[68].mxu1 %vm1946_vm13, %v11622_v17  ;;  %v18794_v17 = vld [vmem:[%s23096_s8 + $0xd8] sm:$0xff]  }
 0x827   : > { %17387 = vmatprep.mubr.msk.bf16.mxu1 %vm1946_vm13, %v23587_v43  ;;  %v23609_v43 = vld [vmem:[#allocation46_spill] sm:$0xff] }
 0x82e   : > { %17388 = vmatmul.mubr.msk.bf16.vlgmr.msra.gmra.mrb[36].mxu1 %vm1946_vm13, %v23588_v18  ;;  %v18797_v18 = vld [vmem:[%s23096_s8 + $0xe0] sm:$0xff]  }
 0x82f   : > { %17424 = vmatpush3.bf16.msra.mxu1 %v18785_v31  ;;  %17391 = vmatprep.mubr.msk.bf16.mxu1 %vm1946_vm13, %v23589_v25  ;;  %v18791_v31 = vld [vmem:[%s23096_s8 + $0xc0] sm:$0xff]  }
 0x830   : > { %17425 = vmatprep.subr.bf16.mxu1 %v18786_v35  ;;  %v23611_v25 = vld [vmem:[#allocation71_spill] sm:$0xff] }
 0x833   : > { %17426 = vmatpush3.bf16.msra.mxu1 %v18786_v35  ;;  %v23610_v35 = vld [vmem:[#allocation68_spill] sm:$0xff] }
 0x834   : > { %17427 = vmatprep.subr.bf16.mxu1 %v18787_v60 }
 0x836   : > { %17392 = vmatmul.mubr.msk.bf16.gmra.mrb[40].mxu1 %vm1946_vm13, %v23590_v34  ;;  %v23614_v34 = vld [vmem:[#allocation74_spill] sm:$0xff] }
 0x837   : > { %17395 = vmatprep.mubr.msk.bf16.mxu1 %vm1946_vm13, %v23591_v51  ;;  %17428 = vmatpush3.bf16.msra.mxu1 %v18787_v60  ;;  %v23612_v60 = vld [vmem:[#allocation72_spill] sm:$0xff]  ;;  %v23615_v51 = vld [vmem:[#allocation75_spill] sm:$0xff] }
 0x838   : > { %17429 = vmatprep.subr.bf16.mxu1 %v18788_v62 }
 0x83b   : > { %17430 = vmatpush3.bf16.msra.mxu1 %v18788_v62  ;;  %v23613_v62 = vld [vmem:[#allocation73_spill] sm:$0xff] }
 0x83c   : > { %17467 = vmatprep.subr.bf16.mxu1 %v18791_v31 }
 0x83e   : > { %17396 = vmatmul.mubr.msk.bf16.gmra.mrb[44].mxu1 %vm1946_vm13, %v23592_v11  ;;  %v23617_v11 = vld [vmem:[#allocation77_spill] sm:$0xff] }
 0x83f   : > { %17399 = vmatprep.mubr.msk.bf16.mxu1 %vm1946_vm13, %v23593_v27  ;;  %v23618_v27 = vld [vmem:[#allocation78_spill] sm:$0xff] }
 0x846   : > { %17400 = vmatmul.mubr.msk.bf16.gmra.mrb[48].mxu1 %vm1946_vm13, %v23594_v50  ;;  %v23619_v50 = vld [vmem:[#allocation79_spill] sm:$0xff] }
 0x847   : > { %17403 = vmatprep.mubr.msk.bf16.mxu1 %vm1946_vm13, %v23595_v5  ;;  %v23620_v5 = vld [vmem:[#allocation80_spill] sm:$0xff] }
 0x84e   : > { %17404 = vmatmul.mubr.msk.bf16.gmra.mrb[52].mxu1 %vm1946_vm13, %v23596_v55  ;;  %v23621_v55 = vld [vmem:[#allocation81_spill] sm:$0xff] }
 0x84f   : > { %17407 = vmatprep.mubr.msk.bf16.mxu1 %vm1946_vm13, %v23597_v49  ;;  %v23622_v49 = vld [vmem:[#allocation82_spill] sm:$0xff] }
 0x856   : > { %17408 = vmatmul.mubr.msk.bf16.gmra.mrb[56].mxu1 %vm1946_vm13, %v23598_v14  ;;  %v12869_v14 = vrot.slane %v22424_v41, 2  ;;  %v12874_v41 = vsel %vm3712_vm15, %v12871_v7, %v12873_v24  ;;  %v13371_v24 = vshrl.u32 %v22606_v20, 16 }
 0x857   : > { %17411 = vmatprep.mubr.msk.bf16.mxu1 %vm1946_vm13, %v23599_v6  ;;  %v23623_v6 = vld [vmem:[#allocation83_spill] sm:$0xff] }
 0x858   : > { %v12872_v53 = vsel %vm3712_vm15, %v12869_v14, %v12871_v7  ;;  %v23635_v7 = vld [vmem:[#allocation95_spill] sm:$0xff] }
 0x85e   : > { %17412 = vmatmul.mubr.msk.bf16.gmra.mrb[60].mxu1 %vm1946_vm13, %v23600_v22  ;;  %v12868_v22 = vrot.slane %v23623_v6, 2  ;;  %v23631_v6 = vld [vmem:[#allocation91_spill] sm:$0xff] }
 0x85f   : > { %17415 = vmatprep.mubr.msk.bf16.mxu1 %vm1946_vm13, %v23601_v39  ;;  %v23624_v39 = vld [vmem:[#allocation84_spill] sm:$0xff] }
 0x860   : > { %v12870_v0 = vsel %vm3712_vm15, %v12868_v22, %v12869_v14  ;;  %v23630_v14 = vld [vmem:[#allocation90_spill] sm:$0xff]  ;;  %v23632_v22 = vld [vmem:[#allocation92_spill] sm:$0xff] }
 0x866   : > { %17416 = vmatmul.mubr.msk.bf16.gmra.mrb[64].mxu1 %vm1946_vm13, %v23603_v19  ;;  %v12877_v19 = vrot.slane %v22437_v38, 2  ;;  %v12879_v38 = vrot.slane %v22447_v32, 2 }
 0x867   : > { %17419 = vmatprep.mubr.msk.bf16.mxu1 %vm1946_vm13, %v23604_v23  ;;  %v18814_v23 = vld [vmem:[%s23096_s8 + $0xf8] sm:$0xff]  }
 0x868   : > { %v12878_v4 = vsel %vm3712_vm15, %v12875_v36, %v12877_v19  ;;  %v23643_v36 = vld [vmem:[#allocation103_spill] sm:$0xff] }
 0x86e   : > { %17420 = vmatmul.mubr.msk.bf16.gmra.mrb[68].mxu1 %vm1946_vm13, %v12096_v28  ;;  %v12881_v28 = vrot.slane %v22452_v2, 2  ;;  %v12887_v2 = vrot.slane %v22471_v15, 2 }
 0x86f   : > { %17431 = vmatprep.mubr.msk.bf16.mxu1 %vm1946_vm13, %v23606_v44  ;;  %v12880_v44 = vsel %vm3712_vm15, %v12877_v19, %v12879_v38  ;;  %v23644_v19 = vld [vmem:[#allocation104_spill] sm:$0xff] }
 0x876   : > { %17432 = vmatmul.mubr.msk.bf16.vlgmr.msra.gmra.mrb[36].mxu1 %vm1946_vm13, %v23607_v13  ;;  %v12883_v13 = vrot.slane %v22456_v9, 2 }
 0x877   : > { %17468 = vmatpush3.bf16.msra.mxu1 %v18791_v31  ;;  %17435 = vmatprep.mubr.msk.bf16.mxu1 %vm1946_vm13, %v23608_v57  ;;  %v23616_v31 = vld [vmem:[#allocation76_spill] sm:$0xff]  ;;  %v12885_v57 = vrot.slane %v22463_v1, 2  ;;  %v12891_v1 = vrot.slane %v22487_v40, 2 }
 0x878   : > { %17469 = vmatprep.subr.bf16.mxu1 %v18792_v29 }
 0x879   : > { %v12886_v32 = vsel %vm3712_vm15, %v12883_v13, %v12885_v57 }
 0x87b   : > { %17470 = vmatpush3.bf16.msra.mxu1 %v18792_v29  ;;  %v12882_v29 = vsel %vm3712_vm15, %v12879_v38, %v12881_v28 }
 0x87c   : > { %17471 = vmatprep.subr.bf16.mxu1 %v18793_v30 }
 0x87e   : > { %17436 = vmatmul.mubr.msk.bf16.gmra.mrb[40].mxu1 %vm1946_vm13, %v23609_v43  ;;  %v12888_v43 = vsel %vm3712_vm15, %v12885_v57, %v12887_v2 }
 0x87f   : > { %17439 = vmatprep.mubr.msk.bf16.mxu1 %vm1946_vm13, %v23610_v35  ;;  %17472 = vmatpush3.bf16.msra.mxu1 %v18793_v30  ;;  %v12884_v30 = vsel %vm3712_vm15, %v12881_v28, %v12883_v13  ;;  %v12893_v35 = vrot.slane %v22493_v46, 2  ;;  %v12899_v46 = vrot.slane %v22520_v63, 2  ;;  %v18819_v63 = vld [vmem:[%s23096_s8 + $0x108] sm:$0xff]  }
 0x880   : > { %17473 = vmatprep.subr.bf16.mxu1 %v18794_v17 }
 0x881   : > { %v12894_v15 = vsel %vm3712_vm15, %v12891_v1, %v12893_v35 }
 0x883   : > { %17474 = vmatpush3.bf16.msra.mxu1 %v18794_v17  ;;  %v12889_v17 = vrot.slane %v22477_v59, 2  ;;  %v12895_v59 = vrot.slane %v22502_v47, 2 }
 0x884   : > { %17511 = vmatprep.subr.bf16.mxu1 %v18797_v18 }
 0x885   : > { %v12890_v9 = vsel %vm3712_vm15, %v12887_v2, %v12889_v17 }
 0x886   : > { %17440 = vmatmul.mubr.msk.bf16.gmra.mrb[44].mxu1 %vm1946_vm13, %v23611_v25  ;;  %v12897_v25 = vrot.slane %v22511_v42, 2 }
 0x887   : > { %17443 = vmatprep.mubr.msk.bf16.mxu1 %vm1946_vm13, %v23612_v60  ;;  %v12896_v60 = vsel %vm3712_vm15, %v12893_v35, %v12895_v59 }
 0x888   : > { %v12898_v40 = vsel %vm3712_vm15, %v12895_v59, %v12897_v25 }
 0x88e   : > { %17444 = vmatmul.mubr.msk.bf16.gmra.mrb[48].mxu1 %vm1946_vm13, %v23613_v62  ;;  %v12901_v62 = vrot.slane %v22527_v3, 2  ;;  %v23626_v3 = vld [vmem:[#allocation86_spill] sm:$0xff] }
 0x88f   : > { %17447 = vmatprep.mubr.msk.bf16.mxu1 %vm1946_vm13, %v23614_v34  ;;  %v12900_v34 = vsel %vm3712_vm15, %v12897_v25, %v12899_v46 }
 0x890   : > { %v12902_v47 = vsel %vm3712_vm15, %v12899_v46, %v12901_v62 }
 0x896   : > { %17448 = vmatmul.mubr.msk.bf16.gmra.mrb[52].mxu1 %vm1946_vm13, %v23615_v51  ;;  %v18817_v51 = vld [vmem:[#allocation4 + $0xa0] ss:$0 sps:$4 sm:$0x33]  }
 0x897   : > { %17451 = vmatprep.mubr.msk.bf16.mxu1 %vm1946_vm13, %v23616_v31  ;;  %v12903_v42 = vrot.slane %v18817_v51, 2 }
 0x899   : > { %v12904_v31 = vsel %vm3712_vm15, %v12901_v62, %v12903_v42 }
 0x89e   : > { %17452 = vmatmul.mubr.msk.bf16.gmra.mrb[56].mxu1 %vm1946_vm13, %v23617_v11  ;;  %v23625_v11 = vld [vmem:[#allocation85_spill] sm:$0xff] }
 0x89f   : > { %17455 = vmatprep.mubr.msk.bf16.mxu1 %vm1946_vm13, %v23618_v27  ;;  %v23627_v27 = vld [vmem:[#allocation87_spill] sm:$0xff] }
 0x8a6   : > { %17456 = vmatmul.mubr.msk.bf16.gmra.mrb[60].mxu1 %vm1946_vm13, %v23619_v50  ;;  %v18820_v50 = vld [vmem:[%s23096_s8 + $0x110] sm:$0xff]  }
 0x8a7   : > { %17459 = vmatprep.mubr.msk.bf16.mxu1 %vm1946_vm13, %v23620_v5  ;;  %v18821_v5 = vld [vmem:[%s23096_s8 + $0x118] sm:$0xff]  }
 0x8ae   : > { %17460 = vmatmul.mubr.msk.bf16.gmra.mrb[64].mxu1 %vm1946_vm13, %v23621_v55  ;;  %v23628_v55 = vld [vmem:[#allocation88_spill] sm:$0xff] }
 0x8af   : > { %17463 = vmatprep.mubr.msk.bf16.mxu1 %vm1946_vm13, %v23622_v49  ;;  %v23629_v49 = vld [vmem:[#allocation89_spill] sm:$0xff] }
 0x8b6   : > { %17464 = vmatmul.mubr.msk.bf16.gmra.mrb[68].mxu1 %vm1946_vm13, %v23624_v39  ;;  %v23633_v39 = vld [vmem:[#allocation93_spill] sm:$0xff] }
 0x8b7   : > { %17475 = vmatprep.mubr.msk.bf16.mxu1 %vm1946_vm13, %v12870_v0  ;;  %v23634_v0 = vld [vmem:[#allocation94_spill] sm:$0xff] }
 0x8be   : > { %17476 = vmatmul.mubr.msk.bf16.vlgmr.msra.gmra.mrb[36].mxu1 %vm1946_vm13, %v12872_v53  ;;  %v13373_v53 = vrot.slane %v13371_v24, 2 }
 0x8bf   : > { %17512 = vmatpush3.bf16.msra.mxu1 %v18797_v18  ;;  %17479 = vmatprep.mubr.msk.bf16.mxu1 %vm1946_vm13, %v12874_v41  ;;  %v12892_v18 = vsel %vm3712_vm15, %v12889_v17, %v12891_v1 }
 0x8c0   : > { %17513 = vmatprep.subr.bf16.mxu1 %v18804_v21 }
 0x8c3   : > { %17514 = vmatpush3.bf16.msra.mxu1 %v18804_v21  ;;  %v13374_v21 = vshll.u32 %v22606_v20, 16  ;;  %v23638_v20 = vld [vmem:[#allocation98_spill] sm:$0xff] }
 0x8c4   : > { %17515 = vmatprep.subr.bf16.mxu1 %v18809_v8 }
 0x8c5   : > { %v13376_v41 = vrot.slane %v13374_v21, 3 }
 0x8c6   : > { %17480 = vmatmul.mubr.msk.bf16.gmra.mrb[40].mxu1 %vm1946_vm13, %v12876_v16  ;;  %v23646_v16 = vld [vmem:[#allocation106_spill] sm:$0xff] }
 0x8c7   : > { %17483 = vmatprep.mubr.msk.bf16.mxu1 %vm1946_vm13, %v12878_v4  ;;  %17516 = vmatpush3.bf16.msra.mxu1 %v18809_v8  ;;  %v23639_v8 = vld [vmem:[#allocation99_spill] sm:$0xff] }
 0x8c8   : > { %17517 = vmatprep.subr.bf16.mxu1 %v18814_v23  ;;  %v23647_v4 = vld [vmem:[#allocation107_spill] sm:$0xff] }
 0x8cb   : > { %17518 = vmatpush3.bf16.msra.mxu1 %v18814_v23  ;;  %v23645_v23 = vld [vmem:[#allocation105_spill] sm:$0xff] }
 0x8cc   : > { %17555 = vmatprep.subr.bf16.mxu1 %v18818_v58 }
 0x8ce   : > { %17484 = vmatmul.mubr.msk.bf16.gmra.mrb[44].mxu1 %vm1946_vm13, %v12880_v44 }
 0x8cf   : > { %17487 = vmatprep.mubr.msk.bf16.mxu1 %vm1946_vm13, %v12882_v29 }
 0x8d6   : > { %17488 = vmatmul.mubr.msk.bf16.gmra.mrb[48].mxu1 %vm1946_vm13, %v12884_v30 }
 0x8d7   : > { %17491 = vmatprep.mubr.msk.bf16.mxu1 %vm1946_vm13, %v12886_v32 }
 0x8de   : > { %17492 = vmatmul.mubr.msk.bf16.gmra.mrb[52].mxu1 %vm1946_vm13, %v12888_v43 }
 0x8df   : > { %17495 = vmatprep.mubr.msk.bf16.mxu1 %vm1946_vm13, %v12890_v9 }
 0x8e6   : > { %17496 = vmatmul.mubr.msk.bf16.gmra.mrb[56].mxu1 %vm1946_vm13, %v12892_v18 }
 0x8e7   : > { %17499 = vmatprep.mubr.msk.bf16.mxu1 %vm1946_vm13, %v12894_v15 }
 0x8ee   : > { %17500 = vmatmul.mubr.msk.bf16.gmra.mrb[60].mxu1 %vm1946_vm13, %v12896_v60 }
 0x8ef   : > { %17503 = vmatprep.mubr.msk.bf16.mxu1 %vm1946_vm13, %v12898_v40 }
 0x8f6   : > { %17504 = vmatmul.mubr.msk.bf16.gmra.mrb[64].mxu1 %vm1946_vm13, %v12900_v34 }
 0x8f7   : > { %17507 = vmatprep.mubr.msk.bf16.mxu1 %vm1946_vm13, %v12902_v47 }
 0x8fe   : > { %17508 = vmatmul.mubr.msk.bf16.gmra.mrb[68].mxu1 %vm1946_vm13, %v12904_v31 }
 0x8ff   : > { %17519 = vmatprep.mubr.msk.bf16.mxu1 %vm1946_vm13, %v23625_v11 }
 0x906   : > { %17520 = vmatmul.mubr.msk.bf16.vlgmr.msra.gmra.mrb[36].mxu1 %vm1946_vm13, %v23626_v3 }
 0x907   : > { %17556 = vmatpush3.bf16.msra.mxu1 %v18818_v58  ;;  %17523 = vmatprep.mubr.msk.bf16.mxu1 %vm1946_vm13, %v23627_v27  ;;  %v23648_v58 = vld [vmem:[#allocation108_spill] sm:$0xff] }
 0x908   : > { %17557 = vmatprep.subr.bf16.mxu1 %v18819_v63 }
 0x90b   : > { %17558 = vmatpush3.bf16.msra.mxu1 %v18819_v63 }
 0x90c   : > { %17559 = vmatprep.subr.bf16.mxu1 %v18820_v50 }
 0x90e   : > { %17524 = vmatmul.mubr.msk.bf16.gmra.mrb[40].mxu1 %vm1946_vm13, %v23628_v55 }
 0x90f   : > { %17527 = vmatprep.mubr.msk.bf16.mxu1 %vm1946_vm13, %v23629_v49  ;;  %17560 = vmatpush3.bf16.msra.mxu1 %v18820_v50 }
 0x910   : > { %17561 = vmatprep.subr.bf16.mxu1 %v18821_v5 }
 0x913   : > { %17562 = vmatpush3.bf16.msra.mxu1 %v18821_v5 }
 0x916   : > { %17528 = vmatmul.mubr.msk.bf16.gmra.mrb[44].mxu1 %vm1946_vm13, %v23630_v14 }
 0x917   : > { %17531 = vmatprep.mubr.msk.bf16.mxu1 %vm1946_vm13, %v23631_v6 }
 0x91e   : > { %17532 = vmatmul.mubr.msk.bf16.gmra.mrb[48].mxu1 %vm1946_vm13, %v23632_v22 }
 0x91f   : > { %17535 = vmatprep.mubr.msk.bf16.mxu1 %vm1946_vm13, %v23633_v39 }
 0x926   : > { %17536 = vmatmul.mubr.msk.bf16.gmra.mrb[52].mxu1 %vm1946_vm13, %v23634_v0 }
 0x927   : > { %17539 = vmatprep.mubr.msk.bf16.mxu1 %vm1946_vm13, %v22536_v26  ;;  %v13377_v26 = vor.u32 %v13376_v41, %v13373_v53 }
 0x92e   : > { %17540 = vmatmul.mubr.msk.bf16.gmra.mrb[56].mxu1 %vm1946_vm13, %v22540_v61  ;;  %v13378_v61 = vsel %vm4521_vm0, %v22571_v45, %v13377_v26  ;;  %v23642_v45 = vld [vmem:[#allocation102_spill] sm:$0xff] }
 0x92f   : > { %17543 = vmatprep.mubr.msk.bf16.mxu1 %vm1946_vm13, %v23635_v7 }
 0x936   : > { %17544 = vmatmul.mubr.msk.bf16.gmra.mrb[60].mxu1 %vm1946_vm13, %v22557_v10  ;;  %v23636_v10 = vld [vmem:[#allocation96_spill] sm:$0xff] }
 0x937   : > { %17547 = vmatprep.mubr.msk.bf16.mxu1 %vm1946_vm13, %v22564_v37  ;;  %v23637_v37 = vld [vmem:[#allocation97_spill] sm:$0xff] }
 0x93e   : > { %17548 = vmatmul.mubr.msk.bf16.gmra.mrb[64].mxu1 %vm1946_vm13, %v22569_v12  ;;  %v23640_v12 = vld [vmem:[#allocation100_spill] sm:$0xff] }
 0x93f   : > { %17551 = vmatprep.mubr.msk.bf16.mxu1 %vm1946_vm13, %v22590_v52  ;;  %v23641_v52 = vld [vmem:[#allocation101_spill] sm:$0xff] }
 0x946   : > { %17552 = vmatmul.mubr.msk.bf16.gmra.mrb[68].mxu1 %vm1946_vm13, %v13378_v61 }
 0x947   : > { %17563 = vmatprep.mubr.msk.bf16.mxu1 %vm1946_vm13, %v23636_v10 }
 0x94e   : > { %17564 = vmatmul.mubr.msk.bf16.vlgmr.msra.gmra.mrb[36].mxu1 %vm1946_vm13, %v23637_v37 }
 0x94f   : > { %17567 = vmatprep.mubr.msk.bf16.mxu1 %vm1946_vm13, %v23638_v20 }
 0x956   : > { %17568 = vmatmul.mubr.msk.bf16.gmra.mrb[40].mxu1 %vm1946_vm13, %v23639_v8 }
 0x957   : > { %17571 = vmatprep.mubr.msk.bf16.mxu1 %vm1946_vm13, %v23640_v12 }
 0x95e   : > { %17572 = vmatmul.mubr.msk.bf16.gmra.mrb[44].mxu1 %vm1946_vm13, %v23641_v52 }
 0x95f   : > { %17575 = vmatprep.mubr.msk.bf16.mxu1 %vm1946_vm13, %v23642_v45 }
 0x966   : > { %17576 = vmatmul.mubr.msk.bf16.gmra.mrb[48].mxu1 %vm1946_vm13, %v23643_v36 }
 0x967   : > { %17579 = vmatprep.mubr.msk.bf16.mxu1 %vm1946_vm13, %v23644_v19 }
 0x96e   : > { %17580 = vmatmul.mubr.msk.bf16.gmra.mrb[52].mxu1 %vm1946_vm13, %v22631_v48  ;;  %v23649_v48 = vld [vmem:[#allocation9_spill] sm:$0xff] }
 0x96f   : > { %17583 = vmatprep.mubr.msk.bf16.mxu1 %vm1946_vm13, %v23645_v23 }
 0x976   : > { %17584 = vmatmul.mubr.msk.bf16.gmra.mrb[56].mxu1 %vm1946_vm13, %v22638_v54  ;;  %v23022_v54 = vld [vmem:[%s23097_s9] ss:$0 sm:$0xff] }
 0x977   : > { %17587 = vmatprep.mubr.msk.bf16.mxu1 %vm1946_vm13, %v23646_v16 }
 0x97e   : > { %17588 = vmatmul.mubr.msk.bf16.gmra.mrb[60].mxu1 %vm1946_vm13, %v23647_v4 }
 0x97f   : > { %17591 = vmatprep.mubr.msk.bf16.mxu1 %vm1946_vm13, %v22651_v33 }
 0x986   : > { %17592 = vmatmul.mubr.msk.bf16.gmra.mrb[64].mxu1 %vm1946_vm13, %v23648_v58 }
 0x987   : > { %17595 = vmatprep.mubr.msk.bf16.mxu1 %vm1946_vm13, %v23649_v48 }
 0x98e   : > { %17596 = vmatmul.mubr.msk.bf16.gmra.mrb[68].mxu1 %vm1946_vm13, %v22663_v56 }
 0xa21   : > { %v17565_v38 = vpop.f32.mrb[36].mxu1 }
 0xa22   : > { %v13832_v28 = vpop.f32.mrb[37].mxu1  ;;  %v14020_v29 = vadd.f32 %v17565_v38, %v23022_v54 }
 0xa23   : > { %v17566_v44 = vpop.f32.mrb[38].mxu1  ;;  %v14018_v57 = vadd.f32 %v23022_v54, %v13832_v28 }
 0xa24   : > { %v14021_v33 = vadd.f32 %v17566_v44, %v23022_v54  ;;  %v13835_v13 = vpop.f32.mrb[39].mxu1 }
 0xa25   : > { %v14019_v56 = vadd.f32 %v23022_v54, %v13835_v13 }
 0xa26   : > { %v15547_v30 = vpack.c.bf16 %v14021_v33, %v14020_v29 }
 0xa27   : > { %v15542_v32 = vpack.c.bf16 %v14019_v56, %v14018_v57 }
 0xa28   : > { %15629 = vst [vmem:[%s23032_s30 + $0x8] sm:$0xff] %v15547_v30  }
 0xa29   : > { %15543 = vst [vmem:[%s23032_s30] sm:$0xff] %v15542_v32   ;;  %v17569_v2 = vpop.f32.mrb[40].mxu1 }
 0xa2a   : > { %v13848_v17 = vpop.f32.mrb[41].mxu1  ;;  %v14024_v9 = vadd.f32 %v17569_v2, %v23022_v54 }
 0xa2b   : > { %v17570_v43 = vpop.f32.mrb[42].mxu1  ;;  %v14022_v18 = vadd.f32 %v23022_v54, %v13848_v17 }
 0xa2c   : > { %v14025_v1 = vadd.f32 %v17570_v43, %v23022_v54  ;;  %v13851_v35 = vpop.f32.mrb[43].mxu1 }
 0xa2d   : > { %v14023_v15 = vadd.f32 %v23022_v54, %v13851_v35 }
 0xa2e   : > { %v15557_v59 = vpack.c.bf16 %v14025_v1, %v14024_v9 }
 0xa2f   : > { %v15552_v25 = vpack.c.bf16 %v14023_v15, %v14022_v18 }
 0xa30   : > { %15631 = vst [vmem:[%s23032_s30 + $0x18] sm:$0xff] %v15557_v59  }
 0xa31   : > { %15630 = vst [vmem:[%s23032_s30 + $0x10] sm:$0xff] %v15552_v25   ;;  %v17573_v60 = vpop.f32.mrb[44].mxu1 }
 0xa32   : > { %v13864_v40 = vpop.f32.mrb[45].mxu1  ;;  %v14028_v62 = vadd.f32 %v17573_v60, %v23022_v54 }
 0xa33   : > { %v17574_v46 = vpop.f32.mrb[46].mxu1  ;;  %v14026_v47 = vadd.f32 %v23022_v54, %v13864_v40 }
 0xa34   : > { %v14029_v34 = vadd.f32 %v17574_v46, %v23022_v54  ;;  %v13867_v51 = vpop.f32.mrb[47].mxu1 }
 0xa35   : > { %v14027_v42 = vadd.f32 %v23022_v54, %v13867_v51 }
 0xa36   : > { %v15567_v31 = vpack.c.bf16 %v14029_v34, %v14028_v62 }
 0xa37   : > { %v15562_v11 = vpack.c.bf16 %v14027_v42, %v14026_v47 }
 0xa38   : > { %15633 = vst [vmem:[%s23032_s30 + $0x28] sm:$0xff] %v15567_v31  }
 0xa39   : > { %15632 = vst [vmem:[%s23032_s30 + $0x20] sm:$0xff] %v15562_v11   ;;  %v17577_v63 = vpop.f32.mrb[48].mxu1 }
 0xa3a   : > { %v13880_v3 = vpop.f32.mrb[49].mxu1  ;;  %v14032_v50 = vadd.f32 %v17577_v63, %v23022_v54 }
 0xa3b   : > { %v17578_v27 = vpop.f32.mrb[50].mxu1  ;;  %v14030_v49 = vadd.f32 %v23022_v54, %v13880_v3 }
 0xa3c   : > { %v14033_v5 = vadd.f32 %v17578_v27, %v23022_v54  ;;  %v13883_v55 = vpop.f32.mrb[51].mxu1 }
 0xa3d   : > { %v14031_v14 = vadd.f32 %v23022_v54, %v13883_v55 }
 0xa3e   : > { %v15577_v6 = vpack.c.bf16 %v14033_v5, %v14032_v50 }
 0xa3f   : > { %v15572_v22 = vpack.c.bf16 %v14031_v14, %v14030_v49 }
 0xa40   : > { %15635 = vst [vmem:[%s23032_s30 + $0x38] sm:$0xff] %v15577_v6  }
 0xa41   : > { %15634 = vst [vmem:[%s23032_s30 + $0x30] sm:$0xff] %v15572_v22   ;;  %v17581_v39 = vpop.f32.mrb[52].mxu1 }
 0xa42   : > { %v13896_v0 = vpop.f32.mrb[53].mxu1  ;;  %v14036_v24 = vadd.f32 %v17581_v39, %v23022_v54 }
 0xa43   : > { %v17582_v7 = vpop.f32.mrb[54].mxu1  ;;  %v14034_v41 = vadd.f32 %v23022_v54, %v13896_v0 }
 0xa44   : > { %v14037_v21 = vadd.f32 %v17582_v7, %v23022_v54  ;;  %v13899_v53 = vpop.f32.mrb[55].mxu1 }
 0xa45   : > { %v14035_v26 = vadd.f32 %v23022_v54, %v13899_v53 }
 0xa46   : > { %v15587_v61 = vpack.c.bf16 %v14037_v21, %v14036_v24 }
 0xa47   : > { %v15582_v10 = vpack.c.bf16 %v14035_v26, %v14034_v41 }
 0xa48   : > { %15637 = vst [vmem:[%s23032_s30 + $0x48] sm:$0xff] %v15587_v61  }
 0xa49   : > { %15636 = vst [vmem:[%s23032_s30 + $0x40] sm:$0xff] %v15582_v10   ;;  %v17585_v37 = vpop.f32.mrb[56].mxu1 }
 0xa4a   : > { %v13912_v20 = vpop.f32.mrb[57].mxu1  ;;  %v14040_v12 = vadd.f32 %v17585_v37, %v23022_v54 }
 0xa4b   : > { %v17586_v8 = vpop.f32.mrb[58].mxu1  ;;  %v14038_v36 = vadd.f32 %v23022_v54, %v13912_v20 }
 0xa4c   : > { %v14041_v52 = vadd.f32 %v17586_v8, %v23022_v54  ;;  %v13915_v45 = vpop.f32.mrb[59].mxu1 }
 0xa4d   : > { %v14039_v19 = vadd.f32 %v23022_v54, %v13915_v45 }
 0xa4e   : > { %v15597_v23 = vpack.c.bf16 %v14041_v52, %v14040_v12 }
 0xa4f   : > { %v15592_v16 = vpack.c.bf16 %v14039_v19, %v14038_v36 }
 0xa50   : > { %15639 = vst [vmem:[%s23032_s30 + $0x58] sm:$0xff] %v15597_v23  }
 0xa51   : > { %15638 = vst [vmem:[%s23032_s30 + $0x50] sm:$0xff] %v15592_v16   ;;  %v17589_v4 = vpop.f32.mrb[60].mxu1 }
 0xa52   : > { %v13928_v58 = vpop.f32.mrb[61].mxu1  ;;  %v14044_v38 = vadd.f32 %v17589_v4, %v23022_v54 }
 0xa53   : > { %v17590_v48 = vpop.f32.mrb[62].mxu1  ;;  %v14042_v29 = vadd.f32 %v23022_v54, %v13928_v58 }
 0xa54   : > { %v14045_v28 = vadd.f32 %v17590_v48, %v23022_v54  ;;  %v13931_v44 = vpop.f32.mrb[63].mxu1 }
 0xa55   : > { %v14043_v33 = vadd.f32 %v23022_v54, %v13931_v44 }
 0xa56   : > { %v15607_v13 = vpack.c.bf16 %v14045_v28, %v14044_v38 }
 0xa57   : > { %v15602_v57 = vpack.c.bf16 %v14043_v33, %v14042_v29 }
 0xa58   : > { %15641 = vst [vmem:[%s23032_s30 + $0x68] sm:$0xff] %v15607_v13  }
 0xa59   : > { %15640 = vst [vmem:[%s23032_s30 + $0x60] sm:$0xff] %v15602_v57   ;;  %v17593_v56 = vpop.f32.mrb[64].mxu1 }
 0xa5a   : > { %v13944_v30 = vpop.f32.mrb[65].mxu1  ;;  %v14048_v2 = vadd.f32 %v17593_v56, %v23022_v54 }
 0xa5b   : > { %v17594_v32 = vpop.f32.mrb[66].mxu1  ;;  %v14046_v9 = vadd.f32 %v23022_v54, %v13944_v30 }
 0xa5c   : > { %v14049_v17 = vadd.f32 %v17594_v32, %v23022_v54  ;;  %v13947_v43 = vpop.f32.mrb[67].mxu1 }
 0xa5d   : > { %v14047_v1 = vadd.f32 %v23022_v54, %v13947_v43 }
 0xa5e   : > { %v15617_v35 = vpack.c.bf16 %v14049_v17, %v14048_v2 }
 0xa5f   : > { %v15612_v18 = vpack.c.bf16 %v14047_v1, %v14046_v9 }
 0xa60   : > { %15643 = vst [vmem:[%s23032_s30 + $0x78] sm:$0xff] %v15617_v35  }
 0xa61   : > { %15642 = vst [vmem:[%s23032_s30 + $0x70] sm:$0xff] %v15612_v18   ;;  %v17597_v15 = vpop.f32.mrb[68].mxu1 }
 0xa62   : > { %v13960_v59 = vpop.f32.mrb[69].mxu1  ;;  %v14052_v60 = vadd.f32 %v17597_v15, %v23022_v54 }
 0xa63   : > { %v17598_v25 = vpop.f32.mrb[70].mxu1  ;;  %v14050_v62 = vadd.f32 %v23022_v54, %v13960_v59 }
 0xa64   : > { %v14053_v40 = vadd.f32 %v17598_v25, %v23022_v54  ;;  %v13963_v46 = vpop.f32.mrb[71].mxu1 }
 0xa65   : > { %v14051_v34 = vadd.f32 %v23022_v54, %v13963_v46 }
 0xa66   : > { %v15627_v51 = vpack.c.bf16 %v14053_v40, %v14052_v60 }
 0xa67   : > { %v15622_v47 = vpack.c.bf16 %v14051_v34, %v14050_v62 }
 0xa68   : > { %15645 = vst [vmem:[%s23032_s30 + $0x88] sm:$0xff] %v15627_v51  }
 0xa69   : > { %15644 = vst [vmem:[%s23032_s30 + $0x80] sm:$0xff] %v15622_v47  }
 0xa6a PF: > { %s20_s13 = sadd.s32 1, %s18888_s13  }
 0xa6b   : > { %p17_p4 = scmp.ge.s32.totalorder %s20_s13, 4  }
 0xa6d   :  { %19 = sbr.rel (!%p17_p4) target bundleno = 1 (0x1), region = 114 }

</bundles_post_ra>
